<compile_context>
chip_gen: v7x
topology: tpu7x:2x2x1
jax: 0.10.0
libtpu: 0.0.40
codegen_flags: <defaults>
</compile_context>

<pallas_src>
import jax
import jax.numpy as jnp
from jax import lax
from jax.experimental import pallas as pl
from jax.experimental.pallas import tpu as pltpu


VMEM_LIMIT = 32 * 1024 * 1024  # safe on v5e/v6e (128 MiB) and v7x (64 MiB physical)


# ----------------------------- 1x1 conv (row-tiled channel matmul) ----------
def _pointwise_kernel(x_ref, w_ref, o_ref):
    o_ref[...] = jnp.dot(
        x_ref[...].astype(jnp.bfloat16),
        w_ref[...].astype(jnp.bfloat16),
        preferred_element_type=jnp.float32,
    ).astype(o_ref.dtype)


def pointwise_conv(x2d, w, *, block_m=512):
    M, Cin = x2d.shape
    Cout = w.shape[1]
    bm = block_m if M >= block_m else M
    return pl.pallas_call(
        _pointwise_kernel,
        grid=(pl.cdiv(M, bm),),
        in_specs=[
            pl.BlockSpec((bm, Cin), lambda i: (i, 0)),
            pl.BlockSpec((Cin, Cout), lambda i: (0, 0)),   # weight stays resident
        ],
        out_specs=pl.BlockSpec((bm, Cout), lambda i: (i, 0)),
        out_shape=jax.ShapeDtypeStruct((M, Cout), x2d.dtype),
        compiler_params=pltpu.CompilerParams(
            dimension_semantics=("parallel",),
            vmem_limit_bytes=VMEM_LIMIT,
        ),
    )(x2d, w)


# ------------------- fused qkv 1x1 conv + 3x3 depthwise conv ----------------
def _fused_qkv_dw_kernel(xc_ref, xu_ref, xd_ref, wq_ref, wd_ref, o_ref, xp_ref):
    # xc: (1, TH*W, C) row tile of the NHWC input (spatial flattened)
    # xu/xd: (1, W, C) halo rows above / below the tile
    # wq: (C, 3C) 1x1 conv weight, wd: (9, 3C) depthwise taps
    # o : (1, TH*W, 3C), xp scratch: (TH+2, W+2, 3C) f32 (padded qkv tile)
    i = pl.program_id(1)
    last = pl.num_programs(1) - 1
    THp2, Wp2, C3 = xp_ref.shape
    TH, W = THp2 - 2, Wp2 - 2

    wq = wq_ref[...].astype(jnp.bfloat16)

    # zero the left / right padding columns (everything else is rewritten below)
    xp_ref[:, 0, :] = jnp.zeros((TH + 2, C3), jnp.float32)
    xp_ref[:, W + 1, :] = jnp.zeros((TH + 2, C3), jnp.float32)

    # 1x1 conv of the whole row tile on the MXU: (TH*W, C) @ (C, 3C)
    qkv = jnp.dot(xc_ref[0].astype(jnp.bfloat16), wq,
                  preferred_element_type=jnp.float32)
    for r in range(TH):
        xp_ref[1 + r, 1:W + 1, :] = qkv[r * W:(r + 1) * W, :]

    # halo rows (zero at the top / bottom of the image)
    up = jnp.where(i > 0, xu_ref[0], 0.0).astype(jnp.bfloat16)     # (W, C)
    dn = jnp.where(i < last, xd_ref[0], 0.0).astype(jnp.bfloat16)  # (W, C)
    xp_ref[0, 1:W + 1, :] = jnp.dot(up, wq, preferred_element_type=jnp.float32)
    xp_ref[TH + 1, 1:W + 1, :] = jnp.dot(dn, wq, preferred_element_type=jnp.float32)

    # 3x3 depthwise taps on the VPU, one output row (register-sized tile) at a time.
    # TODO(synk): the dx shifts could use pltpu.roll (XLU) instead of unaligned
    #             sublane slices of the scratch.
    for r in range(TH):
        acc = jnp.zeros((W, C3), jnp.float32)
        for dy in range(3):
            for dx in range(3):
                tap = wd_ref[dy * 3 + dx, :].astype(jnp.float32)
                acc = acc + xp_ref[r + dy, dx:dx + W, :] * tap
        o_ref[0, r * W:(r + 1) * W, :] = acc.astype(o_ref.dtype)


def qkv_dwconv_fused(x_flat, H, W, w_qkv, w_dw, *, row_block=8):
    # x_flat: (B, H*W, C) NHWC input with flattened spatial dims
    B, L, C = x_flat.shape
    C3 = w_qkv.shape[1]
    TH = row_block if H % row_block == 0 else H
    nT = H // TH

    return pl.pallas_call(
        _fused_qkv_dw_kernel,
        grid=(B, nT),
        in_specs=[
            pl.BlockSpec((1, TH * W, C), lambda b, i: (b, i, 0)),
            pl.BlockSpec((1, W, C), lambda b, i: (b, jnp.maximum(i * TH - 1, 0), 0)),
            pl.BlockSpec((1, W, C), lambda b, i: (b, jnp.minimum((i + 1) * TH, H - 1), 0)),
            pl.BlockSpec((C, C3), lambda b, i: (0, 0)),
            pl.BlockSpec((9, C3), lambda b, i: (0, 0)),
        ],
        out_specs=pl.BlockSpec((1, TH * W, C3), lambda b, i: (b, i, 0)),
        out_shape=jax.ShapeDtypeStruct((B, L, C3), x_flat.dtype),
        scratch_shapes=[pltpu.VMEM((TH + 2, W + 2, C3), jnp.float32)],
        compiler_params=pltpu.CompilerParams(
            dimension_semantics=("parallel", "parallel"),
            vmem_limit_bytes=VMEM_LIMIT,
        ),
    )(x_flat, x_flat, x_flat, w_qkv, w_dw)


# ----------------------------- transposed attention -------------------------
def _choose_l_chunk(L):
    for c in (512, 256, 128):
        if L % c == 0:
            return c
    return L


def _make_attn_kernel(num_heads, ch, C):
    def kernel(temp_ref, qkv_ref, o_ref, s_ref, ss_ref):
        # temp: SMEM (num_heads,)
        # qkv : (1, Lc, 3C) chunk of the fused qkv tensor (NHWC-flat layout)
        # o   : (1, Lc, C)
        # s_ref : (num_heads, ch, ch) scores, later softmax probabilities
        # ss_ref: (2, C) running sum over L of q^2 (row 0) and k^2 (row 1)
        p = pl.program_id(1)
        li = pl.program_id(2)

        @pl.when(jnp.logical_and(p == 0, li == 0))
        def _init():
            s_ref[...] = jnp.zeros_like(s_ref)
            ss_ref[...] = jnp.zeros_like(ss_ref)

        @pl.when(p == 0)
        def _accumulate():
            q = qkv_ref[0, :, 0:C].astype(jnp.float32)          # (Lc, C)
            k = qkv_ref[0, :, C:2 * C].astype(jnp.float32)      # (Lc, C)
            ss_ref[0:1, :] += jnp.sum(q * q, axis=0, keepdims=True)
            ss_ref[1:2, :] += jnp.sum(k * k, axis=0, keepdims=True)
            qb = q.astype(jnp.bfloat16)
            kb = k.astype(jnp.bfloat16)
            for h in range(num_heads):
                hs = h * ch
                s_ref[h] += lax.dot_general(
                    qb[:, hs:hs + ch], kb[:, hs:hs + ch],
                    (((0,), (0,)), ((), ())),
                    preferred_element_type=jnp.float32)         # (ch, ch)

        @pl.when(jnp.logical_and(p == 1, li == 0))
        def _finalize():
            eps = 1e-12
            ii = lax.broadcasted_iota(jnp.int32, (ch, ch), 0)
            jj = lax.broadcasted_iota(jnp.int32, (ch, ch), 1)
            eye = ii == jj
            for h in range(num_heads):
                hs = h * ch
                rq_row = pl.reciprocal(
                    jnp.maximum(jnp.sqrt(ss_ref[0:1, hs:hs + ch]), eps), approx=True)
                rk_row = pl.reciprocal(
                    jnp.maximum(jnp.sqrt(ss_ref[1:2, hs:hs + ch]), eps), approx=True)
                # row vector -> column vector via masked lane reduction (no transpose)
                rq_col = jnp.sum(jnp.where(eye, rq_row, 0.0), axis=-1, keepdims=True)
                a = s_ref[h] * rq_col * rk_row * temp_ref[h]
                a = a - jnp.max(a, axis=-1, keepdims=True)
                e = jnp.exp(a)
                s_ref[h] = e * pl.reciprocal(
                    jnp.sum(e, axis=-1, keepdims=True), approx=True)

        @pl.when(p == 1)
        def _output():
            v = qkv_ref[0, :, 2 * C:3 * C].astype(jnp.bfloat16)  # (Lc, C)
            outs = []
            for h in range(num_heads):
                hs = h * ch
                ph = s_ref[h].astype(jnp.bfloat16)               # (ch, ch) probs
                outs.append(lax.dot_general(
                    v[:, hs:hs + ch], ph,
                    (((1,), (1,)), ((), ())),
                    preferred_element_type=jnp.float32))         # (Lc, ch)
            o_ref[0] = jnp.concatenate(outs, axis=-1).astype(o_ref.dtype)

    return kernel


def transposed_attention(qkv3, temp, num_heads):
    # qkv3: (B, L, 3C) in NHWC-flat layout; returns (B, L, C) in the same layout.
    B, L, C3 = qkv3.shape
    C = C3 // 3
    ch = C // num_heads
    Lc = _choose_l_chunk(L)
    nL = L // Lc
    kernel = _make_attn_kernel(num_heads, ch, C)
    return pl.pallas_call(
        kernel,
        grid=(B, 2, nL),                       # (batch, pass, L-chunk)
        in_specs=[
            pl.BlockSpec(memory_space=pltpu.MemorySpace.SMEM),          # temperature
            pl.BlockSpec((1, Lc, C3), lambda b, p, l: (b, l, 0)),
        ],
        out_specs=pl.BlockSpec((1, Lc, C), lambda b, p, l: (b, p * l, 0)),
        out_shape=jax.ShapeDtypeStruct((B, L, C), qkv3.dtype),
        scratch_shapes=[
            pltpu.VMEM((num_heads, ch, ch), jnp.float32),   # scores -> softmax probs
            pltpu.VMEM((2, C), jnp.float32),                # sum_L q^2 / k^2
        ],
        compiler_params=pltpu.CompilerParams(
            dimension_semantics=("parallel", "arbitrary", "arbitrary"),
            vmem_limit_bytes=VMEM_LIMIT,
        ),
    )(temp, qkv3)


# ----------------------------- full forward ---------------------------------
def mdta_forward(x_nchw, w_qkv, w_dw, w_proj, temp, num_heads):
    B, C, H, W = x_nchw.shape
    x = jnp.transpose(x_nchw, (0, 2, 3, 1)).reshape(B, H * W, C)   # NHWC, flat spatial
    qkv = qkv_dwconv_fused(x, H, W, w_qkv, w_dw)                   # (B, HW, 3C)
    out = transposed_attention(qkv, temp, num_heads)               # (B, HW, C)
    y = pointwise_conv(out.reshape(B * H * W, C), w_proj)          # (BHW, C)
    return jnp.transpose(y.reshape(B, H, W, C), (0, 3, 1, 2))      # NCHW out


# ----------------------------- pure-JAX reference ---------------------------
def mdta_reference(x_nchw, w_qkv, w_dw, w_proj, temp, num_heads):
    B, C, H, W = x_nchw.shape
    ch = C // num_heads
    x = jnp.transpose(x_nchw, (0, 2, 3, 1))
    qkv = jnp.einsum('bhwc,cd->bhwd', x, w_qkv)
    qkv_pad = jnp.pad(qkv, ((0, 0), (1, 1), (1, 1), (0, 0)))
    dw = jnp.zeros_like(qkv)
    for dy in range(3):
        for dx in range(3):
            dw = dw + qkv_pad[:, dy:dy + H, dx:dx + W, :] * w_dw[dy * 3 + dx]
    q, k, v = dw[..., :C], dw[..., C:2 * C], dw[..., 2 * C:]

    def heads(t):
        return jnp.transpose(t, (0, 3, 1, 2)).reshape(B, num_heads, ch, H * W)

    q, k, v = heads(q), heads(k), heads(v)
    q = q / jnp.maximum(jnp.linalg.norm(q, axis=-1, keepdims=True), 1e-12)
    k = k / jnp.maximum(jnp.linalg.norm(k, axis=-1, keepdims=True), 1e-12)
    attn = jnp.einsum('bncl,bndl->bncd', q, k) * temp.reshape(1, num_heads, 1, 1)
    attn = jax.nn.softmax(attn, axis=-1)
    out = jnp.einsum('bncd,bndl->bncl', attn, v)
    out = out.reshape(B, C, H, W)
    out = jnp.transpose(out, (0, 2, 3, 1))
    y = jnp.einsum('bhwc,cd->bhwd', out, w_proj)
    return jnp.transpose(y, (0, 3, 1, 2))


if __name__ == "__main__":
    B, C, H, W = 2, 32, 32, 32
    num_heads = 4

    key = jax.random.PRNGKey(0)
    k1, k2, k3, kx = jax.random.split(key, 4)
    # Parameter layouts (MDTA.__init__, bias=False):
    #   qkv:        Conv2d(C, 3C, 1)        -> (C, 3C)  [W[o,i,0,0] == w_qkv[i,o]]
    #   qkv_dwconv: Conv2d(3C, 3C, 3, g=3C) -> (9, 3C)  [W[c,0,dy,dx] == w_dw[dy*3+dx,c]]
    #   project_out:Conv2d(C, C, 1)         -> (C, C)
    #   temperature: (num_heads, 1, 1)      -> (num_heads,)
    w_qkv = jax.random.normal(k1, (C, 3 * C), jnp.float32) * 0.1
    w_dw = jax.random.normal(k2, (9, 3 * C), jnp.float32) * 0.1
    w_proj = jax.random.normal(k3, (C, C), jnp.float32) * 0.1
    temp = 0.5 + 0.25 * jnp.arange(num_heads, dtype=jnp.float32)

    x = jax.random.normal(kx, (B, C, H, W), jnp.float32)

    fwd = jax.jit(mdta_forward, static_argnums=(5,))
    y = jax.block_until_ready(fwd(x, w_qkv, w_dw, w_proj, temp, num_heads))

    y_ref = mdta_reference(x, w_qkv, w_dw, w_proj, temp, num_heads)
    assert y.shape == (B, C, H, W)
    assert bool(jnp.all(jnp.isfinite(y)))
    max_err = float(jnp.max(jnp.abs(y - y_ref)))
    # bf16 MXU inputs (f32 accumulation) + approx reciprocals -> slightly looser tol
    assert bool(jnp.allclose(y, y_ref, rtol=2e-2, atol=2e-2)), \
        f"mismatch vs reference (max abs err {max_err})"

    print("KERNEL_OK")
</pallas_src>

<mosaic_0001>
module attributes {stable_mosaic.version = 11 : i64} {
  func.func @kernel(%arg0: i32, %arg1: i32, %arg2: i32, %arg3: memref<4xf32, #tpu.memory_space<smem>>, %arg4: memref<1x512x96xf32, #tpu.memory_space<vmem>>, %arg5: memref<1x512x32xf32, #tpu.memory_space<vmem>>, %arg6: memref<4x8x8xf32, #tpu.memory_space<vmem>>, %arg7: memref<2x32xf32, #tpu.memory_space<vmem>>) attributes {dimension_semantics = [#tpu.dimension_semantics<parallel>, #tpu.dimension_semantics<arbitrary>, #tpu.dimension_semantics<arbitrary>], iteration_bounds = array<i64: 2, 2, 2>, scalar_prefetch = 0 : i64, scratch_operands = 2 : i64, tpu.core_type = #tpu.core_type<tc>, window_params = [{transform_indices = @transform_0, window_bounds = array<i64: 4>}, {transform_indices = @transform_1, window_bounds = array<i64: 1, 512, 96>}, {transform_indices = @transform_2, window_bounds = array<i64: 1, 512, 32>}]} {
    %c0_i32 = arith.constant 0 : i32
    %0 = arith.cmpi eq, %arg1, %c0_i32 : i32
    %c0_i32_0 = arith.constant 0 : i32
    %1 = arith.cmpi eq, %arg2, %c0_i32_0 : i32
    %2 = arith.andi %0, %1 : i1
    %3 = arith.extui %2 : i1 to i32
    %c0_i32_1 = arith.constant 0 : i32
    %4 = arith.cmpi ne, %3, %c0_i32_1 : i32
    scf.if %4 {
      %cst = arith.constant 0.000000e+00 : f32
      %16 = vector.broadcast %cst : f32 to vector<4x8x8xf32>
      %c0 = arith.constant 0 : index
      %c0_8 = arith.constant 0 : index
      %c0_9 = arith.constant 0 : index
      %17 = vector.load %arg6[%c0, %c0_8, %c0_9] : memref<4x8x8xf32, #tpu.memory_space<vmem>>, vector<4x8x8xf32>
      tpu.vector_store %arg6[%c0, %c0_8, %c0_9], %16 {strides = array<i32>} : memref<4x8x8xf32, #tpu.memory_space<vmem>>, vector<4x8x8xf32>,
      %cst_10 = arith.constant 0.000000e+00 : f32
      %18 = vector.broadcast %cst_10 : f32 to vector<2x32xf32>
      %c0_11 = arith.constant 0 : index
      %c0_12 = arith.constant 0 : index
      %19 = vector.load %arg7[%c0_11, %c0_12] : memref<2x32xf32, #tpu.memory_space<vmem>>, vector<2x32xf32>
      tpu.vector_store %arg7[%c0_11, %c0_12], %18 {strides = array<i32>} : memref<2x32xf32, #tpu.memory_space<vmem>>, vector<2x32xf32>,
    } else {
    }
    %c0_i32_2 = arith.constant 0 : i32
    %5 = arith.cmpi eq, %arg1, %c0_i32_2 : i32
    %6 = arith.extui %5 : i1 to i32
    %c0_i32_3 = arith.constant 0 : i32
    %7 = arith.cmpi ne, %6, %c0_i32_3 : i32
    scf.if %7 {
      %c0 = arith.constant 0 : index
      %c0_8 = arith.constant 0 : index
      %c0_9 = arith.constant 0 : index
      %16 = vector.load %arg4[%c0, %c0_8, %c0_9] : memref<1x512x96xf32, #tpu.memory_space<vmem>>, vector<1x512x32xf32>
      %17 = vector.shape_cast %16 : vector<1x512x32xf32> to vector<512x32xf32>
      %c0_10 = arith.constant 0 : index
      %c0_11 = arith.constant 0 : index
      %c32 = arith.constant 32 : index
      %18 = vector.load %arg4[%c0_10, %c0_11, %c32] : memref<1x512x96xf32, #tpu.memory_space<vmem>>, vector<1x512x32xf32>
      %19 = vector.shape_cast %18 : vector<1x512x32xf32> to vector<512x32xf32>
      %c0_12 = arith.constant 0 : index
      %c0_13 = arith.constant 0 : index
      %20 = vector.load %arg7[%c0_12, %c0_13] : memref<2x32xf32, #tpu.memory_space<vmem>>, vector<1x32xf32>
      %21 = arith.mulf %17, %17 : vector<512x32xf32>
      %cst = arith.constant dense<0.000000e+00> : vector<32xf32>
      %22 = vector.multi_reduction <add>, %21, %cst [0] : vector<512x32xf32> to vector<32xf32>
      %23 = vector.shape_cast %22 : vector<32xf32> to vector<1x32xf32>
      %24 = arith.addf %20, %23 : vector<1x32xf32>
      %c0_14 = arith.constant 0 : index
      %c0_15 = arith.constant 0 : index
      %25 = vector.load %arg7[%c0_14, %c0_15] : memref<2x32xf32, #tpu.memory_space<vmem>>, vector<1x32xf32>
      tpu.vector_store %arg7[%c0_14, %c0_15], %24 {strides = array<i32>} : memref<2x32xf32, #tpu.memory_space<vmem>>, vector<1x32xf32>,
      %c1 = arith.constant 1 : index
      %c0_16 = arith.constant 0 : index
      %26 = vector.load %arg7[%c1, %c0_16] : memref<2x32xf32, #tpu.memory_space<vmem>>, vector<1x32xf32>
      %27 = arith.mulf %19, %19 : vector<512x32xf32>
      %cst_17 = arith.constant dense<0.000000e+00> : vector<32xf32>
      %28 = vector.multi_reduction <add>, %27, %cst_17 [0] : vector<512x32xf32> to vector<32xf32>
      %29 = vector.shape_cast %28 : vector<32xf32> to vector<1x32xf32>
      %30 = arith.addf %26, %29 : vector<1x32xf32>
      %c1_18 = arith.constant 1 : index
      %c0_19 = arith.constant 0 : index
      %31 = vector.load %arg7[%c1_18, %c0_19] : memref<2x32xf32, #tpu.memory_space<vmem>>, vector<1x32xf32>
      tpu.vector_store %arg7[%c1_18, %c0_19], %30 {strides = array<i32>} : memref<2x32xf32, #tpu.memory_space<vmem>>, vector<1x32xf32>,
      %32 = arith.truncf %17 : vector<512x32xf32> to vector<512x32xbf16>
      %33 = arith.truncf %19 : vector<512x32xf32> to vector<512x32xbf16>
      %c0_20 = arith.constant 0 : index
      %c0_21 = arith.constant 0 : index
      %c0_22 = arith.constant 0 : index
      %34 = vector.load %arg6[%c0_20, %c0_21, %c0_22] : memref<4x8x8xf32, #tpu.memory_space<vmem>>, vector<1x8x8xf32>
      %35 = vector.shape_cast %34 : vector<1x8x8xf32> to vector<8x8xf32>
      %36 = vector.extract_strided_slice %32 {offsets = [0, 0], sizes = [512, 8], strides = [1, 1]} : vector<512x32xbf16> to vector<512x8xbf16>
      %37 = vector.extract_strided_slice %33 {offsets = [0, 0], sizes = [512, 8], strides = [1, 1]} : vector<512x32xbf16> to vector<512x8xbf16>
      %cst_23 = arith.constant dense<0.000000e+00> : vector<8x8xf32>
      %38 = tpu.matmul %36, %37, %cst_23 {dimension_numbers = #tpu.dot_dimension_numbers<[0], [0], [1], [1], [0, 1, 1, 1], [], []>} : vector<512x8xbf16>, vector<512x8xbf16>, vector<8x8xf32> -> vector<8x8xf32>
      %39 = arith.addf %35, %38 : vector<8x8xf32>
      %c0_24 = arith.constant 0 : index
      %c0_25 = arith.constant 0 : index
      %c0_26 = arith.constant 0 : index
      %40 = vector.load %arg6[%c0_24, %c0_25, %c0_26] : memref<4x8x8xf32, #tpu.memory_space<vmem>>, vector<1x8x8xf32>
      %41 = vector.shape_cast %40 : vector<1x8x8xf32> to vector<8x8xf32>
      %42 = vector.shape_cast %39 : vector<8x8xf32> to vector<1x8x8xf32>
      tpu.vector_store %arg6[%c0_24, %c0_25, %c0_26], %42 {strides = array<i32>} : memref<4x8x8xf32, #tpu.memory_space<vmem>>, vector<1x8x8xf32>,
      %c1_27 = arith.constant 1 : index
      %c0_28 = arith.constant 0 : index
      %c0_29 = arith.constant 0 : index
      %43 = vector.load %arg6[%c1_27, %c0_28, %c0_29] : memref<4x8x8xf32, #tpu.memory_space<vmem>>, vector<1x8x8xf32>
      %44 = vector.shape_cast %43 : vector<1x8x8xf32> to vector<8x8xf32>
      %45 = vector.extract_strided_slice %32 {offsets = [0, 8], sizes = [512, 8], strides = [1, 1]} : vector<512x32xbf16> to vector<512x8xbf16>
      %46 = vector.extract_strided_slice %33 {offsets = [0, 8], sizes = [512, 8], strides = [1, 1]} : vector<512x32xbf16> to vector<512x8xbf16>
      %cst_30 = arith.constant dense<0.000000e+00> : vector<8x8xf32>
      %47 = tpu.matmul %45, %46, %cst_30 {dimension_numbers = #tpu.dot_dimension_numbers<[0], [0], [1], [1], [0, 1, 1, 1], [], []>} : vector<512x8xbf16>, vector<512x8xbf16>, vector<8x8xf32> -> vector<8x8xf32>
      %48 = arith.addf %44, %47 : vector<8x8xf32>
      %c1_31 = arith.constant 1 : index
      %c0_32 = arith.constant 0 : index
      %c0_33 = arith.constant 0 : index
      %49 = vector.load %arg6[%c1_31, %c0_32, %c0_33] : memref<4x8x8xf32, #tpu.memory_space<vmem>>, vector<1x8x8xf32>
      %50 = vector.shape_cast %49 : vector<1x8x8xf32> to vector<8x8xf32>
      %51 = vector.shape_cast %48 : vector<8x8xf32> to vector<1x8x8xf32>
      tpu.vector_store %arg6[%c1_31, %c0_32, %c0_33], %51 {strides = array<i32>} : memref<4x8x8xf32, #tpu.memory_space<vmem>>, vector<1x8x8xf32>,
      %c2 = arith.constant 2 : index
      %c0_34 = arith.constant 0 : index
      %c0_35 = arith.constant 0 : index
      %52 = vector.load %arg6[%c2, %c0_34, %c0_35] : memref<4x8x8xf32, #tpu.memory_space<vmem>>, vector<1x8x8xf32>
      %53 = vector.shape_cast %52 : vector<1x8x8xf32> to vector<8x8xf32>
      %54 = vector.extract_strided_slice %32 {offsets = [0, 16], sizes = [512, 8], strides = [1, 1]} : vector<512x32xbf16> to vector<512x8xbf16>
      %55 = vector.extract_strided_slice %33 {offsets = [0, 16], sizes = [512, 8], strides = [1, 1]} : vector<512x32xbf16> to vector<512x8xbf16>
      %cst_36 = arith.constant dense<0.000000e+00> : vector<8x8xf32>
      %56 = tpu.matmul %54, %55, %cst_36 {dimension_numbers = #tpu.dot_dimension_numbers<[0], [0], [1], [1], [0, 1, 1, 1], [], []>} : vector<512x8xbf16>, vector<512x8xbf16>, vector<8x8xf32> -> vector<8x8xf32>
      %57 = arith.addf %53, %56 : vector<8x8xf32>
      %c2_37 = arith.constant 2 : index
      %c0_38 = arith.constant 0 : index
      %c0_39 = arith.constant 0 : index
      %58 = vector.load %arg6[%c2_37, %c0_38, %c0_39] : memref<4x8x8xf32, #tpu.memory_space<vmem>>, vector<1x8x8xf32>
      %59 = vector.shape_cast %58 : vector<1x8x8xf32> to vector<8x8xf32>
      %60 = vector.shape_cast %57 : vector<8x8xf32> to vector<1x8x8xf32>
      tpu.vector_store %arg6[%c2_37, %c0_38, %c0_39], %60 {strides = array<i32>} : memref<4x8x8xf32, #tpu.memory_space<vmem>>, vector<1x8x8xf32>,
      %c3 = arith.constant 3 : index
      %c0_40 = arith.constant 0 : index
      %c0_41 = arith.constant 0 : index
      %61 = vector.load %arg6[%c3, %c0_40, %c0_41] : memref<4x8x8xf32, #tpu.memory_space<vmem>>, vector<1x8x8xf32>
      %62 = vector.shape_cast %61 : vector<1x8x8xf32> to vector<8x8xf32>
      %63 = vector.extract_strided_slice %32 {offsets = [0, 24], sizes = [512, 8], strides = [1, 1]} : vector<512x32xbf16> to vector<512x8xbf16>
      %64 = vector.extract_strided_slice %33 {offsets = [0, 24], sizes = [512, 8], strides = [1, 1]} : vector<512x32xbf16> to vector<512x8xbf16>
      %cst_42 = arith.constant dense<0.000000e+00> : vector<8x8xf32>
      %65 = tpu.matmul %63, %64, %cst_42 {dimension_numbers = #tpu.dot_dimension_numbers<[0], [0], [1], [1], [0, 1, 1, 1], [], []>} : vector<512x8xbf16>, vector<512x8xbf16>, vector<8x8xf32> -> vector<8x8xf32>
      %66 = arith.addf %62, %65 : vector<8x8xf32>
      %c3_43 = arith.constant 3 : index
      %c0_44 = arith.constant 0 : index
      %c0_45 = arith.constant 0 : index
      %67 = vector.load %arg6[%c3_43, %c0_44, %c0_45] : memref<4x8x8xf32, #tpu.memory_space<vmem>>, vector<1x8x8xf32>
      %68 = vector.shape_cast %67 : vector<1x8x8xf32> to vector<8x8xf32>
      %69 = vector.shape_cast %66 : vector<8x8xf32> to vector<1x8x8xf32>
      tpu.vector_store %arg6[%c3_43, %c0_44, %c0_45], %69 {strides = array<i32>} : memref<4x8x8xf32, #tpu.memory_space<vmem>>, vector<1x8x8xf32>,
    } else {
    }
    %c1_i32 = arith.constant 1 : i32
    %8 = arith.cmpi eq, %arg1, %c1_i32 : i32
    %c0_i32_4 = arith.constant 0 : i32
    %9 = arith.cmpi eq, %arg2, %c0_i32_4 : i32
    %10 = arith.andi %8, %9 : i1
    %11 = arith.extui %10 : i1 to i32
    %c0_i32_5 = arith.constant 0 : i32
    %12 = arith.cmpi ne, %11, %c0_i32_5 : i32
    scf.if %12 {
      %16 = tpu.iota {dimensions = array<i32: 0>} : vector<8x8xi32>
      %17 = tpu.iota {dimensions = array<i32: 1>} : vector<8x8xi32>
      %18 = arith.cmpi eq, %16, %17 : vector<8x8xi32>
      %c0 = arith.constant 0 : index
      %c0_8 = arith.constant 0 : index
      %19 = vector.load %arg7[%c0, %c0_8] : memref<2x32xf32, #tpu.memory_space<vmem>>, vector<1x8xf32>
      %20 = math.sqrt %19 : vector<1x8xf32>
      %cst = arith.constant 9.99999996E-13 : f32
      %21 = vector.broadcast %cst : f32 to vector<1x8xf32>
      %22 = arith.maximumf %20, %21 : vector<1x8xf32>
      %23 = tpu.reciprocal %22 {approx = true} : vector<1x8xf32> -> vector<1x8xf32>
      %c1 = arith.constant 1 : index
      %c0_9 = arith.constant 0 : index
      %24 = vector.load %arg7[%c1, %c0_9] : memref<2x32xf32, #tpu.memory_space<vmem>>, vector<1x8xf32>
      %25 = math.sqrt %24 : vector<1x8xf32>
      %cst_10 = arith.constant 9.99999996E-13 : f32
      %26 = vector.broadcast %cst_10 : f32 to vector<1x8xf32>
      %27 = arith.maximumf %25, %26 : vector<1x8xf32>
      %28 = tpu.reciprocal %27 {approx = true} : vector<1x8xf32> -> vector<1x8xf32>
      %cst_11 = arith.constant 0.000000e+00 : f32
      %29 = vector.shape_cast %23 : vector<1x8xf32> to vector<1x8xf32>
      %30 = vector.broadcast %29 : vector<1x8xf32> to vector<8x8xf32>
      %31 = vector.broadcast %cst_11 : f32 to vector<8x8xf32>
      %32 = arith.select %18, %30, %31 : vector<8x8xi1>, vector<8x8xf32>
      %cst_12 = arith.constant dense<0.000000e+00> : vector<8xf32>
      %33 = vector.multi_reduction <add>, %32, %cst_12 [1] : vector<8x8xf32> to vector<8xf32>
      %34 = vector.shape_cast %33 : vector<8xf32> to vector<8x1xf32>
      %c0_13 = arith.constant 0 : index
      %c0_14 = arith.constant 0 : index
      %c0_15 = arith.constant 0 : index
      %35 = vector.load %arg6[%c0_13, %c0_14, %c0_15] : memref<4x8x8xf32, #tpu.memory_space<vmem>>, vector<1x8x8xf32>
      %36 = vector.shape_cast %35 : vector<1x8x8xf32> to vector<8x8xf32>
      %37 = vector.broadcast %34 : vector<8x1xf32> to vector<8x8xf32>
      %38 = arith.mulf %36, %37 : vector<8x8xf32>
      %39 = vector.broadcast %28 : vector<1x8xf32> to vector<8x8xf32>
      %40 = arith.mulf %38, %39 : vector<8x8xf32>
      %c0_16 = arith.constant 0 : index
      %41 = memref.load %arg3[%c0_16] : memref<4xf32, #tpu.memory_space<smem>>
      %42 = vector.broadcast %41 : f32 to vector<8x8xf32>
      %43 = arith.mulf %40, %42 : vector<8x8xf32>
      %cst_17 = arith.constant dense<0xFF800000> : vector<8xf32>
      %44 = vector.multi_reduction <maximumf>, %43, %cst_17 [1] : vector<8x8xf32> to vector<8xf32>
      %45 = vector.shape_cast %44 : vector<8xf32> to vector<8x1xf32>
      %46 = vector.broadcast %45 : vector<8x1xf32> to vector<8x8xf32>
      %47 = arith.subf %43, %46 : vector<8x8xf32>
      %48 = math.exp %47 : vector<8x8xf32>
      %cst_18 = arith.constant dense<0.000000e+00> : vector<8xf32>
      %49 = vector.multi_reduction <add>, %48, %cst_18 [1] : vector<8x8xf32> to vector<8xf32>
      %50 = vector.shape_cast %49 : vector<8xf32> to vector<8x1xf32>
      %51 = tpu.reciprocal %50 {approx = true} : vector<8x1xf32> -> vector<8x1xf32>
      %52 = vector.broadcast %51 : vector<8x1xf32> to vector<8x8xf32>
      %53 = arith.mulf %48, %52 : vector<8x8xf32>
      %c0_19 = arith.constant 0 : index
      %c0_20 = arith.constant 0 : index
      %c0_21 = arith.constant 0 : index
      %54 = vector.load %arg6[%c0_19, %c0_20, %c0_21] : memref<4x8x8xf32, #tpu.memory_space<vmem>>, vector<1x8x8xf32>
      %55 = vector.shape_cast %54 : vector<1x8x8xf32> to vector<8x8xf32>
      %56 = vector.shape_cast %53 : vector<8x8xf32> to vector<1x8x8xf32>
      tpu.vector_store %arg6[%c0_19, %c0_20, %c0_21], %56 {strides = array<i32>} : memref<4x8x8xf32, #tpu.memory_space<vmem>>, vector<1x8x8xf32>,
      %c0_22 = arith.constant 0 : index
      %c8 = arith.constant 8 : index
      %57 = vector.load %arg7[%c0_22, %c8] : memref<2x32xf32, #tpu.memory_space<vmem>>, vector<1x8xf32>
      %58 = math.sqrt %57 : vector<1x8xf32>
      %cst_23 = arith.constant 9.99999996E-13 : f32
      %59 = vector.broadcast %cst_23 : f32 to vector<1x8xf32>
      %60 = arith.maximumf %58, %59 : vector<1x8xf32>
      %61 = tpu.reciprocal %60 {approx = true} : vector<1x8xf32> -> vector<1x8xf32>
      %c1_24 = arith.constant 1 : index
      %c8_25 = arith.constant 8 : index
      %62 = vector.load %arg7[%c1_24, %c8_25] : memref<2x32xf32, #tpu.memory_space<vmem>>, vector<1x8xf32>
      %63 = math.sqrt %62 : vector<1x8xf32>
      %cst_26 = arith.constant 9.99999996E-13 : f32
      %64 = vector.broadcast %cst_26 : f32 to vector<1x8xf32>
      %65 = arith.maximumf %63, %64 : vector<1x8xf32>
      %66 = tpu.reciprocal %65 {approx = true} : vector<1x8xf32> -> vector<1x8xf32>
      %cst_27 = arith.constant 0.000000e+00 : f32
      %67 = vector.shape_cast %61 : vector<1x8xf32> to vector<1x8xf32>
      %68 = vector.broadcast %67 : vector<1x8xf32> to vector<8x8xf32>
      %69 = vector.broadcast %cst_27 : f32 to vector<8x8xf32>
      %70 = arith.select %18, %68, %69 : vector<8x8xi1>, vector<8x8xf32>
      %cst_28 = arith.constant dense<0.000000e+00> : vector<8xf32>
      %71 = vector.multi_reduction <add>, %70, %cst_28 [1] : vector<8x8xf32> to vector<8xf32>
      %72 = vector.shape_cast %71 : vector<8xf32> to vector<8x1xf32>
      %c1_29 = arith.constant 1 : index
      %c0_30 = arith.constant 0 : index
      %c0_31 = arith.constant 0 : index
      %73 = vector.load %arg6[%c1_29, %c0_30, %c0_31] : memref<4x8x8xf32, #tpu.memory_space<vmem>>, vector<1x8x8xf32>
      %74 = vector.shape_cast %73 : vector<1x8x8xf32> to vector<8x8xf32>
      %75 = vector.broadcast %72 : vector<8x1xf32> to vector<8x8xf32>
      %76 = arith.mulf %74, %75 : vector<8x8xf32>
      %77 = vector.broadcast %66 : vector<1x8xf32> to vector<8x8xf32>
      %78 = arith.mulf %76, %77 : vector<8x8xf32>
      %c1_32 = arith.constant 1 : index
      %79 = memref.load %arg3[%c1_32] : memref<4xf32, #tpu.memory_space<smem>>
      %80 = vector.broadcast %79 : f32 to vector<8x8xf32>
      %81 = arith.mulf %78, %80 : vector<8x8xf32>
      %cst_33 = arith.constant dense<0xFF800000> : vector<8xf32>
      %82 = vector.multi_reduction <maximumf>, %81, %cst_33 [1] : vector<8x8xf32> to vector<8xf32>
      %83 = vector.shape_cast %82 : vector<8xf32> to vector<8x1xf32>
      %84 = vector.broadcast %83 : vector<8x1xf32> to vector<8x8xf32>
      %85 = arith.subf %81, %84 : vector<8x8xf32>
      %86 = math.exp %85 : vector<8x8xf32>
      %cst_34 = arith.constant dense<0.000000e+00> : vector<8xf32>
      %87 = vector.multi_reduction <add>, %86, %cst_34 [1] : vector<8x8xf32> to vector<8xf32>
      %88 = vector.shape_cast %87 : vector<8xf32> to vector<8x1xf32>
      %89 = tpu.reciprocal %88 {approx = true} : vector<8x1xf32> -> vector<8x1xf32>
      %90 = vector.broadcast %89 : vector<8x1xf32> to vector<8x8xf32>
      %91 = arith.mulf %86, %90 : vector<8x8xf32>
      %c1_35 = arith.constant 1 : index
      %c0_36 = arith.constant 0 : index
      %c0_37 = arith.constant 0 : index
      %92 = vector.load %arg6[%c1_35, %c0_36, %c0_37] : memref<4x8x8xf32, #tpu.memory_space<vmem>>, vector<1x8x8xf32>
      %93 = vector.shape_cast %92 : vector<1x8x8xf32> to vector<8x8xf32>
      %94 = vector.shape_cast %91 : vector<8x8xf32> to vector<1x8x8xf32>
      tpu.vector_store %arg6[%c1_35, %c0_36, %c0_37], %94 {strides = array<i32>} : memref<4x8x8xf32, #tpu.memory_space<vmem>>, vector<1x8x8xf32>,
      %c0_38 = arith.constant 0 : index
      %c16 = arith.constant 16 : index
      %95 = vector.load %arg7[%c0_38, %c16] : memref<2x32xf32, #tpu.memory_space<vmem>>, vector<1x8xf32>
      %96 = math.sqrt %95 : vector<1x8xf32>
      %cst_39 = arith.constant 9.99999996E-13 : f32
      %97 = vector.broadcast %cst_39 : f32 to vector<1x8xf32>
      %98 = arith.maximumf %96, %97 : vector<1x8xf32>
      %99 = tpu.reciprocal %98 {approx = true} : vector<1x8xf32> -> vector<1x8xf32>
      %c1_40 = arith.constant 1 : index
      %c16_41 = arith.constant 16 : index
      %100 = vector.load %arg7[%c1_40, %c16_41] : memref<2x32xf32, #tpu.memory_space<vmem>>, vector<1x8xf32>
      %101 = math.sqrt %100 : vector<1x8xf32>
      %cst_42 = arith.constant 9.99999996E-13 : f32
      %102 = vector.broadcast %cst_42 : f32 to vector<1x8xf32>
      %103 = arith.maximumf %101, %102 : vector<1x8xf32>
      %104 = tpu.reciprocal %103 {approx = true} : vector<1x8xf32> -> vector<1x8xf32>
      %cst_43 = arith.constant 0.000000e+00 : f32
      %105 = vector.shape_cast %99 : vector<1x8xf32> to vector<1x8xf32>
      %106 = vector.broadcast %105 : vector<1x8xf32> to vector<8x8xf32>
      %107 = vector.broadcast %cst_43 : f32 to vector<8x8xf32>
      %108 = arith.select %18, %106, %107 : vector<8x8xi1>, vector<8x8xf32>
      %cst_44 = arith.constant dense<0.000000e+00> : vector<8xf32>
      %109 = vector.multi_reduction <add>, %108, %cst_44 [1] : vector<8x8xf32> to vector<8xf32>
      %110 = vector.shape_cast %109 : vector<8xf32> to vector<8x1xf32>
      %c2 = arith.constant 2 : index
      %c0_45 = arith.constant 0 : index
      %c0_46 = arith.constant 0 : index
      %111 = vector.load %arg6[%c2, %c0_45, %c0_46] : memref<4x8x8xf32, #tpu.memory_space<vmem>>, vector<1x8x8xf32>
      %112 = vector.shape_cast %111 : vector<1x8x8xf32> to vector<8x8xf32>
      %113 = vector.broadcast %110 : vector<8x1xf32> to vector<8x8xf32>
      %114 = arith.mulf %112, %113 : vector<8x8xf32>
      %115 = vector.broadcast %104 : vector<1x8xf32> to vector<8x8xf32>
      %116 = arith.mulf %114, %115 : vector<8x8xf32>
      %c2_47 = arith.constant 2 : index
      %117 = memref.load %arg3[%c2_47] : memref<4xf32, #tpu.memory_space<smem>>
      %118 = vector.broadcast %117 : f32 to vector<8x8xf32>
      %119 = arith.mulf %116, %118 : vector<8x8xf32>
      %cst_48 = arith.constant dense<0xFF800000> : vector<8xf32>
      %120 = vector.multi_reduction <maximumf>, %119, %cst_48 [1] : vector<8x8xf32> to vector<8xf32>
      %121 = vector.shape_cast %120 : vector<8xf32> to vector<8x1xf32>
      %122 = vector.broadcast %121 : vector<8x1xf32> to vector<8x8xf32>
      %123 = arith.subf %119, %122 : vector<8x8xf32>
      %124 = math.exp %123 : vector<8x8xf32>
      %cst_49 = arith.constant dense<0.000000e+00> : vector<8xf32>
      %125 = vector.multi_reduction <add>, %124, %cst_49 [1] : vector<8x8xf32> to vector<8xf32>
      %126 = vector.shape_cast %125 : vector<8xf32> to vector<8x1xf32>
      %127 = tpu.reciprocal %126 {approx = true} : vector<8x1xf32> -> vector<8x1xf32>
      %128 = vector.broadcast %127 : vector<8x1xf32> to vector<8x8xf32>
      %129 = arith.mulf %124, %128 : vector<8x8xf32>
      %c2_50 = arith.constant 2 : index
      %c0_51 = arith.constant 0 : index
      %c0_52 = arith.constant 0 : index
      %130 = vector.load %arg6[%c2_50, %c0_51, %c0_52] : memref<4x8x8xf32, #tpu.memory_space<vmem>>, vector<1x8x8xf32>
      %131 = vector.shape_cast %130 : vector<1x8x8xf32> to vector<8x8xf32>
      %132 = vector.shape_cast %129 : vector<8x8xf32> to vector<1x8x8xf32>
      tpu.vector_store %arg6[%c2_50, %c0_51, %c0_52], %132 {strides = array<i32>} : memref<4x8x8xf32, #tpu.memory_space<vmem>>, vector<1x8x8xf32>,
      %c0_53 = arith.constant 0 : index
      %c24 = arith.constant 24 : index
      %133 = vector.load %arg7[%c0_53, %c24] : memref<2x32xf32, #tpu.memory_space<vmem>>, vector<1x8xf32>
      %134 = math.sqrt %133 : vector<1x8xf32>
      %cst_54 = arith.constant 9.99999996E-13 : f32
      %135 = vector.broadcast %cst_54 : f32 to vector<1x8xf32>
      %136 = arith.maximumf %134, %135 : vector<1x8xf32>
      %137 = tpu.reciprocal %136 {approx = true} : vector<1x8xf32> -> vector<1x8xf32>
      %c1_55 = arith.constant 1 : index
      %c24_56 = arith.constant 24 : index
      %138 = vector.load %arg7[%c1_55, %c24_56] : memref<2x32xf32, #tpu.memory_space<vmem>>, vector<1x8xf32>
      %139 = math.sqrt %138 : vector<1x8xf32>
      %cst_57 = arith.constant 9.99999996E-13 : f32
      %140 = vector.broadcast %cst_57 : f32 to vector<1x8xf32>
      %141 = arith.maximumf %139, %140 : vector<1x8xf32>
      %142 = tpu.reciprocal %141 {approx = true} : vector<1x8xf32> -> vector<1x8xf32>
      %cst_58 = arith.constant 0.000000e+00 : f32
      %143 = vector.shape_cast %137 : vector<1x8xf32> to vector<1x8xf32>
      %144 = vector.broadcast %143 : vector<1x8xf32> to vector<8x8xf32>
      %145 = vector.broadcast %cst_58 : f32 to vector<8x8xf32>
      %146 = arith.select %18, %144, %145 : vector<8x8xi1>, vector<8x8xf32>
      %cst_59 = arith.constant dense<0.000000e+00> : vector<8xf32>
      %147 = vector.multi_reduction <add>, %146, %cst_59 [1] : vector<8x8xf32> to vector<8xf32>
      %148 = vector.shape_cast %147 : vector<8xf32> to vector<8x1xf32>
      %c3 = arith.constant 3 : index
      %c0_60 = arith.constant 0 : index
      %c0_61 = arith.constant 0 : index
      %149 = vector.load %arg6[%c3, %c0_60, %c0_61] : memref<4x8x8xf32, #tpu.memory_space<vmem>>, vector<1x8x8xf32>
      %150 = vector.shape_cast %149 : vector<1x8x8xf32> to vector<8x8xf32>
      %151 = vector.broadcast %148 : vector<8x1xf32> to vector<8x8xf32>
      %152 = arith.mulf %150, %151 : vector<8x8xf32>
      %153 = vector.broadcast %142 : vector<1x8xf32> to vector<8x8xf32>
      %154 = arith.mulf %152, %153 : vector<8x8xf32>
      %c3_62 = arith.constant 3 : index
      %155 = memref.load %arg3[%c3_62] : memref<4xf32, #tpu.memory_space<smem>>
      %156 = vector.broadcast %155 : f32 to vector<8x8xf32>
      %157 = arith.mulf %154, %156 : vector<8x8xf32>
      %cst_63 = arith.constant dense<0xFF800000> : vector<8xf32>
      %158 = vector.multi_reduction <maximumf>, %157, %cst_63 [1] : vector<8x8xf32> to vector<8xf32>
      %159 = vector.shape_cast %158 : vector<8xf32> to vector<8x1xf32>
      %160 = vector.broadcast %159 : vector<8x1xf32> to vector<8x8xf32>
      %161 = arith.subf %157, %160 : vector<8x8xf32>
      %162 = math.exp %161 : vector<8x8xf32>
      %cst_64 = arith.constant dense<0.000000e+00> : vector<8xf32>
      %163 = vector.multi_reduction <add>, %162, %cst_64 [1] : vector<8x8xf32> to vector<8xf32>
      %164 = vector.shape_cast %163 : vector<8xf32> to vector<8x1xf32>
      %165 = tpu.reciprocal %164 {approx = true} : vector<8x1xf32> -> vector<8x1xf32>
      %166 = vector.broadcast %165 : vector<8x1xf32> to vector<8x8xf32>
      %167 = arith.mulf %162, %166 : vector<8x8xf32>
      %c3_65 = arith.constant 3 : index
      %c0_66 = arith.constant 0 : index
      %c0_67 = arith.constant 0 : index
      %168 = vector.load %arg6[%c3_65, %c0_66, %c0_67] : memref<4x8x8xf32, #tpu.memory_space<vmem>>, vector<1x8x8xf32>
      %169 = vector.shape_cast %168 : vector<1x8x8xf32> to vector<8x8xf32>
      %170 = vector.shape_cast %167 : vector<8x8xf32> to vector<1x8x8xf32>
      tpu.vector_store %arg6[%c3_65, %c0_66, %c0_67], %170 {strides = array<i32>} : memref<4x8x8xf32, #tpu.memory_space<vmem>>, vector<1x8x8xf32>,
    } else {
    }
    %c1_i32_6 = arith.constant 1 : i32
    %13 = arith.cmpi eq, %arg1, %c1_i32_6 : i32
    %14 = arith.extui %13 : i1 to i32
    %c0_i32_7 = arith.constant 0 : i32
    %15 = arith.cmpi ne, %14, %c0_i32_7 : i32
    scf.if %15 {
      %c0 = arith.constant 0 : index
      %c0_8 = arith.constant 0 : index
      %c64 = arith.constant 64 : index
      %16 = vector.load %arg4[%c0, %c0_8, %c64] : memref<1x512x96xf32, #tpu.memory_space<vmem>>, vector<1x512x32xf32>
      %17 = vector.shape_cast %16 : vector<1x512x32xf32> to vector<512x32xf32>
      %18 = arith.truncf %17 : vector<512x32xf32> to vector<512x32xbf16>
      %c0_9 = arith.constant 0 : index
      %c0_10 = arith.constant 0 : index
      %c0_11 = arith.constant 0 : index
      %19 = vector.load %arg6[%c0_9, %c0_10, %c0_11] : memref<4x8x8xf32, #tpu.memory_space<vmem>>, vector<1x8x8xf32>
      %20 = vector.shape_cast %19 : vector<1x8x8xf32> to vector<8x8xf32>
      %21 = arith.truncf %20 : vector<8x8xf32> to vector<8x8xbf16>
      %22 = vector.extract_strided_slice %18 {offsets = [0, 0], sizes = [512, 8], strides = [1, 1]} : vector<512x32xbf16> to vector<512x8xbf16>
      %cst = arith.constant dense<0.000000e+00> : vector<512x8xf32>
      %23 = tpu.matmul %22, %21, %cst {dimension_numbers = #tpu.dot_dimension_numbers<[1], [1], [0], [0], [0, 0, 1, 0], [], []>} : vector<512x8xbf16>, vector<8x8xbf16>, vector<512x8xf32> -> vector<512x8xf32>
      %c1 = arith.constant 1 : index
      %c0_12 = arith.constant 0 : index
      %c0_13 = arith.constant 0 : index
      %24 = vector.load %arg6[%c1, %c0_12, %c0_13] : memref<4x8x8xf32, #tpu.memory_space<vmem>>, vector<1x8x8xf32>
      %25 = vector.shape_cast %24 : vector<1x8x8xf32> to vector<8x8xf32>
      %26 = arith.truncf %25 : vector<8x8xf32> to vector<8x8xbf16>
      %27 = vector.extract_strided_slice %18 {offsets = [0, 8], sizes = [512, 8], strides = [1, 1]} : vector<512x32xbf16> to vector<512x8xbf16>
      %cst_14 = arith.constant dense<0.000000e+00> : vector<512x8xf32>
      %28 = tpu.matmul %27, %26, %cst_14 {dimension_numbers = #tpu.dot_dimension_numbers<[1], [1], [0], [0], [0, 0, 1, 0], [], []>} : vector<512x8xbf16>, vector<8x8xbf16>, vector<512x8xf32> -> vector<512x8xf32>
      %c2 = arith.constant 2 : index
      %c0_15 = arith.constant 0 : index
      %c0_16 = arith.constant 0 : index
      %29 = vector.load %arg6[%c2, %c0_15, %c0_16] : memref<4x8x8xf32, #tpu.memory_space<vmem>>, vector<1x8x8xf32>
      %30 = vector.shape_cast %29 : vector<1x8x8xf32> to vector<8x8xf32>
      %31 = arith.truncf %30 : vector<8x8xf32> to vector<8x8xbf16>
      %32 = vector.extract_strided_slice %18 {offsets = [0, 16], sizes = [512, 8], strides = [1, 1]} : vector<512x32xbf16> to vector<512x8xbf16>
      %cst_17 = arith.constant dense<0.000000e+00> : vector<512x8xf32>
      %33 = tpu.matmul %32, %31, %cst_17 {dimension_numbers = #tpu.dot_dimension_numbers<[1], [1], [0], [0], [0, 0, 1, 0], [], []>} : vector<512x8xbf16>, vector<8x8xbf16>, vector<512x8xf32> -> vector<512x8xf32>
      %c3 = arith.constant 3 : index
      %c0_18 = arith.constant 0 : index
      %c0_19 = arith.constant 0 : index
      %34 = vector.load %arg6[%c3, %c0_18, %c0_19] : memref<4x8x8xf32, #tpu.memory_space<vmem>>, vector<1x8x8xf32>
      %35 = vector.shape_cast %34 : vector<1x8x8xf32> to vector<8x8xf32>
      %36 = arith.truncf %35 : vector<8x8xf32> to vector<8x8xbf16>
      %37 = vector.extract_strided_slice %18 {offsets = [0, 24], sizes = [512, 8], strides = [1, 1]} : vector<512x32xbf16> to vector<512x8xbf16>
      %cst_20 = arith.constant dense<0.000000e+00> : vector<512x8xf32>
      %38 = tpu.matmul %37, %36, %cst_20 {dimension_numbers = #tpu.dot_dimension_numbers<[1], [1], [0], [0], [0, 0, 1, 0], [], []>} : vector<512x8xbf16>, vector<8x8xbf16>, vector<512x8xf32> -> vector<512x8xf32>
      %39 = tpu.concatenate %23, %28, %33, %38 in 1 : vector<512x8xf32>, vector<512x8xf32>, vector<512x8xf32>, vector<512x8xf32> -> vector<512x32xf32>
      %c0_21 = arith.constant 0 : index
      %c0_22 = arith.constant 0 : index
      %c0_23 = arith.constant 0 : index
      %40 = vector.load %arg5[%c0_21, %c0_22, %c0_23] : memref<1x512x32xf32, #tpu.memory_space<vmem>>, vector<1x512x32xf32>
      %41 = vector.shape_cast %40 : vector<1x512x32xf32> to vector<512x32xf32>
      %42 = vector.shape_cast %39 : vector<512x32xf32> to vector<1x512x32xf32>
      tpu.vector_store %arg5[%c0_21, %c0_22, %c0_23], %42 {strides = array<i32>} : memref<1x512x32xf32, #tpu.memory_space<vmem>>, vector<1x512x32xf32>,
    } else {
    }
    return
  }
  func.func @transform_0(%arg0: i32, %arg1: i32, %arg2: i32) -> i32 {
    %c0_i32 = arith.constant 0 : i32
    %c0_i32_0 = arith.constant 0 : i32
    return %c0_i32 : i32
  }
  func.func @transform_1(%arg0: i32, %arg1: i32, %arg2: i32) -> (i32, i32, i32) {
    %c0_i32 = arith.constant 0 : i32
    %c0_i32_0 = arith.constant 0 : i32
    return %arg0, %arg2, %c0_i32 : i32, i32, i32
  }
  func.func @transform_2(%arg0: i32, %arg1: i32, %arg2: i32) -> (i32, i32, i32) {
    %0 = arith.muli %arg1, %arg2 : i32
    %c0_i32 = arith.constant 0 : i32
    %c0_i32_0 = arith.constant 0 : i32
    return %arg0, %0, %c0_i32 : i32, i32, i32
  }
}

module attributes {stable_mosaic.version = 11 : i64} {
  func.func @_pointwise_kernel(%arg0: i32, %arg1: memref<512x32xf32, #tpu.memory_space<vmem>>, %arg2: memref<32x32xf32, #tpu.memory_space<vmem>>, %arg3: memref<512x32xf32, #tpu.memory_space<vmem>>) attributes {dimension_semantics = [#tpu.dimension_semantics<parallel>], iteration_bounds = array<i64: 4>, scalar_prefetch = 0 : i64, scratch_operands = 0 : i64, tpu.core_type = #tpu.core_type<tc>, window_params = [{transform_indices = @transform_0, window_bounds = array<i64: 512, 32>}, {pipeline_mode = #tpu.pipeline_mode<synchronous>, transform_indices = @transform_1, window_bounds = array<i64: 32, 32>}, {transform_indices = @transform_2, window_bounds = array<i64: 512, 32>}]} {
    %c0 = arith.constant 0 : index
    %c0_0 = arith.constant 0 : index
    %0 = vector.load %arg1[%c0, %c0_0] : memref<512x32xf32, #tpu.memory_space<vmem>>, vector<512x32xf32>
    %1 = arith.truncf %0 : vector<512x32xf32> to vector<512x32xbf16>
    %c0_1 = arith.constant 0 : index
    %c0_2 = arith.constant 0 : index
    %2 = vector.load %arg2[%c0_1, %c0_2] : memref<32x32xf32, #tpu.memory_space<vmem>>, vector<32x32xf32>
    %3 = arith.truncf %2 : vector<32x32xf32> to vector<32x32xbf16>
    %cst = arith.constant dense<0.000000e+00> : vector<512x32xf32>
    %4 = tpu.matmul %1, %3, %cst {dimension_numbers = #tpu.dot_dimension_numbers<[1], [0], [0], [1], [0, 0, 1, 1], [], []>} : vector<512x32xbf16>, vector<32x32xbf16>, vector<512x32xf32> -> vector<512x32xf32>
    %c0_3 = arith.constant 0 : index
    %c0_4 = arith.constant 0 : index
    %5 = vector.load %arg3[%c0_3, %c0_4] : memref<512x32xf32, #tpu.memory_space<vmem>>, vector<512x32xf32>
    tpu.vector_store %arg3[%c0_3, %c0_4], %4 {strides = array<i32>} : memref<512x32xf32, #tpu.memory_space<vmem>>, vector<512x32xf32>,
    return
  }
  func.func @transform_0(%arg0: i32) -> (i32, i32) {
    %c0_i32 = arith.constant 0 : i32
    %c0_i32_0 = arith.constant 0 : i32
    return %arg0, %c0_i32 : i32, i32
  }
  func.func @transform_1(%arg0: i32) -> (i32, i32) {
    %c0_i32 = arith.constant 0 : i32
    %c0_i32_0 = arith.constant 0 : i32
    %c0_i32_1 = arith.constant 0 : i32
    return %c0_i32, %c0_i32_0 : i32, i32
  }
  func.func @transform_2(%arg0: i32) -> (i32, i32) {
    %c0_i32 = arith.constant 0 : i32
    %c0_i32_0 = arith.constant 0 : i32
    return %arg0, %c0_i32 : i32, i32
  }
}

module attributes {stable_mosaic.version = 11 : i64} {
  func.func @_fused_qkv_dw_kernel(%arg0: i32, %arg1: i32, %arg2: memref<1x256x32xf32, #tpu.memory_space<vmem>>, %arg3: memref<1x32x32xf32, #tpu.memory_space<vmem>>, %arg4: memref<1x32x32xf32, #tpu.memory_space<vmem>>, %arg5: memref<32x96xf32, #tpu.memory_space<vmem>>, %arg6: memref<9x96xf32, #tpu.memory_space<vmem>>, %arg7: memref<1x256x96xf32, #tpu.memory_space<vmem>>, %arg8: memref<10x34x96xf32, #tpu.memory_space<vmem>>) attributes {dimension_semantics = [#tpu.dimension_semantics<parallel>, #tpu.dimension_semantics<parallel>], iteration_bounds = array<i64: 2, 4>, scalar_prefetch = 0 : i64, scratch_operands = 1 : i64, tpu.core_type = #tpu.core_type<tc>, window_params = [{transform_indices = @transform_0, window_bounds = array<i64: 1, 256, 32>}, {transform_indices = @transform_1, window_bounds = array<i64: 1, 32, 32>}, {transform_indices = @transform_2, window_bounds = array<i64: 1, 32, 32>}, {pipeline_mode = #tpu.pipeline_mode<synchronous>, transform_indices = @transform_3, window_bounds = array<i64: 32, 96>}, {pipeline_mode = #tpu.pipeline_mode<synchronous>, transform_indices = @transform_4, window_bounds = array<i64: 9, 96>}, {transform_indices = @transform_5, window_bounds = array<i64: 1, 256, 96>}]} {
    %c0 = arith.constant 0 : index
    %c0_0 = arith.constant 0 : index
    %0 = vector.load %arg5[%c0, %c0_0] : memref<32x96xf32, #tpu.memory_space<vmem>>, vector<32x96xf32>
    %1 = arith.truncf %0 : vector<32x96xf32> to vector<32x96xbf16>
    %cst = arith.constant 0.000000e+00 : f32
    %2 = vector.broadcast %cst : f32 to vector<10x96xf32>
    %c0_1 = arith.constant 0 : index
    %c0_2 = arith.constant 0 : index
    %c0_3 = arith.constant 0 : index
    %3 = vector.load %arg8[%c0_1, %c0_2, %c0_3] : memref<10x34x96xf32, #tpu.memory_space<vmem>>, vector<10x1x96xf32>
    %4 = vector.shape_cast %3 : vector<10x1x96xf32> to vector<10x96xf32>
    %5 = vector.shape_cast %2 : vector<10x96xf32> to vector<10x1x96xf32>
    tpu.vector_store %arg8[%c0_1, %c0_2, %c0_3], %5 {strides = array<i32>} : memref<10x34x96xf32, #tpu.memory_space<vmem>>, vector<10x1x96xf32>,
    %cst_4 = arith.constant 0.000000e+00 : f32
    %6 = vector.broadcast %cst_4 : f32 to vector<10x96xf32>
    %c0_5 = arith.constant 0 : index
    %c33 = arith.constant 33 : index
    %c0_6 = arith.constant 0 : index
    %7 = vector.load %arg8[%c0_5, %c33, %c0_6] : memref<10x34x96xf32, #tpu.memory_space<vmem>>, vector<10x1x96xf32>
    %8 = vector.shape_cast %7 : vector<10x1x96xf32> to vector<10x96xf32>
    %9 = vector.shape_cast %6 : vector<10x96xf32> to vector<10x1x96xf32>
    tpu.vector_store %arg8[%c0_5, %c33, %c0_6], %9 {strides = array<i32>} : memref<10x34x96xf32, #tpu.memory_space<vmem>>, vector<10x1x96xf32>,
    %c0_7 = arith.constant 0 : index
    %c0_8 = arith.constant 0 : index
    %c0_9 = arith.constant 0 : index
    %10 = vector.load %arg2[%c0_7, %c0_8, %c0_9] : memref<1x256x32xf32, #tpu.memory_space<vmem>>, vector<1x256x32xf32>
    %11 = vector.shape_cast %10 : vector<1x256x32xf32> to vector<256x32xf32>
    %12 = arith.truncf %11 : vector<256x32xf32> to vector<256x32xbf16>
    %cst_10 = arith.constant dense<0.000000e+00> : vector<256x96xf32>
    %13 = tpu.matmul %12, %1, %cst_10 {dimension_numbers = #tpu.dot_dimension_numbers<[1], [0], [0], [1], [0, 0, 1, 1], [], []>} : vector<256x32xbf16>, vector<32x96xbf16>, vector<256x96xf32> -> vector<256x96xf32>
    %14 = vector.extract_strided_slice %13 {offsets = [0, 0], sizes = [32, 96], strides = [1, 1]} : vector<256x96xf32> to vector<32x96xf32>
    %c1 = arith.constant 1 : index
    %c1_11 = arith.constant 1 : index
    %c0_12 = arith.constant 0 : index
    %15 = vector.load %arg8[%c1, %c1_11, %c0_12] : memref<10x34x96xf32, #tpu.memory_space<vmem>>, vector<1x32x96xf32>
    %16 = vector.shape_cast %15 : vector<1x32x96xf32> to vector<32x96xf32>
    %17 = vector.shape_cast %14 : vector<32x96xf32> to vector<1x32x96xf32>
    tpu.vector_store %arg8[%c1, %c1_11, %c0_12], %17 {strides = array<i32>} : memref<10x34x96xf32, #tpu.memory_space<vmem>>, vector<1x32x96xf32>,
    %18 = vector.extract_strided_slice %13 {offsets = [32, 0], sizes = [32, 96], strides = [1, 1]} : vector<256x96xf32> to vector<32x96xf32>
    %c2 = arith.constant 2 : index
    %c1_13 = arith.constant 1 : index
    %c0_14 = arith.constant 0 : index
    %19 = vector.load %arg8[%c2, %c1_13, %c0_14] : memref<10x34x96xf32, #tpu.memory_space<vmem>>, vector<1x32x96xf32>
    %20 = vector.shape_cast %19 : vector<1x32x96xf32> to vector<32x96xf32>
    %21 = vector.shape_cast %18 : vector<32x96xf32> to vector<1x32x96xf32>
    tpu.vector_store %arg8[%c2, %c1_13, %c0_14], %21 {strides = array<i32>} : memref<10x34x96xf32, #tpu.memory_space<vmem>>, vector<1x32x96xf32>,
    %22 = vector.extract_strided_slice %13 {offsets = [64, 0], sizes = [32, 96], strides = [1, 1]} : vector<256x96xf32> to vector<32x96xf32>
    %c3 = arith.constant 3 : index
    %c1_15 = arith.constant 1 : index
    %c0_16 = arith.constant 0 : index
    %23 = vector.load %arg8[%c3, %c1_15, %c0_16] : memref<10x34x96xf32, #tpu.memory_space<vmem>>, vector<1x32x96xf32>
    %24 = vector.shape_cast %23 : vector<1x32x96xf32> to vector<32x96xf32>
    %25 = vector.shape_cast %22 : vector<32x96xf32> to vector<1x32x96xf32>
    tpu.vector_store %arg8[%c3, %c1_15, %c0_16], %25 {strides = array<i32>} : memref<10x34x96xf32, #tpu.memory_space<vmem>>, vector<1x32x96xf32>,
    %26 = vector.extract_strided_slice %13 {offsets = [96, 0], sizes = [32, 96], strides = [1, 1]} : vector<256x96xf32> to vector<32x96xf32>
    %c4 = arith.constant 4 : index
    %c1_17 = arith.constant 1 : index
    %c0_18 = arith.constant 0 : index
    %27 = vector.load %arg8[%c4, %c1_17, %c0_18] : memref<10x34x96xf32, #tpu.memory_space<vmem>>, vector<1x32x96xf32>
    %28 = vector.shape_cast %27 : vector<1x32x96xf32> to vector<32x96xf32>
    %29 = vector.shape_cast %26 : vector<32x96xf32> to vector<1x32x96xf32>
    tpu.vector_store %arg8[%c4, %c1_17, %c0_18], %29 {strides = array<i32>} : memref<10x34x96xf32, #tpu.memory_space<vmem>>, vector<1x32x96xf32>,
    %30 = vector.extract_strided_slice %13 {offsets = [128, 0], sizes = [32, 96], strides = [1, 1]} : vector<256x96xf32> to vector<32x96xf32>
    %c5 = arith.constant 5 : index
    %c1_19 = arith.constant 1 : index
    %c0_20 = arith.constant 0 : index
    %31 = vector.load %arg8[%c5, %c1_19, %c0_20] : memref<10x34x96xf32, #tpu.memory_space<vmem>>, vector<1x32x96xf32>
    %32 = vector.shape_cast %31 : vector<1x32x96xf32> to vector<32x96xf32>
    %33 = vector.shape_cast %30 : vector<32x96xf32> to vector<1x32x96xf32>
    tpu.vector_store %arg8[%c5, %c1_19, %c0_20], %33 {strides = array<i32>} : memref<10x34x96xf32, #tpu.memory_space<vmem>>, vector<1x32x96xf32>,
    %34 = vector.extract_strided_slice %13 {offsets = [160, 0], sizes = [32, 96], strides = [1, 1]} : vector<256x96xf32> to vector<32x96xf32>
    %c6 = arith.constant 6 : index
    %c1_21 = arith.constant 1 : index
    %c0_22 = arith.constant 0 : index
    %35 = vector.load %arg8[%c6, %c1_21, %c0_22] : memref<10x34x96xf32, #tpu.memory_space<vmem>>, vector<1x32x96xf32>
    %36 = vector.shape_cast %35 : vector<1x32x96xf32> to vector<32x96xf32>
    %37 = vector.shape_cast %34 : vector<32x96xf32> to vector<1x32x96xf32>
    tpu.vector_store %arg8[%c6, %c1_21, %c0_22], %37 {strides = array<i32>} : memref<10x34x96xf32, #tpu.memory_space<vmem>>, vector<1x32x96xf32>,
    %38 = vector.extract_strided_slice %13 {offsets = [192, 0], sizes = [32, 96], strides = [1, 1]} : vector<256x96xf32> to vector<32x96xf32>
    %c7 = arith.constant 7 : index
    %c1_23 = arith.constant 1 : index
    %c0_24 = arith.constant 0 : index
    %39 = vector.load %arg8[%c7, %c1_23, %c0_24] : memref<10x34x96xf32, #tpu.memory_space<vmem>>, vector<1x32x96xf32>
    %40 = vector.shape_cast %39 : vector<1x32x96xf32> to vector<32x96xf32>
    %41 = vector.shape_cast %38 : vector<32x96xf32> to vector<1x32x96xf32>
    tpu.vector_store %arg8[%c7, %c1_23, %c0_24], %41 {strides = array<i32>} : memref<10x34x96xf32, #tpu.memory_space<vmem>>, vector<1x32x96xf32>,
    %42 = vector.extract_strided_slice %13 {offsets = [224, 0], sizes = [32, 96], strides = [1, 1]} : vector<256x96xf32> to vector<32x96xf32>
    %c8 = arith.constant 8 : index
    %c1_25 = arith.constant 1 : index
    %c0_26 = arith.constant 0 : index
    %43 = vector.load %arg8[%c8, %c1_25, %c0_26] : memref<10x34x96xf32, #tpu.memory_space<vmem>>, vector<1x32x96xf32>
    %44 = vector.shape_cast %43 : vector<1x32x96xf32> to vector<32x96xf32>
    %45 = vector.shape_cast %42 : vector<32x96xf32> to vector<1x32x96xf32>
    tpu.vector_store %arg8[%c8, %c1_25, %c0_26], %45 {strides = array<i32>} : memref<10x34x96xf32, #tpu.memory_space<vmem>>, vector<1x32x96xf32>,
    %c0_i32 = arith.constant 0 : i32
    %46 = arith.cmpi sgt, %arg1, %c0_i32 : i32
    %c0_27 = arith.constant 0 : index
    %c0_28 = arith.constant 0 : index
    %c0_29 = arith.constant 0 : index
    %47 = vector.load %arg3[%c0_27, %c0_28, %c0_29] : memref<1x32x32xf32, #tpu.memory_space<vmem>>, vector<1x32x32xf32>
    %48 = vector.shape_cast %47 : vector<1x32x32xf32> to vector<32x32xf32>
    %cst_30 = arith.constant 0.000000e+00 : f32
    %49 = vector.broadcast %cst_30 : f32 to vector<32x32xf32>
    %50 = arith.select %46, %48, %49 : vector<32x32xf32>
    %51 = arith.truncf %50 : vector<32x32xf32> to vector<32x32xbf16>
    %c3_i32 = arith.constant 3 : i32
    %52 = arith.cmpi slt, %arg1, %c3_i32 : i32
    %c0_31 = arith.constant 0 : index
    %c0_32 = arith.constant 0 : index
    %c0_33 = arith.constant 0 : index
    %53 = vector.load %arg4[%c0_31, %c0_32, %c0_33] : memref<1x32x32xf32, #tpu.memory_space<vmem>>, vector<1x32x32xf32>
    %54 = vector.shape_cast %53 : vector<1x32x32xf32> to vector<32x32xf32>
    %cst_34 = arith.constant 0.000000e+00 : f32
    %55 = vector.broadcast %cst_34 : f32 to vector<32x32xf32>
    %56 = arith.select %52, %54, %55 : vector<32x32xf32>
    %57 = arith.truncf %56 : vector<32x32xf32> to vector<32x32xbf16>
    %cst_35 = arith.constant dense<0.000000e+00> : vector<32x96xf32>
    %58 = tpu.matmul %51, %1, %cst_35 {dimension_numbers = #tpu.dot_dimension_numbers<[1], [0], [0], [1], [0, 0, 1, 1], [], []>} : vector<32x32xbf16>, vector<32x96xbf16>, vector<32x96xf32> -> vector<32x96xf32>
    %c0_36 = arith.constant 0 : index
    %c1_37 = arith.constant 1 : index
    %c0_38 = arith.constant 0 : index
    %59 = vector.load %arg8[%c0_36, %c1_37, %c0_38] : memref<10x34x96xf32, #tpu.memory_space<vmem>>, vector<1x32x96xf32>
    %60 = vector.shape_cast %59 : vector<1x32x96xf32> to vector<32x96xf32>
    %61 = vector.shape_cast %58 : vector<32x96xf32> to vector<1x32x96xf32>
    tpu.vector_store %arg8[%c0_36, %c1_37, %c0_38], %61 {strides = array<i32>} : memref<10x34x96xf32, #tpu.memory_space<vmem>>, vector<1x32x96xf32>,
    %cst_39 = arith.constant dense<0.000000e+00> : vector<32x96xf32>
    %62 = tpu.matmul %57, %1, %cst_39 {dimension_numbers = #tpu.dot_dimension_numbers<[1], [0], [0], [1], [0, 0, 1, 1], [], []>} : vector<32x32xbf16>, vector<32x96xbf16>, vector<32x96xf32> -> vector<32x96xf32>
    %c9 = arith.constant 9 : index
    %c1_40 = arith.constant 1 : index
    %c0_41 = arith.constant 0 : index
    %63 = vector.load %arg8[%c9, %c1_40, %c0_41] : memref<10x34x96xf32, #tpu.memory_space<vmem>>, vector<1x32x96xf32>
    %64 = vector.shape_cast %63 : vector<1x32x96xf32> to vector<32x96xf32>
    %65 = vector.shape_cast %62 : vector<32x96xf32> to vector<1x32x96xf32>
    tpu.vector_store %arg8[%c9, %c1_40, %c0_41], %65 {strides = array<i32>} : memref<10x34x96xf32, #tpu.memory_space<vmem>>, vector<1x32x96xf32>,
    %cst_42 = arith.constant 0.000000e+00 : f32
    %66 = vector.broadcast %cst_42 : f32 to vector<32x96xf32>
    %c0_43 = arith.constant 0 : index
    %c0_44 = arith.constant 0 : index
    %67 = vector.load %arg6[%c0_43, %c0_44] : memref<9x96xf32, #tpu.memory_space<vmem>>, vector<1x96xf32>
    %68 = vector.shape_cast %67 : vector<1x96xf32> to vector<96xf32>
    %c0_45 = arith.constant 0 : index
    %c0_46 = arith.constant 0 : index
    %c0_47 = arith.constant 0 : index
    %69 = vector.load %arg8[%c0_45, %c0_46, %c0_47] : memref<10x34x96xf32, #tpu.memory_space<vmem>>, vector<1x32x96xf32>
    %70 = vector.shape_cast %69 : vector<1x32x96xf32> to vector<32x96xf32>
    %71 = vector.shape_cast %68 : vector<96xf32> to vector<1x96xf32>
    %72 = vector.broadcast %71 : vector<1x96xf32> to vector<32x96xf32>
    %73 = arith.mulf %70, %72 : vector<32x96xf32>
    %74 = arith.addf %66, %73 : vector<32x96xf32>
    %c1_48 = arith.constant 1 : index
    %c0_49 = arith.constant 0 : index
    %75 = vector.load %arg6[%c1_48, %c0_49] : memref<9x96xf32, #tpu.memory_space<vmem>>, vector<1x96xf32>
    %76 = vector.shape_cast %75 : vector<1x96xf32> to vector<96xf32>
    %c0_50 = arith.constant 0 : index
    %c1_51 = arith.constant 1 : index
    %c0_52 = arith.constant 0 : index
    %77 = vector.load %arg8[%c0_50, %c1_51, %c0_52] : memref<10x34x96xf32, #tpu.memory_space<vmem>>, vector<1x32x96xf32>
    %78 = vector.shape_cast %77 : vector<1x32x96xf32> to vector<32x96xf32>
    %79 = vector.shape_cast %76 : vector<96xf32> to vector<1x96xf32>
    %80 = vector.broadcast %79 : vector<1x96xf32> to vector<32x96xf32>
    %81 = arith.mulf %78, %80 : vector<32x96xf32>
    %82 = arith.addf %74, %81 : vector<32x96xf32>
    %c2_53 = arith.constant 2 : index
    %c0_54 = arith.constant 0 : index
    %83 = vector.load %arg6[%c2_53, %c0_54] : memref<9x96xf32, #tpu.memory_space<vmem>>, vector<1x96xf32>
    %84 = vector.shape_cast %83 : vector<1x96xf32> to vector<96xf32>
    %c0_55 = arith.constant 0 : index
    %c2_56 = arith.constant 2 : index
    %c0_57 = arith.constant 0 : index
    %85 = vector.load %arg8[%c0_55, %c2_56, %c0_57] : memref<10x34x96xf32, #tpu.memory_space<vmem>>, vector<1x32x96xf32>
    %86 = vector.shape_cast %85 : vector<1x32x96xf32> to vector<32x96xf32>
    %87 = vector.shape_cast %84 : vector<96xf32> to vector<1x96xf32>
    %88 = vector.broadcast %87 : vector<1x96xf32> to vector<32x96xf32>
    %89 = arith.mulf %86, %88 : vector<32x96xf32>
    %90 = arith.addf %82, %89 : vector<32x96xf32>
    %c3_58 = arith.constant 3 : index
    %c0_59 = arith.constant 0 : index
    %91 = vector.load %arg6[%c3_58, %c0_59] : memref<9x96xf32, #tpu.memory_space<vmem>>, vector<1x96xf32>
    %92 = vector.shape_cast %91 : vector<1x96xf32> to vector<96xf32>
    %c1_60 = arith.constant 1 : index
    %c0_61 = arith.constant 0 : index
    %c0_62 = arith.constant 0 : index
    %93 = vector.load %arg8[%c1_60, %c0_61, %c0_62] : memref<10x34x96xf32, #tpu.memory_space<vmem>>, vector<1x32x96xf32>
    %94 = vector.shape_cast %93 : vector<1x32x96xf32> to vector<32x96xf32>
    %95 = vector.shape_cast %92 : vector<96xf32> to vector<1x96xf32>
    %96 = vector.broadcast %95 : vector<1x96xf32> to vector<32x96xf32>
    %97 = arith.mulf %94, %96 : vector<32x96xf32>
    %98 = arith.addf %90, %97 : vector<32x96xf32>
    %c4_63 = arith.constant 4 : index
    %c0_64 = arith.constant 0 : index
    %99 = vector.load %arg6[%c4_63, %c0_64] : memref<9x96xf32, #tpu.memory_space<vmem>>, vector<1x96xf32>
    %100 = vector.shape_cast %99 : vector<1x96xf32> to vector<96xf32>
    %c1_65 = arith.constant 1 : index
    %c1_66 = arith.constant 1 : index
    %c0_67 = arith.constant 0 : index
    %101 = vector.load %arg8[%c1_65, %c1_66, %c0_67] : memref<10x34x96xf32, #tpu.memory_space<vmem>>, vector<1x32x96xf32>
    %102 = vector.shape_cast %101 : vector<1x32x96xf32> to vector<32x96xf32>
    %103 = vector.shape_cast %100 : vector<96xf32> to vector<1x96xf32>
    %104 = vector.broadcast %103 : vector<1x96xf32> to vector<32x96xf32>
    %105 = arith.mulf %102, %104 : vector<32x96xf32>
    %106 = arith.addf %98, %105 : vector<32x96xf32>
    %c5_68 = arith.constant 5 : index
    %c0_69 = arith.constant 0 : index
    %107 = vector.load %arg6[%c5_68, %c0_69] : memref<9x96xf32, #tpu.memory_space<vmem>>, vector<1x96xf32>
    %108 = vector.shape_cast %107 : vector<1x96xf32> to vector<96xf32>
    %c1_70 = arith.constant 1 : index
    %c2_71 = arith.constant 2 : index
    %c0_72 = arith.constant 0 : index
    %109 = vector.load %arg8[%c1_70, %c2_71, %c0_72] : memref<10x34x96xf32, #tpu.memory_space<vmem>>, vector<1x32x96xf32>
    %110 = vector.shape_cast %109 : vector<1x32x96xf32> to vector<32x96xf32>
    %111 = vector.shape_cast %108 : vector<96xf32> to vector<1x96xf32>
    %112 = vector.broadcast %111 : vector<1x96xf32> to vector<32x96xf32>
    %113 = arith.mulf %110, %112 : vector<32x96xf32>
    %114 = arith.addf %106, %113 : vector<32x96xf32>
    %c6_73 = arith.constant 6 : index
    %c0_74 = arith.constant 0 : index
    %115 = vector.load %arg6[%c6_73, %c0_74] : memref<9x96xf32, #tpu.memory_space<vmem>>, vector<1x96xf32>
    %116 = vector.shape_cast %115 : vector<1x96xf32> to vector<96xf32>
    %c2_75 = arith.constant 2 : index
    %c0_76 = arith.constant 0 : index
    %c0_77 = arith.constant 0 : index
    %117 = vector.load %arg8[%c2_75, %c0_76, %c0_77] : memref<10x34x96xf32, #tpu.memory_space<vmem>>, vector<1x32x96xf32>
    %118 = vector.shape_cast %117 : vector<1x32x96xf32> to vector<32x96xf32>
    %119 = vector.shape_cast %116 : vector<96xf32> to vector<1x96xf32>
    %120 = vector.broadcast %119 : vector<1x96xf32> to vector<32x96xf32>
    %121 = arith.mulf %118, %120 : vector<32x96xf32>
    %122 = arith.addf %114, %121 : vector<32x96xf32>
    %c7_78 = arith.constant 7 : index
    %c0_79 = arith.constant 0 : index
    %123 = vector.load %arg6[%c7_78, %c0_79] : memref<9x96xf32, #tpu.memory_space<vmem>>, vector<1x96xf32>
    %124 = vector.shape_cast %123 : vector<1x96xf32> to vector<96xf32>
    %c2_80 = arith.constant 2 : index
    %c1_81 = arith.constant 1 : index
    %c0_82 = arith.constant 0 : index
    %125 = vector.load %arg8[%c2_80, %c1_81, %c0_82] : memref<10x34x96xf32, #tpu.memory_space<vmem>>, vector<1x32x96xf32>
    %126 = vector.shape_cast %125 : vector<1x32x96xf32> to vector<32x96xf32>
    %127 = vector.shape_cast %124 : vector<96xf32> to vector<1x96xf32>
    %128 = vector.broadcast %127 : vector<1x96xf32> to vector<32x96xf32>
    %129 = arith.mulf %126, %128 : vector<32x96xf32>
    %130 = arith.addf %122, %129 : vector<32x96xf32>
    %c8_83 = arith.constant 8 : index
    %c0_84 = arith.constant 0 : index
    %131 = vector.load %arg6[%c8_83, %c0_84] : memref<9x96xf32, #tpu.memory_space<vmem>>, vector<1x96xf32>
    %132 = vector.shape_cast %131 : vector<1x96xf32> to vector<96xf32>
    %c2_85 = arith.constant 2 : index
    %c2_86 = arith.constant 2 : index
    %c0_87 = arith.constant 0 : index
    %133 = vector.load %arg8[%c2_85, %c2_86, %c0_87] : memref<10x34x96xf32, #tpu.memory_space<vmem>>, vector<1x32x96xf32>
    %134 = vector.shape_cast %133 : vector<1x32x96xf32> to vector<32x96xf32>
    %135 = vector.shape_cast %132 : vector<96xf32> to vector<1x96xf32>
    %136 = vector.broadcast %135 : vector<1x96xf32> to vector<32x96xf32>
    %137 = arith.mulf %134, %136 : vector<32x96xf32>
    %138 = arith.addf %130, %137 : vector<32x96xf32>
    %c0_88 = arith.constant 0 : index
    %c0_89 = arith.constant 0 : index
    %c0_90 = arith.constant 0 : index
    %139 = vector.load %arg7[%c0_88, %c0_89, %c0_90] : memref<1x256x96xf32, #tpu.memory_space<vmem>>, vector<1x32x96xf32>
    %140 = vector.shape_cast %139 : vector<1x32x96xf32> to vector<32x96xf32>
    %141 = vector.shape_cast %138 : vector<32x96xf32> to vector<1x32x96xf32>
    tpu.vector_store %arg7[%c0_88, %c0_89, %c0_90], %141 {strides = array<i32>} : memref<1x256x96xf32, #tpu.memory_space<vmem>>, vector<1x32x96xf32>,
    %cst_91 = arith.constant 0.000000e+00 : f32
    %142 = vector.broadcast %cst_91 : f32 to vector<32x96xf32>
    %c0_92 = arith.constant 0 : index
    %c0_93 = arith.constant 0 : index
    %143 = vector.load %arg6[%c0_92, %c0_93] : memref<9x96xf32, #tpu.memory_space<vmem>>, vector<1x96xf32>
    %144 = vector.shape_cast %143 : vector<1x96xf32> to vector<96xf32>
    %c1_94 = arith.constant 1 : index
    %c0_95 = arith.constant 0 : index
    %c0_96 = arith.constant 0 : index
    %145 = vector.load %arg8[%c1_94, %c0_95, %c0_96] : memref<10x34x96xf32, #tpu.memory_space<vmem>>, vector<1x32x96xf32>
    %146 = vector.shape_cast %145 : vector<1x32x96xf32> to vector<32x96xf32>
    %147 = vector.shape_cast %144 : vector<96xf32> to vector<1x96xf32>
    %148 = vector.broadcast %147 : vector<1x96xf32> to vector<32x96xf32>
    %149 = arith.mulf %146, %148 : vector<32x96xf32>
    %150 = arith.addf %142, %149 : vector<32x96xf32>
    %c1_97 = arith.constant 1 : index
    %c0_98 = arith.constant 0 : index
    %151 = vector.load %arg6[%c1_97, %c0_98] : memref<9x96xf32, #tpu.memory_space<vmem>>, vector<1x96xf32>
    %152 = vector.shape_cast %151 : vector<1x96xf32> to vector<96xf32>
    %c1_99 = arith.constant 1 : index
    %c1_100 = arith.constant 1 : index
    %c0_101 = arith.constant 0 : index
    %153 = vector.load %arg8[%c1_99, %c1_100, %c0_101] : memref<10x34x96xf32, #tpu.memory_space<vmem>>, vector<1x32x96xf32>
    %154 = vector.shape_cast %153 : vector<1x32x96xf32> to vector<32x96xf32>
    %155 = vector.shape_cast %152 : vector<96xf32> to vector<1x96xf32>
    %156 = vector.broadcast %155 : vector<1x96xf32> to vector<32x96xf32>
    %157 = arith.mulf %154, %156 : vector<32x96xf32>
    %158 = arith.addf %150, %157 : vector<32x96xf32>
    %c2_102 = arith.constant 2 : index
    %c0_103 = arith.constant 0 : index
    %159 = vector.load %arg6[%c2_102, %c0_103] : memref<9x96xf32, #tpu.memory_space<vmem>>, vector<1x96xf32>
    %160 = vector.shape_cast %159 : vector<1x96xf32> to vector<96xf32>
    %c1_104 = arith.constant 1 : index
    %c2_105 = arith.constant 2 : index
    %c0_106 = arith.constant 0 : index
    %161 = vector.load %arg8[%c1_104, %c2_105, %c0_106] : memref<10x34x96xf32, #tpu.memory_space<vmem>>, vector<1x32x96xf32>
    %162 = vector.shape_cast %161 : vector<1x32x96xf32> to vector<32x96xf32>
    %163 = vector.shape_cast %160 : vector<96xf32> to vector<1x96xf32>
    %164 = vector.broadcast %163 : vector<1x96xf32> to vector<32x96xf32>
    %165 = arith.mulf %162, %164 : vector<32x96xf32>
    %166 = arith.addf %158, %165 : vector<32x96xf32>
    %c3_107 = arith.constant 3 : index
    %c0_108 = arith.constant 0 : index
    %167 = vector.load %arg6[%c3_107, %c0_108] : memref<9x96xf32, #tpu.memory_space<vmem>>, vector<1x96xf32>
    %168 = vector.shape_cast %167 : vector<1x96xf32> to vector<96xf32>
    %c2_109 = arith.constant 2 : index
    %c0_110 = arith.constant 0 : index
    %c0_111 = arith.constant 0 : index
    %169 = vector.load %arg8[%c2_109, %c0_110, %c0_111] : memref<10x34x96xf32, #tpu.memory_space<vmem>>, vector<1x32x96xf32>
    %170 = vector.shape_cast %169 : vector<1x32x96xf32> to vector<32x96xf32>
    %171 = vector.shape_cast %168 : vector<96xf32> to vector<1x96xf32>
    %172 = vector.broadcast %171 : vector<1x96xf32> to vector<32x96xf32>
    %173 = arith.mulf %170, %172 : vector<32x96xf32>
    %174 = arith.addf %166, %173 : vector<32x96xf32>
    %c4_112 = arith.constant 4 : index
    %c0_113 = arith.constant 0 : index
    %175 = vector.load %arg6[%c4_112, %c0_113] : memref<9x96xf32, #tpu.memory_space<vmem>>, vector<1x96xf32>
    %176 = vector.shape_cast %175 : vector<1x96xf32> to vector<96xf32>
    %c2_114 = arith.constant 2 : index
    %c1_115 = arith.constant 1 : index
    %c0_116 = arith.constant 0 : index
    %177 = vector.load %arg8[%c2_114, %c1_115, %c0_116] : memref<10x34x96xf32, #tpu.memory_space<vmem>>, vector<1x32x96xf32>
    %178 = vector.shape_cast %177 : vector<1x32x96xf32> to vector<32x96xf32>
    %179 = vector.shape_cast %176 : vector<96xf32> to vector<1x96xf32>
    %180 = vector.broadcast %179 : vector<1x96xf32> to vector<32x96xf32>
    %181 = arith.mulf %178, %180 : vector<32x96xf32>
    %182 = arith.addf %174, %181 : vector<32x96xf32>
    %c5_117 = arith.constant 5 : index
    %c0_118 = arith.constant 0 : index
    %183 = vector.load %arg6[%c5_117, %c0_118] : memref<9x96xf32, #tpu.memory_space<vmem>>, vector<1x96xf32>
    %184 = vector.shape_cast %183 : vector<1x96xf32> to vector<96xf32>
    %c2_119 = arith.constant 2 : index
    %c2_120 = arith.constant 2 : index
    %c0_121 = arith.constant 0 : index
    %185 = vector.load %arg8[%c2_119, %c2_120, %c0_121] : memref<10x34x96xf32, #tpu.memory_space<vmem>>, vector<1x32x96xf32>
    %186 = vector.shape_cast %185 : vector<1x32x96xf32> to vector<32x96xf32>
    %187 = vector.shape_cast %184 : vector<96xf32> to vector<1x96xf32>
    %188 = vector.broadcast %187 : vector<1x96xf32> to vector<32x96xf32>
    %189 = arith.mulf %186, %188 : vector<32x96xf32>
    %190 = arith.addf %182, %189 : vector<32x96xf32>
    %c6_122 = arith.constant 6 : index
    %c0_123 = arith.constant 0 : index
    %191 = vector.load %arg6[%c6_122, %c0_123] : memref<9x96xf32, #tpu.memory_space<vmem>>, vector<1x96xf32>
    %192 = vector.shape_cast %191 : vector<1x96xf32> to vector<96xf32>
    %c3_124 = arith.constant 3 : index
    %c0_125 = arith.constant 0 : index
    %c0_126 = arith.constant 0 : index
    %193 = vector.load %arg8[%c3_124, %c0_125, %c0_126] : memref<10x34x96xf32, #tpu.memory_space<vmem>>, vector<1x32x96xf32>
    %194 = vector.shape_cast %193 : vector<1x32x96xf32> to vector<32x96xf32>
    %195 = vector.shape_cast %192 : vector<96xf32> to vector<1x96xf32>
    %196 = vector.broadcast %195 : vector<1x96xf32> to vector<32x96xf32>
    %197 = arith.mulf %194, %196 : vector<32x96xf32>
    %198 = arith.addf %190, %197 : vector<32x96xf32>
    %c7_127 = arith.constant 7 : index
    %c0_128 = arith.constant 0 : index
    %199 = vector.load %arg6[%c7_127, %c0_128] : memref<9x96xf32, #tpu.memory_space<vmem>>, vector<1x96xf32>
    %200 = vector.shape_cast %199 : vector<1x96xf32> to vector<96xf32>
    %c3_129 = arith.constant 3 : index
    %c1_130 = arith.constant 1 : index
    %c0_131 = arith.constant 0 : index
    %201 = vector.load %arg8[%c3_129, %c1_130, %c0_131] : memref<10x34x96xf32, #tpu.memory_space<vmem>>, vector<1x32x96xf32>
    %202 = vector.shape_cast %201 : vector<1x32x96xf32> to vector<32x96xf32>
    %203 = vector.shape_cast %200 : vector<96xf32> to vector<1x96xf32>
    %204 = vector.broadcast %203 : vector<1x96xf32> to vector<32x96xf32>
    %205 = arith.mulf %202, %204 : vector<32x96xf32>
    %206 = arith.addf %198, %205 : vector<32x96xf32>
    %c8_132 = arith.constant 8 : index
    %c0_133 = arith.constant 0 : index
    %207 = vector.load %arg6[%c8_132, %c0_133] : memref<9x96xf32, #tpu.memory_space<vmem>>, vector<1x96xf32>
    %208 = vector.shape_cast %207 : vector<1x96xf32> to vector<96xf32>
    %c3_134 = arith.constant 3 : index
    %c2_135 = arith.constant 2 : index
    %c0_136 = arith.constant 0 : index
    %209 = vector.load %arg8[%c3_134, %c2_135, %c0_136] : memref<10x34x96xf32, #tpu.memory_space<vmem>>, vector<1x32x96xf32>
    %210 = vector.shape_cast %209 : vector<1x32x96xf32> to vector<32x96xf32>
    %211 = vector.shape_cast %208 : vector<96xf32> to vector<1x96xf32>
    %212 = vector.broadcast %211 : vector<1x96xf32> to vector<32x96xf32>
    %213 = arith.mulf %210, %212 : vector<32x96xf32>
    %214 = arith.addf %206, %213 : vector<32x96xf32>
    %c0_137 = arith.constant 0 : index
    %c32 = arith.constant 32 : index
    %c0_138 = arith.constant 0 : index
    %215 = vector.load %arg7[%c0_137, %c32, %c0_138] : memref<1x256x96xf32, #tpu.memory_space<vmem>>, vector<1x32x96xf32>
    %216 = vector.shape_cast %215 : vector<1x32x96xf32> to vector<32x96xf32>
    %217 = vector.shape_cast %214 : vector<32x96xf32> to vector<1x32x96xf32>
    tpu.vector_store %arg7[%c0_137, %c32, %c0_138], %217 {strides = array<i32>} : memref<1x256x96xf32, #tpu.memory_space<vmem>>, vector<1x32x96xf32>,
    %cst_139 = arith.constant 0.000000e+00 : f32
    %218 = vector.broadcast %cst_139 : f32 to vector<32x96xf32>
    %c0_140 = arith.constant 0 : index
    %c0_141 = arith.constant 0 : index
    %219 = vector.load %arg6[%c0_140, %c0_141] : memref<9x96xf32, #tpu.memory_space<vmem>>, vector<1x96xf32>
    %220 = vector.shape_cast %219 : vector<1x96xf32> to vector<96xf32>
    %c2_142 = arith.constant 2 : index
    %c0_143 = arith.constant 0 : index
    %c0_144 = arith.constant 0 : index
    %221 = vector.load %arg8[%c2_142, %c0_143, %c0_144] : memref<10x34x96xf32, #tpu.memory_space<vmem>>, vector<1x32x96xf32>
    %222 = vector.shape_cast %221 : vector<1x32x96xf32> to vector<32x96xf32>
    %223 = vector.shape_cast %220 : vector<96xf32> to vector<1x96xf32>
    %224 = vector.broadcast %223 : vector<1x96xf32> to vector<32x96xf32>
    %225 = arith.mulf %222, %224 : vector<32x96xf32>
    %226 = arith.addf %218, %225 : vector<32x96xf32>
    %c1_145 = arith.constant 1 : index
    %c0_146 = arith.constant 0 : index
    %227 = vector.load %arg6[%c1_145, %c0_146] : memref<9x96xf32, #tpu.memory_space<vmem>>, vector<1x96xf32>
    %228 = vector.shape_cast %227 : vector<1x96xf32> to vector<96xf32>
    %c2_147 = arith.constant 2 : index
    %c1_148 = arith.constant 1 : index
    %c0_149 = arith.constant 0 : index
    %229 = vector.load %arg8[%c2_147, %c1_148, %c0_149] : memref<10x34x96xf32, #tpu.memory_space<vmem>>, vector<1x32x96xf32>
    %230 = vector.shape_cast %229 : vector<1x32x96xf32> to vector<32x96xf32>
    %231 = vector.shape_cast %228 : vector<96xf32> to vector<1x96xf32>
    %232 = vector.broadcast %231 : vector<1x96xf32> to vector<32x96xf32>
    %233 = arith.mulf %230, %232 : vector<32x96xf32>
    %234 = arith.addf %226, %233 : vector<32x96xf32>
    %c2_150 = arith.constant 2 : index
    %c0_151 = arith.constant 0 : index
    %235 = vector.load %arg6[%c2_150, %c0_151] : memref<9x96xf32, #tpu.memory_space<vmem>>, vector<1x96xf32>
    %236 = vector.shape_cast %235 : vector<1x96xf32> to vector<96xf32>
    %c2_152 = arith.constant 2 : index
    %c2_153 = arith.constant 2 : index
    %c0_154 = arith.constant 0 : index
    %237 = vector.load %arg8[%c2_152, %c2_153, %c0_154] : memref<10x34x96xf32, #tpu.memory_space<vmem>>, vector<1x32x96xf32>
    %238 = vector.shape_cast %237 : vector<1x32x96xf32> to vector<32x96xf32>
    %239 = vector.shape_cast %236 : vector<96xf32> to vector<1x96xf32>
    %240 = vector.broadcast %239 : vector<1x96xf32> to vector<32x96xf32>
    %241 = arith.mulf %238, %240 : vector<32x96xf32>
    %242 = arith.addf %234, %241 : vector<32x96xf32>
    %c3_155 = arith.constant 3 : index
    %c0_156 = arith.constant 0 : index
    %243 = vector.load %arg6[%c3_155, %c0_156] : memref<9x96xf32, #tpu.memory_space<vmem>>, vector<1x96xf32>
    %244 = vector.shape_cast %243 : vector<1x96xf32> to vector<96xf32>
    %c3_157 = arith.constant 3 : index
    %c0_158 = arith.constant 0 : index
    %c0_159 = arith.constant 0 : index
    %245 = vector.load %arg8[%c3_157, %c0_158, %c0_159] : memref<10x34x96xf32, #tpu.memory_space<vmem>>, vector<1x32x96xf32>
    %246 = vector.shape_cast %245 : vector<1x32x96xf32> to vector<32x96xf32>
    %247 = vector.shape_cast %244 : vector<96xf32> to vector<1x96xf32>
    %248 = vector.broadcast %247 : vector<1x96xf32> to vector<32x96xf32>
    %249 = arith.mulf %246, %248 : vector<32x96xf32>
    %250 = arith.addf %242, %249 : vector<32x96xf32>
    %c4_160 = arith.constant 4 : index
    %c0_161 = arith.constant 0 : index
    %251 = vector.load %arg6[%c4_160, %c0_161] : memref<9x96xf32, #tpu.memory_space<vmem>>, vector<1x96xf32>
    %252 = vector.shape_cast %251 : vector<1x96xf32> to vector<96xf32>
    %c3_162 = arith.constant 3 : index
    %c1_163 = arith.constant 1 : index
    %c0_164 = arith.constant 0 : index
    %253 = vector.load %arg8[%c3_162, %c1_163, %c0_164] : memref<10x34x96xf32, #tpu.memory_space<vmem>>, vector<1x32x96xf32>
    %254 = vector.shape_cast %253 : vector<1x32x96xf32> to vector<32x96xf32>
    %255 = vector.shape_cast %252 : vector<96xf32> to vector<1x96xf32>
    %256 = vector.broadcast %255 : vector<1x96xf32> to vector<32x96xf32>
    %257 = arith.mulf %254, %256 : vector<32x96xf32>
    %258 = arith.addf %250, %257 : vector<32x96xf32>
    %c5_165 = arith.constant 5 : index
    %c0_166 = arith.constant 0 : index
    %259 = vector.load %arg6[%c5_165, %c0_166] : memref<9x96xf32, #tpu.memory_space<vmem>>, vector<1x96xf32>
    %260 = vector.shape_cast %259 : vector<1x96xf32> to vector<96xf32>
    %c3_167 = arith.constant 3 : index
    %c2_168 = arith.constant 2 : index
    %c0_169 = arith.constant 0 : index
    %261 = vector.load %arg8[%c3_167, %c2_168, %c0_169] : memref<10x34x96xf32, #tpu.memory_space<vmem>>, vector<1x32x96xf32>
    %262 = vector.shape_cast %261 : vector<1x32x96xf32> to vector<32x96xf32>
    %263 = vector.shape_cast %260 : vector<96xf32> to vector<1x96xf32>
    %264 = vector.broadcast %263 : vector<1x96xf32> to vector<32x96xf32>
    %265 = arith.mulf %262, %264 : vector<32x96xf32>
    %266 = arith.addf %258, %265 : vector<32x96xf32>
    %c6_170 = arith.constant 6 : index
    %c0_171 = arith.constant 0 : index
    %267 = vector.load %arg6[%c6_170, %c0_171] : memref<9x96xf32, #tpu.memory_space<vmem>>, vector<1x96xf32>
    %268 = vector.shape_cast %267 : vector<1x96xf32> to vector<96xf32>
    %c4_172 = arith.constant 4 : index
    %c0_173 = arith.constant 0 : index
    %c0_174 = arith.constant 0 : index
    %269 = vector.load %arg8[%c4_172, %c0_173, %c0_174] : memref<10x34x96xf32, #tpu.memory_space<vmem>>, vector<1x32x96xf32>
    %270 = vector.shape_cast %269 : vector<1x32x96xf32> to vector<32x96xf32>
    %271 = vector.shape_cast %268 : vector<96xf32> to vector<1x96xf32>
    %272 = vector.broadcast %271 : vector<1x96xf32> to vector<32x96xf32>
    %273 = arith.mulf %270, %272 : vector<32x96xf32>
    %274 = arith.addf %266, %273 : vector<32x96xf32>
    %c7_175 = arith.constant 7 : index
    %c0_176 = arith.constant 0 : index
    %275 = vector.load %arg6[%c7_175, %c0_176] : memref<9x96xf32, #tpu.memory_space<vmem>>, vector<1x96xf32>
    %276 = vector.shape_cast %275 : vector<1x96xf32> to vector<96xf32>
    %c4_177 = arith.constant 4 : index
    %c1_178 = arith.constant 1 : index
    %c0_179 = arith.constant 0 : index
    %277 = vector.load %arg8[%c4_177, %c1_178, %c0_179] : memref<10x34x96xf32, #tpu.memory_space<vmem>>, vector<1x32x96xf32>
    %278 = vector.shape_cast %277 : vector<1x32x96xf32> to vector<32x96xf32>
    %279 = vector.shape_cast %276 : vector<96xf32> to vector<1x96xf32>
    %280 = vector.broadcast %279 : vector<1x96xf32> to vector<32x96xf32>
    %281 = arith.mulf %278, %280 : vector<32x96xf32>
    %282 = arith.addf %274, %281 : vector<32x96xf32>
    %c8_180 = arith.constant 8 : index
    %c0_181 = arith.constant 0 : index
    %283 = vector.load %arg6[%c8_180, %c0_181] : memref<9x96xf32, #tpu.memory_space<vmem>>, vector<1x96xf32>
    %284 = vector.shape_cast %283 : vector<1x96xf32> to vector<96xf32>
    %c4_182 = arith.constant 4 : index
    %c2_183 = arith.constant 2 : index
    %c0_184 = arith.constant 0 : index
    %285 = vector.load %arg8[%c4_182, %c2_183, %c0_184] : memref<10x34x96xf32, #tpu.memory_space<vmem>>, vector<1x32x96xf32>
    %286 = vector.shape_cast %285 : vector<1x32x96xf32> to vector<32x96xf32>
    %287 = vector.shape_cast %284 : vector<96xf32> to vector<1x96xf32>
    %288 = vector.broadcast %287 : vector<1x96xf32> to vector<32x96xf32>
    %289 = arith.mulf %286, %288 : vector<32x96xf32>
    %290 = arith.addf %282, %289 : vector<32x96xf32>
    %c0_185 = arith.constant 0 : index
    %c64 = arith.constant 64 : index
    %c0_186 = arith.constant 0 : index
    %291 = vector.load %arg7[%c0_185, %c64, %c0_186] : memref<1x256x96xf32, #tpu.memory_space<vmem>>, vector<1x32x96xf32>
    %292 = vector.shape_cast %291 : vector<1x32x96xf32> to vector<32x96xf32>
    %293 = vector.shape_cast %290 : vector<32x96xf32> to vector<1x32x96xf32>
    tpu.vector_store %arg7[%c0_185, %c64, %c0_186], %293 {strides = array<i32>} : memref<1x256x96xf32, #tpu.memory_space<vmem>>, vector<1x32x96xf32>,
    %cst_187 = arith.constant 0.000000e+00 : f32
    %294 = vector.broadcast %cst_187 : f32 to vector<32x96xf32>
    %c0_188 = arith.constant 0 : index
    %c0_189 = arith.constant 0 : index
    %295 = vector.load %arg6[%c0_188, %c0_189] : memref<9x96xf32, #tpu.memory_space<vmem>>, vector<1x96xf32>
    %296 = vector.shape_cast %295 : vector<1x96xf32> to vector<96xf32>
    %c3_190 = arith.constant 3 : index
    %c0_191 = arith.constant 0 : index
    %c0_192 = arith.constant 0 : index
    %297 = vector.load %arg8[%c3_190, %c0_191, %c0_192] : memref<10x34x96xf32, #tpu.memory_space<vmem>>, vector<1x32x96xf32>
    %298 = vector.shape_cast %297 : vector<1x32x96xf32> to vector<32x96xf32>
    %299 = vector.shape_cast %296 : vector<96xf32> to vector<1x96xf32>
    %300 = vector.broadcast %299 : vector<1x96xf32> to vector<32x96xf32>
    %301 = arith.mulf %298, %300 : vector<32x96xf32>
    %302 = arith.addf %294, %301 : vector<32x96xf32>
    %c1_193 = arith.constant 1 : index
    %c0_194 = arith.constant 0 : index
    %303 = vector.load %arg6[%c1_193, %c0_194] : memref<9x96xf32, #tpu.memory_space<vmem>>, vector<1x96xf32>
    %304 = vector.shape_cast %303 : vector<1x96xf32> to vector<96xf32>
    %c3_195 = arith.constant 3 : index
    %c1_196 = arith.constant 1 : index
    %c0_197 = arith.constant 0 : index
    %305 = vector.load %arg8[%c3_195, %c1_196, %c0_197] : memref<10x34x96xf32, #tpu.memory_space<vmem>>, vector<1x32x96xf32>
    %306 = vector.shape_cast %305 : vector<1x32x96xf32> to vector<32x96xf32>
    %307 = vector.shape_cast %304 : vector<96xf32> to vector<1x96xf32>
    %308 = vector.broadcast %307 : vector<1x96xf32> to vector<32x96xf32>
    %309 = arith.mulf %306, %308 : vector<32x96xf32>
    %310 = arith.addf %302, %309 : vector<32x96xf32>
    %c2_198 = arith.constant 2 : index
    %c0_199 = arith.constant 0 : index
    %311 = vector.load %arg6[%c2_198, %c0_199] : memref<9x96xf32, #tpu.memory_space<vmem>>, vector<1x96xf32>
    %312 = vector.shape_cast %311 : vector<1x96xf32> to vector<96xf32>
    %c3_200 = arith.constant 3 : index
    %c2_201 = arith.constant 2 : index
    %c0_202 = arith.constant 0 : index
    %313 = vector.load %arg8[%c3_200, %c2_201, %c0_202] : memref<10x34x96xf32, #tpu.memory_space<vmem>>, vector<1x32x96xf32>
    %314 = vector.shape_cast %313 : vector<1x32x96xf32> to vector<32x96xf32>
    %315 = vector.shape_cast %312 : vector<96xf32> to vector<1x96xf32>
    %316 = vector.broadcast %315 : vector<1x96xf32> to vector<32x96xf32>
    %317 = arith.mulf %314, %316 : vector<32x96xf32>
    %318 = arith.addf %310, %317 : vector<32x96xf32>
    %c3_203 = arith.constant 3 : index
    %c0_204 = arith.constant 0 : index
    %319 = vector.load %arg6[%c3_203, %c0_204] : memref<9x96xf32, #tpu.memory_space<vmem>>, vector<1x96xf32>
    %320 = vector.shape_cast %319 : vector<1x96xf32> to vector<96xf32>
    %c4_205 = arith.constant 4 : index
    %c0_206 = arith.constant 0 : index
    %c0_207 = arith.constant 0 : index
    %321 = vector.load %arg8[%c4_205, %c0_206, %c0_207] : memref<10x34x96xf32, #tpu.memory_space<vmem>>, vector<1x32x96xf32>
    %322 = vector.shape_cast %321 : vector<1x32x96xf32> to vector<32x96xf32>
    %323 = vector.shape_cast %320 : vector<96xf32> to vector<1x96xf32>
    %324 = vector.broadcast %323 : vector<1x96xf32> to vector<32x96xf32>
    %325 = arith.mulf %322, %324 : vector<32x96xf32>
    %326 = arith.addf %318, %325 : vector<32x96xf32>
    %c4_208 = arith.constant 4 : index
    %c0_209 = arith.constant 0 : index
    %327 = vector.load %arg6[%c4_208, %c0_209] : memref<9x96xf32, #tpu.memory_space<vmem>>, vector<1x96xf32>
    %328 = vector.shape_cast %327 : vector<1x96xf32> to vector<96xf32>
    %c4_210 = arith.constant 4 : index
    %c1_211 = arith.constant 1 : index
    %c0_212 = arith.constant 0 : index
    %329 = vector.load %arg8[%c4_210, %c1_211, %c0_212] : memref<10x34x96xf32, #tpu.memory_space<vmem>>, vector<1x32x96xf32>
    %330 = vector.shape_cast %329 : vector<1x32x96xf32> to vector<32x96xf32>
    %331 = vector.shape_cast %328 : vector<96xf32> to vector<1x96xf32>
    %332 = vector.broadcast %331 : vector<1x96xf32> to vector<32x96xf32>
    %333 = arith.mulf %330, %332 : vector<32x96xf32>
    %334 = arith.addf %326, %333 : vector<32x96xf32>
    %c5_213 = arith.constant 5 : index
    %c0_214 = arith.constant 0 : index
    %335 = vector.load %arg6[%c5_213, %c0_214] : memref<9x96xf32, #tpu.memory_space<vmem>>, vector<1x96xf32>
    %336 = vector.shape_cast %335 : vector<1x96xf32> to vector<96xf32>
    %c4_215 = arith.constant 4 : index
    %c2_216 = arith.constant 2 : index
    %c0_217 = arith.constant 0 : index
    %337 = vector.load %arg8[%c4_215, %c2_216, %c0_217] : memref<10x34x96xf32, #tpu.memory_space<vmem>>, vector<1x32x96xf32>
    %338 = vector.shape_cast %337 : vector<1x32x96xf32> to vector<32x96xf32>
    %339 = vector.shape_cast %336 : vector<96xf32> to vector<1x96xf32>
    %340 = vector.broadcast %339 : vector<1x96xf32> to vector<32x96xf32>
    %341 = arith.mulf %338, %340 : vector<32x96xf32>
    %342 = arith.addf %334, %341 : vector<32x96xf32>
    %c6_218 = arith.constant 6 : index
    %c0_219 = arith.constant 0 : index
    %343 = vector.load %arg6[%c6_218, %c0_219] : memref<9x96xf32, #tpu.memory_space<vmem>>, vector<1x96xf32>
    %344 = vector.shape_cast %343 : vector<1x96xf32> to vector<96xf32>
    %c5_220 = arith.constant 5 : index
    %c0_221 = arith.constant 0 : index
    %c0_222 = arith.constant 0 : index
    %345 = vector.load %arg8[%c5_220, %c0_221, %c0_222] : memref<10x34x96xf32, #tpu.memory_space<vmem>>, vector<1x32x96xf32>
    %346 = vector.shape_cast %345 : vector<1x32x96xf32> to vector<32x96xf32>
    %347 = vector.shape_cast %344 : vector<96xf32> to vector<1x96xf32>
    %348 = vector.broadcast %347 : vector<1x96xf32> to vector<32x96xf32>
    %349 = arith.mulf %346, %348 : vector<32x96xf32>
    %350 = arith.addf %342, %349 : vector<32x96xf32>
    %c7_223 = arith.constant 7 : index
    %c0_224 = arith.constant 0 : index
    %351 = vector.load %arg6[%c7_223, %c0_224] : memref<9x96xf32, #tpu.memory_space<vmem>>, vector<1x96xf32>
    %352 = vector.shape_cast %351 : vector<1x96xf32> to vector<96xf32>
    %c5_225 = arith.constant 5 : index
    %c1_226 = arith.constant 1 : index
    %c0_227 = arith.constant 0 : index
    %353 = vector.load %arg8[%c5_225, %c1_226, %c0_227] : memref<10x34x96xf32, #tpu.memory_space<vmem>>, vector<1x32x96xf32>
    %354 = vector.shape_cast %353 : vector<1x32x96xf32> to vector<32x96xf32>
    %355 = vector.shape_cast %352 : vector<96xf32> to vector<1x96xf32>
    %356 = vector.broadcast %355 : vector<1x96xf32> to vector<32x96xf32>
    %357 = arith.mulf %354, %356 : vector<32x96xf32>
    %358 = arith.addf %350, %357 : vector<32x96xf32>
    %c8_228 = arith.constant 8 : index
    %c0_229 = arith.constant 0 : index
    %359 = vector.load %arg6[%c8_228, %c0_229] : memref<9x96xf32, #tpu.memory_space<vmem>>, vector<1x96xf32>
    %360 = vector.shape_cast %359 : vector<1x96xf32> to vector<96xf32>
    %c5_230 = arith.constant 5 : index
    %c2_231 = arith.constant 2 : index
    %c0_232 = arith.constant 0 : index
    %361 = vector.load %arg8[%c5_230, %c2_231, %c0_232] : memref<10x34x96xf32, #tpu.memory_space<vmem>>, vector<1x32x96xf32>
    %362 = vector.shape_cast %361 : vector<1x32x96xf32> to vector<32x96xf32>
    %363 = vector.shape_cast %360 : vector<96xf32> to vector<1x96xf32>
    %364 = vector.broadcast %363 : vector<1x96xf32> to vector<32x96xf32>
    %365 = arith.mulf %362, %364 : vector<32x96xf32>
    %366 = arith.addf %358, %365 : vector<32x96xf32>
    %c0_233 = arith.constant 0 : index
    %c96 = arith.constant 96 : index
    %c0_234 = arith.constant 0 : index
    %367 = vector.load %arg7[%c0_233, %c96, %c0_234] : memref<1x256x96xf32, #tpu.memory_space<vmem>>, vector<1x32x96xf32>
    %368 = vector.shape_cast %367 : vector<1x32x96xf32> to vector<32x96xf32>
    %369 = vector.shape_cast %366 : vector<32x96xf32> to vector<1x32x96xf32>
    tpu.vector_store %arg7[%c0_233, %c96, %c0_234], %369 {strides = array<i32>} : memref<1x256x96xf32, #tpu.memory_space<vmem>>, vector<1x32x96xf32>,
    %cst_235 = arith.constant 0.000000e+00 : f32
    %370 = vector.broadcast %cst_235 : f32 to vector<32x96xf32>
    %c0_236 = arith.constant 0 : index
    %c0_237 = arith.constant 0 : index
    %371 = vector.load %arg6[%c0_236, %c0_237] : memref<9x96xf32, #tpu.memory_space<vmem>>, vector<1x96xf32>
    %372 = vector.shape_cast %371 : vector<1x96xf32> to vector<96xf32>
    %c4_238 = arith.constant 4 : index
    %c0_239 = arith.constant 0 : index
    %c0_240 = arith.constant 0 : index
    %373 = vector.load %arg8[%c4_238, %c0_239, %c0_240] : memref<10x34x96xf32, #tpu.memory_space<vmem>>, vector<1x32x96xf32>
    %374 = vector.shape_cast %373 : vector<1x32x96xf32> to vector<32x96xf32>
    %375 = vector.shape_cast %372 : vector<96xf32> to vector<1x96xf32>
    %376 = vector.broadcast %375 : vector<1x96xf32> to vector<32x96xf32>
    %377 = arith.mulf %374, %376 : vector<32x96xf32>
    %378 = arith.addf %370, %377 : vector<32x96xf32>
    %c1_241 = arith.constant 1 : index
    %c0_242 = arith.constant 0 : index
    %379 = vector.load %arg6[%c1_241, %c0_242] : memref<9x96xf32, #tpu.memory_space<vmem>>, vector<1x96xf32>
    %380 = vector.shape_cast %379 : vector<1x96xf32> to vector<96xf32>
    %c4_243 = arith.constant 4 : index
    %c1_244 = arith.constant 1 : index
    %c0_245 = arith.constant 0 : index
    %381 = vector.load %arg8[%c4_243, %c1_244, %c0_245] : memref<10x34x96xf32, #tpu.memory_space<vmem>>, vector<1x32x96xf32>
    %382 = vector.shape_cast %381 : vector<1x32x96xf32> to vector<32x96xf32>
    %383 = vector.shape_cast %380 : vector<96xf32> to vector<1x96xf32>
    %384 = vector.broadcast %383 : vector<1x96xf32> to vector<32x96xf32>
    %385 = arith.mulf %382, %384 : vector<32x96xf32>
    %386 = arith.addf %378, %385 : vector<32x96xf32>
    %c2_246 = arith.constant 2 : index
    %c0_247 = arith.constant 0 : index
    %387 = vector.load %arg6[%c2_246, %c0_247] : memref<9x96xf32, #tpu.memory_space<vmem>>, vector<1x96xf32>
    %388 = vector.shape_cast %387 : vector<1x96xf32> to vector<96xf32>
    %c4_248 = arith.constant 4 : index
    %c2_249 = arith.constant 2 : index
    %c0_250 = arith.constant 0 : index
    %389 = vector.load %arg8[%c4_248, %c2_249, %c0_250] : memref<10x34x96xf32, #tpu.memory_space<vmem>>, vector<1x32x96xf32>
    %390 = vector.shape_cast %389 : vector<1x32x96xf32> to vector<32x96xf32>
    %391 = vector.shape_cast %388 : vector<96xf32> to vector<1x96xf32>
    %392 = vector.broadcast %391 : vector<1x96xf32> to vector<32x96xf32>
    %393 = arith.mulf %390, %392 : vector<32x96xf32>
    %394 = arith.addf %386, %393 : vector<32x96xf32>
    %c3_251 = arith.constant 3 : index
    %c0_252 = arith.constant 0 : index
    %395 = vector.load %arg6[%c3_251, %c0_252] : memref<9x96xf32, #tpu.memory_space<vmem>>, vector<1x96xf32>
    %396 = vector.shape_cast %395 : vector<1x96xf32> to vector<96xf32>
    %c5_253 = arith.constant 5 : index
    %c0_254 = arith.constant 0 : index
    %c0_255 = arith.constant 0 : index
    %397 = vector.load %arg8[%c5_253, %c0_254, %c0_255] : memref<10x34x96xf32, #tpu.memory_space<vmem>>, vector<1x32x96xf32>
    %398 = vector.shape_cast %397 : vector<1x32x96xf32> to vector<32x96xf32>
    %399 = vector.shape_cast %396 : vector<96xf32> to vector<1x96xf32>
    %400 = vector.broadcast %399 : vector<1x96xf32> to vector<32x96xf32>
    %401 = arith.mulf %398, %400 : vector<32x96xf32>
    %402 = arith.addf %394, %401 : vector<32x96xf32>
    %c4_256 = arith.constant 4 : index
    %c0_257 = arith.constant 0 : index
    %403 = vector.load %arg6[%c4_256, %c0_257] : memref<9x96xf32, #tpu.memory_space<vmem>>, vector<1x96xf32>
    %404 = vector.shape_cast %403 : vector<1x96xf32> to vector<96xf32>
    %c5_258 = arith.constant 5 : index
    %c1_259 = arith.constant 1 : index
    %c0_260 = arith.constant 0 : index
    %405 = vector.load %arg8[%c5_258, %c1_259, %c0_260] : memref<10x34x96xf32, #tpu.memory_space<vmem>>, vector<1x32x96xf32>
    %406 = vector.shape_cast %405 : vector<1x32x96xf32> to vector<32x96xf32>
    %407 = vector.shape_cast %404 : vector<96xf32> to vector<1x96xf32>
    %408 = vector.broadcast %407 : vector<1x96xf32> to vector<32x96xf32>
    %409 = arith.mulf %406, %408 : vector<32x96xf32>
    %410 = arith.addf %402, %409 : vector<32x96xf32>
    %c5_261 = arith.constant 5 : index
    %c0_262 = arith.constant 0 : index
    %411 = vector.load %arg6[%c5_261, %c0_262] : memref<9x96xf32, #tpu.memory_space<vmem>>, vector<1x96xf32>
    %412 = vector.shape_cast %411 : vector<1x96xf32> to vector<96xf32>
    %c5_263 = arith.constant 5 : index
    %c2_264 = arith.constant 2 : index
    %c0_265 = arith.constant 0 : index
    %413 = vector.load %arg8[%c5_263, %c2_264, %c0_265] : memref<10x34x96xf32, #tpu.memory_space<vmem>>, vector<1x32x96xf32>
    %414 = vector.shape_cast %413 : vector<1x32x96xf32> to vector<32x96xf32>
    %415 = vector.shape_cast %412 : vector<96xf32> to vector<1x96xf32>
    %416 = vector.broadcast %415 : vector<1x96xf32> to vector<32x96xf32>
    %417 = arith.mulf %414, %416 : vector<32x96xf32>
    %418 = arith.addf %410, %417 : vector<32x96xf32>
    %c6_266 = arith.constant 6 : index
    %c0_267 = arith.constant 0 : index
    %419 = vector.load %arg6[%c6_266, %c0_267] : memref<9x96xf32, #tpu.memory_space<vmem>>, vector<1x96xf32>
    %420 = vector.shape_cast %419 : vector<1x96xf32> to vector<96xf32>
    %c6_268 = arith.constant 6 : index
    %c0_269 = arith.constant 0 : index
    %c0_270 = arith.constant 0 : index
    %421 = vector.load %arg8[%c6_268, %c0_269, %c0_270] : memref<10x34x96xf32, #tpu.memory_space<vmem>>, vector<1x32x96xf32>
    %422 = vector.shape_cast %421 : vector<1x32x96xf32> to vector<32x96xf32>
    %423 = vector.shape_cast %420 : vector<96xf32> to vector<1x96xf32>
    %424 = vector.broadcast %423 : vector<1x96xf32> to vector<32x96xf32>
    %425 = arith.mulf %422, %424 : vector<32x96xf32>
    %426 = arith.addf %418, %425 : vector<32x96xf32>
    %c7_271 = arith.constant 7 : index
    %c0_272 = arith.constant 0 : index
    %427 = vector.load %arg6[%c7_271, %c0_272] : memref<9x96xf32, #tpu.memory_space<vmem>>, vector<1x96xf32>
    %428 = vector.shape_cast %427 : vector<1x96xf32> to vector<96xf32>
    %c6_273 = arith.constant 6 : index
    %c1_274 = arith.constant 1 : index
    %c0_275 = arith.constant 0 : index
    %429 = vector.load %arg8[%c6_273, %c1_274, %c0_275] : memref<10x34x96xf32, #tpu.memory_space<vmem>>, vector<1x32x96xf32>
    %430 = vector.shape_cast %429 : vector<1x32x96xf32> to vector<32x96xf32>
    %431 = vector.shape_cast %428 : vector<96xf32> to vector<1x96xf32>
    %432 = vector.broadcast %431 : vector<1x96xf32> to vector<32x96xf32>
    %433 = arith.mulf %430, %432 : vector<32x96xf32>
    %434 = arith.addf %426, %433 : vector<32x96xf32>
    %c8_276 = arith.constant 8 : index
    %c0_277 = arith.constant 0 : index
    %435 = vector.load %arg6[%c8_276, %c0_277] : memref<9x96xf32, #tpu.memory_space<vmem>>, vector<1x96xf32>
    %436 = vector.shape_cast %435 : vector<1x96xf32> to vector<96xf32>
    %c6_278 = arith.constant 6 : index
    %c2_279 = arith.constant 2 : index
    %c0_280 = arith.constant 0 : index
    %437 = vector.load %arg8[%c6_278, %c2_279, %c0_280] : memref<10x34x96xf32, #tpu.memory_space<vmem>>, vector<1x32x96xf32>
    %438 = vector.shape_cast %437 : vector<1x32x96xf32> to vector<32x96xf32>
    %439 = vector.shape_cast %436 : vector<96xf32> to vector<1x96xf32>
    %440 = vector.broadcast %439 : vector<1x96xf32> to vector<32x96xf32>
    %441 = arith.mulf %438, %440 : vector<32x96xf32>
    %442 = arith.addf %434, %441 : vector<32x96xf32>
    %c0_281 = arith.constant 0 : index
    %c128 = arith.constant 128 : index
    %c0_282 = arith.constant 0 : index
    %443 = vector.load %arg7[%c0_281, %c128, %c0_282] : memref<1x256x96xf32, #tpu.memory_space<vmem>>, vector<1x32x96xf32>
    %444 = vector.shape_cast %443 : vector<1x32x96xf32> to vector<32x96xf32>
    %445 = vector.shape_cast %442 : vector<32x96xf32> to vector<1x32x96xf32>
    tpu.vector_store %arg7[%c0_281, %c128, %c0_282], %445 {strides = array<i32>} : memref<1x256x96xf32, #tpu.memory_space<vmem>>, vector<1x32x96xf32>,
    %cst_283 = arith.constant 0.000000e+00 : f32
    %446 = vector.broadcast %cst_283 : f32 to vector<32x96xf32>
    %c0_284 = arith.constant 0 : index
    %c0_285 = arith.constant 0 : index
    %447 = vector.load %arg6[%c0_284, %c0_285] : memref<9x96xf32, #tpu.memory_space<vmem>>, vector<1x96xf32>
    %448 = vector.shape_cast %447 : vector<1x96xf32> to vector<96xf32>
    %c5_286 = arith.constant 5 : index
    %c0_287 = arith.constant 0 : index
    %c0_288 = arith.constant 0 : index
    %449 = vector.load %arg8[%c5_286, %c0_287, %c0_288] : memref<10x34x96xf32, #tpu.memory_space<vmem>>, vector<1x32x96xf32>
    %450 = vector.shape_cast %449 : vector<1x32x96xf32> to vector<32x96xf32>
    %451 = vector.shape_cast %448 : vector<96xf32> to vector<1x96xf32>
    %452 = vector.broadcast %451 : vector<1x96xf32> to vector<32x96xf32>
    %453 = arith.mulf %450, %452 : vector<32x96xf32>
    %454 = arith.addf %446, %453 : vector<32x96xf32>
    %c1_289 = arith.constant 1 : index
    %c0_290 = arith.constant 0 : index
    %455 = vector.load %arg6[%c1_289, %c0_290] : memref<9x96xf32, #tpu.memory_space<vmem>>, vector<1x96xf32>
    %456 = vector.shape_cast %455 : vector<1x96xf32> to vector<96xf32>
    %c5_291 = arith.constant 5 : index
    %c1_292 = arith.constant 1 : index
    %c0_293 = arith.constant 0 : index
    %457 = vector.load %arg8[%c5_291, %c1_292, %c0_293] : memref<10x34x96xf32, #tpu.memory_space<vmem>>, vector<1x32x96xf32>
    %458 = vector.shape_cast %457 : vector<1x32x96xf32> to vector<32x96xf32>
    %459 = vector.shape_cast %456 : vector<96xf32> to vector<1x96xf32>
    %460 = vector.broadcast %459 : vector<1x96xf32> to vector<32x96xf32>
    %461 = arith.mulf %458, %460 : vector<32x96xf32>
    %462 = arith.addf %454, %461 : vector<32x96xf32>
    %c2_294 = arith.constant 2 : index
    %c0_295 = arith.constant 0 : index
    %463 = vector.load %arg6[%c2_294, %c0_295] : memref<9x96xf32, #tpu.memory_space<vmem>>, vector<1x96xf32>
    %464 = vector.shape_cast %463 : vector<1x96xf32> to vector<96xf32>
    %c5_296 = arith.constant 5 : index
    %c2_297 = arith.constant 2 : index
    %c0_298 = arith.constant 0 : index
    %465 = vector.load %arg8[%c5_296, %c2_297, %c0_298] : memref<10x34x96xf32, #tpu.memory_space<vmem>>, vector<1x32x96xf32>
    %466 = vector.shape_cast %465 : vector<1x32x96xf32> to vector<32x96xf32>
    %467 = vector.shape_cast %464 : vector<96xf32> to vector<1x96xf32>
    %468 = vector.broadcast %467 : vector<1x96xf32> to vector<32x96xf32>
    %469 = arith.mulf %466, %468 : vector<32x96xf32>
    %470 = arith.addf %462, %469 : vector<32x96xf32>
    %c3_299 = arith.constant 3 : index
    %c0_300 = arith.constant 0 : index
    %471 = vector.load %arg6[%c3_299, %c0_300] : memref<9x96xf32, #tpu.memory_space<vmem>>, vector<1x96xf32>
    %472 = vector.shape_cast %471 : vector<1x96xf32> to vector<96xf32>
    %c6_301 = arith.constant 6 : index
    %c0_302 = arith.constant 0 : index
    %c0_303 = arith.constant 0 : index
    %473 = vector.load %arg8[%c6_301, %c0_302, %c0_303] : memref<10x34x96xf32, #tpu.memory_space<vmem>>, vector<1x32x96xf32>
    %474 = vector.shape_cast %473 : vector<1x32x96xf32> to vector<32x96xf32>
    %475 = vector.shape_cast %472 : vector<96xf32> to vector<1x96xf32>
    %476 = vector.broadcast %475 : vector<1x96xf32> to vector<32x96xf32>
    %477 = arith.mulf %474, %476 : vector<32x96xf32>
    %478 = arith.addf %470, %477 : vector<32x96xf32>
    %c4_304 = arith.constant 4 : index
    %c0_305 = arith.constant 0 : index
    %479 = vector.load %arg6[%c4_304, %c0_305] : memref<9x96xf32, #tpu.memory_space<vmem>>, vector<1x96xf32>
    %480 = vector.shape_cast %479 : vector<1x96xf32> to vector<96xf32>
    %c6_306 = arith.constant 6 : index
    %c1_307 = arith.constant 1 : index
    %c0_308 = arith.constant 0 : index
    %481 = vector.load %arg8[%c6_306, %c1_307, %c0_308] : memref<10x34x96xf32, #tpu.memory_space<vmem>>, vector<1x32x96xf32>
    %482 = vector.shape_cast %481 : vector<1x32x96xf32> to vector<32x96xf32>
    %483 = vector.shape_cast %480 : vector<96xf32> to vector<1x96xf32>
    %484 = vector.broadcast %483 : vector<1x96xf32> to vector<32x96xf32>
    %485 = arith.mulf %482, %484 : vector<32x96xf32>
    %486 = arith.addf %478, %485 : vector<32x96xf32>
    %c5_309 = arith.constant 5 : index
    %c0_310 = arith.constant 0 : index
    %487 = vector.load %arg6[%c5_309, %c0_310] : memref<9x96xf32, #tpu.memory_space<vmem>>, vector<1x96xf32>
    %488 = vector.shape_cast %487 : vector<1x96xf32> to vector<96xf32>
    %c6_311 = arith.constant 6 : index
    %c2_312 = arith.constant 2 : index
    %c0_313 = arith.constant 0 : index
    %489 = vector.load %arg8[%c6_311, %c2_312, %c0_313] : memref<10x34x96xf32, #tpu.memory_space<vmem>>, vector<1x32x96xf32>
    %490 = vector.shape_cast %489 : vector<1x32x96xf32> to vector<32x96xf32>
    %491 = vector.shape_cast %488 : vector<96xf32> to vector<1x96xf32>
    %492 = vector.broadcast %491 : vector<1x96xf32> to vector<32x96xf32>
    %493 = arith.mulf %490, %492 : vector<32x96xf32>
    %494 = arith.addf %486, %493 : vector<32x96xf32>
    %c6_314 = arith.constant 6 : index
    %c0_315 = arith.constant 0 : index
    %495 = vector.load %arg6[%c6_314, %c0_315] : memref<9x96xf32, #tpu.memory_space<vmem>>, vector<1x96xf32>
    %496 = vector.shape_cast %495 : vector<1x96xf32> to vector<96xf32>
    %c7_316 = arith.constant 7 : index
    %c0_317 = arith.constant 0 : index
    %c0_318 = arith.constant 0 : index
    %497 = vector.load %arg8[%c7_316, %c0_317, %c0_318] : memref<10x34x96xf32, #tpu.memory_space<vmem>>, vector<1x32x96xf32>
    %498 = vector.shape_cast %497 : vector<1x32x96xf32> to vector<32x96xf32>
    %499 = vector.shape_cast %496 : vector<96xf32> to vector<1x96xf32>
    %500 = vector.broadcast %499 : vector<1x96xf32> to vector<32x96xf32>
    %501 = arith.mulf %498, %500 : vector<32x96xf32>
    %502 = arith.addf %494, %501 : vector<32x96xf32>
    %c7_319 = arith.constant 7 : index
    %c0_320 = arith.constant 0 : index
    %503 = vector.load %arg6[%c7_319, %c0_320] : memref<9x96xf32, #tpu.memory_space<vmem>>, vector<1x96xf32>
    %504 = vector.shape_cast %503 : vector<1x96xf32> to vector<96xf32>
    %c7_321 = arith.constant 7 : index
    %c1_322 = arith.constant 1 : index
    %c0_323 = arith.constant 0 : index
    %505 = vector.load %arg8[%c7_321, %c1_322, %c0_323] : memref<10x34x96xf32, #tpu.memory_space<vmem>>, vector<1x32x96xf32>
    %506 = vector.shape_cast %505 : vector<1x32x96xf32> to vector<32x96xf32>
    %507 = vector.shape_cast %504 : vector<96xf32> to vector<1x96xf32>
    %508 = vector.broadcast %507 : vector<1x96xf32> to vector<32x96xf32>
    %509 = arith.mulf %506, %508 : vector<32x96xf32>
    %510 = arith.addf %502, %509 : vector<32x96xf32>
    %c8_324 = arith.constant 8 : index
    %c0_325 = arith.constant 0 : index
    %511 = vector.load %arg6[%c8_324, %c0_325] : memref<9x96xf32, #tpu.memory_space<vmem>>, vector<1x96xf32>
    %512 = vector.shape_cast %511 : vector<1x96xf32> to vector<96xf32>
    %c7_326 = arith.constant 7 : index
    %c2_327 = arith.constant 2 : index
    %c0_328 = arith.constant 0 : index
    %513 = vector.load %arg8[%c7_326, %c2_327, %c0_328] : memref<10x34x96xf32, #tpu.memory_space<vmem>>, vector<1x32x96xf32>
    %514 = vector.shape_cast %513 : vector<1x32x96xf32> to vector<32x96xf32>
    %515 = vector.shape_cast %512 : vector<96xf32> to vector<1x96xf32>
    %516 = vector.broadcast %515 : vector<1x96xf32> to vector<32x96xf32>
    %517 = arith.mulf %514, %516 : vector<32x96xf32>
    %518 = arith.addf %510, %517 : vector<32x96xf32>
    %c0_329 = arith.constant 0 : index
    %c160 = arith.constant 160 : index
    %c0_330 = arith.constant 0 : index
    %519 = vector.load %arg7[%c0_329, %c160, %c0_330] : memref<1x256x96xf32, #tpu.memory_space<vmem>>, vector<1x32x96xf32>
    %520 = vector.shape_cast %519 : vector<1x32x96xf32> to vector<32x96xf32>
    %521 = vector.shape_cast %518 : vector<32x96xf32> to vector<1x32x96xf32>
    tpu.vector_store %arg7[%c0_329, %c160, %c0_330], %521 {strides = array<i32>} : memref<1x256x96xf32, #tpu.memory_space<vmem>>, vector<1x32x96xf32>,
    %cst_331 = arith.constant 0.000000e+00 : f32
    %522 = vector.broadcast %cst_331 : f32 to vector<32x96xf32>
    %c0_332 = arith.constant 0 : index
    %c0_333 = arith.constant 0 : index
    %523 = vector.load %arg6[%c0_332, %c0_333] : memref<9x96xf32, #tpu.memory_space<vmem>>, vector<1x96xf32>
    %524 = vector.shape_cast %523 : vector<1x96xf32> to vector<96xf32>
    %c6_334 = arith.constant 6 : index
    %c0_335 = arith.constant 0 : index
    %c0_336 = arith.constant 0 : index
    %525 = vector.load %arg8[%c6_334, %c0_335, %c0_336] : memref<10x34x96xf32, #tpu.memory_space<vmem>>, vector<1x32x96xf32>
    %526 = vector.shape_cast %525 : vector<1x32x96xf32> to vector<32x96xf32>
    %527 = vector.shape_cast %524 : vector<96xf32> to vector<1x96xf32>
    %528 = vector.broadcast %527 : vector<1x96xf32> to vector<32x96xf32>
    %529 = arith.mulf %526, %528 : vector<32x96xf32>
    %530 = arith.addf %522, %529 : vector<32x96xf32>
    %c1_337 = arith.constant 1 : index
    %c0_338 = arith.constant 0 : index
    %531 = vector.load %arg6[%c1_337, %c0_338] : memref<9x96xf32, #tpu.memory_space<vmem>>, vector<1x96xf32>
    %532 = vector.shape_cast %531 : vector<1x96xf32> to vector<96xf32>
    %c6_339 = arith.constant 6 : index
    %c1_340 = arith.constant 1 : index
    %c0_341 = arith.constant 0 : index
    %533 = vector.load %arg8[%c6_339, %c1_340, %c0_341] : memref<10x34x96xf32, #tpu.memory_space<vmem>>, vector<1x32x96xf32>
    %534 = vector.shape_cast %533 : vector<1x32x96xf32> to vector<32x96xf32>
    %535 = vector.shape_cast %532 : vector<96xf32> to vector<1x96xf32>
    %536 = vector.broadcast %535 : vector<1x96xf32> to vector<32x96xf32>
    %537 = arith.mulf %534, %536 : vector<32x96xf32>
    %538 = arith.addf %530, %537 : vector<32x96xf32>
    %c2_342 = arith.constant 2 : index
    %c0_343 = arith.constant 0 : index
    %539 = vector.load %arg6[%c2_342, %c0_343] : memref<9x96xf32, #tpu.memory_space<vmem>>, vector<1x96xf32>
    %540 = vector.shape_cast %539 : vector<1x96xf32> to vector<96xf32>
    %c6_344 = arith.constant 6 : index
    %c2_345 = arith.constant 2 : index
    %c0_346 = arith.constant 0 : index
    %541 = vector.load %arg8[%c6_344, %c2_345, %c0_346] : memref<10x34x96xf32, #tpu.memory_space<vmem>>, vector<1x32x96xf32>
    %542 = vector.shape_cast %541 : vector<1x32x96xf32> to vector<32x96xf32>
    %543 = vector.shape_cast %540 : vector<96xf32> to vector<1x96xf32>
    %544 = vector.broadcast %543 : vector<1x96xf32> to vector<32x96xf32>
    %545 = arith.mulf %542, %544 : vector<32x96xf32>
    %546 = arith.addf %538, %545 : vector<32x96xf32>
    %c3_347 = arith.constant 3 : index
    %c0_348 = arith.constant 0 : index
    %547 = vector.load %arg6[%c3_347, %c0_348] : memref<9x96xf32, #tpu.memory_space<vmem>>, vector<1x96xf32>
    %548 = vector.shape_cast %547 : vector<1x96xf32> to vector<96xf32>
    %c7_349 = arith.constant 7 : index
    %c0_350 = arith.constant 0 : index
    %c0_351 = arith.constant 0 : index
    %549 = vector.load %arg8[%c7_349, %c0_350, %c0_351] : memref<10x34x96xf32, #tpu.memory_space<vmem>>, vector<1x32x96xf32>
    %550 = vector.shape_cast %549 : vector<1x32x96xf32> to vector<32x96xf32>
    %551 = vector.shape_cast %548 : vector<96xf32> to vector<1x96xf32>
    %552 = vector.broadcast %551 : vector<1x96xf32> to vector<32x96xf32>
    %553 = arith.mulf %550, %552 : vector<32x96xf32>
    %554 = arith.addf %546, %553 : vector<32x96xf32>
    %c4_352 = arith.constant 4 : index
    %c0_353 = arith.constant 0 : index
    %555 = vector.load %arg6[%c4_352, %c0_353] : memref<9x96xf32, #tpu.memory_space<vmem>>, vector<1x96xf32>
    %556 = vector.shape_cast %555 : vector<1x96xf32> to vector<96xf32>
    %c7_354 = arith.constant 7 : index
    %c1_355 = arith.constant 1 : index
    %c0_356 = arith.constant 0 : index
    %557 = vector.load %arg8[%c7_354, %c1_355, %c0_356] : memref<10x34x96xf32, #tpu.memory_space<vmem>>, vector<1x32x96xf32>
    %558 = vector.shape_cast %557 : vector<1x32x96xf32> to vector<32x96xf32>
    %559 = vector.shape_cast %556 : vector<96xf32> to vector<1x96xf32>
    %560 = vector.broadcast %559 : vector<1x96xf32> to vector<32x96xf32>
    %561 = arith.mulf %558, %560 : vector<32x96xf32>
    %562 = arith.addf %554, %561 : vector<32x96xf32>
    %c5_357 = arith.constant 5 : index
    %c0_358 = arith.constant 0 : index
    %563 = vector.load %arg6[%c5_357, %c0_358] : memref<9x96xf32, #tpu.memory_space<vmem>>, vector<1x96xf32>
    %564 = vector.shape_cast %563 : vector<1x96xf32> to vector<96xf32>
    %c7_359 = arith.constant 7 : index
    %c2_360 = arith.constant 2 : index
    %c0_361 = arith.constant 0 : index
    %565 = vector.load %arg8[%c7_359, %c2_360, %c0_361] : memref<10x34x96xf32, #tpu.memory_space<vmem>>, vector<1x32x96xf32>
    %566 = vector.shape_cast %565 : vector<1x32x96xf32> to vector<32x96xf32>
    %567 = vector.shape_cast %564 : vector<96xf32> to vector<1x96xf32>
    %568 = vector.broadcast %567 : vector<1x96xf32> to vector<32x96xf32>
    %569 = arith.mulf %566, %568 : vector<32x96xf32>
    %570 = arith.addf %562, %569 : vector<32x96xf32>
    %c6_362 = arith.constant 6 : index
    %c0_363 = arith.constant 0 : index
    %571 = vector.load %arg6[%c6_362, %c0_363] : memref<9x96xf32, #tpu.memory_space<vmem>>, vector<1x96xf32>
    %572 = vector.shape_cast %571 : vector<1x96xf32> to vector<96xf32>
    %c8_364 = arith.constant 8 : index
    %c0_365 = arith.constant 0 : index
    %c0_366 = arith.constant 0 : index
    %573 = vector.load %arg8[%c8_364, %c0_365, %c0_366] : memref<10x34x96xf32, #tpu.memory_space<vmem>>, vector<1x32x96xf32>
    %574 = vector.shape_cast %573 : vector<1x32x96xf32> to vector<32x96xf32>
    %575 = vector.shape_cast %572 : vector<96xf32> to vector<1x96xf32>
    %576 = vector.broadcast %575 : vector<1x96xf32> to vector<32x96xf32>
    %577 = arith.mulf %574, %576 : vector<32x96xf32>
    %578 = arith.addf %570, %577 : vector<32x96xf32>
    %c7_367 = arith.constant 7 : index
    %c0_368 = arith.constant 0 : index
    %579 = vector.load %arg6[%c7_367, %c0_368] : memref<9x96xf32, #tpu.memory_space<vmem>>, vector<1x96xf32>
    %580 = vector.shape_cast %579 : vector<1x96xf32> to vector<96xf32>
    %c8_369 = arith.constant 8 : index
    %c1_370 = arith.constant 1 : index
    %c0_371 = arith.constant 0 : index
    %581 = vector.load %arg8[%c8_369, %c1_370, %c0_371] : memref<10x34x96xf32, #tpu.memory_space<vmem>>, vector<1x32x96xf32>
    %582 = vector.shape_cast %581 : vector<1x32x96xf32> to vector<32x96xf32>
    %583 = vector.shape_cast %580 : vector<96xf32> to vector<1x96xf32>
    %584 = vector.broadcast %583 : vector<1x96xf32> to vector<32x96xf32>
    %585 = arith.mulf %582, %584 : vector<32x96xf32>
    %586 = arith.addf %578, %585 : vector<32x96xf32>
    %c8_372 = arith.constant 8 : index
    %c0_373 = arith.constant 0 : index
    %587 = vector.load %arg6[%c8_372, %c0_373] : memref<9x96xf32, #tpu.memory_space<vmem>>, vector<1x96xf32>
    %588 = vector.shape_cast %587 : vector<1x96xf32> to vector<96xf32>
    %c8_374 = arith.constant 8 : index
    %c2_375 = arith.constant 2 : index
    %c0_376 = arith.constant 0 : index
    %589 = vector.load %arg8[%c8_374, %c2_375, %c0_376] : memref<10x34x96xf32, #tpu.memory_space<vmem>>, vector<1x32x96xf32>
    %590 = vector.shape_cast %589 : vector<1x32x96xf32> to vector<32x96xf32>
    %591 = vector.shape_cast %588 : vector<96xf32> to vector<1x96xf32>
    %592 = vector.broadcast %591 : vector<1x96xf32> to vector<32x96xf32>
    %593 = arith.mulf %590, %592 : vector<32x96xf32>
    %594 = arith.addf %586, %593 : vector<32x96xf32>
    %c0_377 = arith.constant 0 : index
    %c192 = arith.constant 192 : index
    %c0_378 = arith.constant 0 : index
    %595 = vector.load %arg7[%c0_377, %c192, %c0_378] : memref<1x256x96xf32, #tpu.memory_space<vmem>>, vector<1x32x96xf32>
    %596 = vector.shape_cast %595 : vector<1x32x96xf32> to vector<32x96xf32>
    %597 = vector.shape_cast %594 : vector<32x96xf32> to vector<1x32x96xf32>
    tpu.vector_store %arg7[%c0_377, %c192, %c0_378], %597 {strides = array<i32>} : memref<1x256x96xf32, #tpu.memory_space<vmem>>, vector<1x32x96xf32>,
    %cst_379 = arith.constant 0.000000e+00 : f32
    %598 = vector.broadcast %cst_379 : f32 to vector<32x96xf32>
    %c0_380 = arith.constant 0 : index
    %c0_381 = arith.constant 0 : index
    %599 = vector.load %arg6[%c0_380, %c0_381] : memref<9x96xf32, #tpu.memory_space<vmem>>, vector<1x96xf32>
    %600 = vector.shape_cast %599 : vector<1x96xf32> to vector<96xf32>
    %c7_382 = arith.constant 7 : index
    %c0_383 = arith.constant 0 : index
    %c0_384 = arith.constant 0 : index
    %601 = vector.load %arg8[%c7_382, %c0_383, %c0_384] : memref<10x34x96xf32, #tpu.memory_space<vmem>>, vector<1x32x96xf32>
    %602 = vector.shape_cast %601 : vector<1x32x96xf32> to vector<32x96xf32>
    %603 = vector.shape_cast %600 : vector<96xf32> to vector<1x96xf32>
    %604 = vector.broadcast %603 : vector<1x96xf32> to vector<32x96xf32>
    %605 = arith.mulf %602, %604 : vector<32x96xf32>
    %606 = arith.addf %598, %605 : vector<32x96xf32>
    %c1_385 = arith.constant 1 : index
    %c0_386 = arith.constant 0 : index
    %607 = vector.load %arg6[%c1_385, %c0_386] : memref<9x96xf32, #tpu.memory_space<vmem>>, vector<1x96xf32>
    %608 = vector.shape_cast %607 : vector<1x96xf32> to vector<96xf32>
    %c7_387 = arith.constant 7 : index
    %c1_388 = arith.constant 1 : index
    %c0_389 = arith.constant 0 : index
    %609 = vector.load %arg8[%c7_387, %c1_388, %c0_389] : memref<10x34x96xf32, #tpu.memory_space<vmem>>, vector<1x32x96xf32>
    %610 = vector.shape_cast %609 : vector<1x32x96xf32> to vector<32x96xf32>
    %611 = vector.shape_cast %608 : vector<96xf32> to vector<1x96xf32>
    %612 = vector.broadcast %611 : vector<1x96xf32> to vector<32x96xf32>
    %613 = arith.mulf %610, %612 : vector<32x96xf32>
    %614 = arith.addf %606, %613 : vector<32x96xf32>
    %c2_390 = arith.constant 2 : index
    %c0_391 = arith.constant 0 : index
    %615 = vector.load %arg6[%c2_390, %c0_391] : memref<9x96xf32, #tpu.memory_space<vmem>>, vector<1x96xf32>
    %616 = vector.shape_cast %615 : vector<1x96xf32> to vector<96xf32>
    %c7_392 = arith.constant 7 : index
    %c2_393 = arith.constant 2 : index
    %c0_394 = arith.constant 0 : index
    %617 = vector.load %arg8[%c7_392, %c2_393, %c0_394] : memref<10x34x96xf32, #tpu.memory_space<vmem>>, vector<1x32x96xf32>
    %618 = vector.shape_cast %617 : vector<1x32x96xf32> to vector<32x96xf32>
    %619 = vector.shape_cast %616 : vector<96xf32> to vector<1x96xf32>
    %620 = vector.broadcast %619 : vector<1x96xf32> to vector<32x96xf32>
    %621 = arith.mulf %618, %620 : vector<32x96xf32>
    %622 = arith.addf %614, %621 : vector<32x96xf32>
    %c3_395 = arith.constant 3 : index
    %c0_396 = arith.constant 0 : index
    %623 = vector.load %arg6[%c3_395, %c0_396] : memref<9x96xf32, #tpu.memory_space<vmem>>, vector<1x96xf32>
    %624 = vector.shape_cast %623 : vector<1x96xf32> to vector<96xf32>
    %c8_397 = arith.constant 8 : index
    %c0_398 = arith.constant 0 : index
    %c0_399 = arith.constant 0 : index
    %625 = vector.load %arg8[%c8_397, %c0_398, %c0_399] : memref<10x34x96xf32, #tpu.memory_space<vmem>>, vector<1x32x96xf32>
    %626 = vector.shape_cast %625 : vector<1x32x96xf32> to vector<32x96xf32>
    %627 = vector.shape_cast %624 : vector<96xf32> to vector<1x96xf32>
    %628 = vector.broadcast %627 : vector<1x96xf32> to vector<32x96xf32>
    %629 = arith.mulf %626, %628 : vector<32x96xf32>
    %630 = arith.addf %622, %629 : vector<32x96xf32>
    %c4_400 = arith.constant 4 : index
    %c0_401 = arith.constant 0 : index
    %631 = vector.load %arg6[%c4_400, %c0_401] : memref<9x96xf32, #tpu.memory_space<vmem>>, vector<1x96xf32>
    %632 = vector.shape_cast %631 : vector<1x96xf32> to vector<96xf32>
    %c8_402 = arith.constant 8 : index
    %c1_403 = arith.constant 1 : index
    %c0_404 = arith.constant 0 : index
    %633 = vector.load %arg8[%c8_402, %c1_403, %c0_404] : memref<10x34x96xf32, #tpu.memory_space<vmem>>, vector<1x32x96xf32>
    %634 = vector.shape_cast %633 : vector<1x32x96xf32> to vector<32x96xf32>
    %635 = vector.shape_cast %632 : vector<96xf32> to vector<1x96xf32>
    %636 = vector.broadcast %635 : vector<1x96xf32> to vector<32x96xf32>
    %637 = arith.mulf %634, %636 : vector<32x96xf32>
    %638 = arith.addf %630, %637 : vector<32x96xf32>
    %c5_405 = arith.constant 5 : index
    %c0_406 = arith.constant 0 : index
    %639 = vector.load %arg6[%c5_405, %c0_406] : memref<9x96xf32, #tpu.memory_space<vmem>>, vector<1x96xf32>
    %640 = vector.shape_cast %639 : vector<1x96xf32> to vector<96xf32>
    %c8_407 = arith.constant 8 : index
    %c2_408 = arith.constant 2 : index
    %c0_409 = arith.constant 0 : index
    %641 = vector.load %arg8[%c8_407, %c2_408, %c0_409] : memref<10x34x96xf32, #tpu.memory_space<vmem>>, vector<1x32x96xf32>
    %642 = vector.shape_cast %641 : vector<1x32x96xf32> to vector<32x96xf32>
    %643 = vector.shape_cast %640 : vector<96xf32> to vector<1x96xf32>
    %644 = vector.broadcast %643 : vector<1x96xf32> to vector<32x96xf32>
    %645 = arith.mulf %642, %644 : vector<32x96xf32>
    %646 = arith.addf %638, %645 : vector<32x96xf32>
    %c6_410 = arith.constant 6 : index
    %c0_411 = arith.constant 0 : index
    %647 = vector.load %arg6[%c6_410, %c0_411] : memref<9x96xf32, #tpu.memory_space<vmem>>, vector<1x96xf32>
    %648 = vector.shape_cast %647 : vector<1x96xf32> to vector<96xf32>
    %c9_412 = arith.constant 9 : index
    %c0_413 = arith.constant 0 : index
    %c0_414 = arith.constant 0 : index
    %649 = vector.load %arg8[%c9_412, %c0_413, %c0_414] : memref<10x34x96xf32, #tpu.memory_space<vmem>>, vector<1x32x96xf32>
    %650 = vector.shape_cast %649 : vector<1x32x96xf32> to vector<32x96xf32>
    %651 = vector.shape_cast %648 : vector<96xf32> to vector<1x96xf32>
    %652 = vector.broadcast %651 : vector<1x96xf32> to vector<32x96xf32>
    %653 = arith.mulf %650, %652 : vector<32x96xf32>
    %654 = arith.addf %646, %653 : vector<32x96xf32>
    %c7_415 = arith.constant 7 : index
    %c0_416 = arith.constant 0 : index
    %655 = vector.load %arg6[%c7_415, %c0_416] : memref<9x96xf32, #tpu.memory_space<vmem>>, vector<1x96xf32>
    %656 = vector.shape_cast %655 : vector<1x96xf32> to vector<96xf32>
    %c9_417 = arith.constant 9 : index
    %c1_418 = arith.constant 1 : index
    %c0_419 = arith.constant 0 : index
    %657 = vector.load %arg8[%c9_417, %c1_418, %c0_419] : memref<10x34x96xf32, #tpu.memory_space<vmem>>, vector<1x32x96xf32>
    %658 = vector.shape_cast %657 : vector<1x32x96xf32> to vector<32x96xf32>
    %659 = vector.shape_cast %656 : vector<96xf32> to vector<1x96xf32>
    %660 = vector.broadcast %659 : vector<1x96xf32> to vector<32x96xf32>
    %661 = arith.mulf %658, %660 : vector<32x96xf32>
    %662 = arith.addf %654, %661 : vector<32x96xf32>
    %c8_420 = arith.constant 8 : index
    %c0_421 = arith.constant 0 : index
    %663 = vector.load %arg6[%c8_420, %c0_421] : memref<9x96xf32, #tpu.memory_space<vmem>>, vector<1x96xf32>
    %664 = vector.shape_cast %663 : vector<1x96xf32> to vector<96xf32>
    %c9_422 = arith.constant 9 : index
    %c2_423 = arith.constant 2 : index
    %c0_424 = arith.constant 0 : index
    %665 = vector.load %arg8[%c9_422, %c2_423, %c0_424] : memref<10x34x96xf32, #tpu.memory_space<vmem>>, vector<1x32x96xf32>
    %666 = vector.shape_cast %665 : vector<1x32x96xf32> to vector<32x96xf32>
    %667 = vector.shape_cast %664 : vector<96xf32> to vector<1x96xf32>
    %668 = vector.broadcast %667 : vector<1x96xf32> to vector<32x96xf32>
    %669 = arith.mulf %666, %668 : vector<32x96xf32>
    %670 = arith.addf %662, %669 : vector<32x96xf32>
    %c0_425 = arith.constant 0 : index
    %c224 = arith.constant 224 : index
    %c0_426 = arith.constant 0 : index
    %671 = vector.load %arg7[%c0_425, %c224, %c0_426] : memref<1x256x96xf32, #tpu.memory_space<vmem>>, vector<1x32x96xf32>
    %672 = vector.shape_cast %671 : vector<1x32x96xf32> to vector<32x96xf32>
    %673 = vector.shape_cast %670 : vector<32x96xf32> to vector<1x32x96xf32>
    tpu.vector_store %arg7[%c0_425, %c224, %c0_426], %673 {strides = array<i32>} : memref<1x256x96xf32, #tpu.memory_space<vmem>>, vector<1x32x96xf32>,
    return
  }
  func.func @transform_0(%arg0: i32, %arg1: i32) -> (i32, i32, i32) {
    %c0_i32 = arith.constant 0 : i32
    %c0_i32_0 = arith.constant 0 : i32
    return %arg0, %arg1, %c0_i32 : i32, i32, i32
  }
  func.func @transform_1(%arg0: i32, %arg1: i32) -> (i32, i32, i32) {
    %c8_i32 = arith.constant 8 : i32
    %0 = arith.muli %arg1, %c8_i32 : i32
    %c1_i32 = arith.constant 1 : i32
    %1 = arith.subi %0, %c1_i32 : i32
    %c0_i32 = arith.constant 0 : i32
    %2 = arith.maxsi %1, %c0_i32 : i32
    %c0_i32_0 = arith.constant 0 : i32
    %c0_i32_1 = arith.constant 0 : i32
    return %arg0, %2, %c0_i32_0 : i32, i32, i32
  }
  func.func @transform_2(%arg0: i32, %arg1: i32) -> (i32, i32, i32) {
    %c1_i32 = arith.constant 1 : i32
    %0 = arith.addi %arg1, %c1_i32 : i32
    %c8_i32 = arith.constant 8 : i32
    %1 = arith.muli %0, %c8_i32 : i32
    %c31_i32 = arith.constant 31 : i32
    %2 = arith.minsi %1, %c31_i32 : i32
    %c0_i32 = arith.constant 0 : i32
    %c0_i32_0 = arith.constant 0 : i32
    return %arg0, %2, %c0_i32 : i32, i32, i32
  }
  func.func @transform_3(%arg0: i32, %arg1: i32) -> (i32, i32) {
    %c0_i32 = arith.constant 0 : i32
    %c0_i32_0 = arith.constant 0 : i32
    %c0_i32_1 = arith.constant 0 : i32
    return %c0_i32, %c0_i32_0 : i32, i32
  }
  func.func @transform_4(%arg0: i32, %arg1: i32) -> (i32, i32) {
    %c0_i32 = arith.constant 0 : i32
    %c0_i32_0 = arith.constant 0 : i32
    %c0_i32_1 = arith.constant 0 : i32
    return %c0_i32, %c0_i32_0 : i32, i32
  }
  func.func @transform_5(%arg0: i32, %arg1: i32) -> (i32, i32, i32) {
    %c0_i32 = arith.constant 0 : i32
    %c0_i32_0 = arith.constant 0 : i32
    return %arg0, %arg1, %c0_i32 : i32, i32, i32
  }
}

</mosaic_0001>

<bundles_post_ra>
// kernel: mdta_forward.5
= control target key start
LH: loop header
LB: loop body
LE: loop exit
PB: predicated region body
PF: predicated region fallthrough
CT: control target
= control target key end

     0   :  { %s936_s9 = smov 0   ;;  %s1200_s0 = inlined_call_operand.vmem [shape: f32[2048,32], index: 0, kind: input, shape index: {}]   ;;  %s1201_s1 = inlined_call_operand.vmem [shape: f32[32,32], index: 1, kind: input, shape index: {}]   ;;  %s1202_s2 = inlined_call_operand.vmem [shape: f32[2048,32], index: 2, kind: output, shape index: {}]  }
   0x1 LB: > { %s756_s10 = sadd.s32 4294967295, %s919_s9   ;;  %p760_p0 = scmp.ge.s32.totalorder %s919_s9, 1  ;;  %s919_s9 = sphi %s936_s9, %s12_s9  }
   0x2   : > { %p113_p1 = scmp.lt.s32.totalorder %s919_s9, 5 }
   0x4   : > { %p114_p2 = pnand %p760_p0, %p113_p1 }
   0x5   : > { %v244_v0 = vld [vmem:[%s1201_s1] sm:$0xff] (!%p114_p2)  ;;  %v245_v1 = vld [vmem:[%s1201_s1 + $0x8] sm:$0xff] (!%p114_p2)  ;;  %v246_v2 = vld [vmem:[%s1201_s1 + $0x10] sm:$0xff] (!%p114_p2)  ;;  %s761_s17 = sshll.u32 (!%p114_p2), %s756_s10, 6  ;;  %vm250_vm0 = vcmask (!%p114_p2), 261120  }
   0x6   : > { %117 = sbr.rel (%p114_p2) target bundleno = 293 (0x125), region = 28  ;;  %v248_v3 = vpack.c.bf16 (!%p114_p2), %v245_v1, %v244_v0  ;;  %v247_v4 = vld [vmem:[%s1201_s1 + $0x18] sm:$0xff] (!%p114_p2)  ;;  %p136_p3 = scmp.lt.s32.totalorder (!%p114_p2), %s761_s17, 255 }
   0x7   : > { %v249_v5 = vpack.c.bf16 (!%p114_p2), %v247_v4, %v246_v2 }
   0x8   : > { %833 = vmatprep.subr.bf16.mxu0 (!%p114_p2), %v248_v3  ;;  %901 = vmatprep.subr.bf16.mxu1 (!%p114_p2), %v248_v3 }
   0x9   : > { %834 = vmatpush3.bf16.msra.mxu0 (!%p114_p2), %v248_v3  ;;  %903 = vmatpush3.bf16.msra.mxu1 (!%p114_p2), %v248_v3 }
   0xa   : > { %835 = vmatprep.subr.bf16.mxu0 (!%p114_p2), %v249_v5  ;;  %902 = vmatprep.subr.bf16.mxu1 (!%p114_p2), %v249_v5 }
   0xd   : > { %s1204_s17 = smov (!%p136_p3, %s761_s17), 255  ;;  %836 = vmatpush3.bf16.msra.mxu0 %v249_v5  ;;  %904 = vmatpush3.bf16.msra.mxu1 %v249_v5 }
   0xe   : > { %s762_s20 = sshll.u32 %s1204_s17, 3 }
   0xf   : > { %s964_s23 = scalar_lea.vmem %s1200_s0, %s762_s20  ;;  %s1067_s26 = scalar_lea.vmem %s1202_s2, %s762_s20 }
  0x10   : > { %v148_v6 = vld [vmem:[%s964_s23] sm:$0xff]  ;;  %v149_v7 = vld [vmem:[%s964_s23 + $0x8] sm:$0xff]  ;;  %v150_v11 = vld [vmem:[%s964_s23 + $0x10] sm:$0xff] }
  0x11   : > { %v180_v8 = vld [vmem:[%s964_s23 + $0x100] sm:$0xff]  ;;  %v212_v9 = vpack.c.bf16 %v149_v7, %v148_v6  ;;  %v181_v10 = vld [vmem:[%s964_s23 + $0x108] sm:$0xff]  ;;  %v151_v12 = vld [vmem:[%s964_s23 + $0x18] sm:$0xff] }
  0x12   : > { %v228_v13 = vpack.c.bf16 %v181_v10, %v180_v8  ;;  %v213_v14 = vpack.c.bf16 %v151_v12, %v150_v11  ;;  %v182_v15 = vld [vmem:[%s964_s23 + $0x110] sm:$0xff]  ;;  %v183_v16 = vld [vmem:[%s964_s23 + $0x118] sm:$0xff]  ;;  %v152_v17 = vld [vmem:[%s964_s23 + $0x20] sm:$0xff] }
  0x13   : > { %837 = vmatprep.mubr.msk.bf16.mxu0 %vm250_vm0, %v212_v9  ;;  %v229_v18 = vpack.c.bf16 %v183_v16, %v182_v15  ;;  %v153_v19 = vld [vmem:[%s964_s23 + $0x28] sm:$0xff]  ;;  %v184_v20 = vld [vmem:[%s964_s23 + $0x120] sm:$0xff]  ;;  %v154_v24 = vld [vmem:[%s964_s23 + $0x30] sm:$0xff] }
  0x14   : > { %v185_v21 = vld [vmem:[%s964_s23 + $0x128] sm:$0xff]  ;;  %869 = vmatprep.mubr.msk.bf16.mxu1 %vm250_vm0, %v228_v13  ;;  %838 = vmatmul.mubr.msk.bf16.vlgmr.msra.gmra.mrb[0].mxu0 %vm250_vm0, %v213_v14  ;;  %v214_v22 = vpack.c.bf16 %v153_v19, %v152_v17  ;;  %v155_v25 = vld [vmem:[%s964_s23 + $0x38] sm:$0xff]  ;;  %v186_v26 = vld [vmem:[%s964_s23 + $0x130] sm:$0xff] }
  0x15   : > { %v230_v23 = vpack.c.bf16 %v185_v21, %v184_v20  ;;  %870 = vmatmul.mubr.msk.bf16.vlgmr.msra.gmra.mrb[0].mxu1 %vm250_vm0, %v229_v18  ;;  %v187_v27 = vld [vmem:[%s964_s23 + $0x138] sm:$0xff]  ;;  %v156_v28 = vld [vmem:[%s964_s23 + $0x40] sm:$0xff]  ;;  %v157_v29 = vld [vmem:[%s964_s23 + $0x48] sm:$0xff]  ;;  %v215_v32 = vpack.c.bf16 %v155_v25, %v154_v24 }
  0x16   : > { %841 = vmatprep.mubr.msk.bf16.mxu0 %vm250_vm0, %v214_v22  ;;  %v188_v30 = vld [vmem:[%s964_s23 + $0x140] sm:$0xff]  ;;  %v189_v31 = vld [vmem:[%s964_s23 + $0x148] sm:$0xff]  ;;  %v231_v33 = vpack.c.bf16 %v187_v27, %v186_v26  ;;  %v216_v34 = vpack.c.bf16 %v157_v29, %v156_v28  ;;  %v158_v36 = vld [vmem:[%s964_s23 + $0x50] sm:$0xff] }
  0x17   : > { %873 = vmatprep.mubr.msk.bf16.mxu1 %vm250_vm0, %v230_v23  ;;  %v232_v35 = vpack.c.bf16 %v189_v31, %v188_v30  ;;  %v159_v37 = vld [vmem:[%s964_s23 + $0x58] sm:$0xff]  ;;  %v190_v38 = vld [vmem:[%s964_s23 + $0x150] sm:$0xff]  ;;  %v160_v40 = vld [vmem:[%s964_s23 + $0x60] sm:$0xff] }
  0x18   : > { %v191_v39 = vld [vmem:[%s964_s23 + $0x158] sm:$0xff]  ;;  %v161_v41 = vld [vmem:[%s964_s23 + $0x68] sm:$0xff]  ;;  %v192_v42 = vld [vmem:[%s964_s23 + $0x160] sm:$0xff]  ;;  %v217_v44 = vpack.c.bf16 %v159_v37, %v158_v36 }
  0x19   : > { %v193_v43 = vld [vmem:[%s964_s23 + $0x168] sm:$0xff]  ;;  %v233_v45 = vpack.c.bf16 %v191_v39, %v190_v38  ;;  %v218_v46 = vpack.c.bf16 %v161_v41, %v160_v40  ;;  %v162_v48 = vld [vmem:[%s964_s23 + $0x70] sm:$0xff]  ;;  %v163_v49 = vld [vmem:[%s964_s23 + $0x78] sm:$0xff] }
  0x1a   : > { %v234_v47 = vpack.c.bf16 %v193_v43, %v192_v42  ;;  %v194_v50 = vld [vmem:[%s964_s23 + $0x170] sm:$0xff]  ;;  %v195_v51 = vld [vmem:[%s964_s23 + $0x178] sm:$0xff]  ;;  %v164_v52 = vld [vmem:[%s964_s23 + $0x80] sm:$0xff]  ;;  %v219_v56 = vpack.c.bf16 %v163_v49, %v162_v48 }
  0x1b   : > { %v165_v53 = vld [vmem:[%s964_s23 + $0x88] sm:$0xff]  ;;  %v196_v54 = vld [vmem:[%s964_s23 + $0x180] sm:$0xff]  ;;  %v235_v57 = vpack.c.bf16 %v195_v51, %v194_v50  ;;  %v166_v60 = vld [vmem:[%s964_s23 + $0x90] sm:$0xff] }
  0x1c   : > { %842 = vmatmul.mubr.msk.bf16.gmra.mrb[4].mxu0 %vm250_vm0, %v215_v32  ;;  %v197_v55 = vld [vmem:[%s964_s23 + $0x188] sm:$0xff]  ;;  %v220_v58 = vpack.c.bf16 %v165_v53, %v164_v52  ;;  %v167_v61 = vld [vmem:[%s964_s23 + $0x98] sm:$0xff]  ;;  %v198_v62 = vld [vmem:[%s964_s23 + $0x190] sm:$0xff] }
  0x1d   : > { %874 = vmatmul.mubr.msk.bf16.gmra.mrb[4].mxu1 %vm250_vm0, %v231_v33  ;;  %845 = vmatprep.mubr.msk.bf16.mxu0 %vm250_vm0, %v216_v34  ;;  %v236_v59 = vpack.c.bf16 %v197_v55, %v196_v54  ;;  %v199_v63 = vld [vmem:[%s964_s23 + $0x198] sm:$0xff]  ;;  %v168_v0 = vld [vmem:[%s964_s23 + $0xa0] sm:$0xff]  ;;  %v169_v1 = vld [vmem:[%s964_s23 + $0xa8] sm:$0xff]  ;;  %v221_v4 = vpack.c.bf16 %v167_v61, %v166_v60 }
  0x1e   : > { %877 = vmatprep.mubr.msk.bf16.mxu1 %vm250_vm0, %v232_v35  ;;  %v200_v2 = vld [vmem:[%s964_s23 + $0x1a0] sm:$0xff]  ;;  %v201_v3 = vld [vmem:[%s964_s23 + $0x1a8] sm:$0xff]  ;;  %v237_v5 = vpack.c.bf16 %v199_v63, %v198_v62  ;;  %v222_v6 = vpack.c.bf16 %v169_v1, %v168_v0  ;;  %v170_v8 = vld [vmem:[%s964_s23 + $0xb0] sm:$0xff] }
  0x1f   : > { %v238_v7 = vpack.c.bf16 %v201_v3, %v200_v2  ;;  %v171_v9 = vld [vmem:[%s964_s23 + $0xb8] sm:$0xff]  ;;  %v202_v10 = vld [vmem:[%s964_s23 + $0x1b0] sm:$0xff]  ;;  %v172_v12 = vld [vmem:[%s964_s23 + $0xc0] sm:$0xff] }
  0x20   : > { %v203_v11 = vld [vmem:[%s964_s23 + $0x1b8] sm:$0xff]  ;;  %v173_v13 = vld [vmem:[%s964_s23 + $0xc8] sm:$0xff]  ;;  %v204_v14 = vld [vmem:[%s964_s23 + $0x1c0] sm:$0xff]  ;;  %v223_v16 = vpack.c.bf16 %v171_v9, %v170_v8 }
  0x21   : > { %v205_v15 = vld [vmem:[%s964_s23 + $0x1c8] sm:$0xff]  ;;  %v239_v17 = vpack.c.bf16 %v203_v11, %v202_v10  ;;  %v224_v18 = vpack.c.bf16 %v173_v13, %v172_v12  ;;  %v174_v20 = vld [vmem:[%s964_s23 + $0xd0] sm:$0xff]  ;;  %v175_v21 = vld [vmem:[%s964_s23 + $0xd8] sm:$0xff] }
  0x22   : > { %v240_v19 = vpack.c.bf16 %v205_v15, %v204_v14  ;;  %v206_v22 = vld [vmem:[%s964_s23 + $0x1d0] sm:$0xff]  ;;  %v207_v23 = vld [vmem:[%s964_s23 + $0x1d8] sm:$0xff]  ;;  %v176_v24 = vld [vmem:[%s964_s23 + $0xe0] sm:$0xff]  ;;  %v225_v28 = vpack.c.bf16 %v175_v21, %v174_v20 }
  0x23   : > { %v177_v25 = vld [vmem:[%s964_s23 + $0xe8] sm:$0xff]  ;;  %v208_v26 = vld [vmem:[%s964_s23 + $0x1e0] sm:$0xff]  ;;  %v241_v29 = vpack.c.bf16 %v207_v23, %v206_v22  ;;  %v178_v32 = vld [vmem:[%s964_s23 + $0xf0] sm:$0xff] }
  0x24   : > { %846 = vmatmul.mubr.msk.bf16.gmra.mrb[8].mxu0 %vm250_vm0, %v217_v44  ;;  %v209_v27 = vld [vmem:[%s964_s23 + $0x1e8] sm:$0xff]  ;;  %v226_v30 = vpack.c.bf16 %v177_v25, %v176_v24  ;;  %v179_v33 = vld [vmem:[%s964_s23 + $0xf8] sm:$0xff]  ;;  %v210_v34 = vld [vmem:[%s964_s23 + $0x1f0] sm:$0xff] }
  0x25   : > { %878 = vmatmul.mubr.msk.bf16.gmra.mrb[8].mxu1 %vm250_vm0, %v233_v45  ;;  %849 = vmatprep.mubr.msk.bf16.mxu0 %vm250_vm0, %v218_v46  ;;  %v242_v31 = vpack.c.bf16 %v209_v27, %v208_v26  ;;  %v211_v35 = vld [vmem:[%s964_s23 + $0x1f8] sm:$0xff]  ;;  %v227_v36 = vpack.c.bf16 %v179_v33, %v178_v32 }
  0x26   : > { %881 = vmatprep.mubr.msk.bf16.mxu1 %vm250_vm0, %v234_v47  ;;  %v243_v37 = vpack.c.bf16 %v211_v35, %v210_v34 }
  0x2c   : > { %850 = vmatmul.mubr.msk.bf16.gmra.mrb[12].mxu0 %vm250_vm0, %v219_v56 }
  0x2d   : > { %882 = vmatmul.mubr.msk.bf16.gmra.mrb[12].mxu1 %vm250_vm0, %v235_v57  ;;  %853 = vmatprep.mubr.msk.bf16.mxu0 %vm250_vm0, %v220_v58 }
  0x2e   : > { %885 = vmatprep.mubr.msk.bf16.mxu1 %vm250_vm0, %v236_v59 }
  0x34   : > { %854 = vmatmul.mubr.msk.bf16.gmra.mrb[16].mxu0 %vm250_vm0, %v221_v4 }
  0x35   : > { %886 = vmatmul.mubr.msk.bf16.gmra.mrb[16].mxu1 %vm250_vm0, %v237_v5  ;;  %857 = vmatprep.mubr.msk.bf16.mxu0 %vm250_vm0, %v222_v6 }
  0x36   : > { %889 = vmatprep.mubr.msk.bf16.mxu1 %vm250_vm0, %v238_v7 }
  0x3c   : > { %858 = vmatmul.mubr.msk.bf16.gmra.mrb[20].mxu0 %vm250_vm0, %v223_v16 }
  0x3d   : > { %890 = vmatmul.mubr.msk.bf16.gmra.mrb[20].mxu1 %vm250_vm0, %v239_v17  ;;  %861 = vmatprep.mubr.msk.bf16.mxu0 %vm250_vm0, %v224_v18 }
  0x3e   : > { %893 = vmatprep.mubr.msk.bf16.mxu1 %vm250_vm0, %v240_v19 }
  0x44   : > { %862 = vmatmul.mubr.msk.bf16.gmra.mrb[24].mxu0 %vm250_vm0, %v225_v28 }
  0x45   : > { %894 = vmatmul.mubr.msk.bf16.gmra.mrb[24].mxu1 %vm250_vm0, %v241_v29  ;;  %865 = vmatprep.mubr.msk.bf16.mxu0 %vm250_vm0, %v226_v30 }
  0x46   : > { %897 = vmatprep.mubr.msk.bf16.mxu1 %vm250_vm0, %v242_v31 }
  0x4c   : > { %866 = vmatmul.mubr.msk.bf16.gmra.mrb[28].mxu0 %vm250_vm0, %v227_v36 }
  0x4d   : > { %898 = vmatmul.mubr.msk.bf16.gmra.mrb[28].mxu1 %vm250_vm0, %v243_v37 }
  0xe7   : > { %v839_v38 = vpop.f32.mrb[0].mxu0 }
  0xe8   : > { %638 = vst.msk [vmem:[%s1067_s26 + $0x10] sm:$0xff] %vm250_vm0, %v839_v38  ;;  %v871_v39 = vpop.f32.mrb[0].mxu1  ;;  %v381_v40 = vpop.f32.mrb[1].mxu0 }
  0xe9   : > { %670 = vst.msk [vmem:[%s1067_s26 + $0x110] sm:$0xff] %vm250_vm0, %v871_v39  ;;  %636 = vst.msk [vmem:[%s1067_s26] sm:$0xff] %vm250_vm0, %v381_v40  ;;  %v509_v41 = vpop.f32.mrb[1].mxu1  ;;  %v840_v42 = vpop.f32.mrb[2].mxu0 }
  0xea   : > { %668 = vst.msk [vmem:[%s1067_s26 + $0x100] sm:$0xff] %vm250_vm0, %v509_v41  ;;  %639 = vst.msk [vmem:[%s1067_s26 + $0x18] sm:$0xff] %vm250_vm0, %v840_v42  ;;  %v872_v43 = vpop.f32.mrb[2].mxu1  ;;  %v384_v44 = vpop.f32.mrb[3].mxu0 }
  0xeb   : > { %671 = vst.msk [vmem:[%s1067_s26 + $0x118] sm:$0xff] %vm250_vm0, %v872_v43  ;;  %637 = vst.msk [vmem:[%s1067_s26 + $0x8] sm:$0xff] %vm250_vm0, %v384_v44  ;;  %v512_v45 = vpop.f32.mrb[3].mxu1 }
  0xec   : > { %669 = vst.msk [vmem:[%s1067_s26 + $0x108] sm:$0xff] %vm250_vm0, %v512_v45 }
  0xef   : > { %v843_v46 = vpop.f32.mrb[4].mxu0 }
  0xf0   : > { %642 = vst.msk [vmem:[%s1067_s26 + $0x30] sm:$0xff] %vm250_vm0, %v843_v46  ;;  %v875_v47 = vpop.f32.mrb[4].mxu1  ;;  %v397_v48 = vpop.f32.mrb[5].mxu0 }
  0xf1   : > { %674 = vst.msk [vmem:[%s1067_s26 + $0x130] sm:$0xff] %vm250_vm0, %v875_v47  ;;  %640 = vst.msk [vmem:[%s1067_s26 + $0x20] sm:$0xff] %vm250_vm0, %v397_v48  ;;  %v525_v49 = vpop.f32.mrb[5].mxu1  ;;  %v844_v50 = vpop.f32.mrb[6].mxu0 }
  0xf2   : > { %672 = vst.msk [vmem:[%s1067_s26 + $0x120] sm:$0xff] %vm250_vm0, %v525_v49  ;;  %643 = vst.msk [vmem:[%s1067_s26 + $0x38] sm:$0xff] %vm250_vm0, %v844_v50  ;;  %v876_v51 = vpop.f32.mrb[6].mxu1  ;;  %v400_v52 = vpop.f32.mrb[7].mxu0 }
  0xf3   : > { %675 = vst.msk [vmem:[%s1067_s26 + $0x138] sm:$0xff] %vm250_vm0, %v876_v51  ;;  %641 = vst.msk [vmem:[%s1067_s26 + $0x28] sm:$0xff] %vm250_vm0, %v400_v52  ;;  %v528_v53 = vpop.f32.mrb[7].mxu1 }
  0xf4   : > { %673 = vst.msk [vmem:[%s1067_s26 + $0x128] sm:$0xff] %vm250_vm0, %v528_v53 }
  0xf7   : > { %v847_v54 = vpop.f32.mrb[8].mxu0 }
  0xf8   : > { %646 = vst.msk [vmem:[%s1067_s26 + $0x50] sm:$0xff] %vm250_vm0, %v847_v54  ;;  %v879_v55 = vpop.f32.mrb[8].mxu1  ;;  %v413_v56 = vpop.f32.mrb[9].mxu0 }
  0xf9   : > { %678 = vst.msk [vmem:[%s1067_s26 + $0x150] sm:$0xff] %vm250_vm0, %v879_v55  ;;  %644 = vst.msk [vmem:[%s1067_s26 + $0x40] sm:$0xff] %vm250_vm0, %v413_v56  ;;  %v541_v57 = vpop.f32.mrb[9].mxu1  ;;  %v848_v58 = vpop.f32.mrb[10].mxu0 }
  0xfa   : > { %676 = vst.msk [vmem:[%s1067_s26 + $0x140] sm:$0xff] %vm250_vm0, %v541_v57  ;;  %647 = vst.msk [vmem:[%s1067_s26 + $0x58] sm:$0xff] %vm250_vm0, %v848_v58  ;;  %v880_v59 = vpop.f32.mrb[10].mxu1  ;;  %v416_v60 = vpop.f32.mrb[11].mxu0 }
  0xfb   : > { %679 = vst.msk [vmem:[%s1067_s26 + $0x158] sm:$0xff] %vm250_vm0, %v880_v59  ;;  %645 = vst.msk [vmem:[%s1067_s26 + $0x48] sm:$0xff] %vm250_vm0, %v416_v60  ;;  %v544_v61 = vpop.f32.mrb[11].mxu1 }
  0xfc   : > { %677 = vst.msk [vmem:[%s1067_s26 + $0x148] sm:$0xff] %vm250_vm0, %v544_v61 }
  0xff   : > { %v851_v62 = vpop.f32.mrb[12].mxu0 }
 0x100   : > { %650 = vst.msk [vmem:[%s1067_s26 + $0x70] sm:$0xff] %vm250_vm0, %v851_v62  ;;  %v883_v63 = vpop.f32.mrb[12].mxu1  ;;  %v429_v0 = vpop.f32.mrb[13].mxu0 }
 0x101   : > { %682 = vst.msk [vmem:[%s1067_s26 + $0x170] sm:$0xff] %vm250_vm0, %v883_v63  ;;  %648 = vst.msk [vmem:[%s1067_s26 + $0x60] sm:$0xff] %vm250_vm0, %v429_v0  ;;  %v557_v1 = vpop.f32.mrb[13].mxu1  ;;  %v852_v2 = vpop.f32.mrb[14].mxu0 }
 0x102   : > { %680 = vst.msk [vmem:[%s1067_s26 + $0x160] sm:$0xff] %vm250_vm0, %v557_v1  ;;  %651 = vst.msk [vmem:[%s1067_s26 + $0x78] sm:$0xff] %vm250_vm0, %v852_v2  ;;  %v884_v3 = vpop.f32.mrb[14].mxu1  ;;  %v432_v4 = vpop.f32.mrb[15].mxu0 }
 0x103   : > { %683 = vst.msk [vmem:[%s1067_s26 + $0x178] sm:$0xff] %vm250_vm0, %v884_v3  ;;  %649 = vst.msk [vmem:[%s1067_s26 + $0x68] sm:$0xff] %vm250_vm0, %v432_v4  ;;  %v560_v5 = vpop.f32.mrb[15].mxu1 }
 0x104   : > { %681 = vst.msk [vmem:[%s1067_s26 + $0x168] sm:$0xff] %vm250_vm0, %v560_v5 }
 0x107   : > { %v855_v6 = vpop.f32.mrb[16].mxu0 }
 0x108   : > { %654 = vst.msk [vmem:[%s1067_s26 + $0x90] sm:$0xff] %vm250_vm0, %v855_v6  ;;  %v887_v7 = vpop.f32.mrb[16].mxu1  ;;  %v445_v8 = vpop.f32.mrb[17].mxu0 }
 0x109   : > { %686 = vst.msk [vmem:[%s1067_s26 + $0x190] sm:$0xff] %vm250_vm0, %v887_v7  ;;  %652 = vst.msk [vmem:[%s1067_s26 + $0x80] sm:$0xff] %vm250_vm0, %v445_v8  ;;  %v573_v9 = vpop.f32.mrb[17].mxu1  ;;  %v856_v10 = vpop.f32.mrb[18].mxu0 }
 0x10a   : > { %684 = vst.msk [vmem:[%s1067_s26 + $0x180] sm:$0xff] %vm250_vm0, %v573_v9  ;;  %655 = vst.msk [vmem:[%s1067_s26 + $0x98] sm:$0xff] %vm250_vm0, %v856_v10  ;;  %v888_v11 = vpop.f32.mrb[18].mxu1  ;;  %v448_v12 = vpop.f32.mrb[19].mxu0 }
 0x10b   : > { %687 = vst.msk [vmem:[%s1067_s26 + $0x198] sm:$0xff] %vm250_vm0, %v888_v11  ;;  %653 = vst.msk [vmem:[%s1067_s26 + $0x88] sm:$0xff] %vm250_vm0, %v448_v12  ;;  %v576_v13 = vpop.f32.mrb[19].mxu1 }
 0x10c   : > { %685 = vst.msk [vmem:[%s1067_s26 + $0x188] sm:$0xff] %vm250_vm0, %v576_v13 }
 0x10f   : > { %v859_v14 = vpop.f32.mrb[20].mxu0 }
 0x110   : > { %658 = vst.msk [vmem:[%s1067_s26 + $0xb0] sm:$0xff] %vm250_vm0, %v859_v14  ;;  %v891_v15 = vpop.f32.mrb[20].mxu1  ;;  %v461_v16 = vpop.f32.mrb[21].mxu0 }
 0x111   : > { %690 = vst.msk [vmem:[%s1067_s26 + $0x1b0] sm:$0xff] %vm250_vm0, %v891_v15  ;;  %656 = vst.msk [vmem:[%s1067_s26 + $0xa0] sm:$0xff] %vm250_vm0, %v461_v16  ;;  %v589_v17 = vpop.f32.mrb[21].mxu1  ;;  %v860_v18 = vpop.f32.mrb[22].mxu0 }
 0x112   : > { %688 = vst.msk [vmem:[%s1067_s26 + $0x1a0] sm:$0xff] %vm250_vm0, %v589_v17  ;;  %659 = vst.msk [vmem:[%s1067_s26 + $0xb8] sm:$0xff] %vm250_vm0, %v860_v18  ;;  %v892_v19 = vpop.f32.mrb[22].mxu1  ;;  %v464_v20 = vpop.f32.mrb[23].mxu0 }
 0x113   : > { %691 = vst.msk [vmem:[%s1067_s26 + $0x1b8] sm:$0xff] %vm250_vm0, %v892_v19  ;;  %657 = vst.msk [vmem:[%s1067_s26 + $0xa8] sm:$0xff] %vm250_vm0, %v464_v20  ;;  %v592_v21 = vpop.f32.mrb[23].mxu1 }
 0x114   : > { %689 = vst.msk [vmem:[%s1067_s26 + $0x1a8] sm:$0xff] %vm250_vm0, %v592_v21 }
 0x117   : > { %v863_v22 = vpop.f32.mrb[24].mxu0 }
 0x118   : > { %662 = vst.msk [vmem:[%s1067_s26 + $0xd0] sm:$0xff] %vm250_vm0, %v863_v22  ;;  %v895_v23 = vpop.f32.mrb[24].mxu1  ;;  %v477_v24 = vpop.f32.mrb[25].mxu0 }
 0x119   : > { %694 = vst.msk [vmem:[%s1067_s26 + $0x1d0] sm:$0xff] %vm250_vm0, %v895_v23  ;;  %660 = vst.msk [vmem:[%s1067_s26 + $0xc0] sm:$0xff] %vm250_vm0, %v477_v24  ;;  %v605_v25 = vpop.f32.mrb[25].mxu1  ;;  %v864_v26 = vpop.f32.mrb[26].mxu0 }
 0x11a   : > { %692 = vst.msk [vmem:[%s1067_s26 + $0x1c0] sm:$0xff] %vm250_vm0, %v605_v25  ;;  %663 = vst.msk [vmem:[%s1067_s26 + $0xd8] sm:$0xff] %vm250_vm0, %v864_v26  ;;  %v896_v27 = vpop.f32.mrb[26].mxu1  ;;  %v480_v28 = vpop.f32.mrb[27].mxu0 }
 0x11b   : > { %695 = vst.msk [vmem:[%s1067_s26 + $0x1d8] sm:$0xff] %vm250_vm0, %v896_v27  ;;  %661 = vst.msk [vmem:[%s1067_s26 + $0xc8] sm:$0xff] %vm250_vm0, %v480_v28  ;;  %v608_v29 = vpop.f32.mrb[27].mxu1 }
 0x11c   : > { %693 = vst.msk [vmem:[%s1067_s26 + $0x1c8] sm:$0xff] %vm250_vm0, %v608_v29 }
 0x11f   : > { %v867_v30 = vpop.f32.mrb[28].mxu0 }
 0x120   : > { %666 = vst.msk [vmem:[%s1067_s26 + $0xf0] sm:$0xff] %vm250_vm0, %v867_v30  ;;  %v899_v31 = vpop.f32.mrb[28].mxu1  ;;  %v493_v32 = vpop.f32.mrb[29].mxu0 }
 0x121   : > { %698 = vst.msk [vmem:[%s1067_s26 + $0x1f0] sm:$0xff] %vm250_vm0, %v899_v31  ;;  %664 = vst.msk [vmem:[%s1067_s26 + $0xe0] sm:$0xff] %vm250_vm0, %v493_v32  ;;  %v621_v33 = vpop.f32.mrb[29].mxu1  ;;  %v868_v34 = vpop.f32.mrb[30].mxu0 }
 0x122   : > { %696 = vst.msk [vmem:[%s1067_s26 + $0x1e0] sm:$0xff] %vm250_vm0, %v621_v33  ;;  %667 = vst.msk [vmem:[%s1067_s26 + $0xf8] sm:$0xff] %vm250_vm0, %v868_v34  ;;  %v900_v35 = vpop.f32.mrb[30].mxu1  ;;  %v496_v36 = vpop.f32.mrb[31].mxu0 }
 0x123   : > { %699 = vst.msk [vmem:[%s1067_s26 + $0x1f8] sm:$0xff] %vm250_vm0, %v900_v35  ;;  %665 = vst.msk [vmem:[%s1067_s26 + $0xe8] sm:$0xff] %vm250_vm0, %v496_v36  ;;  %v624_v37 = vpop.f32.mrb[31].mxu1 }
 0x124   : > { %697 = vst.msk [vmem:[%s1067_s26 + $0x1e8] sm:$0xff] %vm250_vm0, %v624_v37 }
 0x125 PF: > { %s12_s9 = sadd.s32 1, %s919_s9  }
 0x126   : > { %p9_p4 = scmp.ge.s32.totalorder %s12_s9, 6  }
 0x128   :  { %11 = sbr.rel (!%p9_p4) target bundleno = 1 (0x1), region = 58 }

// kernel: mdta_forward.3
= control target key start
LH: loop header
LB: loop body
LE: loop exit
PB: predicated region body
PF: predicated region fallthrough
CT: control target
= control target key end

     0   :  { %s2592_s18 = smov 0   ;;  %s2594_s19 = smov 0   ;;  %s3724_s0 = inlined_call_operand.vmem [shape: f32[2,1024,32], index: 0, kind: input, shape index: {}, may-alias: {0,1,2}]   ;;  %s3725_s1 = inlined_call_operand.vmem [shape: f32[2,1024,32], index: 1, kind: input, shape index: {}, may-alias: {0,1,2}]   ;;  %s3726_s2 = inlined_call_operand.vmem [shape: f32[2,1024,32], index: 2, kind: input, shape index: {}, may-alias: {0,1,2}]   ;;  %s3727_s3 = inlined_call_operand.vmem [shape: f32[32,96], index: 3, kind: input, shape index: {}]   ;;  %s3728_s4 = inlined_call_operand.vmem [shape: f32[9,96], index: 4, kind: input, shape index: {}]   ;;  %s3729_s5 = inlined_call_operand.vmem [shape: f32[2,1024,96], index: 5, kind: output, shape index: {}]  }
   0x1   :  { %s2596_s20 = smov 0   ;;  %s2598_s21 = smov 0  }
   0x2   :  { %s2600_s22 = smov 0  }
   0x3 LB: > { %s24_s23 = sadd.s32 1, %s2551_s20  ;;  %s27_s24 = sadd.s32 1, %s2555_s21  ;;  %s2559_s22 = sphi %s2600_s22, %s15_s22   ;;  %s2555_s21 = sphi %s2598_s21, %s3853_s21   ;;  %s2551_s20 = sphi %s2596_s20, %s3852_s20   ;;  %s2547_s19 = sphi %s2594_s19, %s3851_s19   ;;  %s2543_s18 = sphi %s2592_s18, %s3850_s18  }
   0x4   : > { %p25_p0 = scmp.ge.s32.totalorder %s24_s23, 4  ;;  %p2258_p1 = scmp.ge.s32.totalorder %s2559_s22, 1 }
   0x5   : > { %p274_p2 = scmp.lt.s32.totalorder %s2559_s22, 9 }
   0x6   : > { %s3855_s23 = smov (%p25_p0, %s24_s23), 0  ;;  %s3857_s24 = smov (!%p25_p0, %s27_s24), %s2555_s21 }
   0x7   : > { %p275_p3 = pnand %p2258_p1, %p274_p2  ;;  %p29_p4 = scmp.ge.s32.totalorder %s3857_s24, 2 }
   0x9   : > { %s3859_s24 = smov (%p29_p4, %s3857_s24), 0  ;;  %278 = sbr.rel (%p275_p3) target bundleno = 402 (0x192), region = 40 }
  0x10   : > { %v393_v0 = vld [vmem:[%s3727_s3] sm:$0xff]  ;;  %v394_v1 = vld [vmem:[%s3727_s3 + $0x8] sm:$0xff]  ;;  %v395_v2 = vld [vmem:[%s3727_s3 + $0x10] sm:$0xff]  ;;  %s2259_s6 = sshll.u32 %s2543_s18, 5  ;;  %p337_p5 = scmp.lt.s32.totalorder %s2547_s19, 1  ;;  %vm468_vm0 = vcmask 261120  }
  0x11   : > { %v2634_v3 = vpack.c.bf16 %v394_v1, %v393_v0  ;;  %v396_v4 = vld [vmem:[%s3727_s3 + $0x18] sm:$0xff]  ;;  %p339_p6 = scmp.lt.s32.totalorder %s2259_s6, 127  ;;  %s2262_s9 = sshll.u32 %s2543_s18, 3  ;;  %vm399_vm1 = vcmask 778240   ;;  %vm679_vm2 = vcmask 785408  }
  0x12   : > { %v2640_v5 = vpack.c.bf16 %v396_v4, %v395_v2  ;;  %s3861_s19 = smov (!%p337_p5, %s2547_s19), 1  ;;  %s2263_s11 = sadd.s32 4294967295, %s2262_s9  ;;  %v2561_v2 = vmov 0.0  }
  0x13   : > { %2400 = vmatprep.subr.bf16.mxu0 %v2634_v3  ;;  %2452 = vmatprep.subr.bf16.mxu1 %v2634_v3  ;;  %s3863_s6 = smov (!%p339_p6, %s2259_s6), 127  ;;  %s2646_s10 = sshll.u32 %s3861_s19, 7  ;;  %401 = vst.msk [vmem:[#allocation2 + $0x28] sm:$0x1] %vm399_vm1, %v2561_v2  ;;  %400 = vst.msk [vmem:[#allocation2] sm:$0x1] %vm399_vm1, %v2561_v2 }
  0x14   : > { %2401 = vmatpush3.bf16.msra.mxu0 %v2634_v3  ;;  %2454 = vmatpush3.bf16.msra.mxu1 %v2634_v3  ;;  %s342_s12 = sadd.s32 %s2646_s10, %s3863_s6  ;;  %p348_p7 = scmp.gt.s32.totalorder %s2263_s11, 0  ;;  %402 = vst.msk [vmem:[#allocation2 + $0x50] sm:$0x1] %vm399_vm1, %v2561_v2  ;;  %403 = vst.msk [vmem:[#allocation2 + $0x78] sm:$0x1] %vm399_vm1, %v2561_v2 }
  0x15   : > { %2402 = vmatprep.subr.bf16.mxu0 %v2640_v5  ;;  %2453 = vmatprep.subr.bf16.mxu1 %v2640_v5  ;;  %s2653_s13 = sshll.u32 %s342_s12, 3  ;;  %p719_p8 = scmp.gt.s32.totalorder %s2543_s18, 0  ;;  %404 = vst.msk [vmem:[#allocation2 + $0xa0] sm:$0x1] %vm399_vm1, %v2561_v2  ;;  %405 = vst.msk [vmem:[#allocation2 + $0xc8] sm:$0x1] %vm399_vm1, %v2561_v2 }
  0x16   : > { %s2660_s16 = scalar_lea.vmem %s3724_s0, %s2653_s13  ;;  %s3865_s11 = smov (!%p348_p7, %s2263_s11), 0  ;;  %406 = vst.msk [vmem:[#allocation2 + $0xf0] sm:$0x1] %vm399_vm1, %v2561_v2  ;;  %407 = vst.msk [vmem:[#allocation2 + $0x118] sm:$0x1] %vm399_vm1, %v2561_v2 }
  0x17   : > { %v420_v6 = vld [vmem:[%s2660_s16] sm:$0xff]  ;;  %v421_v7 = vld [vmem:[%s2660_s16 + $0x8] sm:$0xff]  ;;  %v422_v11 = vld [vmem:[%s2660_s16 + $0x10] sm:$0xff]  ;;  %s2264_s17 = sshll.u32 %s3865_s11, 2  ;;  %s2676_s19 = sadd.s32 8, %s2262_s9 }
  0x18   : > { %2403 = vmatpush3.bf16.msra.mxu0 %v2640_v5  ;;  %2455 = vmatpush3.bf16.msra.mxu1 %v2640_v5  ;;  %v440_v8 = vld [vmem:[%s2660_s16 + $0xa0] sm:$0xff]  ;;  %v452_v9 = vpack.c.bf16 %v421_v7, %v420_v6  ;;  %v441_v10 = vld [vmem:[%s2660_s16 + $0xa8] sm:$0xff]  ;;  %v423_v12 = vld [vmem:[%s2660_s16 + $0x18] sm:$0xff]  ;;  %p353_p9 = scmp.lt.s32.totalorder %s2264_s17, 127  ;;  %p366_p10 = scmp.lt.s32.totalorder %s2676_s19, 31 }
  0x19   : > { %2436 = vmatprep.subr.bf16.mxu1 %v2634_v3  ;;  %v462_v13 = vpack.c.bf16 %v441_v10, %v440_v8  ;;  %v453_v14 = vpack.c.bf16 %v423_v12, %v422_v11  ;;  %v442_v15 = vld [vmem:[%s2660_s16 + $0xb0] sm:$0xff]  ;;  %v443_v16 = vld [vmem:[%s2660_s16 + $0xb8] sm:$0xff]  ;;  %v424_v17 = vld [vmem:[%s2660_s16 + $0x20] sm:$0xff]  ;;  %s2695_s25 = scalar_select %p719_p8, 255, 0 }
  0x1a   : > { %2404 = vmatprep.mubr.msk.bf16.mxu0 %vm468_vm0, %v452_v9  ;;  %v463_v18 = vpack.c.bf16 %v443_v16, %v442_v15  ;;  %v425_v19 = vld [vmem:[%s2660_s16 + $0x28] sm:$0xff]  ;;  %v444_v20 = vld [vmem:[%s2660_s16 + $0xc0] sm:$0xff]  ;;  %v426_v24 = vld [vmem:[%s2660_s16 + $0x30] sm:$0xff]  ;;  %s3867_s17 = smov (!%p353_p9, %s2264_s17), 127  ;;  %p733_p11 = scmp.lt.s32.totalorder %s2543_s18, 3 }
  0x1b   : > { %v445_v21 = vld [vmem:[%s2660_s16 + $0xc8] sm:$0xff]  ;;  %2424 = vmatprep.mubr.msk.bf16.mxu1 %vm468_vm0, %v462_v13  ;;  %2405 = vmatmul.mubr.msk.bf16.vlgmr.msra.gmra.mrb[0].mxu0 %vm468_vm0, %v453_v14  ;;  %v454_v22 = vpack.c.bf16 %v425_v19, %v424_v17  ;;  %v427_v25 = vld [vmem:[%s2660_s16 + $0x38] sm:$0xff]  ;;  %v446_v26 = vld [vmem:[%s2660_s16 + $0xd0] sm:$0xff]  ;;  %s356_s26 = sadd.s32 %s2646_s10, %s3867_s17  ;;  %s3869_s19 = smov (!%p366_p10, %s2676_s19), 31  ;;  %408 = vst.msk [vmem:[#allocation2 + $0x140] sm:$0x1] %vm399_vm1, %v2561_v2 }
  0x1c   : > { %v464_v23 = vpack.c.bf16 %v445_v21, %v444_v20  ;;  %2425 = vmatmul.mubr.msk.bf16.vlgmr.msra.gmra.mrb[0].mxu1 %vm468_vm0, %v463_v18  ;;  %v447_v27 = vld [vmem:[%s2660_s16 + $0xd8] sm:$0xff]  ;;  %v428_v28 = vld [vmem:[%s2660_s16 + $0x40] sm:$0xff]  ;;  %v429_v29 = vld [vmem:[%s2660_s16 + $0x48] sm:$0xff]  ;;  %v455_v32 = vpack.c.bf16 %v427_v25, %v426_v24  ;;  %s2266_s27 = sshll.u32 %s356_s26, 3  ;;  %s2268_s6 = sshll.u32 %s3869_s19, 2 }
  0x1d   : > { %2408 = vmatprep.mubr.msk.bf16.mxu0 %vm468_vm0, %v454_v22  ;;  %2437 = vmatpush3.bf16.msra.mxu1 %v2634_v3  ;;  %v448_v30 = vld [vmem:[%s2660_s16 + $0xe0] sm:$0xff]  ;;  %v449_v31 = vld [vmem:[%s2660_s16 + $0xe8] sm:$0xff]  ;;  %v465_v33 = vpack.c.bf16 %v447_v27, %v446_v26  ;;  %v456_v34 = vpack.c.bf16 %v429_v29, %v428_v28  ;;  %s2706_s30 = scalar_lea.vmem %s3725_s1, %s2266_s27  ;;  %v430_v36 = vld [vmem:[%s2660_s16 + $0x50] sm:$0xff]  ;;  %p371_p12 = scmp.lt.s32.totalorder %s2268_s6, 127  ;;  %409 = vst.msk [vmem:[#allocation2 + $0x168] sm:$0x1] %vm399_vm1, %v2561_v2 }
  0x1e   : > { %2428 = vmatprep.mubr.msk.bf16.mxu1 %vm468_vm0, %v464_v23  ;;  %2438 = vmatprep.subr.bf16.mxu1 %v2640_v5  ;;  %v466_v35 = vpack.c.bf16 %v449_v31, %v448_v30  ;;  %v431_v37 = vld [vmem:[%s2660_s16 + $0x58] sm:$0xff]  ;;  %v450_v38 = vld [vmem:[%s2660_s16 + $0xf0] sm:$0xff]  ;;  %v432_v40 = vld [vmem:[%s2660_s16 + $0x60] sm:$0xff]  ;;  %s2510_s7 = scalar_select %p733_p11, 255, 0 }
  0x1f   : > { %v451_v39 = vld [vmem:[%s2660_s16 + $0xf8] sm:$0xff]  ;;  %v433_v41 = vld [vmem:[%s2660_s16 + $0x68] sm:$0xff]  ;;  %v2499_v42 = vld [vmem:[%s2706_s30] sm:%s2695_s25]  ;;  %v457_v44 = vpack.c.bf16 %v431_v37, %v430_v36  ;;  %s3871_s6 = smov (!%p371_p12, %s2268_s6), 127  ;;  %410 = vst.msk [vmem:[#allocation2 + $0x21] sm:$0x1] %vm399_vm1, %v2561_v2  ;;  %s3253_s14 = scalar_lea.vmem %s3729_s5, %s2653_s13 }
  0x20   : > { %v2502_v43 = vld [vmem:[%s2706_s30 + $0x8] sm:%s2695_s25]  ;;  %v467_v45 = vpack.c.bf16 %v451_v39, %v450_v38  ;;  %v458_v46 = vpack.c.bf16 %v433_v41, %v432_v40  ;;  %v434_v48 = vld [vmem:[%s2660_s16 + $0x70] sm:$0xff]  ;;  %s374_s8 = sadd.s32 %s2646_s10, %s3871_s6  ;;  %v435_v49 = vld [vmem:[%s2660_s16 + $0x78] sm:$0xff]  ;;  %411 = vst.msk [vmem:[#allocation2 + $0x49] sm:$0x1] %vm399_vm1, %v2561_v2 }
  0x21   : > { %2439 = vmatpush3.bf16.msra.mxu1 %v2640_v5  ;;  %v731_v47 = vpack.c.bf16 %v2502_v43, %v2499_v42  ;;  %v436_v50 = vld [vmem:[%s2660_s16 + $0x80] sm:$0xff]  ;;  %v437_v51 = vld [vmem:[%s2660_s16 + $0x88] sm:$0xff]  ;;  %s2270_s9 = sshll.u32 %s374_s8, 3  ;;  %v2505_v52 = vld [vmem:[%s2706_s30 + $0x10] sm:%s2695_s25]  ;;  %v459_v55 = vpack.c.bf16 %v435_v49, %v434_v48  ;;  %412 = vst.msk [vmem:[#allocation2 + $0x71] sm:$0x1] %vm399_vm1, %v2561_v2 }
  0x22   : > { %2444 = vmatprep.subr.bf16.mxu1 %v2634_v3  ;;  %v2508_v53 = vld [vmem:[%s2706_s30 + $0x18] sm:%s2695_s25]  ;;  %s376_s12 = scalar_lea.vmem %s3726_s2, %s2270_s9  ;;  %v460_v57 = vpack.c.bf16 %v437_v51, %v436_v50  ;;  %v438_v60 = vld [vmem:[%s2660_s16 + $0x90] sm:$0xff]  ;;  %413 = vst.msk [vmem:[#allocation2 + $0x99] sm:$0x1] %vm399_vm1, %v2561_v2  ;;  %414 = vst.msk [vmem:[#allocation2 + $0xc1] sm:$0x1] %vm399_vm1, %v2561_v2 }
  0x23   : > { %2409 = vmatmul.mubr.msk.bf16.gmra.mrb[4].mxu0 %vm468_vm0, %v455_v32  ;;  %v2511_v54 = vld [vmem:[%s376_s12] sm:%s2510_s7]  ;;  %v732_v56 = vpack.c.bf16 %v2508_v53, %v2505_v52  ;;  %v2514_v58 = vld [vmem:[%s376_s12 + $0x8] sm:%s2510_s7]  ;;  %415 = vst.msk [vmem:[#allocation2 + $0xe9] sm:$0x1] %vm399_vm1, %v2561_v2  ;;  %416 = vst.msk [vmem:[#allocation2 + $0x111] sm:$0x1] %vm399_vm1, %v2561_v2 }
  0x24   : > { %2429 = vmatmul.mubr.msk.bf16.gmra.mrb[4].mxu1 %vm468_vm0, %v465_v33  ;;  %2412 = vmatprep.mubr.msk.bf16.mxu0 %vm468_vm0, %v456_v34  ;;  %v745_v59 = vpack.c.bf16 %v2514_v58, %v2511_v54  ;;  %v439_v61 = vld [vmem:[%s2660_s16 + $0x98] sm:$0xff]  ;;  %v2517_v62 = vld [vmem:[%s376_s12 + $0x10] sm:%s2510_s7]  ;;  %417 = vst.msk [vmem:[#allocation2 + $0x139] sm:$0x1] %vm399_vm1, %v2561_v2  ;;  %418 = vst.msk [vmem:[#allocation2 + $0x161] sm:$0x1] %vm399_vm1, %v2561_v2 }
  0x25   : > { %2432 = vmatprep.mubr.msk.bf16.mxu1 %vm468_vm0, %v466_v35  ;;  %v2520_v63 = vld [vmem:[%s376_s12 + $0x18] sm:%s2510_s7]  ;;  %v461_v0 = vpack.c.bf16 %v439_v61, %v438_v60  ;;  %419 = vst.msk [vmem:[#allocation2 + $0x189] sm:$0x1] %vm399_vm1, %v2561_v2  ;;  %v2788_v11 = vld [vmem:[%s3728_s4 + $0x4] ss:$0 sm:$0xff] }
  0x26   : > { %v746_v1 = vpack.c.bf16 %v2520_v63, %v2517_v62  ;;  %v2793_v12 = vld [vmem:[%s3728_s4 + $0x1] ss:$0 sm:$0xff]  ;;  %v2798_v13 = vld [vmem:[%s3728_s4 + $0x3] ss:$0 sm:$0xff]  ;;  %v2803_v14 = vld [vmem:[%s3728_s4] ss:$0 sm:$0xff] }
  0x27   : > { %v2808_v16 = vld [vmem:[%s3728_s4 + $0x5] ss:$0 sm:$0xff]  ;;  %v2819_v22 = vld [vmem:[%s3728_s4 + $0x2] ss:$0 sm:$0xff]  ;;  %v2879_v61 = vld [vmem:[%s3728_s4 + $0x6] ss:$0 sm:$0xff] }
  0x2b   : > { %2413 = vmatmul.mubr.msk.bf16.gmra.mrb[8].mxu0 %vm468_vm0, %v457_v44 }
  0x2c   : > { %2433 = vmatmul.mubr.msk.bf16.gmra.mrb[8].mxu1 %vm468_vm0, %v467_v45  ;;  %2416 = vmatprep.mubr.msk.bf16.mxu0 %vm468_vm0, %v458_v46 }
  0x2d   : > { %2440 = vmatprep.mubr.msk.bf16.mxu1 %vm468_vm0, %v731_v47 }
  0x33   : > { %2417 = vmatmul.mubr.msk.bf16.gmra.mrb[12].mxu0 %vm468_vm0, %v459_v55  ;;  %v2866_v55 = vld [vmem:[%s3728_s4 + $0x7] ss:$0 sm:$0xff] }
  0x34   : > { %2441 = vmatmul.mubr.msk.bf16.vlgmr.msra.gmra.mrb[12].mxu1 %vm468_vm0, %v732_v56  ;;  %2420 = vmatprep.mubr.msk.bf16.mxu0 %vm468_vm0, %v460_v57 }
  0x35   : > { %2445 = vmatpush3.bf16.msra.mxu1 %v2634_v3  ;;  %2448 = vmatprep.mubr.msk.bf16.mxu1 %vm468_vm0, %v745_v59 }
  0x36   : > { %2446 = vmatprep.subr.bf16.mxu1 %v2640_v5 }
  0x39   : > { %2447 = vmatpush3.bf16.msra.mxu1 %v2640_v5 }
  0x3b   : > { %2421 = vmatmul.mubr.msk.bf16.gmra.mrb[16].mxu0 %vm468_vm0, %v461_v0 }
  0x3c   : > { %2449 = vmatmul.mubr.msk.bf16.vlgmr.msra.gmra.mrb[16].mxu1 %vm468_vm0, %v746_v1 }
  0xee   : > { %v2406_v3 = vpop.f32.mrb[0].mxu0 }
  0xef   : > { %682 = vst.msk [vmem:[#allocation2 + $0x39] sm:$0xff] %vm679_vm2, %v2406_v3  ;;  %v551_v4 = vpop.f32.mrb[1].mxu0  ;;  %v2426_v5 = vpop.f32.mrb[0].mxu1 }
  0xf0   : > { %680 = vst.msk [vmem:[#allocation2 + $0x29] sm:$0xff] %vm679_vm2, %v551_v4  ;;  %v2407_v6 = vpop.f32.mrb[2].mxu0  ;;  %707 = vst.msk [vmem:[#allocation2 + $0x101] sm:$0xff] %vm679_vm2, %v2426_v5  ;;  %v631_v7 = vpop.f32.mrb[1].mxu1 }
  0xf1   : > { %683 = vst.msk [vmem:[#allocation2 + $0x41] sm:$0xff] %vm679_vm2, %v2407_v6  ;;  %v554_v8 = vpop.f32.mrb[3].mxu0  ;;  %705 = vst.msk [vmem:[#allocation2 + $0xf1] sm:$0xff] %vm679_vm2, %v631_v7  ;;  %v2427_v9 = vpop.f32.mrb[2].mxu1 }
  0xf2   : > { %681 = vst.msk [vmem:[#allocation2 + $0x31] sm:$0xff] %vm679_vm2, %v554_v8  ;;  %708 = vst.msk [vmem:[#allocation2 + $0x109] sm:$0xff] %vm679_vm2, %v2427_v9  ;;  %v634_v10 = vpop.f32.mrb[3].mxu1 }
  0xf3   : > { %706 = vst.msk [vmem:[#allocation2 + $0xf9] sm:$0xff] %vm679_vm2, %v634_v10 }
  0xf6   : > { %v937_v15 = vld [vmem:[#allocation2 + $0x39] sm:$0xff]  ;;  %v2410_v17 = vpop.f32.mrb[4].mxu0 }
  0xf7   : > { %v2811_v18 = vmul.f32 %v2788_v11, %v937_v15  ;;  %v2814_v19 = vmul.f32 %v2793_v12, %v937_v15  ;;  %v918_v20 = vld [vmem:[#allocation2 + $0x28] sm:$0xff]  ;;  %687 = vst.msk [vmem:[#allocation2 + $0x61] sm:$0xff] %vm679_vm2, %v2410_v17  ;;  %v2430_v23 = vpop.f32.mrb[4].mxu1  ;;  %v567_v24 = vpop.f32.mrb[5].mxu0 }
  0xf8   : > { %v935_v21 = vld [vmem:[#allocation2 + $0x29] sm:$0xff]  ;;  %v2823_v25 = vmul.f32 %v2798_v13, %v918_v20  ;;  %v1032_v27 = vmul.f32 %v2803_v14, %v918_v20  ;;  %v921_v29 = vld [vmem:[#allocation2 + $0x40] sm:$0xff]  ;;  %712 = vst.msk [vmem:[#allocation2 + $0x129] sm:$0xff] %vm679_vm2, %v2430_v23  ;;  %685 = vst.msk [vmem:[#allocation2 + $0x51] sm:$0xff] %vm679_vm2, %v567_v24  ;;  %v647_v32 = vpop.f32.mrb[5].mxu1  ;;  %v2411_v33 = vpop.f32.mrb[6].mxu0 }
  0xf9   : > { %3730 = vst [vmem:[#allocation3_spill] sm:$0xff] %v2811_v18  ;;  %v2826_v26 = vmul.f32 %v2788_v11, %v935_v21  ;;  %v1049_v28 = vmul.f32 %v2793_v12, %v935_v21  ;;  %v938_v30 = vld [vmem:[#allocation2 + $0x41] sm:$0xff]  ;;  %v2833_v34 = vmul.f32 %v2798_v13, %v921_v29  ;;  %v1035_v38 = vmul.f32 %v2803_v14, %v921_v29  ;;  %v919_v39 = vld [vmem:[#allocation2 + $0x30] sm:$0xff]  ;;  %v920_v40 = vld [vmem:[#allocation2 + $0x38] sm:$0xff]  ;;  %v2431_v41 = vpop.f32.mrb[6].mxu1  ;;  %v570_v42 = vpop.f32.mrb[7].mxu0 }
  0xfa   : > { %3731 = vst [vmem:[#allocation4_spill] sm:$0xff] %v2823_v25  ;;  %v954_v31 = vld [vmem:[#allocation2 + $0x3a] sm:$0xff]  ;;  %v2836_v35 = vmul.f32 %v2788_v11, %v938_v30  ;;  %v955_v36 = vld [vmem:[#allocation2 + $0x42] sm:$0xff]  ;;  %710 = vst.msk [vmem:[#allocation2 + $0x119] sm:$0xff] %vm679_vm2, %v647_v32  ;;  %v1052_v45 = vmul.f32 %v2793_v12, %v938_v30  ;;  %v650_v50 = vpop.f32.mrb[7].mxu1  ;;  %v2855_v52 = vmul.f32 %v2798_v13, %v919_v39 }
  0xfb   : > { %3732 = vst [vmem:[#allocation5_spill] sm:$0xff] %v2826_v26  ;;  %v2839_v37 = vmul.f32 %v2808_v16, %v954_v31  ;;  %688 = vst.msk [vmem:[#allocation2 + $0x69] sm:$0xff] %vm679_vm2, %v2411_v33  ;;  %v1053_v43 = vadd.f32 %v1049_v28, %v1032_v27  ;;  %v2845_v44 = vmul.f32 %v2808_v16, %v955_v36  ;;  %v936_v47 = vld [vmem:[#allocation2 + $0x31] sm:$0xff]  ;;  %v1616_v56 = vld [vmem:[#allocation2 + $0x101] sm:$0xff] }
  0xfc   : > { %3733 = vst [vmem:[#allocation6_spill] sm:$0xff] %v2836_v35  ;;  %v2849_v46 = vmul.f32 %v2819_v22, %v954_v31  ;;  %v952_v48 = vld [vmem:[#allocation2 + $0x2a] sm:$0xff]  ;;  %v953_v49 = vld [vmem:[#allocation2 + $0x32] sm:$0xff]  ;;  %713 = vst.msk [vmem:[#allocation2 + $0x131] sm:$0xff] %vm679_vm2, %v2431_v41  ;;  %v1069_v51 = vmul.f32 %v2819_v22, %v955_v36  ;;  %v2858_v53 = vmul.f32 %v2798_v13, %v920_v40 }
  0xfd   : > { %3734 = vst [vmem:[#allocation7_spill] sm:$0xff] %v2839_v37  ;;  %3735 = vst [vmem:[#allocation8_spill] sm:$0xff] %v2845_v44  ;;  %v2861_v54 = vmul.f32 %v2788_v11, %v936_v47  ;;  %v1056_v57 = vadd.f32 %v1052_v45, %v1035_v38  ;;  %v2870_v58 = vmul.f32 %v2808_v16, %v952_v48  ;;  %v1597_v2 = vld [vmem:[#allocation2 + $0xf0] sm:$0xff]  ;;  %v2907_v20 = vld [vmem:[%s3728_s4 + $0x8] ss:$0 sm:$0xff] }
  0xfe   : > { %686 = vst.msk [vmem:[#allocation2 + $0x59] sm:$0xff] %vm679_vm2, %v570_v42  ;;  %3736 = vst [vmem:[#allocation9_spill] sm:$0xff] %v2855_v52  ;;  %v2873_v59 = vmul.f32 %v2808_v16, %v953_v49  ;;  %v1033_v60 = vmul.f32 %v2803_v14, %v919_v39  ;;  %v1034_v62 = vmul.f32 %v2803_v14, %v920_v40  ;;  %v1614_v7 = vld [vmem:[#allocation2 + $0xf1] sm:$0xff]  ;;  %v2414_v8 = vpop.f32.mrb[8].mxu0  ;;  %v1633_v21 = vld [vmem:[#allocation2 + $0x102] sm:$0xff] }
  0xff   : > { %3737 = vst [vmem:[#allocation10_spill] sm:$0xff] %v2858_v53  ;;  %3738 = vst [vmem:[#allocation11_spill] sm:$0xff] %v2861_v54  ;;  %v1050_v63 = vmul.f32 %v2793_v12, %v936_v47  ;;  %v1066_v0 = vmul.f32 %v2819_v22, %v952_v48  ;;  %v1067_v1 = vmul.f32 %v2819_v22, %v953_v49  ;;  %v1634_v23 = vld [vmem:[#allocation2 + $0x10a] sm:$0xff]  ;;  %v2434_v24 = vpop.f32.mrb[8].mxu1  ;;  %v583_v27 = vpop.f32.mrb[9].mxu0 }
 0x100   : > { %711 = vst.msk [vmem:[#allocation2 + $0x121] sm:$0xff] %vm679_vm2, %v650_v50  ;;  %3739 = vst [vmem:[#allocation12_spill] sm:$0xff] %v2870_v58  ;;  %v2885_v3 = vadd.f32 %v1069_v51, %v1056_v57  ;;  %v2888_v4 = vmul.f32 %v2866_v55, %v1616_v56  ;;  %v2891_v5 = vmul.f32 %v2788_v11, %v1616_v56  ;;  %v1600_v31 = vld [vmem:[#allocation2 + $0x108] sm:$0xff]  ;;  %v663_v33 = vpop.f32.mrb[9].mxu1  ;;  %v2415_v36 = vpop.f32.mrb[10].mxu0  ;;  %v1631_v50 = vld [vmem:[#allocation2 + $0xf2] sm:$0xff] }
 0x101   : > { %3740 = vst [vmem:[#allocation13_spill] sm:$0xff] %v2873_v59  ;;  %v2894_v6 = vmul.f32 %v2793_v12, %v1616_v56  ;;  %v1054_v9 = vadd.f32 %v1050_v63, %v1033_v60  ;;  %v2897_v10 = vadd.f32 %v2814_v19, %v1034_v62  ;;  %v2899_v15 = vadd.f32 %v1066_v0, %v1053_v43  ;;  %v1617_v32 = vld [vmem:[#allocation2 + $0x109] sm:$0xff]  ;;  %v2435_v42 = vpop.f32.mrb[10].mxu1  ;;  %v586_v43 = vpop.f32.mrb[11].mxu0  ;;  %v1632_v51 = vld [vmem:[#allocation2 + $0xfa] sm:$0xff] }
 0x102   : > { %3741 = vst [vmem:[#allocation14_spill] sm:$0xff] %v2888_v4  ;;  %3742 = vst [vmem:[#allocation15_spill] sm:$0xff] %v2891_v5  ;;  %v2902_v17 = vmul.f32 %v2879_v61, %v1597_v2  ;;  %v2911_v28 = vmul.f32 %v2866_v55, %v1614_v7  ;;  %v2914_v19 = vmul.f32 %v2798_v13, %v1597_v2  ;;  %v666_v56 = vpop.f32.mrb[11].mxu1  ;;  %v1598_v0 = vld [vmem:[#allocation2 + $0xf8] sm:$0xff] }
 0x103   : > { %692 = vst.msk [vmem:[#allocation2 + $0x89] sm:$0xff] %vm679_vm2, %v2414_v8  ;;  %v2917_v29 = vmul.f32 %v2788_v11, %v1614_v7  ;;  %v1817_v30 = vmul.f32 %v2803_v14, %v1597_v2  ;;  %717 = vst.msk [vmem:[#allocation2 + $0x151] sm:$0xff] %vm679_vm2, %v2434_v24  ;;  %v2922_v38 = vadd.f32 %v1067_v1, %v1054_v9  ;;  %v1599_v8 = vld [vmem:[#allocation2 + $0x100] sm:$0xff]  ;;  %v986_v4 = vld [vmem:[#allocation2 + $0x51] sm:$0xff] }
 0x104   : > { %3743 = vst [vmem:[#allocation16_spill] sm:$0xff] %v2902_v17  ;;  %3744 = vst [vmem:[#allocation17_spill] sm:$0xff] %v2911_v28  ;;  %v1834_v39 = vmul.f32 %v2793_v12, %v1614_v7  ;;  %v2926_v40 = vmul.f32 %v2879_v61, %v1600_v31  ;;  %v2929_v41 = vmul.f32 %v2866_v55, %v1617_v32  ;;  %v1615_v24 = vld [vmem:[#allocation2 + $0xf9] sm:$0xff] }
 0x105   : > { %3745 = vst [vmem:[#allocation18_spill] sm:$0xff] %v2914_v19  ;;  %3746 = vst [vmem:[#allocation19_spill] sm:$0xff] %v2917_v29  ;;  %v2934_v45 = vmul.f32 %v2907_v20, %v1633_v21  ;;  %v2937_v47 = vmul.f32 %v2907_v20, %v1634_v23  ;;  %v2940_v48 = vmul.f32 %v2798_v13, %v1600_v31 }
 0x106   : > { %690 = vst.msk [vmem:[#allocation2 + $0x79] sm:$0xff] %vm679_vm2, %v583_v27  ;;  %3747 = vst [vmem:[#allocation20_spill] sm:$0xff] %v2926_v40  ;;  %v2943_v49 = vmul.f32 %v2788_v11, %v1617_v32  ;;  %v1838_v57 = vadd.f32 %v1834_v39, %v1817_v30  ;;  %v2948_v60 = vmul.f32 %v2808_v16, %v1633_v21  ;;  %v988_v39 = vld [vmem:[#allocation2 + $0x61] sm:$0xff]  ;;  %v1791_v40 = vld [vmem:[#allocation2 + $0x132] sm:$0xff] }
 0x107   : > { %3748 = vst [vmem:[#allocation21_spill] sm:$0xff] %v2929_v41  ;;  %715 = vst.msk [vmem:[#allocation2 + $0x141] sm:$0xff] %vm679_vm2, %v663_v33  ;;  %v2951_v62 = vmul.f32 %v2808_v16, %v1634_v23  ;;  %v1820_v63 = vmul.f32 %v2803_v14, %v1600_v31  ;;  %v1837_v1 = vmul.f32 %v2793_v12, %v1617_v32 }
 0x108   : > { %693 = vst.msk [vmem:[#allocation2 + $0x91] sm:$0xff] %vm679_vm2, %v2415_v36  ;;  %3749 = vst [vmem:[#allocation22_spill] sm:$0xff] %v2934_v45  ;;  %v2957_v2 = vmul.f32 %v2819_v22, %v1633_v21  ;;  %v1854_v7 = vmul.f32 %v2819_v22, %v1634_v23  ;;  %v2961_v9 = vmul.f32 %v2879_v61, %v1598_v0  ;;  %v2442_v45 = vpop.f32.mrb[12].mxu1 }
 0x109   : > { %3750 = vst [vmem:[#allocation23_spill] sm:$0xff] %v2937_v47  ;;  %3751 = vst [vmem:[#allocation24_spill] sm:$0xff] %v2940_v48  ;;  %v2964_v27 = vmul.f32 %v2879_v61, %v1599_v8  ;;  %v2967_v30 = vmul.f32 %v2866_v55, %v1615_v24  ;;  %v2970_v31 = vmul.f32 %v2907_v20, %v1631_v50  ;;  %v1757_v47 = vld [vmem:[#allocation2 + $0x130] sm:$0xff] }
 0x10a   : > { %3752 = vst [vmem:[#allocation25_spill] sm:$0xff] %v2943_v49  ;;  %718 = vst.msk [vmem:[#allocation2 + $0x159] sm:$0xff] %vm679_vm2, %v2435_v42  ;;  %v2973_v32 = vmul.f32 %v2907_v20, %v1632_v51  ;;  %v1841_v21 = vadd.f32 %v1837_v1, %v1820_v63  ;;  %v2976_v23 = vmul.f32 %v2798_v13, %v1598_v0  ;;  %v2418_v42 = vpop.f32.mrb[12].mxu0  ;;  %v1773_v1 = vld [vmem:[#allocation2 + $0x129] sm:$0xff]  ;;  %v1774_v48 = vld [vmem:[#allocation2 + $0x131] sm:$0xff] }
 0x10b   : > { %691 = vst.msk [vmem:[#allocation2 + $0x81] sm:$0xff] %vm679_vm2, %v586_v43  ;;  %3753 = vst [vmem:[#allocation26_spill] sm:$0xff] %v2948_v60  ;;  %v2979_v33 = vmul.f32 %v2798_v13, %v1599_v8  ;;  %v2982_v36 = vmul.f32 %v2788_v11, %v1615_v24  ;;  %v2985_v43 = vmul.f32 %v2808_v16, %v1631_v50  ;;  %v599_v5 = vpop.f32.mrb[13].mxu0 }
 0x10c   : > { %3754 = vst [vmem:[#allocation27_spill] sm:$0xff] %v2951_v62  ;;  %716 = vst.msk [vmem:[#allocation2 + $0x149] sm:$0xff] %vm679_vm2, %v666_v56  ;;  %v2988_v56 = vmul.f32 %v2808_v16, %v1632_v51  ;;  %v1818_v60 = vmul.f32 %v2803_v14, %v1598_v0  ;;  %v1819_v63 = vmul.f32 %v2803_v14, %v1599_v8  ;;  %v787_v0 = vpop.f32.mrb[13].mxu1  ;;  %v2419_v8 = vpop.f32.mrb[14].mxu0 }
 0x10d   : > { %3755 = vst [vmem:[#allocation28_spill] sm:$0xff] %v2961_v9  ;;  %3756 = vst [vmem:[#allocation29_spill] sm:$0xff] %v2964_v27  ;;  %v1851_v29 = vmul.f32 %v2819_v22, %v1631_v50  ;;  %v3010_v50 = vmul.f32 %v2793_v12, %v988_v39  ;;  %v2011_v59 = vmul.f32 %v2819_v22, %v1791_v40 }
 0x10e   : > { %3757 = vst [vmem:[#allocation30_spill] sm:$0xff] %v2967_v30  ;;  %3758 = vst [vmem:[#allocation31_spill] sm:$0xff] %v2970_v31 }
 0x10f   : > { %3759 = vst [vmem:[#allocation32_spill] sm:$0xff] %v2973_v32  ;;  %3760 = vst [vmem:[#allocation33_spill] sm:$0xff] %v2976_v23  ;;  %v2993_v32 = vadd.f32 %v1854_v7, %v1841_v21  ;;  %v969_v23 = vld [vmem:[#allocation2 + $0x50] sm:$0xff]  ;;  %v3004_v7 = vmul.f32 %v2866_v55, %v988_v39  ;;  %v1855_v21 = vadd.f32 %v1851_v29, %v1838_v57 }
 0x110   : > { %3761 = vst [vmem:[#allocation34_spill] sm:$0xff] %v2979_v33  ;;  %3762 = vst [vmem:[#allocation35_spill] sm:$0xff] %v2982_v36  ;;  %v1835_v36 = vmul.f32 %v2793_v12, %v1615_v24  ;;  %v3007_v24 = vmul.f32 %v2788_v11, %v988_v39  ;;  %v3029_v29 = vmul.f32 %v2866_v55, %v986_v4  ;;  %v989_v33 = vld [vmem:[#allocation2 + $0x69] sm:$0xff]  ;;  %v1163_v26 = vld [vmem:[#allocation2 + $0x92] sm:$0xff] }
 0x111   : > { %3763 = vst [vmem:[#allocation36_spill] sm:$0xff] %v2985_v43  ;;  %3764 = vst [vmem:[#allocation37_spill] sm:$0xff] %v2988_v56  ;;  %v1852_v43 = vmul.f32 %v2819_v22, %v1632_v51  ;;  %v1754_v56 = vld [vmem:[#allocation2 + $0x118] sm:$0xff]  ;;  %v1083_v57 = vmul.f32 %v2798_v13, %v969_v23 }
 0x112   : > { %697 = vst.msk [vmem:[#allocation2 + $0xb1] sm:$0xff] %vm679_vm2, %v2418_v42  ;;  %804 = vst.msk [vmem:[#allocation2 + $0x11] sm:$0xff] %vm679_vm2, %v2442_v45  ;;  %v3001_v42 = vadd.f32 %v2894_v6, %v1819_v63  ;;  %v2443_v45 = vpop.f32.mrb[14].mxu1  ;;  %v1839_v51 = vadd.f32 %v1835_v36, %v1818_v60  ;;  %v3015_v6 = vmul.f32 %v2866_v55, %v1773_v1  ;;  %v1771_v60 = vld [vmem:[#allocation2 + $0x119] sm:$0xff] }
 0x113   : > { %695 = vst.msk [vmem:[#allocation2 + $0xa1] sm:$0xff] %vm679_vm2, %v599_v5  ;;  %3765 = vst [vmem:[#allocation38_spill] sm:$0xff] %v3004_v7  ;;  %v602_v5 = vpop.f32.mrb[15].mxu0  ;;  %v3018_v63 = vmul.f32 %v2788_v11, %v1773_v1  ;;  %v790_v39 = vpop.f32.mrb[15].mxu1  ;;  %v1087_v31 = vadd.f32 %v1083_v57, %v2899_v15  ;;  %v3040_v30 = vmul.f32 %v2879_v61, %v1754_v56 }
 0x114   : > { %802 = vst.msk [vmem:[#allocation2 + $0x1] sm:$0xff] %vm679_vm2, %v787_v0  ;;  %698 = vst.msk [vmem:[#allocation2 + $0xb9] sm:$0xff] %vm679_vm2, %v2419_v8  ;;  %v3023_v0 = vmul.f32 %v2793_v12, %v1773_v1  ;;  %v3026_v8 = vmul.f32 %v2879_v61, %v969_v23  ;;  %v3033_v36 = vadd.f32 %v1852_v43, %v1839_v51  ;;  %v1005_v43 = vld [vmem:[#allocation2 + $0x62] sm:$0xff]  ;;  %v1006_v51 = vld [vmem:[#allocation2 + $0x6a] sm:$0xff]  ;;  %v2422_v9 = vpop.f32.mrb[16].mxu0 }
 0x115   : > { %3766 = vst [vmem:[#allocation39_spill] sm:$0xff] %v3015_v6  ;;  %805 = vst.msk [vmem:[#allocation2 + $0x19] sm:$0xff] %vm679_vm2, %v2443_v45  ;;  %v1100_v45 = vmul.f32 %v2788_v11, %v986_v4  ;;  %v1206_v1 = vmul.f32 %v2793_v12, %v986_v4  ;;  %v972_v6 = vld [vmem:[#allocation2 + $0x68] sm:$0xff]  ;;  %v3043_v19 = vmul.f32 %v2866_v55, %v1771_v60 }
 0x116   : > { %696 = vst.msk [vmem:[#allocation2 + $0xa9] sm:$0xff] %vm679_vm2, %v602_v5  ;;  %3767 = vst [vmem:[#allocation40_spill] sm:$0xff] %v3026_v8  ;;  %v1189_v5 = vmul.f32 %v2803_v14, %v969_v23  ;;  %v1885_v23 = vmul.f32 %v2788_v11, %v1771_v60  ;;  %v1974_v4 = vmul.f32 %v2803_v14, %v1754_v56 }
 0x117   : > { %3768 = vst [vmem:[#allocation41_spill] sm:$0xff] %v3029_v29  ;;  %803 = vst.msk [vmem:[#allocation2 + $0x9] sm:$0xff] %vm679_vm2, %v790_v39  ;;  %v1868_v39 = vmul.f32 %v2798_v13, %v1754_v56  ;;  %v1991_v28 = vmul.f32 %v2793_v12, %v1771_v60  ;;  %v3051_v15 = vadd.f32 %v1100_v45, %v1087_v31  ;;  %v987_v29 = vld [vmem:[#allocation2 + $0x59] sm:$0xff] }
 0x118   : > { %3769 = vst [vmem:[#allocation42_spill] sm:$0xff] %v3040_v30  ;;  %3770 = vst [vmem:[#allocation43_spill] sm:$0xff] %v3043_v19  ;;  %v3046_v27 = vadd.f32 %v1206_v1, %v1189_v5  ;;  %v3054_v30 = vmul.f32 %v2879_v61, %v972_v6  ;;  %v3057_v19 = vmul.f32 %v2866_v55, %v989_v33  ;;  %v2450_v5 = vpop.f32.mrb[16].mxu1  ;;  %v615_v1 = vpop.f32.mrb[17].mxu0 }
 0x119   : > { %v1872_v57 = vadd.f32 %v1868_v39, %v1855_v21  ;;  %702 = vst.msk [vmem:[#allocation2 + $0xd9] sm:$0xff] %vm679_vm2, %v2422_v9  ;;  %v3060_v17 = vadd.f32 %v1991_v28, %v1974_v4  ;;  %v3063_v56 = vmul.f32 %v2907_v20, %v1005_v43  ;;  %v3066_v60 = vmul.f32 %v2907_v20, %v1006_v51  ;;  %v1790_v21 = vld [vmem:[#allocation2 + $0x12a] sm:$0xff]  ;;  %v846_v45 = vpop.f32.mrb[17].mxu1  ;;  %v2423_v39 = vpop.f32.mrb[18].mxu0 }
 0x11a   : > { %3771 = vst [vmem:[#allocation44_spill] sm:$0xff] %v3054_v30  ;;  %3772 = vst [vmem:[#allocation45_spill] sm:$0xff] %v3057_v19  ;;  %v1086_v31 = vmul.f32 %v2798_v13, %v972_v6  ;;  %v1103_v28 = vmul.f32 %v2788_v11, %v989_v33  ;;  %v3075_v4 = vmul.f32 %v2808_v16, %v1005_v43  ;;  %v2451_v49 = vpop.f32.mrb[18].mxu1 }
 0x11b   : > { %3773 = vst [vmem:[#allocation46_spill] sm:$0xff] %v3063_v56  ;;  %3774 = vst [vmem:[#allocation47_spill] sm:$0xff] %v3066_v60  ;;  %v3071_v9 = vadd.f32 %v1885_v23, %v1872_v57  ;;  %v1120_v62 = vmul.f32 %v2808_v16, %v1006_v51  ;;  %v1192_v41 = vmul.f32 %v2803_v14, %v972_v6 }
 0x11c   : > { %864 = vst.msk [vmem:[#allocation2 + $0x179] sm:$0xff] %vm679_vm2, %v2450_v5  ;;  %700 = vst.msk [vmem:[#allocation2 + $0xc9] sm:$0xff] %vm679_vm2, %v615_v1  ;;  %v618_v5 = vpop.f32.mrb[19].mxu0  ;;  %v1090_v1 = vadd.f32 %v1086_v31, %v2885_v3  ;;  %v1209_v23 = vmul.f32 %v2793_v12, %v989_v33  ;;  %v3084_v57 = vmul.f32 %v2819_v22, %v1005_v43 }
 0x11d   : > { %862 = vst.msk [vmem:[#allocation2 + $0x169] sm:$0xff] %vm679_vm2, %v846_v45  ;;  %703 = vst.msk [vmem:[#allocation2 + $0xe1] sm:$0xff] %vm679_vm2, %v2423_v39  ;;  %v849_v45 = vpop.f32.mrb[19].mxu1  ;;  %v1226_v39 = vmul.f32 %v2819_v22, %v1006_v51  ;;  %v3090_v56 = vmul.f32 %v2879_v61, %v1757_v47  ;;  %v3093_v3 = vmul.f32 %v2866_v55, %v1774_v48  ;;  %v971_v51 = vld [vmem:[#allocation2 + $0x60] sm:$0xff] }
 0x11e   : > { %865 = vst.msk [vmem:[#allocation2 + $0x181] sm:$0xff] %vm679_vm2, %v2451_v49  ;;  %701 = vst.msk [vmem:[#allocation2 + $0xd1] sm:$0xff] %vm679_vm2, %v618_v5  ;;  %v3096_v33 = vmul.f32 %v2907_v20, %v1790_v21  ;;  %v1107_v6 = vadd.f32 %v1103_v28, %v1090_v1  ;;  %v1213_v43 = vadd.f32 %v1209_v23, %v1192_v41  ;;  %v970_v5 = vld [vmem:[#allocation2 + $0x58] sm:$0xff] }
 0x11f   : > { %3775 = vst [vmem:[#allocation48_spill] sm:$0xff] %v3090_v56  ;;  %3776 = vst [vmem:[#allocation49_spill] sm:$0xff] %v3093_v3  ;;  %v3100_v49 = vmul.f32 %v2907_v20, %v1791_v40  ;;  %v1871_v31 = vmul.f32 %v2798_v13, %v1757_v47  ;;  %v1888_v7 = vmul.f32 %v2788_v11, %v1774_v48 }
 0x120   : > { %3777 = vst [vmem:[#allocation50_spill] sm:$0xff] %v3096_v33  ;;  %863 = vst.msk [vmem:[#allocation2 + $0x171] sm:$0xff] %vm679_vm2, %v849_v45  ;;  %v3105_v56 = vmul.f32 %v2808_v16, %v1790_v21  ;;  %v1905_v3 = vmul.f32 %v2808_v16, %v1791_v40  ;;  %v1977_v33 = vmul.f32 %v2803_v14, %v1757_v47  ;;  %v1003_v45 = vld [vmem:[#allocation2 + $0x52] sm:$0xff] }
 0x121   : > { %3778 = vst [vmem:[#allocation51_spill] sm:$0xff] %v3100_v49  ;;  %v3109_v28 = vadd.f32 %v1120_v62, %v1107_v6  ;;  %v3111_v41 = vadd.f32 %v1226_v39, %v1213_v43  ;;  %v1875_v1 = vadd.f32 %v1871_v31, %v2993_v32  ;;  %v1994_v23 = vmul.f32 %v2793_v12, %v1774_v48  ;;  %v1004_v49 = vld [vmem:[#allocation2 + $0x5a] sm:$0xff] }
 0x122   : > { %v3116_v8 = vmul.f32 %v2819_v22, %v1790_v21  ;;  %v3120_v37 = vmul.f32 %v2879_v61, %v970_v5  ;;  %v3123_v47 = vmul.f32 %v2879_v61, %v971_v51  ;;  %v3126_v39 = vmul.f32 %v2866_v55, %v987_v29 }
 0x123   : > { %v1892_v62 = vadd.f32 %v1888_v7, %v1875_v1  ;;  %v1998_v6 = vadd.f32 %v1994_v23, %v1977_v33  ;;  %v3129_v32 = vmul.f32 %v2907_v20, %v1003_v45  ;;  %v3132_v48 = vmul.f32 %v2907_v20, %v1004_v49 }
 0x124   : > { %3779 = vst [vmem:[#allocation52_spill] sm:$0xff] %v3120_v37  ;;  %3780 = vst [vmem:[#allocation53_spill] sm:$0xff] %v3123_v47  ;;  %v1072_v40 = vadd.f32 %v2849_v46, %v2897_v10  ;;  %v1084_v21 = vmul.f32 %v2798_v13, %v970_v5  ;;  %v1085_v43 = vmul.f32 %v2798_v13, %v971_v51 }
 0x125   : > { %3781 = vst [vmem:[#allocation54_spill] sm:$0xff] %v3126_v39  ;;  %3782 = vst [vmem:[#allocation55_spill] sm:$0xff] %v3129_v32  ;;  %v3138_v31 = vadd.f32 %v1905_v3, %v1892_v62  ;;  %v3140_v7 = vadd.f32 %v2011_v59, %v1998_v6  ;;  %v1101_v33 = vmul.f32 %v2788_v11, %v987_v29  ;;  %v1755_v62 = vld [vmem:[#allocation2 + $0x120] sm:$0xff] }
 0x126   : > { %3783 = vst [vmem:[#allocation56_spill] sm:$0xff] %v3132_v48  ;;  %v1117_v1 = vmul.f32 %v2808_v16, %v1003_v45  ;;  %v1088_v23 = vadd.f32 %v1084_v21, %v2922_v38  ;;  %v1089_v32 = vadd.f32 %v1085_v43, %v1072_v40  ;;  %v1118_v48 = vmul.f32 %v2808_v16, %v1004_v49  ;;  %v1789_v6 = vld [vmem:[#allocation2 + $0x122] sm:$0xff]  ;;  %v1788_v43 = vld [vmem:[#allocation2 + $0x11a] sm:$0xff] }
 0x127   : > { %v1190_v39 = vmul.f32 %v2803_v14, %v970_v5  ;;  %v1191_v10 = vmul.f32 %v2803_v14, %v971_v51  ;;  %v1207_v3 = vmul.f32 %v2793_v12, %v987_v29  ;;  %v1223_v59 = vmul.f32 %v2819_v22, %v1003_v45  ;;  %v1756_v40 = vld [vmem:[#allocation2 + $0x128] sm:$0xff] }
 0x128   : > { %v1121_v46 = vadd.f32 %v1117_v1, %v3051_v15  ;;  %v1105_v37 = vadd.f32 %v1101_v33, %v1088_v23  ;;  %v3152_v47 = vadd.f32 %v3007_v24, %v1089_v32  ;;  %v1224_v38 = vmul.f32 %v2819_v22, %v1004_v49  ;;  %v1772_v45 = vld [vmem:[#allocation2 + $0x121] sm:$0xff] }
 0x129   : > { %v3156_v21 = vmul.f32 %v2879_v61, %v1755_v62  ;;  %v1211_v5 = vadd.f32 %v1207_v3, %v1190_v39  ;;  %v3159_v15 = vadd.f32 %v3010_v50, %v1191_v10  ;;  %v1227_v29 = vadd.f32 %v1223_v59, %v3046_v27 }
 0x12a   : > { %v3163_v51 = vmul.f32 %v2879_v61, %v1756_v40  ;;  %v3165_v33 = vadd.f32 %v1118_v48, %v1105_v37  ;;  %v3168_v24 = vmul.f32 %v2866_v55, %v1772_v45  ;;  %v3171_v49 = vmul.f32 %v2907_v20, %v1788_v43  ;;  %v1145_v37 = vld [vmem:[#allocation2 + $0x89] sm:$0xff] }
 0x12b   : > { %3784 = vst [vmem:[#allocation57_spill] sm:$0xff] %v3156_v21  ;;  %v3174_v39 = vmul.f32 %v2907_v20, %v1789_v6  ;;  %v3176_v50 = vadd.f32 %v1224_v38, %v1211_v5  ;;  %v1857_v27 = vadd.f32 %v2957_v2, %v3001_v42  ;;  %v1869_v32 = vmul.f32 %v2798_v13, %v1755_v62  ;;  %v1930_v42 = vld [vmem:[#allocation2 + $0x151] sm:$0xff] }
 0x12c   : > { %3785 = vst [vmem:[#allocation58_spill] sm:$0xff] %v3163_v51  ;;  %3786 = vst [vmem:[#allocation59_spill] sm:$0xff] %v3168_v24  ;;  %v1870_v1 = vmul.f32 %v2798_v13, %v1756_v40  ;;  %v1886_v48 = vmul.f32 %v2788_v11, %v1772_v45  ;;  %v1902_v23 = vmul.f32 %v2808_v16, %v1788_v43  ;;  %v1126_v51 = vld [vmem:[#allocation2 + $0x78] sm:$0xff] }
 0x12d   : > { %3787 = vst [vmem:[#allocation60_spill] sm:$0xff] %v3171_v49  ;;  %3788 = vst [vmem:[#allocation61_spill] sm:$0xff] %v3174_v39  ;;  %v1903_v10 = vmul.f32 %v2808_v16, %v1789_v6  ;;  %v1975_v3 = vmul.f32 %v2803_v14, %v1755_v62  ;;  %v1873_v59 = vadd.f32 %v1869_v32, %v3033_v36  ;;  %v1911_v32 = vld [vmem:[#allocation2 + $0x140] sm:$0xff] }
 0x12e   : > { %v1874_v38 = vadd.f32 %v1870_v1, %v1857_v27  ;;  %v1976_v5 = vmul.f32 %v2803_v14, %v1756_v40  ;;  %v1992_v2 = vmul.f32 %v2793_v12, %v1772_v45  ;;  %v1906_v39 = vadd.f32 %v1902_v23, %v3071_v9  ;;  %v1143_v45 = vld [vmem:[#allocation2 + $0x79] sm:$0xff]  ;;  %v1928_v1 = vld [vmem:[#allocation2 + $0x141] sm:$0xff] }
 0x12f   : > { %v2008_v49 = vmul.f32 %v2819_v22, %v1788_v43  ;;  %v2009_v24 = vmul.f32 %v2819_v22, %v1789_v6  ;;  %v3193_v21 = vmul.f32 %v2866_v55, %v1145_v37  ;;  %v1890_v58 = vadd.f32 %v1886_v48, %v1873_v59 }
 0x130   : > { %v3196_v62 = vadd.f32 %v3018_v63, %v1874_v38  ;;  %v1996_v36 = vadd.f32 %v1992_v2, %v1975_v3  ;;  %v3199_v40 = vadd.f32 %v3023_v0, %v1976_v5  ;;  %v3203_v9 = vmul.f32 %v2788_v11, %v1145_v37  ;;  %v1146_v38 = vld [vmem:[#allocation2 + $0x91] sm:$0xff] }
 0x131   : > { %v2012_v27 = vadd.f32 %v2008_v49, %v3060_v17  ;;  %v3206_v6 = vmul.f32 %v2793_v12, %v1145_v37  ;;  %v3209_v43 = vmul.f32 %v2866_v55, %v1930_v42  ;;  %v3211_v63 = vadd.f32 %v1903_v10, %v1890_v58  ;;  %v1129_v49 = vld [vmem:[#allocation2 + $0x90] sm:$0xff] }
 0x132   : > { %v3213_v48 = vadd.f32 %v2009_v24, %v1996_v36  ;;  %v3216_v0 = vmul.f32 %v2788_v11, %v1930_v42  ;;  %v1134_v17 = vmul.f32 %v2879_v61, %v1126_v51  ;;  %v1151_v23 = vmul.f32 %v2866_v55, %v1143_v45  ;;  %v1162_v2 = vld [vmem:[#allocation2 + $0x8a] sm:$0xff] }
 0x133   : > { %v1240_v37 = vmul.f32 %v2798_v13, %v1126_v51  ;;  %v1257_v3 = vmul.f32 %v2788_v11, %v1143_v45  ;;  %v1346_v59 = vmul.f32 %v2803_v14, %v1126_v51  ;;  %v1363_v58 = vmul.f32 %v2793_v12, %v1143_v45 }
 0x134   : > { %v1138_v5 = vadd.f32 %v1134_v17, %v1121_v46  ;;  %v1919_v24 = vmul.f32 %v2879_v61, %v1911_v32  ;;  %v1936_v10 = vmul.f32 %v2866_v55, %v1928_v1  ;;  %v2025_v36 = vmul.f32 %v2798_v13, %v1911_v32 }
 0x135   : > { %v1244_v42 = vadd.f32 %v1240_v37, %v1227_v29  ;;  %v2042_v54 = vmul.f32 %v2788_v11, %v1928_v1  ;;  %v1137_v18 = vmul.f32 %v2879_v61, %v1129_v49  ;;  %v3229_v53 = vadd.f32 %v1363_v58, %v1346_v59  ;;  %v1931_v59 = vld [vmem:[#allocation2 + $0x159] sm:$0xff] }
 0x136   : > { %v1155_v52 = vadd.f32 %v1151_v23, %v1138_v5  ;;  %v1923_v51 = vadd.f32 %v1919_v24, %v1906_v39  ;;  %v1154_v46 = vmul.f32 %v2866_v55, %v1146_v38  ;;  %v2029_v17 = vadd.f32 %v2025_v36, %v2012_v27  ;;  %v1914_v39 = vld [vmem:[#allocation2 + $0x158] sm:$0xff] }
 0x137   : > { %v3232_v45 = vadd.f32 %v1257_v3, %v1244_v42  ;;  %v1141_v25 = vadd.f32 %v1137_v18, %v3109_v28  ;;  %v3236_v29 = vmul.f32 %v2907_v20, %v1162_v2  ;;  %v1171_v1 = vmul.f32 %v2907_v20, %v1163_v26  ;;  %v1947_v28 = vld [vmem:[#allocation2 + $0x152] sm:$0xff]  ;;  %v1948_v58 = vld [vmem:[#allocation2 + $0x15a] sm:$0xff] }
 0x138   : > { %v3238_v32 = vadd.f32 %v1936_v10, %v1923_v51  ;;  %v1243_v23 = vmul.f32 %v2798_v13, %v1129_v49  ;;  %v1260_v37 = vmul.f32 %v2788_v11, %v1146_v38  ;;  %v3243_v5 = vadd.f32 %v2042_v54, %v2029_v17 }
 0x139   : > { %v1158_v3 = vadd.f32 %v1154_v46, %v1141_v25  ;;  %v3246_v27 = vmul.f32 %v2808_v16, %v1162_v2  ;;  %v1277_v18 = vmul.f32 %v2808_v16, %v1163_v26  ;;  %v1349_v10 = vmul.f32 %v2803_v14, %v1129_v49  ;;  %v1127_v49 = vld [vmem:[#allocation2 + $0x80] sm:$0xff] }
 0x13a   : > { %v1247_v24 = vadd.f32 %v1243_v23, %v3111_v41  ;;  %v1366_v54 = vmul.f32 %v2793_v12, %v1146_v38  ;;  %v3259_v25 = vmul.f32 %v2819_v22, %v1162_v2  ;;  %v1383_v36 = vmul.f32 %v2819_v22, %v1163_v26  ;;  %v1128_v23 = vld [vmem:[#allocation2 + $0x88] sm:$0xff] }
 0x13b   : > { %v1175_v42 = vadd.f32 %v1171_v1, %v1158_v3  ;;  %v1922_v51 = vmul.f32 %v2879_v61, %v1914_v39  ;;  %v1939_v46 = vmul.f32 %v2866_v55, %v1931_v59  ;;  %v3265_v19 = vmul.f32 %v2907_v20, %v1947_v28  ;;  %v1160_v3 = vld [vmem:[#allocation2 + $0x7a] sm:$0xff] }
 0x13c   : > { %v1264_v17 = vadd.f32 %v1260_v37, %v1247_v24  ;;  %v1370_v60 = vadd.f32 %v1366_v54, %v1349_v10  ;;  %v1956_v41 = vmul.f32 %v2907_v20, %v1948_v58  ;;  %v2028_v2 = vmul.f32 %v2798_v13, %v1914_v39  ;;  %v1144_v37 = vld [vmem:[#allocation2 + $0x81] sm:$0xff] }
 0x13d   : > { %1179 = vst.msk [vmem:[%s3253_s14 + $0x38] sm:$0xff] %vm679_vm2, %v1175_v42  ;;  %v1926_v38 = vadd.f32 %v1922_v51, %v3138_v31  ;;  %v2045_v26 = vmul.f32 %v2788_v11, %v1931_v59  ;;  %v3274_v1 = vmul.f32 %v2808_v16, %v1947_v28  ;;  %v1161_v24 = vld [vmem:[#allocation2 + $0x82] sm:$0xff]  ;;  %v2062_v30 = vmul.f32 %v2808_v16, %v1948_v58 }
 0x13e   : > { %v3276_v10 = vadd.f32 %v1277_v18, %v1264_v17  ;;  %v3278_v54 = vadd.f32 %v1383_v36, %v1370_v60  ;;  %v1123_v42 = vadd.f32 %v3075_v4, %v3152_v47  ;;  %v2032_v39 = vadd.f32 %v2028_v2, %v3140_v7 }
 0x13f   : > { %3789 = vst [vmem:[#allocation62_spill] sm:$0xff] %v3274_v1  ;;  %v1943_v31 = vadd.f32 %v1939_v46, %v1926_v38  ;;  %v1135_v59 = vmul.f32 %v2879_v61, %v1127_v49  ;;  %v1136_v28 = vmul.f32 %v2879_v61, %v1128_v23  ;;  %v1152_v51 = vmul.f32 %v2866_v55, %v1144_v37 }
 0x140   : > { %v1168_v18 = vmul.f32 %v2907_v20, %v1160_v3  ;;  %v1169_v60 = vmul.f32 %v2907_v20, %v1161_v24  ;;  %v1229_v58 = vadd.f32 %v3084_v57, %v3159_v15  ;;  %v2049_v4 = vadd.f32 %v2045_v26, %v2032_v39  ;;  %v1912_v26 = vld [vmem:[#allocation2 + $0x148] sm:$0xff]  ;;  %v1913_v39 = vld [vmem:[#allocation2 + $0x150] sm:$0xff] }
 0x141   : > { %v1960_v36 = vadd.f32 %v1956_v41, %v1943_v31  ;;  %v1139_v47 = vadd.f32 %v1135_v59, %v3165_v33  ;;  %v1140_v46 = vadd.f32 %v1136_v28, %v1123_v42  ;;  %v1241_v17 = vmul.f32 %v2798_v13, %v1127_v49 }
 0x142   : > { %v1172_v7 = vadd.f32 %v1168_v18, %v1155_v52  ;;  %v1242_v38 = vmul.f32 %v2798_v13, %v1128_v23  ;;  %v1258_v2 = vmul.f32 %v2788_v11, %v1144_v37  ;;  %v3297_v1 = vadd.f32 %v2062_v30, %v2049_v4  ;;  %v1929_v18 = vld [vmem:[#allocation2 + $0x149] sm:$0xff]  ;;  %v3361_v4 = vld [vmem:[%s3728_s4 + $0x6] ss:$0 sm:$0xff] }
 0x143   : > { %1964 = vst.msk [vmem:[%s3253_s14 + $0xd8] sm:$0xff] %vm679_vm2, %v1960_v36  ;;  %v1156_v44 = vadd.f32 %v1152_v51, %v1139_v47  ;;  %v1157_v35 = vadd.f32 %v3193_v21, %v1140_v46  ;;  %v1274_v57 = vmul.f32 %v2808_v16, %v1160_v3  ;;  %v1245_v15 = vadd.f32 %v1241_v17, %v3176_v50  ;;  %v1300_v17 = vld [vmem:[#allocation2 + $0xa1] sm:$0xff] }
 0x144   : > { %1176 = vst.msk [vmem:[%s3253_s14 + $0x20] sm:$0xff] %vm679_vm2, %v1172_v7  ;;  %v1246_v52 = vadd.f32 %v1242_v38, %v1229_v58  ;;  %v1275_v33 = vmul.f32 %v2808_v16, %v1161_v24  ;;  %v1347_v41 = vmul.f32 %v2803_v14, %v1127_v49  ;;  %v1348_v21 = vmul.f32 %v2803_v14, %v1128_v23  ;;  %v1945_v49 = vld [vmem:[#allocation2 + $0x142] sm:$0xff]  ;;  %v1946_v58 = vld [vmem:[#allocation2 + $0x14a] sm:$0xff] }
 0x145   : > { %v1173_v42 = vadd.f32 %v1169_v60, %v1156_v44  ;;  %v1174_v30 = vadd.f32 %v3236_v29, %v1157_v35  ;;  %v3308_v31 = vadd.f32 %v1274_v57, %v3232_v45  ;;  %v1262_v59 = vadd.f32 %v1258_v2, %v1245_v15  ;;  %v886_v7 = vld [vmem:[#allocation2 + $0x11] sm:$0xff] }
 0x146   : > { %v3312_v50 = vadd.f32 %v3203_v9, %v1246_v52  ;;  %v1364_v28 = vmul.f32 %v2793_v12, %v1144_v37  ;;  %v1380_v51 = vmul.f32 %v2819_v22, %v1160_v3  ;;  %v3321_v35 = vadd.f32 %v3206_v6, %v1348_v21 }
 0x147   : > { %1177 = vst.msk [vmem:[%s3253_s14 + $0x28] sm:$0xff] %vm679_vm2, %v1173_v42  ;;  %1178 = vst.msk [vmem:[%s3253_s14 + $0x30] sm:$0xff] %vm679_vm2, %v1174_v30  ;;  %v1381_v14 = vmul.f32 %v2819_v22, %v1161_v24  ;;  %v1908_v44 = vadd.f32 %v3105_v56, %v3196_v62  ;;  %v1920_v9 = vmul.f32 %v2879_v61, %v1912_v26  ;;  %v884_v42 = vld [vmem:[#allocation2 + $0x1] sm:$0xff] }
 0x148   : > { %v3327_v12 = vadd.f32 %v1275_v33, %v1262_v59  ;;  %v1368_v45 = vadd.f32 %v1364_v28, %v1347_v41  ;;  %v1384_v29 = vadd.f32 %v1380_v51, %v3229_v53  ;;  %v1921_v23 = vmul.f32 %v2879_v61, %v1913_v39  ;;  %v3343_v53 = vld [vmem:[%s3728_s4 + $0x7] ss:$0 sm:$0xff]  ;;  %v1302_v61 = vld [vmem:[#allocation2 + $0xb1] sm:$0xff]  ;;  %v3395_v30 = vld [vmem:[%s3728_s4 + $0x8] ss:$0 sm:$0xff] }
 0x149   : > { %v1924_v37 = vadd.f32 %v1920_v9, %v3211_v63  ;;  %v1937_v3 = vmul.f32 %v2866_v55, %v1929_v18  ;;  %v1953_v6 = vmul.f32 %v2907_v20, %v1945_v49  ;;  %v1954_v22 = vmul.f32 %v2907_v20, %v1946_v58  ;;  %v3348_v55 = vld [vmem:[%s3728_s4 + $0x4] ss:$0 sm:$0xff]  ;;  %v1286_v59 = vld [vmem:[#allocation2 + $0xb8] sm:$0xff] }
 0x14a   : > { %v3335_v24 = vadd.f32 %v1381_v14, %v1368_v45  ;;  %v1925_v56 = vadd.f32 %v1921_v23, %v1908_v44  ;;  %v2014_v62 = vadd.f32 %v3116_v8, %v3199_v40  ;;  %v2026_v60 = vmul.f32 %v2798_v13, %v1912_v26  ;;  %v3356_v40 = vld [vmem:[%s3728_s4 + $0x1] ss:$0 sm:$0xff]  ;;  %v1303_v28 = vld [vmem:[#allocation2 + $0xb9] sm:$0xff] }
 0x14b   : > { %v1941_v20 = vadd.f32 %v1937_v3, %v1924_v37  ;;  %v1957_v63 = vadd.f32 %v1953_v6, %v3238_v32  ;;  %v2027_v36 = vmul.f32 %v2798_v13, %v1913_v39  ;;  %v2043_v8 = vmul.f32 %v2788_v11, %v1929_v18  ;;  %v1283_v11 = vld [vmem:[#allocation2 + $0xa0] sm:$0xff]  ;;  %v1319_v51 = vld [vmem:[#allocation2 + $0xb2] sm:$0xff] }
 0x14c   : > { %v1942_v47 = vadd.f32 %v3209_v43, %v1925_v56  ;;  %v2030_v46 = vadd.f32 %v2026_v60, %v3213_v48  ;;  %v2059_v32 = vmul.f32 %v2808_v16, %v1945_v49  ;;  %v2060_v13 = vmul.f32 %v2808_v16, %v1946_v58  ;;  %v3378_v43 = vld [vmem:[%s3728_s4 + $0x3] ss:$0 sm:$0xff]  ;;  %v3383_v16 = vld [vmem:[%s3728_s4] ss:$0 sm:$0xff]  ;;  %v3426_v56 = vld [vmem:[%s3728_s4 + $0x5] ss:$0 sm:$0xff] }
 0x14d   : > { %v1958_v38 = vadd.f32 %v1954_v22, %v1941_v20  ;;  %1961 = vst.msk [vmem:[%s3253_s14 + $0xc0] sm:$0xff] %vm679_vm2, %v1957_v63  ;;  %v2031_v2 = vadd.f32 %v2027_v36, %v2014_v62  ;;  %v3370_v57 = vmul.f32 %v3343_v53, %v1302_v61  ;;  %v3373_v15 = vmul.f32 %v3348_v55, %v1302_v61  ;;  %v867_v26 = vld [vmem:[#allocation2] sm:$0xff] }
 0x14e   : > { %v1959_v48 = vadd.f32 %v3265_v19, %v1942_v47  ;;  %v2047_v52 = vadd.f32 %v2043_v8, %v2030_v46  ;;  %v3387_v33 = vadd.f32 %v2059_v32, %v3243_v5  ;;  %v3390_v41 = vmul.f32 %v3356_v40, %v1302_v61  ;;  %v1320_v14 = vld [vmem:[#allocation2 + $0xba] sm:$0xff]  ;;  %v903_v32 = vld [vmem:[#allocation2 + $0x12] sm:$0xff] }
 0x14f   : > { %1962 = vst.msk [vmem:[%s3253_s14 + $0xc8] sm:$0xff] %vm679_vm2, %v1958_v38  ;;  %v3400_v21 = vadd.f32 %v3216_v0, %v2031_v2  ;;  %v3403_v19 = vmul.f32 %v3356_v40, %v886_v7  ;;  %v1291_v5 = vmul.f32 %v3361_v4, %v1283_v11  ;;  %v1308_v39 = vmul.f32 %v3343_v53, %v1300_v17  ;;  %v870_v47 = vld [vmem:[#allocation2 + $0x18] sm:$0xff] }
 0x150   : > { %1963 = vst.msk [vmem:[%s3253_s14 + $0xd0] sm:$0xff] %vm679_vm2, %v1959_v48  ;;  %v3409_v18 = vadd.f32 %v2060_v13, %v2047_v52  ;;  %v1397_v49 = vmul.f32 %v3378_v43, %v1283_v11  ;;  %v1414_v58 = vmul.f32 %v3348_v55, %v1300_v17  ;;  %v1503_v0 = vmul.f32 %v3383_v16, %v1283_v11  ;;  %v887_v46 = vld [vmem:[#allocation2 + $0x19] sm:$0xff] }
 0x151   : > { %v1295_v44 = vadd.f32 %v1291_v5, %v3308_v31  ;;  %v1520_v9 = vmul.f32 %v3356_v40, %v1300_v17  ;;  %v875_v45 = vmul.f32 %v3383_v16, %v867_v26  ;;  %v892_v23 = vmul.f32 %v3356_v40, %v884_v42  ;;  %v904_v38 = vld [vmem:[#allocation2 + $0x1a] sm:$0xff]  ;;  %v1284_v26 = vld [vmem:[#allocation2 + $0xa8] sm:$0xff]  ;;  %v1285_v42 = vld [vmem:[#allocation2 + $0xb0] sm:$0xff] }
 0x152   : > { %v1401_v37 = vadd.f32 %v1397_v49, %v1384_v29  ;;  %v1294_v3 = vmul.f32 %v3361_v4, %v1286_v59  ;;  %v1311_v6 = vmul.f32 %v3343_v53, %v1303_v28  ;;  %v3421_v22 = vmul.f32 %v3395_v30, %v1319_v51  ;;  %v3436_v29 = vld [vmem:[%s3728_s4 + $0x2] ss:$0 sm:$0xff] }
 0x153   : > { %v1312_v31 = vadd.f32 %v1308_v39, %v1295_v44  ;;  %v3428_v62 = vadd.f32 %v1520_v9, %v1503_v0  ;;  %v3430_v60 = vadd.f32 %v892_v23, %v875_v45  ;;  %v1328_v61 = vmul.f32 %v3395_v30, %v1320_v14  ;;  %v1318_v0 = vld [vmem:[#allocation2 + $0xaa] sm:$0xff] }
 0x154   : > { %v1418_v20 = vadd.f32 %v1414_v58, %v1401_v37  ;;  %v1298_v63 = vadd.f32 %v1294_v3, %v3276_v10  ;;  %v1400_v36 = vmul.f32 %v3378_v43, %v1286_v59  ;;  %v1417_v8 = vmul.f32 %v3348_v55, %v1303_v28  ;;  %v1317_v58 = vld [vmem:[#allocation2 + $0xa2] sm:$0xff] }
 0x155   : > { %v3442_v13 = vmul.f32 %v3426_v56, %v1319_v51  ;;  %v1434_v7 = vmul.f32 %v3426_v56, %v1320_v14  ;;  %v1506_v11 = vmul.f32 %v3383_v16, %v1286_v59  ;;  %v1523_v17 = vmul.f32 %v3356_v40, %v1303_v28  ;;  %v1301_v28 = vld [vmem:[#allocation2 + $0xa9] sm:$0xff] }
 0x156   : > { %v1315_v2 = vadd.f32 %v1311_v6, %v1298_v63  ;;  %v1404_v10 = vadd.f32 %v1400_v36, %v3278_v54  ;;  %v3449_v48 = vmul.f32 %v3436_v29, %v1319_v51  ;;  %v1540_v52 = vmul.f32 %v3436_v29, %v1320_v14 }
 0x157   : > { %v1527_v5 = vadd.f32 %v1523_v17, %v1506_v11  ;;  %v878_v39 = vmul.f32 %v3383_v16, %v870_v47  ;;  %v895_v49 = vmul.f32 %v3356_v40, %v887_v46  ;;  %v3455_v59 = vmul.f32 %v3436_v29, %v903_v32 }
 0x158   : > { %v1332_v54 = vadd.f32 %v1328_v61, %v1315_v2  ;;  %v1421_v44 = vadd.f32 %v1417_v8, %v1404_v10  ;;  %v912_v51 = vmul.f32 %v3436_v29, %v904_v38  ;;  %v1280_v14 = vadd.f32 %v3246_v27, %v3312_v50 }
 0x159   : > { %v3460_v9 = vadd.f32 %v1540_v52, %v1527_v5  ;;  %v899_v45 = vadd.f32 %v895_v49, %v878_v39  ;;  %v1292_v23 = vmul.f32 %v3361_v4, %v1284_v26  ;;  %v1293_v37 = vmul.f32 %v3361_v4, %v1285_v42  ;;  %v3790_v52 = vld [vmem:[#allocation6_spill] sm:$0xff]  ;;  %v869_v49 = vld [vmem:[#allocation2 + $0x10] sm:$0xff] }
 0x15a   : > { %1336 = vst.msk [vmem:[%s3253_s14 + $0x58] sm:$0xff] %vm679_vm2, %v1332_v54  ;;  %v3466_v3 = vadd.f32 %v1434_v7, %v1421_v44  ;;  %v1309_v6 = vmul.f32 %v3343_v53, %v1301_v28  ;;  %v1325_v61 = vmul.f32 %v3395_v30, %v1317_v58  ;;  %v1326_v63 = vmul.f32 %v3395_v30, %v1318_v0 }
 0x15b   : > { %v916_v36 = vadd.f32 %v912_v51, %v899_v45  ;;  %v1296_v27 = vadd.f32 %v1292_v23, %v3327_v12  ;;  %v1297_v50 = vadd.f32 %v1293_v37, %v1280_v14  ;;  %v1386_v8 = vadd.f32 %v3259_v25, %v3321_v35  ;;  %v885_v14 = vld [vmem:[#allocation2 + $0x9] sm:$0xff]  ;;  %v3791_v23 = vld [vmem:[#allocation8_spill] sm:$0xff] }
 0x15c   : > { %v1329_v47 = vadd.f32 %v1325_v61, %v1312_v31  ;;  %v1398_v46 = vmul.f32 %v3378_v43, %v1284_v26  ;;  %v1399_v32 = vmul.f32 %v3378_v43, %v1285_v42  ;;  %v1415_v7 = vmul.f32 %v3348_v55, %v1301_v28  ;;  %v868_v31 = vld [vmem:[#allocation2 + $0x8] sm:$0xff] }
 0x15d   : > { %v933_v11 = vadd.f32 %v2833_v34, %v916_v36  ;;  %v1313_v17 = vadd.f32 %v1309_v6, %v1296_v27  ;;  %v1314_v38 = vadd.f32 %v3370_v57, %v1297_v50  ;;  %v1431_v2 = vmul.f32 %v3426_v56, %v1317_v58  ;;  %v901_v45 = vld [vmem:[#allocation2 + $0x2] sm:$0xff]  ;;  %v1459_v6 = vld [vmem:[#allocation2 + $0xd9] sm:$0xff] }
 0x15e   : > { %1333 = vst.msk [vmem:[%s3253_s14 + $0x40] sm:$0xff] %vm679_vm2, %v1329_v47  ;;  %v1402_v12 = vadd.f32 %v1398_v46, %v3335_v24  ;;  %v1403_v10 = vadd.f32 %v1399_v32, %v1386_v8  ;;  %v1432_v25 = vmul.f32 %v3426_v56, %v1318_v0  ;;  %v1504_v35 = vmul.f32 %v3383_v16, %v1284_v26  ;;  %v3792_v36 = vld [vmem:[#allocation44_spill] sm:$0xff]  ;;  %v1440_v47 = vld [vmem:[#allocation2 + $0xc8] sm:$0xff] }
 0x15f   : > { %v950_v5 = vadd.f32 %v3790_v52, %v933_v11  ;;  %v1330_v34 = vadd.f32 %v1326_v63, %v1313_v17  ;;  %v1331_v39 = vadd.f32 %v3421_v22, %v1314_v38  ;;  %v1435_v57 = vadd.f32 %v1431_v2, %v1418_v20  ;;  %v2087_v8 = vld [vmem:[#allocation2 + $0x179] sm:$0xff]  ;;  %v1457_v11 = vld [vmem:[#allocation2 + $0xc9] sm:$0xff] }
 0x160   : > { %v1419_v54 = vadd.f32 %v1415_v7, %v1402_v12  ;;  %v3488_v44 = vadd.f32 %v3373_v15, %v1403_v10  ;;  %v1505_v24 = vmul.f32 %v3383_v16, %v1285_v42  ;;  %v1521_v51 = vmul.f32 %v3356_v40, %v1301_v28  ;;  %v902_v15 = vld [vmem:[#allocation2 + $0xa] sm:$0xff]  ;;  %v3793_v17 = vld [vmem:[#allocation45_spill] sm:$0xff] }
 0x161   : > { %v967_v26 = vadd.f32 %v3791_v23, %v950_v5  ;;  %1334 = vst.msk [vmem:[%s3253_s14 + $0x48] sm:$0xff] %vm679_vm2, %v1330_v34  ;;  %1335 = vst.msk [vmem:[%s3253_s14 + $0x50] sm:$0xff] %vm679_vm2, %v1331_v39  ;;  %v1537_v22 = vmul.f32 %v3436_v29, %v1317_v58  ;;  %v1538_v20 = vmul.f32 %v3436_v29, %v1318_v0  ;;  %v3795_v34 = vld [vmem:[#allocation4_spill] sm:$0xff]  ;;  %v3797_v23 = vld [vmem:[#allocation9_spill] sm:$0xff] }
 0x162   : > { %v876_v37 = vmul.f32 %v3383_v16, %v868_v31  ;;  %v3500_v61 = vadd.f32 %v1432_v25, %v1419_v54  ;;  %v1525_v42 = vadd.f32 %v1521_v51, %v1504_v35  ;;  %v3503_v28 = vadd.f32 %v3390_v41, %v1505_v24  ;;  %v3794_v31 = vld [vmem:[#allocation47_spill] sm:$0xff]  ;;  %v3796_v54 = vld [vmem:[#allocation10_spill] sm:$0xff] }
 0x163   : > { %v877_v63 = vmul.f32 %v3383_v16, %v869_v49  ;;  %v984_v27 = vadd.f32 %v3792_v36, %v967_v26  ;;  %v1541_v50 = vadd.f32 %v1537_v22, %v3428_v62  ;;  %v893_v58 = vmul.f32 %v3356_v40, %v885_v14  ;;  %v2068_v49 = vld [vmem:[#allocation2 + $0x168] sm:$0xff]  ;;  %v3798_v22 = vld [vmem:[#allocation5_spill] sm:$0xff] }
 0x164   : > { %v909_v0 = vmul.f32 %v3436_v29, %v901_v45  ;;  %v3510_v46 = vadd.f32 %v1538_v20, %v1525_v42  ;;  %v910_v7 = vmul.f32 %v3436_v29, %v902_v15  ;;  %v3515_v41 = vmul.f32 %v3343_v53, %v1459_v6  ;;  %v2085_v45 = vld [vmem:[#allocation2 + $0x169] sm:$0xff] }
 0x165   : > { %v898_v32 = vadd.f32 %v3403_v19, %v877_v63  ;;  %v1001_v38 = vadd.f32 %v3793_v17, %v984_v27  ;;  %v897_v2 = vadd.f32 %v893_v58, %v876_v37  ;;  %v3520_v12 = vmul.f32 %v3348_v55, %v1459_v6  ;;  %v3799_v42 = vld [vmem:[#allocation3_spill] sm:$0xff]  ;;  %v1460_v58 = vld [vmem:[#allocation2 + $0xe1] sm:$0xff] }
 0x166   : > { %v913_v62 = vadd.f32 %v909_v0, %v3430_v60  ;;  %v3524_v25 = vmul.f32 %v3356_v40, %v1459_v6  ;;  %v3527_v19 = vmul.f32 %v3343_v53, %v2087_v8  ;;  %v1448_v35 = vmul.f32 %v3361_v4, %v1440_v47  ;;  %v1443_v6 = vld [vmem:[#allocation2 + $0xe0] sm:$0xff]  ;;  %v3800_v8 = vld [vmem:[#allocation11_spill] sm:$0xff] }
 0x167   : > { %v915_v10 = vadd.f32 %v3455_v59, %v898_v32  ;;  %v1018_v52 = vadd.f32 %v3794_v31, %v1001_v38  ;;  %v914_v5 = vadd.f32 %v910_v7, %v897_v2  ;;  %v1465_v60 = vmul.f32 %v3343_v53, %v1457_v11  ;;  %v1476_v0 = vld [vmem:[#allocation2 + $0xda] sm:$0xff]  ;;  %v1477_v2 = vld [vmem:[#allocation2 + $0xe2] sm:$0xff] }
 0x168   : > { %v930_v39 = vadd.f32 %v3795_v34, %v913_v62  ;;  %v1452_v51 = vadd.f32 %v1448_v35, %v1435_v57  ;;  %v1554_v59 = vmul.f32 %v3378_v43, %v1440_v47  ;;  %v1571_v14 = vmul.f32 %v3348_v55, %v1457_v11  ;;  %v3801_v7 = vld [vmem:[#allocation12_spill] sm:$0xff]  ;;  %v3803_v31 = vld [vmem:[#allocation13_spill] sm:$0xff] }
 0x169   : > { %v932_v24 = vadd.f32 %v3796_v54, %v915_v10  ;;  %1022 = vst.msk [vmem:[%s3253_s14 + $0x18] sm:$0xff] %vm679_vm2, %v1018_v52  ;;  %v931_v26 = vadd.f32 %v3797_v23, %v914_v5  ;;  %v1660_v37 = vmul.f32 %v3383_v16, %v1440_v47  ;;  %v1677_v15 = vmul.f32 %v3356_v40, %v1457_v11  ;;  %v3802_v11 = vld [vmem:[#allocation7_spill] sm:$0xff]  ;;  %v3804_v5 = vld [vmem:[#allocation40_spill] sm:$0xff] }
 0x16a   : > { %v947_v20 = vadd.f32 %v3798_v22, %v930_v39  ;;  %v3543_v36 = vadd.f32 %v1465_v60, %v1452_v51  ;;  %v1558_v57 = vadd.f32 %v1554_v59, %v1541_v50  ;;  %v2076_v27 = vmul.f32 %v3361_v4, %v2068_v49  ;;  %v3805_v49 = vld [vmem:[#allocation53_spill] sm:$0xff] }
 0x16b   : > { %v949_v63 = vadd.f32 %v3799_v42, %v932_v24  ;;  %v948_v32 = vadd.f32 %v3800_v8, %v931_v26  ;;  %v3548_v38 = vadd.f32 %v1677_v15, %v1660_v37  ;;  %v2093_v47 = vmul.f32 %v3343_v53, %v2085_v45  ;;  %v3807_v45 = vld [vmem:[#allocation41_spill] sm:$0xff]  ;;  %v3810_v8 = vld [vmem:[#allocation55_spill] sm:$0xff] }
 0x16c   : > { %v964_v17 = vadd.f32 %v3801_v7, %v947_v20  ;;  %v3552_v10 = vadd.f32 %v1571_v14, %v1558_v57  ;;  %v2080_v35 = vadd.f32 %v2076_v27, %v3387_v33  ;;  %v1451_v50 = vmul.f32 %v3361_v4, %v1443_v6  ;;  %v3806_v33 = vld [vmem:[#allocation52_spill] sm:$0xff]  ;;  %v3808_v20 = vld [vmem:[#allocation38_spill] sm:$0xff] }
 0x16d   : > { %v966_v62 = vadd.f32 %v3802_v11, %v949_v63  ;;  %v965_v52 = vadd.f32 %v3803_v31, %v948_v32  ;;  %v1468_v39 = vmul.f32 %v3343_v53, %v1460_v58  ;;  %v3560_v60 = vmul.f32 %v3395_v30, %v1476_v0  ;;  %v3809_v57 = vld [vmem:[#allocation54_spill] sm:$0xff]  ;;  %v2104_v11 = vld [vmem:[#allocation2 + $0x17a] sm:$0xff] }
 0x16e   : > { %v981_v34 = vadd.f32 %v3804_v5, %v964_v17  ;;  %v3563_v24 = vadd.f32 %v2093_v47, %v2080_v35  ;;  %v1455_v51 = vadd.f32 %v1451_v50, %v3466_v3  ;;  %v1485_v59 = vmul.f32 %v3395_v30, %v1477_v2  ;;  %v2071_v3 = vld [vmem:[#allocation2 + $0x180] sm:$0xff]  ;;  %v3811_v35 = vld [vmem:[#allocation46_spill] sm:$0xff] }
 0x16f   : > { %v983_v54 = vadd.f32 %v3805_v49, %v966_v62  ;;  %v982_v14 = vadd.f32 %v3806_v33, %v965_v52  ;;  %v1557_v26 = vmul.f32 %v3378_v43, %v1443_v6  ;;  %v1574_v22 = vmul.f32 %v3348_v55, %v1460_v58  ;;  %v2088_v47 = vld [vmem:[#allocation2 + $0x181] sm:$0xff]  ;;  %v1458_v33 = vld [vmem:[#allocation2 + $0xd1] sm:$0xff] }
 0x170   : > { %v998_v23 = vadd.f32 %v3807_v45, %v981_v34  ;;  %v1472_v15 = vadd.f32 %v1468_v39, %v1455_v51  ;;  %v3573_v42 = vmul.f32 %v3426_v56, %v1476_v0  ;;  %v1591_v63 = vmul.f32 %v3426_v56, %v1477_v2  ;;  %v2105_v62 = vld [vmem:[#allocation2 + $0x182] sm:$0xff]  ;;  %v1441_v34 = vld [vmem:[#allocation2 + $0xd0] sm:$0xff]  ;;  %v3812_v39 = vld [vmem:[#allocation56_spill] sm:$0xff] }
 0x171   : > { %v1000_v37 = vadd.f32 %v3808_v20, %v983_v54  ;;  %v999_v27 = vadd.f32 %v3809_v57, %v982_v14  ;;  %v1561_v7 = vadd.f32 %v1557_v26, %v3460_v9  ;;  %v1663_v17 = vmul.f32 %v3383_v16, %v1443_v6  ;;  %v1442_v51 = vld [vmem:[#allocation2 + $0xd8] sm:$0xff]  ;;  %v1474_v14 = vld [vmem:[#allocation2 + $0xca] sm:$0xff] }
 0x172   : > { %v1015_v32 = vadd.f32 %v3810_v8, %v998_v23  ;;  %v1489_v31 = vadd.f32 %v1485_v59, %v1472_v15  ;;  %v1680_v52 = vmul.f32 %v3356_v40, %v1460_v58  ;;  %v3583_v5 = vmul.f32 %v3436_v29, %v1476_v0  ;;  %v1475_v23 = vld [vmem:[#allocation2 + $0xd2] sm:$0xff] }
 0x173   : > { %v1017_v50 = vadd.f32 %v3811_v35, %v1000_v37  ;;  %v1016_v49 = vadd.f32 %v3812_v39, %v999_v27  ;;  %v1578_v9 = vadd.f32 %v1574_v22, %v1561_v7  ;;  %v1697_v6 = vmul.f32 %v3436_v29, %v1477_v2  ;;  %v3813_v27 = vld [vmem:[#allocation20_spill] sm:$0xff] }
 0x174   : > { %1019 = vst.msk [vmem:[%s3253_s14] sm:$0xff] %vm679_vm2, %v1015_v32  ;;  %v2079_v54 = vmul.f32 %v3361_v4, %v2071_v3  ;;  %1493 = vst.msk [vmem:[%s3253_s14 + $0x78] sm:$0xff] %vm679_vm2, %v1489_v31  ;;  %v1684_v58 = vadd.f32 %v1680_v52, %v1663_v17  ;;  %v2096_v0 = vmul.f32 %v3343_v53, %v2088_v47  ;;  %v3814_v7 = vld [vmem:[#allocation24_spill] sm:$0xff]  ;;  %v3816_v52 = vld [vmem:[#allocation25_spill] sm:$0xff] }
 0x175   : > { %1021 = vst.msk [vmem:[%s3253_s14 + $0x10] sm:$0xff] %vm679_vm2, %v1017_v50  ;;  %v3596_v59 = vmul.f32 %v3395_v30, %v2104_v11  ;;  %v2113_v45 = vmul.f32 %v3395_v30, %v2105_v62  ;;  %1020 = vst.msk [vmem:[%s3253_s14 + $0x8] sm:$0xff] %vm679_vm2, %v1016_v49  ;;  %v1595_v2 = vadd.f32 %v1591_v63, %v1578_v9  ;;  %v3815_v11 = vld [vmem:[#allocation21_spill] sm:$0xff]  ;;  %v3817_v9 = vld [vmem:[#allocation23_spill] sm:$0xff] }
 0x176   : > { %v2083_v26 = vadd.f32 %v2079_v54, %v3297_v1  ;;  %v1437_v22 = vadd.f32 %v3442_v13, %v3488_v44  ;;  %v1449_v20 = vmul.f32 %v3361_v4, %v1441_v34  ;;  %v1701_v37 = vadd.f32 %v1697_v6, %v1684_v58  ;;  %v3818_v58 = vld [vmem:[#allocation27_spill] sm:$0xff] }
 0x177   : > { %v1450_v15 = vmul.f32 %v3361_v4, %v1442_v51  ;;  %v1466_v3 = vmul.f32 %v3343_v53, %v1458_v33  ;;  %v1482_v57 = vmul.f32 %v3395_v30, %v1474_v14  ;;  %v1612_v8 = vadd.f32 %v3813_v27, %v1595_v2 }
 0x178   : > { %v2100_v32 = vadd.f32 %v2096_v0, %v2083_v26  ;;  %v1453_v63 = vadd.f32 %v1449_v20, %v3500_v61  ;;  %v1483_v1 = vmul.f32 %v3395_v30, %v1475_v23  ;;  %v1718_v13 = vadd.f32 %v3814_v7, %v1701_v37  ;;  %v3824_v7 = vld [vmem:[#allocation62_spill] sm:$0xff] }
 0x179   : > { %v1454_v44 = vadd.f32 %v1450_v15, %v1437_v22  ;;  %v1486_v17 = vadd.f32 %v1482_v57, %v3543_v36  ;;  %v1543_v47 = vadd.f32 %v3449_v48, %v3503_v28  ;;  %v1629_v62 = vadd.f32 %v3815_v11, %v1612_v8  ;;  %v3819_v22 = vld [vmem:[#allocation48_spill] sm:$0xff] }
 0x17a   : > { %v2117_v35 = vadd.f32 %v2113_v45, %v2100_v32  ;;  %v1470_v50 = vadd.f32 %v1466_v3, %v1453_v63  ;;  %v1555_v31 = vmul.f32 %v3378_v43, %v1441_v34  ;;  %v1735_v61 = vadd.f32 %v3816_v52, %v1718_v13  ;;  %v3820_v3 = vld [vmem:[#allocation16_spill] sm:$0xff]  ;;  %v3830_v52 = vld [vmem:[#allocation34_spill] sm:$0xff] }
 0x17b   : > { %v1471_v39 = vadd.f32 %v3515_v41, %v1454_v44  ;;  %1490 = vst.msk [vmem:[%s3253_s14 + $0x60] sm:$0xff] %vm679_vm2, %v1486_v17  ;;  %v1556_v49 = vmul.f32 %v3378_v43, %v1442_v51  ;;  %v1572_v36 = vmul.f32 %v3348_v55, %v1458_v33  ;;  %v1646_v48 = vadd.f32 %v3817_v9, %v1629_v62  ;;  %v3822_v63 = vld [vmem:[#allocation28_spill] sm:$0xff]  ;;  %v3826_v44 = vld [vmem:[#allocation29_spill] sm:$0xff]  ;;  %v3828_v62 = vld [vmem:[#allocation30_spill] sm:$0xff] }
 0x17c   : > { %2121 = vst.msk [vmem:[%s3253_s14 + $0xf8] sm:$0xff] %vm679_vm2, %v2117_v35  ;;  %v1487_v28 = vadd.f32 %v1483_v1, %v1470_v50  ;;  %v1559_v6 = vadd.f32 %v1555_v31, %v3510_v46  ;;  %v1588_v54 = vmul.f32 %v3426_v56, %v1474_v14  ;;  %v1752_v0 = vadd.f32 %v3818_v58, %v1735_v61  ;;  %v2070_v13 = vld [vmem:[#allocation2 + $0x178] sm:$0xff]  ;;  %v3829_v50 = vld [vmem:[#allocation31_spill] sm:$0xff] }
 0x17d   : > { %v1488_v41 = vadd.f32 %v3560_v60, %v1471_v39  ;;  %v1560_v45 = vadd.f32 %v1556_v49, %v1543_v47  ;;  %v1589_v2 = vmul.f32 %v3426_v56, %v1475_v23  ;;  %1650 = vst.msk [vmem:[%s3253_s14 + $0x98] sm:$0xff] %vm679_vm2, %v1646_v48  ;;  %v1661_v26 = vmul.f32 %v3383_v16, %v1441_v34  ;;  %v3821_v34 = vld [vmem:[#allocation49_spill] sm:$0xff]  ;;  %v3827_v47 = vld [vmem:[#allocation18_spill] sm:$0xff]  ;;  %v2086_v11 = vld [vmem:[#allocation2 + $0x171] sm:$0xff] }
 0x17e   : > { %1491 = vst.msk [vmem:[%s3253_s14 + $0x68] sm:$0xff] %vm679_vm2, %v1487_v28  ;;  %v1576_v55 = vadd.f32 %v1572_v36, %v1559_v6  ;;  %v1592_v43 = vadd.f32 %v1588_v54, %v3552_v10  ;;  %v1662_v46 = vmul.f32 %v3383_v16, %v1442_v51  ;;  %v1769_v20 = vadd.f32 %v3819_v22, %v1752_v0  ;;  %v3832_v49 = vld [vmem:[#allocation33_spill] sm:$0xff]  ;;  %v3833_v9 = vld [vmem:[#allocation19_spill] sm:$0xff]  ;;  %v3834_v58 = vld [vmem:[#allocation32_spill] sm:$0xff] }
 0x17f   : > { %1492 = vst.msk [vmem:[%s3253_s14 + $0x70] sm:$0xff] %vm679_vm2, %v1488_v41  ;;  %v1577_v60 = vadd.f32 %v3520_v12, %v1560_v45  ;;  %v1678_v37 = vmul.f32 %v3356_v40, %v1458_v33  ;;  %v1694_v56 = vmul.f32 %v3436_v29, %v1474_v14  ;;  %v1695_v10 = vmul.f32 %v3436_v29, %v1475_v23  ;;  %v2069_v12 = vld [vmem:[#allocation2 + $0x170] sm:$0xff]  ;;  %v3823_v33 = vld [vmem:[#allocation17_spill] sm:$0xff] }
 0x180   : > { %v1593_v15 = vadd.f32 %v1589_v2, %v1576_v55  ;;  %v1609_v57 = vadd.f32 %v3820_v3, %v1592_v43  ;;  %v1683_v27 = vadd.f32 %v3524_v25, %v1662_v46  ;;  %v1786_v8 = vadd.f32 %v3821_v34, %v1769_v20  ;;  %v3825_v29 = vld [vmem:[#allocation51_spill] sm:$0xff]  ;;  %v3836_v43 = vld [vmem:[#allocation22_spill] sm:$0xff]  ;;  %v3838_v20 = vld [vmem:[#allocation36_spill] sm:$0xff] }
 0x181   : > { %v1594_v16 = vadd.f32 %v3573_v42, %v1577_v60  ;;  %v1682_v51 = vadd.f32 %v1678_v37, %v1661_v26  ;;  %v1698_v32 = vadd.f32 %v1694_v56, %v3548_v38  ;;  %v2065_v25 = vadd.f32 %v3824_v7, %v3400_v21  ;;  %v3831_v21 = vld [vmem:[#allocation14_spill] sm:$0xff]  ;;  %v2103_v54 = vld [vmem:[#allocation2 + $0x172] sm:$0xff] }
 0x182   : > { %v1610_v40 = vadd.f32 %v3822_v63, %v1593_v15  ;;  %v1626_v14 = vadd.f32 %v3823_v33, %v1609_v57  ;;  %v1700_v1 = vadd.f32 %v3583_v5, %v1683_v27  ;;  %v1803_v23 = vadd.f32 %v3825_v29, %v1786_v8  ;;  %v2102_v6 = vld [vmem:[#allocation2 + $0x16a] sm:$0xff] }
 0x183   : > { %v1611_v17 = vadd.f32 %v3826_v44, %v1594_v16  ;;  %v1699_v42 = vadd.f32 %v1695_v10, %v1682_v51  ;;  %v1715_v38 = vadd.f32 %v3827_v47, %v1698_v32  ;;  %v2077_v5 = vmul.f32 %v3361_v4, %v2069_v12  ;;  %v3835_v41 = vld [vmem:[#allocation15_spill] sm:$0xff]  ;;  %v3839_v37 = vld [vmem:[#allocation26_spill] sm:$0xff]  ;;  %v3843_v12 = vld [vmem:[#allocation57_spill] sm:$0xff] }
 0x184   : > { %v1627_v35 = vadd.f32 %v3828_v62, %v1610_v40  ;;  %v1643_v31 = vadd.f32 %v3829_v50, %v1626_v14  ;;  %v1717_v61 = vadd.f32 %v3830_v52, %v1700_v1  ;;  %1807 = vst.msk [vmem:[%s3253_s14 + $0xb8] sm:$0xff] %vm679_vm2, %v1803_v23  ;;  %v2078_v28 = vmul.f32 %v3361_v4, %v2070_v13  ;;  %v3837_v46 = vld [vmem:[#allocation35_spill] sm:$0xff]  ;;  %v3841_v27 = vld [vmem:[#allocation42_spill] sm:$0xff]  ;;  %v3849_v23 = vld [vmem:[#allocation61_spill] sm:$0xff] }
 0x185   : > { %v1628_v39 = vadd.f32 %v3831_v21, %v1611_v17  ;;  %v1716_v36 = vadd.f32 %v3832_v49, %v1699_v42  ;;  %v1732_v48 = vadd.f32 %v3833_v9, %v1715_v38  ;;  %v2081_v2 = vadd.f32 %v2077_v5, %v3409_v18  ;;  %v3842_v8 = vld [vmem:[#allocation58_spill] sm:$0xff]  ;;  %v3845_v14 = vld [vmem:[#allocation39_spill] sm:$0xff] }
 0x186   : > { %v1644_v0 = vadd.f32 %v3834_v58, %v1627_v35  ;;  %1647 = vst.msk [vmem:[%s3253_s14 + $0x80] sm:$0xff] %vm679_vm2, %v1643_v31  ;;  %v1734_v45 = vadd.f32 %v3835_v41, %v1717_v61  ;;  %v2094_v55 = vmul.f32 %v3343_v53, %v2086_v11  ;;  %v2082_v4 = vadd.f32 %v2078_v28, %v2065_v25  ;;  %v3840_v53 = vld [vmem:[#allocation37_spill] sm:$0xff]  ;;  %v3847_v25 = vld [vmem:[#allocation60_spill] sm:$0xff] }
 0x187   : > { %v1645_v26 = vadd.f32 %v3836_v43, %v1628_v39  ;;  %v1733_v22 = vadd.f32 %v3837_v46, %v1716_v36  ;;  %v1749_v60 = vadd.f32 %v3838_v20, %v1732_v48  ;;  %v2110_v3 = vmul.f32 %v3395_v30, %v2102_v6 }
 0x188   : > { %1648 = vst.msk [vmem:[%s3253_s14 + $0x88] sm:$0xff] %vm679_vm2, %v1644_v0  ;;  %v1751_v56 = vadd.f32 %v3839_v37, %v1734_v45  ;;  %v2098_v15 = vadd.f32 %v2094_v55, %v2081_v2  ;;  %v2111_v18 = vmul.f32 %v3395_v30, %v2103_v54  ;;  %v2099_v34 = vadd.f32 %v3527_v19, %v2082_v4  ;;  %v3844_v30 = vld [vmem:[#allocation43_spill] sm:$0xff] }
 0x189   : > { %1649 = vst.msk [vmem:[%s3253_s14 + $0x90] sm:$0xff] %vm679_vm2, %v1645_v26  ;;  %v1750_v57 = vadd.f32 %v3840_v53, %v1733_v22  ;;  %v1766_v10 = vadd.f32 %v3841_v27, %v1749_v60  ;;  %v2114_v51 = vadd.f32 %v2110_v3, %v3563_v24  ;;  %v3846_v19 = vld [vmem:[#allocation59_spill] sm:$0xff]  ;;  %v3848_v24 = vld [vmem:[#allocation50_spill] sm:$0xff] }
 0x18a   : > { %v1768_v16 = vadd.f32 %v3842_v8, %v1751_v56  ;;  %v2115_v32 = vadd.f32 %v2111_v18, %v2098_v15  ;;  %v2116_v33 = vadd.f32 %v3596_v59, %v2099_v34 }
 0x18b   : > { %v1767_v63 = vadd.f32 %v3843_v12, %v1750_v57  ;;  %v1783_v40 = vadd.f32 %v3844_v30, %v1766_v10  ;;  %2118 = vst.msk [vmem:[%s3253_s14 + $0xe0] sm:$0xff] %vm679_vm2, %v2114_v51 }
 0x18c   : > { %v1785_v1 = vadd.f32 %v3845_v14, %v1768_v16  ;;  %2119 = vst.msk [vmem:[%s3253_s14 + $0xe8] sm:$0xff] %vm679_vm2, %v2115_v32  ;;  %2120 = vst.msk [vmem:[%s3253_s14 + $0xf0] sm:$0xff] %vm679_vm2, %v2116_v33 }
 0x18d   : > { %v1784_v7 = vadd.f32 %v3846_v19, %v1767_v63  ;;  %v1800_v13 = vadd.f32 %v3847_v25, %v1783_v40 }
 0x18e   : > { %v1802_v29 = vadd.f32 %v3848_v24, %v1785_v1 }
 0x18f   : > { %v1801_v44 = vadd.f32 %v3849_v23, %v1784_v7  ;;  %1804 = vst.msk [vmem:[%s3253_s14 + $0xa0] sm:$0xff] %vm679_vm2, %v1800_v13 }
 0x190   : > { %1806 = vst.msk [vmem:[%s3253_s14 + $0xb0] sm:$0xff] %vm679_vm2, %v1802_v29 }
 0x191   : > { %1805 = vst.msk [vmem:[%s3253_s14 + $0xa8] sm:$0xff] %vm679_vm2, %v1801_v44 }
 0x192 PF: > { %s15_s22 = sadd.s32 1, %s2559_s22   ;;  %s3850_s18 = smov %s2551_s20 }
 0x193   : > { %p12_p13 = scmp.ge.s32.totalorder %s15_s22, 10   ;;  %s3851_s19 = smov %s2555_s21 }
 0x194   : > { %s3852_s20 = smov %s3855_s23  ;;  %s3853_s21 = smov %s3859_s24 }
 0x195   :  { %14 = sbr.rel (!%p12_p13) target bundleno = 3 (0x3), region = 85 }

// kernel: mdta_forward.4
= control target key start
LH: loop header
LB: loop body
LE: loop exit
PB: predicated region body
PF: predicated region fallthrough
CT: control target
= control target key end

     0   :  { %7 = vsyncpa [#allocation5], 0  ;;  %s6254_s9 = smov 0   ;;  %s6256_s10 = smov 0   ;;  %s9789_s0 = inlined_call_operand.vmem [shape: f32[4], index: 0, kind: input, shape index: {}]   ;;  %s9790_s1 = inlined_call_operand.vmem [shape: f32[2,1024,96], index: 1, kind: input, shape index: {}]   ;;  %s9791_s2 = inlined_call_operand.vmem [shape: f32[2,1024,32], index: 2, kind: output, shape index: {}]  }
   0x1   :  { %s6258_s11 = smov 0   ;;  %s6260_s12 = smov 0  }
   0x2   :  { %s6262_s13 = smov 0   ;;  %s6264_s14 = smov 0  }
   0x3   :  { %s6266_s15 = smov 0  }
   0x4 LB: > { %s5288_s16 = sadd.s32 4294967295, %s6218_s15   ;;  %s25_s17 = sadd.s32 1, %s6206_s12  ;;  %s6218_s15 = sphi %s6266_s15, %s13_s15   ;;  %s6214_s14 = sphi %s6264_s14, %s10324_s14   ;;  %s6210_s13 = sphi %s6262_s13, %s10323_s13   ;;  %s6206_s12 = sphi %s6260_s12, %s10322_s12   ;;  %s6202_s11 = sphi %s6258_s11, %s10321_s11   ;;  %s6198_s10 = sphi %s6256_s10, %s10320_s10   ;;  %s6194_s9 = sphi %s6254_s9, %s10319_s9  }
   0x5   : > { %p26_p0 = scmp.ge.s32.totalorder %s25_s17, 2  ;;  %s28_s18 = sadd.s32 1, %s6210_s13 }
   0x6   : > { %s32_s19 = sadd.s32 1, %s6214_s14  ;;  %p5290_p1 = scmp.ge.s32.totalorder %s6218_s15, 1 }
   0x7   : > { %s10326_s17 = smov (%p26_p0, %s25_s17), 0  ;;  %s10328_s18 = smov (!%p26_p0, %s28_s18), %s6210_s13 }
   0x8   : > { %p116_p2 = scmp.lt.s32.totalorder %s6218_s15, 9  ;;  %p30_p3 = scmp.ge.s32.totalorder %s10328_s18, 2 }
   0x9   : > { %p6298_p4 = scmp.eq.s32.totalorder %s5288_s16, 0  ;;  %s129_s24 = sshll.u32 %s9789_s0, 4  ;;  %s130_s24 = int_to_ptr.vmem [resolvable:$true] %s129_s24 }
   0xa   : > { %p6302_p5 = pnand %p5290_p1, %p116_p2  ;;  %s10330_s18 = smov (%p30_p3, %s10328_s18), 0 }
   0xb   : > { %s10332_s19 = smov (!%p30_p3, %s32_s19), %s6214_s14  ;;  %s6145_s25 = scalar_lea.vmem %s130_s24, 16 }
   0xc   : > { %p6016_p6 = pneg %p6302_p5  ;;  %p34_p7 = scmp.ge.s32.totalorder %s10332_s19, 2 }
   0xd   : > { %p6146_p9 = scmp.ne.s32.totalorder %s130_s24, %s6145_s25  ;;  %p6153_p13 = scmp.lt.s32.totalorder %s130_s24, %s130_s24 }
   0xe   : > { %p6017_p8 = pnand %p6298_p4, %p6016_p6  ;;  %s10334_s19 = smov (%p34_p7, %s10332_s19), 0 }
   0xf   : > { %p6154_p0 = scmp.lt.s32.totalorder %s6145_s25, %s6145_s25 }
  0x10   : > { %p6147_p10 = pneg %p6017_p8 }
  0x11   : > { %p6155_p1 = por %p6154_p0, %p6153_p13 }
  0x12   : > { %p6148_p11 = pnand %p6147_p10, %p6146_p9 }
  0x14   : > { %p6149_p12 = pneg %p6148_p11 }
  0x16   : > { %p6156_p2 = pnand %p6155_p1, %p6149_p12 }
  0x18   : > { %6159 = shalt.err (!%p6156_p2)
}
  0x19   : > { %s6220_s26 = smov [#allocation4]   ;;  %155 = sbr.rel (%p6302_p5) target bundleno = 2761 (0xac9), region = 28 }
  0x1a   : > { %6019 = dma.vmem_to_smem (!%p6017_p8), %s130_s24, 16, %s6220_s26, [#allocation5]  }
  0x20   : > { %6189 = dma.done.wait (%p6298_p4), [#allocation5], 16  }
  0x21   : > { %6191 = vsyncadd (%p6298_p4), [#allocation5], 4294967280 }
  0x22   : > { %161 = sfence }
  0x23   : > { %s5295_s27 = sshll.u32 %s6194_s9, 6  ;;  %p188_p3 = scmp.lt.s32.totalorder %s6202_s11, 1 }
  0x24   : > { %p190_p6 = scmp.lt.s32.totalorder %s5295_s27, 127  ;;  %s197_s28 = smul.u32 %s6194_s9, %s6198_s10 }
  0x25   : > { %s10336_s11 = smov (!%p188_p3, %s6202_s11), 1  ;;  %p210_p4 = scmp.eq.s32.totalorder %s6198_s10, 0 }
  0x26   : > { %s10338_s27 = smov (!%p190_p6, %s5295_s27), 127  ;;  %s5296_s29 = sshll.u32 %s10336_s11, 7 }
  0x27   : > { %s5298_s30 = sshll.u32 %s197_s28, 6  ;;  %s193_s3 = sadd.s32 %s5296_s29, %s10338_s27 }
  0x28   : > { %p201_p5 = scmp.lt.s32.totalorder %s5298_s30, 127  ;;  %s5297_s4 = sshll.u32 %s193_s3, 3 }
  0x29   : > { %s6333_s7 = scalar_lea.vmem %s9790_s1, %s5297_s4  ;;  %p211_p7 = scmp.eq.s32.totalorder %s6194_s9, 0 }
  0x2a   : > { %s10340_s30 = smov (!%p201_p5, %s5298_s30), 127 }
  0x2b   : > { %p212_p8 = pnand %p211_p7, %p210_p4  ;;  %s204_s8 = sadd.s32 %s5296_s29, %s10340_s30 }
  0x2c   : > { %s5300_s16 = sshll.u32 %s204_s8, 3  ;;  %vm216_vm0 = vcmask (!%p212_p8), 64512   ;;  %vm221_vm1 = vcmask (!%p212_p8), 254976   ;;  %v6221_v0 = vmov (!%p212_p8), 0.0  }
  0x2d   : > { %s6341_s11 = scalar_lea.vmem %s9791_s2, %s5300_s16  ;;  %215 = sbr.rel (%p212_p8) target bundleno = 52 (0x34), region = 36  ;;  %217 = vst.msk [vmem:[#allocation2] sm:$0xff] (!%p212_p8), %vm216_vm0, %v6221_v0  ;;  %218 = vst.msk [vmem:[#allocation2 + $0x8] sm:$0xff] (!%p212_p8), %vm216_vm0, %v6221_v0 }
  0x2e   : > { %219 = vst.msk [vmem:[#allocation2 + $0x10] sm:$0xff] (!%p212_p8), %vm216_vm0, %v6221_v0  ;;  %220 = vst.msk [vmem:[#allocation2 + $0x18] sm:$0xff] (!%p212_p8), %vm216_vm0, %v6221_v0 }
  0x2f   : > { %222 = vst.msk [vmem:[#allocation3] sm:$0x3] (!%p212_p8), %vm221_vm1, %v6221_v0 }
  0x34 PF: > { %p5301_p9 = scmp.ne.s32.totalorder %s6198_s10, 0 }
  0x36   : > { %225 = sbr.rel (%p5301_p9) target bundleno = 1237 (0x4d5), region = 40 }
  0x3d   : > { %v6345_v1 = vld [vmem:[%s6333_s7 + $0x80] sm:$0xff]  ;;  %v6348_v2 = vld [vmem:[%s6333_s7 + $0x88] sm:$0xff]  ;;  %v6351_v3 = vld [vmem:[%s6333_s7 + $0x90] sm:$0xff]  ;;  %s6222_s22 = smov 96   ;;  %vm355_vm2 = vcmask 261120   ;;  %vm493_vm3 = vcmask 523520  }
  0x3e   : > { %v6355_v4 = vpack.c.bf16 %v6348_v2, %v6345_v1  ;;  %v6358_v5 = vld [vmem:[%s6333_s7 + $0x98] sm:$0xff]  ;;  %v6366_v7 = vld [vmem:[%s6333_s7 + $0xb0] sm:$0xff]  ;;  %v6374_v9 = vld [vmem:[%s6333_s7 + $0xa0] sm:$0xff]  ;;  %s6223_s23 = smov 120   ;;  %s6224_s24 = smov 88   ;;  %vm490_vm4 = vcmask 253952  }
  0x3f   : > { %v6363_v6 = vpack.c.bf16 %v6358_v5, %v6351_v3  ;;  %v6369_v8 = vld [vmem:[%s6333_s7 + $0xb8] sm:$0xff]  ;;  %v6377_v10 = vld [vmem:[%s6333_s7 + $0xa8] sm:$0xff]  ;;  %v6389_v13 = vld [vmem:[%s6333_s7 + $0xd0] sm:$0xff]  ;;  %s6225_s25 = smov 112   ;;  %s6226_s26 = smov 80   ;;  %vm939_vm5 = vcmask 64512  }
  0x40   : > { %9828 = vst [vmem:[#allocation7_spill] sm:$0xff] %v6355_v4  ;;  %682 = vxpose.xlu1.c.b16.start [1/8] (narrow) %v6355_v4, 16  ;;  %778 = vrot.lane.b32.xlu0 %v6355_v4, %s6222_s22  ;;  %v6381_v11 = vpack.c.bf16 %v6369_v8, %v6366_v7  ;;  %v6386_v12 = vpack.c.bf16 %v6377_v10, %v6374_v9  ;;  %v6392_v14 = vld [vmem:[%s6333_s7 + $0xd8] sm:$0xff]  ;;  %v6402_v16 = vld [vmem:[%s6333_s7 + $0xf0] sm:$0xff]  ;;  %v6408_v18 = vld [vmem:[%s6333_s7 + $0xc0] sm:$0xff]  ;;  %s6227_s27 = smov 104  }
  0x41   : > { %v6398_v15 = vpack.c.bf16 %v6392_v14, %v6389_v13  ;;  %v6405_v17 = vld [vmem:[%s6333_s7 + $0xf8] sm:$0xff]  ;;  %v6411_v19 = vld [vmem:[%s6333_s7 + $0xc8] sm:$0xff]  ;;  %v260_v21 = vld [vmem:[%s6333_s7 + $0x110] sm:$0xff]  ;;  %s6228_s28 = smov 72  }
  0x42   : > { %9829 = vst [vmem:[#allocation8_spill] sm:$0xff] %v6386_v12  ;;  %9830 = vst [vmem:[#allocation9_spill] sm:$0xff] %v6405_v17  ;;  %v6417_v20 = vpack.c.bf16 %v6405_v17, %v6402_v16  ;;  %v261_v22 = vld [vmem:[%s6333_s7 + $0x118] sm:$0xff]  ;;  %v6424_v23 = vpack.c.bf16 %v6411_v19, %v6408_v18  ;;  %v325_v24 = vmul.f32 %v260_v21, %v260_v21  ;;  %v264_v31 = vld [vmem:[%s6333_s7 + $0x130] sm:$0xff] }
  0x43   : > { %v326_v25 = vmul.f32 %v261_v22, %v261_v22  ;;  %v6428_v26 = vpack.c.bf16 %v261_v22, %v260_v21  ;;  %v265_v32 = vld [vmem:[%s6333_s7 + $0x138] sm:$0xff]  ;;  %v6446_v33 = vld [vmem:[%s6333_s7 + $0xe0] sm:$0xff]  ;;  %v6449_v34 = vld [vmem:[%s6333_s7 + $0xe8] sm:$0xff]  ;;  %v329_v35 = vmul.f32 %v264_v31, %v264_v31  ;;  %v6708_v17 = vmul.f32 %v6358_v5, %v6358_v5 }
  0x44   : > { %683 = vxpose.xlu1.c.b16.cont [2/8] (narrow) %v6363_v6, 16  ;;  %784 = vrot.lane.b32.xlu0 %v6381_v11, %s6222_s22  ;;  %9831 = vst [vmem:[#allocation10_spill] sm:$0xff] %v6424_v23  ;;  %v6431_v27 = vsel %vm355_vm2, %v325_v24, 0.0  ;;  %v6437_v29 = vsel %vm493_vm3, %v325_v24, 0.0  ;;  %v330_v36 = vmul.f32 %v265_v32, %v265_v32  ;;  %v268_v37 = vld [vmem:[%s6333_s7 + $0x150] sm:$0xff]  ;;  %v6454_v38 = vpack.c.bf16 %v265_v32, %v264_v31  ;;  %v269_v39 = vld [vmem:[%s6333_s7 + $0x158] sm:$0xff] }
  0x45   : > { %9832 = vst [vmem:[#allocation11_spill] sm:$0xff] %v6431_v27  ;;  %v6434_v28 = vsel %vm355_vm2, %v326_v25, 0.0  ;;  %9834 = vst [vmem:[#allocation13_spill] sm:$0xff] %v6437_v29  ;;  %v6440_v30 = vsel %vm493_vm3, %v326_v25, 0.0  ;;  %v333_v40 = vmul.f32 %v268_v37, %v268_v37  ;;  %v6458_v41 = vsel %vm355_vm2, %v329_v35, 0.0  ;;  %v272_v50 = vld [vmem:[%s6333_s7 + $0x170] sm:$0xff] }
  0x46   : > { %9833 = vst [vmem:[#allocation12_spill] sm:$0xff] %v6434_v28  ;;  %9835 = vst [vmem:[#allocation14_spill] sm:$0xff] %v6440_v30  ;;  %v6461_v42 = vsel %vm355_vm2, %v330_v36, 0.0  ;;  %v6464_v43 = vsel %vm493_vm3, %v329_v35, 0.0  ;;  %v6467_v44 = vsel %vm493_vm3, %v330_v36, 0.0  ;;  %v6472_v45 = vpack.c.bf16 %v6449_v34, %v6446_v33  ;;  %v273_v51 = vld [vmem:[%s6333_s7 + $0x178] sm:$0xff] }
  0x47   : > { %9836 = vst [vmem:[#allocation15_spill] sm:$0xff] %v6454_v38  ;;  %9837 = vst [vmem:[#allocation16_spill] sm:$0xff] %v6458_v41  ;;  %v334_v46 = vmul.f32 %v269_v39, %v269_v39  ;;  %v6477_v47 = vsel %vm355_vm2, %v333_v40, 0.0  ;;  %v6480_v48 = vsel %vm493_vm3, %v333_v40, 0.0  ;;  %v6482_v49 = vpack.c.bf16 %v269_v39, %v268_v37  ;;  %v6487_v52 = vld [vmem:[%s6333_s7 + $0x100] sm:$0xff]  ;;  %v6490_v53 = vld [vmem:[%s6333_s7 + $0x108] sm:$0xff] }
  0x48   : > { %684 = vxpose.xlu1.c.b16.cont [3/8] (narrow) %v6386_v12, 16  ;;  %788 = vrot.lane.b32.xlu0 %v6398_v15, %s6222_s22  ;;  %9838 = vst [vmem:[#allocation17_spill] sm:$0xff] %v6461_v42  ;;  %9839 = vst [vmem:[#allocation18_spill] sm:$0xff] %v6464_v43  ;;  %v337_v54 = vmul.f32 %v272_v50, %v272_v50  ;;  %v338_v55 = vmul.f32 %v273_v51, %v273_v51  ;;  %v276_v58 = vld [vmem:[%s6333_s7 + $0x190] sm:$0xff]  ;;  %v277_v59 = vld [vmem:[%s6333_s7 + $0x198] sm:$0xff] }
  0x49   : > { %9840 = vst [vmem:[#allocation19_spill] sm:$0xff] %v6467_v44  ;;  %9841 = vst [vmem:[#allocation20_spill] sm:$0xff] %v6472_v45  ;;  %v6493_v56 = vsel %vm355_vm2, %v334_v46, 0.0  ;;  %v6496_v57 = vsel %vm493_vm3, %v334_v46, 0.0  ;;  %v6501_v60 = vld [vmem:[%s6333_s7] sm:$0xff]  ;;  %v6517_v21 = vld [vmem:[%s6333_s7 + $0x8] sm:$0xff]  ;;  %v6521_v22 = vpack.c.bf16 %v273_v51, %v272_v50  ;;  %v341_v25 = vmul.f32 %v276_v58, %v276_v58 }
  0x4a   : > { %9842 = vst [vmem:[#allocation21_spill] sm:$0xff] %v6477_v47  ;;  %9843 = vst [vmem:[#allocation22_spill] sm:$0xff] %v6480_v48  ;;  %v6505_v61 = vsel %vm355_vm2, %v337_v54, 0.0  ;;  %v6508_v62 = vsel %vm355_vm2, %v338_v55, 0.0  ;;  %v6511_v63 = vsel %vm493_vm3, %v337_v54, 0.0  ;;  %v6514_v0 = vsel %vm493_vm3, %v338_v55, 0.0 }
  0x4b   : > { %9844 = vst [vmem:[#allocation23_spill] sm:$0xff] %v6487_v52  ;;  %9845 = vst [vmem:[#allocation24_spill] sm:$0xff] %v6490_v53  ;;  %v6524_v24 = vld [vmem:[%s6333_s7 + $0x10] sm:$0xff]  ;;  %v6526_v31 = vmul.f32 %v277_v59, %v277_v59  ;;  %v6530_v32 = vpack.c.bf16 %v6490_v53, %v6487_v52  ;;  %v6532_v35 = vpack.c.bf16 %v277_v59, %v276_v58  ;;  %v6539_v39 = vld [vmem:[%s6333_s7 + $0x18] sm:$0xff]  ;;  %v6543_v40 = vsel %vm355_vm2, %v341_v25, 0.0 }
  0x4c   : > { %685 = vxpose.xlu1.c.b16.cont [4/8] (narrow) %v6381_v11, 16  ;;  %792 = vrot.lane.b32.xlu0 %v6417_v20, %s6222_s22  ;;  %9846 = vst [vmem:[#allocation25_spill] sm:$0xff] %v6493_v56  ;;  %9847 = vst [vmem:[#allocation26_spill] sm:$0xff] %v6496_v57  ;;  %v292_v36 = vmul.f32 %v6517_v21, %v6517_v21  ;;  %v291_v37 = vmul.f32 %v6501_v60, %v6501_v60  ;;  %v6550_v50 = vsel %vm493_vm3, %v341_v25, 0.0  ;;  %v6555_v54 = vld [vmem:[%s6333_s7 + $0x20] sm:$0xff]  ;;  %v6564_v25 = vld [vmem:[%s6333_s7 + $0x1b0] sm:$0xff] }
  0x4d   : > { %9848 = vst [vmem:[#allocation27_spill] sm:$0xff] %v6505_v61  ;;  %9849 = vst [vmem:[#allocation28_spill] sm:$0xff] %v6508_v62  ;;  %v6547_v46 = vsel %vm355_vm2, %v6526_v31, 0.0  ;;  %v293_v51 = vmul.f32 %v6524_v24, %v6524_v24  ;;  %v6579_v61 = vld [vmem:[%s6333_s7 + $0x30] sm:$0xff]  ;;  %v6585_v57 = vld [vmem:[%s6333_s7 + $0x38] sm:$0xff] }
  0x4e   : > { %9850 = vst [vmem:[#allocation29_spill] sm:$0xff] %v6511_v63  ;;  %9851 = vst [vmem:[#allocation30_spill] sm:$0xff] %v6514_v0  ;;  %v357_v55 = vsel %vm355_vm2, %v292_v36, 0.0  ;;  %v495_v58 = vsel %vm493_vm3, %v292_v36, 0.0  ;;  %v356_v59 = vsel %vm355_vm2, %v291_v37, 0.0  ;;  %v494_v4 = vsel %vm493_vm3, %v291_v37, 0.0 }
  0x4f   : > { %9852 = vst [vmem:[#allocation31_spill] sm:$0xff] %v6530_v32  ;;  %9853 = vst [vmem:[#allocation32_spill] sm:$0xff] %v6532_v35  ;;  %v294_v0 = vmul.f32 %v6539_v39, %v6539_v39  ;;  %v359_v62 = vsel %vm355_vm2, %v293_v51, 0.0  ;;  %v6573_v63 = vld [vmem:[%s6333_s7 + $0x28] sm:$0xff]  ;;  %v497_v36 = vsel %vm493_vm3, %v293_v51, 0.0  ;;  %v295_v37 = vmul.f32 %v6555_v54, %v6555_v54  ;;  %v6588_v56 = vld [vmem:[%s6333_s7 + $0x120] sm:$0xff] }
  0x50   : > { %686 = vxpose.xlu1.c.b16.cont [5/8] (narrow) %v6424_v23, 16  ;;  %796 = vrot.lane.b32.xlu0 %v6428_v26, %s6222_s22  ;;  %9854 = vst [vmem:[#allocation33_spill] sm:$0xff] %v6543_v40  ;;  %9855 = vst [vmem:[#allocation34_spill] sm:$0xff] %v6547_v46  ;;  %v6567_v46 = vld [vmem:[%s6333_s7 + $0x1b8] sm:$0xff]  ;;  %v496_v40 = vadd.f32 %v495_v58, %v494_v4  ;;  %v6591_v51 = vld [vmem:[%s6333_s7 + $0x128] sm:$0xff]  ;;  %v296_v47 = vmul.f32 %v6573_v63, %v6573_v63 }
  0x51   : > { %9856 = vst [vmem:[#allocation35_spill] sm:$0xff] %v6550_v50  ;;  %v358_v50 = vadd.f32 %v357_v55, %v356_v59  ;;  %v361_v4 = vsel %vm355_vm2, %v294_v0, 0.0  ;;  %v499_v55 = vsel %vm493_vm3, %v294_v0, 0.0  ;;  %9857 = vst [vmem:[#allocation36_spill] sm:$0xff] %v6588_v56  ;;  %v6597_v48 = vpack.c.bf16 %v6567_v46, %v6564_v25  ;;  %v6612_v44 = vld [vmem:[%s6333_s7 + $0x40] sm:$0xff]  ;;  %v236_v12 = vld [vmem:[%s6333_s7 + $0x50] sm:$0xff] }
  0x52   : > { %v498_v59 = vadd.f32 %v497_v36, %v496_v40  ;;  %9858 = vst [vmem:[#allocation37_spill] sm:$0xff] %v6591_v51  ;;  %v501_v0 = vsel %vm493_vm3, %v295_v37, 0.0  ;;  %v6604_v40 = vld [vmem:[%s6333_s7 + $0x1d0] sm:$0xff]  ;;  %v365_v42 = vsel %vm355_vm2, %v296_v47, 0.0  ;;  %v503_v43 = vsel %vm493_vm3, %v296_v47, 0.0  ;;  %v237_v27 = vld [vmem:[%s6333_s7 + $0x58] sm:$0xff] }
  0x53   : > { %v360_v58 = vadd.f32 %v359_v62, %v358_v50  ;;  %9859 = vst [vmem:[#allocation38_spill] sm:$0xff] %v6597_v48  ;;  %v363_v62 = vsel %vm355_vm2, %v295_v37, 0.0  ;;  %v6607_v50 = vld [vmem:[%s6333_s7 + $0x1d8] sm:$0xff]  ;;  %v298_v37 = vmul.f32 %v6585_v57, %v6585_v57  ;;  %v6721_v5 = vpack.c.bf16 %v6585_v57, %v6579_v61 }
  0x54   : > { %687 = vxpose.xlu1.c.b16.cont [6/8] (narrow) %v6398_v15, 16  ;;  %800 = vrot.lane.b32.xlu0 %v6454_v38, %s6222_s22  ;;  %v6630_v47 = vpack.c.bf16 %v6607_v50, %v6604_v40  ;;  %v345_v57 = vmul.f32 %v6564_v25, %v6564_v25 }
  0x55   : > { %v362_v36 = vadd.f32 %v361_v4, %v360_v58  ;;  %v6621_v4 = vpack.c.bf16 %v6591_v51, %v6588_v56  ;;  %v369_v30 = vsel %vm355_vm2, %v298_v37, 0.0  ;;  %v507_v28 = vsel %vm493_vm3, %v298_v37, 0.0  ;;  %v6650_v51 = vld [vmem:[%s6333_s7 + $0x140] sm:$0xff]  ;;  %v6653_v56 = vld [vmem:[%s6333_s7 + $0x148] sm:$0xff] }
  0x56   : > { %9861 = vst [vmem:[#allocation40_spill] sm:$0xff] %v6630_v47  ;;  %9862 = vst [vmem:[#allocation41_spill] sm:$0xff] %v6650_v51  ;;  %v6743_v25 = vsel %vm355_vm2, %v345_v57, 0.0 }
  0x57   : > { %9860 = vst [vmem:[#allocation39_spill] sm:$0xff] %v6621_v4  ;;  %9863 = vst [vmem:[#allocation42_spill] sm:$0xff] %v6653_v56 }
  0x58   : > { %688 = vxpose.xlu1.c.b16.cont [7/8] (narrow) %v6472_v45, 16  ;;  %804 = vrot.lane.b32.xlu0 %v6482_v49, %s6222_s22  ;;  %v297_v45 = vmul.f32 %v6579_v61, %v6579_v61  ;;  %v350_v61 = vmul.f32 %v6607_v50, %v6607_v50 }
  0x5a   : > { %v367_v41 = vsel %vm355_vm2, %v297_v45, 0.0  ;;  %v505_v23 = vsel %vm493_vm3, %v297_v45, 0.0 }
  0x5c   : > { %689 = vxpose.xlu1.c.b16.end [8/8] (narrow) %v6417_v20, 16  ;;  %808 = vrot.lane.b32.xlu0 %v6521_v22, %s6222_s22 }
  0x60   : > { %698 = vxpose.xlu1.c.b16.start [1/8] (narrow) %v6530_v32, 16  ;;  %812 = vrot.lane.b32.xlu0 %v6532_v35, %s6222_s22  ;;  %v500_v32 = vadd.f32 %v499_v55, %v498_v59  ;;  %v364_v55 = vadd.f32 %v363_v62, %v362_v36  ;;  %v6624_v59 = vld [vmem:[%s6333_s7 + $0x48] sm:$0xff]  ;;  %v299_v62 = vmul.f32 %v6612_v44, %v6612_v44 }
  0x61   : > { %v300_v35 = vmul.f32 %v6624_v59, %v6624_v59 }
  0x62   : > { %v502_v58 = vadd.f32 %v501_v0, %v500_v32  ;;  %v6637_v32 = vld [vmem:[%s6333_s7 + $0x1f0] sm:$0xff]  ;;  %v6640_v0 = vld [vmem:[%s6333_s7 + $0x1f8] sm:$0xff]  ;;  %v366_v36 = vadd.f32 %v365_v42, %v364_v55  ;;  %v509_v37 = vsel %vm493_vm3, %v299_v62, 0.0  ;;  %v6664_v55 = vld [vmem:[%s6333_s7 + $0x60] sm:$0xff] }
  0x63   : > { %v6659_v42 = vpack.c.bf16 %v6640_v0, %v6637_v32  ;;  %9865 = vst [vmem:[#allocation44_spill] sm:$0xff] %v6664_v55 }
  0x64   : > { %699 = vxpose.xlu1.c.b16.cont [2/8] (narrow) %v6428_v26, 16  ;;  %816 = vrot.lane.b32.xlu0 %v6597_v48, %s6222_s22  ;;  %v504_v48 = vadd.f32 %v503_v43, %v502_v58  ;;  %v368_v45 = vadd.f32 %v367_v41, %v366_v36  ;;  %v371_v43 = vsel %vm355_vm2, %v299_v62, 0.0  ;;  %v301_v41 = vmul.f32 %v236_v12, %v236_v12 }
  0x65   : > { %9864 = vst [vmem:[#allocation43_spill] sm:$0xff] %v6659_v42  ;;  %v373_v58 = vsel %vm355_vm2, %v300_v35, 0.0  ;;  %v511_v36 = vsel %vm493_vm3, %v300_v35, 0.0 }
  0x66   : > { %v506_v29 = vadd.f32 %v505_v23, %v504_v48  ;;  %v370_v23 = vadd.f32 %v369_v30, %v368_v45  ;;  %v240_v30 = vld [vmem:[%s6333_s7 + $0x70] sm:$0xff]  ;;  %v375_v35 = vsel %vm355_vm2, %v301_v41, 0.0  ;;  %v513_v45 = vsel %vm493_vm3, %v301_v41, 0.0 }
  0x67   : > { %v305_v52 = vmul.f32 %v240_v30, %v240_v30 }
  0x68   : > { %700 = vxpose.xlu1.c.b16.cont [3/8] (narrow) %v6621_v4, 16  ;;  %820 = vrot.lane.b32.xlu0 %v6630_v47, %s6222_s22  ;;  %v508_v48 = vadd.f32 %v507_v28, %v506_v29  ;;  %v302_v4 = vmul.f32 %v237_v27, %v237_v27  ;;  %v6671_v47 = vpack.c.bf16 %v6653_v56, %v6650_v51  ;;  %v6675_v28 = vld [vmem:[%s6333_s7 + $0x68] sm:$0xff]  ;;  %v241_v51 = vld [vmem:[%s6333_s7 + $0x78] sm:$0xff] }
  0x69   : > { %v372_v62 = vadd.f32 %v371_v43, %v370_v23  ;;  %v6679_v29 = vmul.f32 %v6348_v2, %v6348_v2  ;;  %v303_v56 = vmul.f32 %v6664_v55, %v6664_v55  ;;  %v307_v43 = vmul.f32 %v6345_v1, %v6345_v1  ;;  %v6693_v23 = vld [vmem:[%s6333_s7 + $0x168] sm:$0xff] }
  0x6a   : > { %9866 = vst [vmem:[#allocation45_spill] sm:$0xff] %v6671_v47  ;;  %v510_v53 = vadd.f32 %v509_v37, %v508_v48  ;;  %v6690_v37 = vld [vmem:[%s6333_s7 + $0x160] sm:$0xff]  ;;  %9867 = vst [vmem:[#allocation46_spill] sm:$0xff] %v6693_v23  ;;  %v6697_v2 = vpack.c.bf16 %v6539_v39, %v6524_v24  ;;  %v515_v41 = vsel %vm493_vm3, %v302_v4, 0.0  ;;  %v304_v55 = vmul.f32 %v6675_v28, %v6675_v28 }
  0x6b   : > { %v374_v48 = vadd.f32 %v373_v58, %v372_v62  ;;  %v309_v1 = vmul.f32 %v6351_v3, %v6351_v3  ;;  %v6713_v39 = vpack.c.bf16 %v6693_v23, %v6690_v37  ;;  %v379_v58 = vsel %vm355_vm2, %v303_v56, 0.0 }
  0x6c   : > { %701 = vxpose.xlu1.c.b16.cont [4/8] (narrow) %v6454_v38, 16  ;;  %824 = vrot.lane.b32.xlu0 %v6659_v42, %s6222_s22  ;;  %v512_v42 = vadd.f32 %v511_v36, %v510_v53  ;;  %v377_v38 = vsel %vm355_vm2, %v302_v4, 0.0  ;;  %v306_v4 = vmul.f32 %v241_v51, %v241_v51  ;;  %v517_v3 = vsel %vm493_vm3, %v303_v56, 0.0 }
  0x6d   : > { %v376_v24 = vadd.f32 %v375_v35, %v374_v48  ;;  %v6723_v36 = vpack.c.bf16 %v237_v27, %v236_v12  ;;  %v383_v35 = vsel %vm355_vm2, %v305_v52, 0.0  ;;  %v381_v48 = vsel %vm355_vm2, %v304_v55, 0.0 }
  0x6e   : > { %v514_v53 = vadd.f32 %v513_v45, %v512_v42  ;;  %v521_v45 = vsel %vm493_vm3, %v305_v52, 0.0  ;;  %v346_v12 = vmul.f32 %v6567_v46, %v6567_v46  ;;  %v385_v27 = vsel %vm355_vm2, %v306_v4, 0.0 }
  0x6f   : > { %v378_v42 = vadd.f32 %v377_v38, %v376_v24  ;;  %v523_v38 = vsel %vm493_vm3, %v306_v4, 0.0  ;;  %v349_v52 = vmul.f32 %v6604_v40, %v6604_v40  ;;  %v353_v24 = vmul.f32 %v6637_v32, %v6637_v32 }
  0x70   : > { %702 = vxpose.xlu1.c.b16.cont [5/8] (narrow) %v6671_v47, 16  ;;  %945 = vrot.lane.b32.xlu0 %v6697_v2, %s6223_s23  ;;  %v516_v62 = vadd.f32 %v515_v41, %v514_v53  ;;  %v519_v47 = vsel %vm493_vm3, %v304_v55, 0.0  ;;  %v6746_v46 = vsel %vm355_vm2, %v346_v12, 0.0  ;;  %v354_v53 = vmul.f32 %v6640_v0, %v6640_v0 }
  0x71   : > { %v380_v23 = vadd.f32 %v379_v58, %v378_v42  ;;  %v6753_v4 = vsel %vm355_vm2, %v349_v52, 0.0  ;;  %v6756_v40 = vsel %vm355_vm2, %v350_v61, 0.0  ;;  %v387_v50 = vsel %vm355_vm2, %v307_v43, 0.0 }
  0x72   : > { %v518_v56 = vadd.f32 %v517_v3, %v516_v62  ;;  %v6763_v32 = vpack.c.bf16 %v241_v51, %v240_v30  ;;  %v6766_v0 = vsel %vm355_vm2, %v353_v24, 0.0  ;;  %v6769_v3 = vsel %vm355_vm2, %v354_v53, 0.0 }
  0x73   : > { %v382_v55 = vadd.f32 %v381_v48, %v380_v23  ;;  %v6773_v42 = vsel %vm493_vm3, %v6526_v31, 0.0  ;;  %v389_v51 = vsel %vm355_vm2, %v6679_v29, 0.0  ;;  %v527_v30 = vsel %vm493_vm3, %v6679_v29, 0.0 }
  0x74   : > { %703 = vxpose.xlu1.c.b16.cont [6/8] (narrow) %v6482_v49, 16  ;;  %949 = vrot.lane.b32.xlu0 %v6721_v5, %s6223_s23  ;;  %v520_v41 = vadd.f32 %v519_v47, %v518_v56  ;;  %v525_v47 = vsel %vm493_vm3, %v307_v43, 0.0  ;;  %v311_v43 = vmul.f32 %v6374_v9, %v6374_v9  ;;  %v6785_v48 = vsel %vm493_vm3, %v346_v12, 0.0 }
  0x75   : > { %v384_v23 = vadd.f32 %v383_v35, %v382_v55  ;;  %v6788_v31 = vsel %vm493_vm3, %v349_v52, 0.0  ;;  %v6793_v9 = vpack.c.bf16 %v6517_v21, %v6501_v60  ;;  %v529_v29 = vsel %vm493_vm3, %v309_v1, 0.0 }
  0x76   : > { %v522_v58 = vadd.f32 %v521_v45, %v520_v41  ;;  %v6778_v45 = vsel %vm493_vm3, %v345_v57, 0.0  ;;  %v6803_v12 = vsel %vm493_vm3, %v353_v24, 0.0  ;;  %v6806_v52 = vsel %vm493_vm3, %v354_v53, 0.0 }
  0x77   : > { %v386_v62 = vadd.f32 %v385_v27, %v384_v23  ;;  %v6796_v27 = vsel %vm493_vm3, %v350_v61, 0.0  ;;  %v393_v55 = vsel %vm355_vm2, %v6708_v17, 0.0  ;;  %v531_v61 = vsel %vm493_vm3, %v6708_v17, 0.0 }
  0x78   : > { %704 = vxpose.xlu1.c.b16.cont [7/8] (narrow) %v6713_v39, 16  ;;  %953 = vrot.lane.b32.xlu0 %v6723_v36, %s6223_s23  ;;  %v524_v35 = vadd.f32 %v523_v38, %v522_v58  ;;  %v391_v38 = vsel %vm355_vm2, %v309_v1, 0.0  ;;  %v312_v1 = vmul.f32 %v6377_v10, %v6377_v10  ;;  %v533_v53 = vsel %vm493_vm3, %v311_v43, 0.0 }
  0x79   : > { %v388_v56 = vadd.f32 %v387_v50, %v386_v62  ;;  %v395_v50 = vsel %vm355_vm2, %v311_v43, 0.0  ;;  %v314_v62 = vmul.f32 %v6369_v8, %v6369_v8  ;;  %v6830_v43 = vpack.c.bf16 %v6573_v63, %v6555_v54 }
  0x7a   : > { %v526_v57 = vadd.f32 %v525_v47, %v524_v35  ;;  %v313_v47 = vmul.f32 %v6366_v7, %v6366_v7  ;;  %v397_v58 = vsel %vm355_vm2, %v312_v1, 0.0  ;;  %v535_v10 = vsel %vm493_vm3, %v312_v1, 0.0 }
  0x7b   : > { %v390_v60 = vadd.f32 %v389_v51, %v388_v56  ;;  %v315_v56 = vmul.f32 %v6408_v18, %v6408_v18  ;;  %v316_v63 = vmul.f32 %v6411_v19, %v6411_v19 }
  0x7c   : > { %705 = vxpose.xlu1.c.b16.end [8/8] (narrow) %v6521_v22, 16  ;;  %957 = vrot.lane.b32.xlu0 %v6763_v32, %s6223_s23  ;;  %v528_v21 = vadd.f32 %v527_v30, %v526_v57  ;;  %v399_v51 = vsel %vm355_vm2, %v313_v47, 0.0  ;;  %v537_v30 = vsel %vm493_vm3, %v313_v47, 0.0 }
  0x7d   : > { %v392_v41 = vadd.f32 %v391_v38, %v390_v60  ;;  %v401_v38 = vsel %vm355_vm2, %v314_v62, 0.0  ;;  %v541_v18 = vsel %vm493_vm3, %v315_v56, 0.0  ;;  %v543_v19 = vsel %vm493_vm3, %v316_v63, 0.0 }
  0x7e   : > { %v530_v24 = vadd.f32 %v529_v29, %v528_v21  ;;  %v539_v29 = vsel %vm493_vm3, %v314_v62, 0.0  ;;  %v403_v21 = vsel %vm355_vm2, %v315_v56, 0.0 }
  0x7f   : > { %v394_v23 = vadd.f32 %v393_v55, %v392_v41  ;;  %v317_v55 = vmul.f32 %v6389_v13, %v6389_v13  ;;  %v405_v41 = vsel %vm355_vm2, %v316_v63, 0.0 }
  0x80   : > { %762 = vrot.lane.b32.xlu1 %v6793_v9, %s6222_s22  ;;  %961 = vrot.lane.b32.xlu0 %v6363_v6, %s6223_s23  ;;  %v532_v17 = vadd.f32 %v531_v61, %v530_v24  ;;  %v318_v24 = vmul.f32 %v6392_v14, %v6392_v14 }
  0x81   : > { %v396_v7 = vadd.f32 %v395_v50, %v394_v23  ;;  %v6858_v50 = vpack.c.bf16 %v6624_v59, %v6612_v44  ;;  %v407_v47 = vsel %vm355_vm2, %v317_v55, 0.0  ;;  %v545_v23 = vsel %vm493_vm3, %v317_v55, 0.0 }
  0x82   : > { %v534_v35 = vadd.f32 %v533_v53, %v532_v17  ;;  %v319_v17 = vmul.f32 %v6446_v33, %v6446_v33  ;;  %v547_v62 = vsel %vm493_vm3, %v318_v24, 0.0  ;;  %v320_v44 = vmul.f32 %v6449_v34, %v6449_v34 }
  0x83   : > { %v398_v8 = vadd.f32 %v397_v58, %v396_v7 }
  0x84   : > { %764 = vrot.lane.b32.xlu1 %v6697_v2, %s6222_s22  ;;  %965 = vrot.lane.b32.xlu0 %v6381_v11, %s6223_s23  ;;  %v536_v57 = vadd.f32 %v535_v10, %v534_v35  ;;  %v409_v10 = vsel %vm355_vm2, %v318_v24, 0.0  ;;  %v411_v35 = vsel %vm355_vm2, %v319_v17, 0.0  ;;  %v549_v33 = vsel %vm493_vm3, %v319_v17, 0.0 }
  0x85   : > { %v400_v54 = vadd.f32 %v399_v51, %v398_v8  ;;  %v321_v51 = vmul.f32 %v6402_v16, %v6402_v16  ;;  %v413_v8 = vsel %vm355_vm2, %v320_v44, 0.0  ;;  %v551_v34 = vsel %vm493_vm3, %v320_v44, 0.0 }
  0x86   : > { %v538_v60 = vadd.f32 %v537_v30, %v536_v57  ;;  %v9868_v57 = vld [vmem:[#allocation9_spill] sm:$0xff] }
  0x87   : > { %v402_v61 = vadd.f32 %v401_v38, %v400_v54  ;;  %v322_v38 = vmul.f32 %v9868_v57, %v9868_v57  ;;  %v9876_v57 = vld [vmem:[#allocation13_spill] sm:$0xff] }
  0x88   : > { %766 = vrot.lane.b32.xlu1 %v6830_v43, %s6222_s22  ;;  %969 = vrot.lane.b32.xlu0 %v6398_v15, %s6223_s23  ;;  %v540_v1 = vadd.f32 %v539_v29, %v538_v60  ;;  %v9869_v29 = vld [vmem:[#allocation44_spill] sm:$0xff]  ;;  %v415_v60 = vsel %vm355_vm2, %v321_v51, 0.0 }
  0x89   : > { %v404_v13 = vadd.f32 %v403_v21, %v402_v61  ;;  %v6886_v63 = vpack.c.bf16 %v6675_v28, %v9869_v29  ;;  %v553_v21 = vsel %vm493_vm3, %v321_v51, 0.0  ;;  %v9871_v61 = vld [vmem:[#allocation15_spill] sm:$0xff]  ;;  %v555_v24 = vsel %vm493_vm3, %v322_v38, 0.0  ;;  %v9872_v28 = vld [vmem:[#allocation24_spill] sm:$0xff] }
  0x8a   : > { %v542_v53 = vadd.f32 %v541_v18, %v540_v1  ;;  %v9870_v18 = vld [vmem:[#allocation23_spill] sm:$0xff] }
  0x8b   : > { %v406_v14 = vadd.f32 %v405_v41, %v404_v13  ;;  %v323_v55 = vmul.f32 %v9870_v18, %v9870_v18  ;;  %v324_v13 = vmul.f32 %v9872_v28, %v9872_v28  ;;  %v9879_v18 = vld [vmem:[#allocation14_spill] sm:$0xff] }
  0x8c   : > { %768 = vrot.lane.b32.xlu1 %v6721_v5, %s6222_s22  ;;  %973 = vrot.lane.b32.xlu0 %v6417_v20, %s6223_s23  ;;  %v544_v58 = vadd.f32 %v543_v19, %v542_v53  ;;  %v417_v19 = vsel %vm355_vm2, %v322_v38, 0.0 }
  0x8d   : > { %v408_v59 = vadd.f32 %v407_v47, %v406_v14  ;;  %v557_v17 = vsel %vm493_vm3, %v323_v55, 0.0 }
  0x8e   : > { %v546_v7 = vadd.f32 %v545_v23, %v544_v58  ;;  %v419_v23 = vsel %vm355_vm2, %v323_v55, 0.0 }
  0x8f   : > { %v410_v30 = vadd.f32 %v409_v10, %v408_v59  ;;  %v421_v10 = vsel %vm355_vm2, %v324_v13, 0.0 }
  0x90   : > { %770 = vrot.lane.b32.xlu1 %v6858_v50, %s6222_s22  ;;  %977 = vrot.lane.b32.xlu0 %v6428_v26, %s6223_s23  ;;  %v548_v56 = vadd.f32 %v547_v62, %v546_v7  ;;  %v559_v62 = vsel %vm493_vm3, %v324_v13, 0.0  ;;  %v9873_v7 = vld [vmem:[#allocation36_spill] sm:$0xff]  ;;  %v9881_v13 = vld [vmem:[#allocation41_spill] sm:$0xff] }
  0x91   : > { %v412_v16 = vadd.f32 %v411_v35, %v410_v30  ;;  %v327_v35 = vmul.f32 %v9873_v7, %v9873_v7  ;;  %v9874_v30 = vld [vmem:[#allocation37_spill] sm:$0xff]  ;;  %v9886_v7 = vld [vmem:[#allocation18_spill] sm:$0xff] }
  0x92   : > { %v550_v54 = vadd.f32 %v549_v33, %v548_v56  ;;  %v328_v56 = vmul.f32 %v9874_v30, %v9874_v30  ;;  %v9887_v30 = vld [vmem:[#allocation40_spill] sm:$0xff] }
  0x93   : > { %v414_v1 = vadd.f32 %v413_v8, %v412_v16  ;;  %v9875_v8 = vld [vmem:[#allocation11_spill] sm:$0xff]  ;;  %v427_v29 = vsel %vm355_vm2, %v327_v35, 0.0  ;;  %v565_v16 = vsel %vm493_vm3, %v327_v35, 0.0 }
  0x94   : > { %772 = vrot.lane.b32.xlu1 %v6723_v36, %s6222_s22  ;;  %981 = vrot.lane.b32.xlu0 %v9871_v61, %s6223_s23  ;;  %v552_v41 = vadd.f32 %v551_v34, %v550_v54  ;;  %v9877_v54 = vld [vmem:[#allocation32_spill] sm:$0xff] }
  0x95   : > { %v416_v53 = vadd.f32 %v415_v60, %v414_v1  ;;  %v9878_v60 = vld [vmem:[#allocation12_spill] sm:$0xff]  ;;  %v429_v1 = vsel %vm355_vm2, %v328_v56, 0.0 }
  0x96   : > { %v554_v47 = vadd.f32 %v553_v21, %v552_v41  ;;  %v567_v41 = vsel %vm493_vm3, %v328_v56, 0.0  ;;  %v9888_v56 = vld [vmem:[#allocation17_spill] sm:$0xff] }
  0x97   : > { %v418_v14 = vadd.f32 %v417_v19, %v416_v53  ;;  %v9880_v19 = vld [vmem:[#allocation8_spill] sm:$0xff]  ;;  %v331_v53 = vmul.f32 %v9881_v13, %v9881_v13  ;;  %v9893_v13 = vld [vmem:[#allocation31_spill] sm:$0xff] }
  0x98   : > { %774 = vrot.lane.b32.xlu1 %v6886_v63, %s6222_s22  ;;  %985 = vrot.lane.b32.xlu0 %v6482_v49, %s6223_s23  ;;  %v556_v58 = vadd.f32 %v555_v24, %v554_v47  ;;  %v9882_v47 = vld [vmem:[#allocation38_spill] sm:$0xff] }
  0x99   : > { %v420_v44 = vadd.f32 %v419_v23, %v418_v14 }
  0x9a   : > { %v558_v59 = vadd.f32 %v557_v17, %v556_v58  ;;  %v9883_v58 = vld [vmem:[#allocation42_spill] sm:$0xff] }
  0x9b   : > { %v422_v33 = vadd.f32 %v421_v10, %v420_v44  ;;  %v332_v10 = vmul.f32 %v9883_v58, %v9883_v58  ;;  %v9885_v44 = vld [vmem:[#allocation16_spill] sm:$0xff] }
  0x9c   : > { %776 = vrot.lane.b32.xlu1 %v6763_v32, %s6222_s22  ;;  %989 = vrot.lane.b32.xlu0 %v6521_v22, %s6223_s23  ;;  %v560_v51 = vadd.f32 %v559_v62, %v558_v59  ;;  %v9884_v62 = vld [vmem:[#allocation10_spill] sm:$0xff] }
  0x9d   : > { %v424_v34 = vadd.f32 %v9875_v8, %v422_v33  ;;  %v435_v33 = vsel %vm355_vm2, %v331_v53, 0.0 }
  0x9e   : > { %v562_v38 = vadd.f32 %v9876_v57, %v560_v51  ;;  %v573_v51 = vsel %vm493_vm3, %v331_v53, 0.0  ;;  %v9894_v53 = vld [vmem:[#allocation21_spill] sm:$0xff] }
  0x9f   : > { %v426_v21 = vadd.f32 %v9878_v60, %v424_v34  ;;  %v9889_v34 = vld [vmem:[#allocation19_spill] sm:$0xff] }
  0xa0   : > { %780 = vrot.lane.b32.xlu1 %v6363_v6, %s6222_s22  ;;  %993 = vrot.lane.b32.xlu0 %v9877_v54, %s6223_s23  ;;  %v564_v55 = vadd.f32 %v9879_v18, %v562_v38  ;;  %v437_v38 = vsel %vm355_vm2, %v332_v10, 0.0  ;;  %v335_v18 = vmul.f32 %v6690_v37, %v6690_v37 }
  0xa1   : > { %v428_v24 = vadd.f32 %v427_v29, %v426_v21  ;;  %v575_v29 = vsel %vm493_vm3, %v332_v10, 0.0  ;;  %v274_v10 = vld [vmem:[%s6333_s7 + $0x180] sm:$0xff] }
  0xa2   : > { %v566_v28 = vadd.f32 %v565_v16, %v564_v55  ;;  %v9890_v16 = vld [vmem:[#allocation20_spill] sm:$0xff]  ;;  %v9891_v55 = vld [vmem:[#allocation43_spill] sm:$0xff]  ;;  %v443_v58 = vsel %vm355_vm2, %v335_v18, 0.0  ;;  %v581_v37 = vsel %vm493_vm3, %v335_v18, 0.0 }
  0xa3   : > { %v430_v23 = vadd.f32 %v429_v1, %v428_v24  ;;  %v9892_v24 = vld [vmem:[#allocation46_spill] sm:$0xff] }
  0xa4   : > { %782 = vrot.lane.b32.xlu1 %v9880_v19, %s6222_s22  ;;  %997 = vrot.lane.b32.xlu0 %v9882_v47, %s6223_s23  ;;  %v568_v17 = vadd.f32 %v567_v41, %v566_v28  ;;  %v336_v28 = vmul.f32 %v9892_v24, %v9892_v24 }
  0xa5   : > { %v432_v59 = vadd.f32 %v9885_v44, %v430_v23  ;;  %v9896_v44 = vld [vmem:[#allocation25_spill] sm:$0xff] }
  0xa6   : > { %v690_v14 = vpop.trf.xlu1  ;;  %v570_v35 = vadd.f32 %v9886_v7, %v568_v17  ;;  %v9895_v17 = vld [vmem:[#allocation22_spill] sm:$0xff] }
  0xa7   : > { %890 = vmatprep.mubr.bf16.mxu0 %v690_v14  ;;  %v434_v8 = vadd.f32 %v9888_v56, %v432_v59  ;;  %v9897_v7 = vld [vmem:[#allocation26_spill] sm:$0xff]  ;;  %v583_v56 = vsel %vm493_vm3, %v336_v28, 0.0 }
  0xa8   : > { %786 = vrot.lane.b32.xlu1 %v9884_v62, %s6222_s22  ;;  %1001 = vrot.lane.b32.xlu0 %v9887_v30, %s6223_s23  ;;  %v572_v57 = vadd.f32 %v9889_v34, %v570_v35  ;;  %v275_v34 = vld [vmem:[%s6333_s7 + $0x188] sm:$0xff] }
  0xa9   : > { %v436_v60 = vadd.f32 %v435_v33, %v434_v8  ;;  %v9898_v8 = vld [vmem:[#allocation39_spill] sm:$0xff]  ;;  %v340_v18 = vmul.f32 %v275_v34, %v275_v34 }
  0xaa   : > { %v574_v21 = vadd.f32 %v573_v51, %v572_v57  ;;  %v445_v51 = vsel %vm355_vm2, %v336_v28, 0.0 }
  0xab   : > { %v438_v1 = vadd.f32 %v437_v38, %v436_v60 }
  0xac   : > { %790 = vrot.lane.b32.xlu1 %v9890_v16, %s6222_s22  ;;  %1005 = vrot.lane.b32.xlu0 %v9891_v55, %s6223_s23  ;;  %v576_v41 = vadd.f32 %v575_v29, %v574_v21  ;;  %v339_v29 = vmul.f32 %v274_v10, %v274_v10 }
  0xad   : > { %v440_v23 = vadd.f32 %v9894_v53, %v438_v1  ;;  %v9899_v1 = vld [vmem:[#allocation45_spill] sm:$0xff] }
  0xae   : > { %v578_v14 = vadd.f32 %v9895_v17, %v576_v41  ;;  %v9900_v41 = vld [vmem:[#allocation27_spill] sm:$0xff]  ;;  %v9901_v53 = vld [vmem:[#allocation29_spill] sm:$0xff]  ;;  %v451_v17 = vsel %vm355_vm2, %v339_v29, 0.0 }
  0xaf   : > { %v442_v59 = vadd.f32 %v9896_v44, %v440_v23  ;;  %v9903_v44 = vld [vmem:[#allocation30_spill] sm:$0xff] }
  0xb0   : > { %794 = vrot.lane.b32.xlu1 %v9893_v13, %s6222_s22  ;;  %v580_v35 = vadd.f32 %v9897_v7, %v578_v14  ;;  %v589_v14 = vsel %vm493_vm3, %v339_v29, 0.0  ;;  %v278_v7 = vld [vmem:[%s6333_s7 + $0x1a0] sm:$0xff] }
  0xb1   : > { %v444_v57 = vadd.f32 %v443_v58, %v442_v59  ;;  %v9902_v58 = vld [vmem:[#allocation28_spill] sm:$0xff]  ;;  %v343_v29 = vmul.f32 %v278_v7, %v278_v7 }
  0xb2   : > { %v779_v33 = vpop.permute.xlu0 %778  ;;  %v582_v38 = vadd.f32 %v581_v37, %v580_v35  ;;  %v453_v35 = vsel %vm355_vm2, %v340_v18, 0.0 }
  0xb3   : > { %5436 = vmatprep.subr.bf16.mxu0 %v779_v33  ;;  %v446_v60 = vadd.f32 %v445_v51, %v444_v57  ;;  %v591_v33 = vsel %vm493_vm3, %v340_v18, 0.0  ;;  %v6983_v51 = vpack.c.bf16 %v275_v34, %v274_v10  ;;  %v9904_v18 = vld [vmem:[#allocation33_spill] sm:$0xff]  ;;  %v9905_v10 = vld [vmem:[#allocation35_spill] sm:$0xff] }
  0xb4   : > { %798 = vrot.lane.b32.xlu1 %v9898_v8, %s6222_s22  ;;  %v584_v21 = vadd.f32 %v583_v56, %v582_v38  ;;  %v279_v38 = vld [vmem:[%s6333_s7 + $0x1a8] sm:$0xff] }
  0xb5   : > { %v448_v24 = vadd.f32 %v9900_v41, %v446_v60 }
  0xb6   : > { %v586_v28 = vadd.f32 %v9901_v53, %v584_v21  ;;  %v6972_v23 = vpop.permute.xlu0 %784 }
  0xb7   : > { %v450_v37 = vadd.f32 %v9902_v58, %v448_v24  ;;  %v344_v24 = vmul.f32 %v279_v38, %v279_v38  ;;  %v9906_v58 = vld [vmem:[#allocation34_spill] sm:$0xff] }
  0xb8   : > { %802 = vrot.lane.b32.xlu1 %v9899_v1, %s6222_s22  ;;  %v588_v59 = vadd.f32 %v9903_v44, %v586_v28  ;;  %v6991_v28 = vpack.c.bf16 %v279_v38, %v278_v7  ;;  %v282_v44 = vld [vmem:[%s6333_s7 + $0x1c0] sm:$0xff] }
  0xb9   : > { %v452_v56 = vadd.f32 %v451_v17, %v450_v37  ;;  %v459_v17 = vsel %vm355_vm2, %v343_v29, 0.0 }
  0xba   : > { %v590_v57 = vadd.f32 %v589_v14, %v588_v59  ;;  %v6986_v41 = vpop.permute.xlu0 %788  ;;  %v597_v14 = vsel %vm493_vm3, %v343_v29, 0.0  ;;  %v347_v29 = vmul.f32 %v282_v44, %v282_v44 }
  0xbb   : > { %v454_v60 = vadd.f32 %v453_v35, %v452_v56  ;;  %v283_v35 = vld [vmem:[%s6333_s7 + $0x1c8] sm:$0xff]  ;;  %v599_v56 = vsel %vm493_vm3, %v344_v24, 0.0 }
  0xbc   : > { %806 = vrot.lane.b32.xlu1 %v6713_v39, %s6222_s22  ;;  %v592_v21 = vadd.f32 %v591_v33, %v590_v57  ;;  %v461_v33 = vsel %vm355_vm2, %v344_v24, 0.0  ;;  %v7004_v57 = vpack.c.bf16 %v283_v35, %v282_v44 }
  0xbd   : > { %v456_v53 = vadd.f32 %v9904_v18, %v454_v60 }
  0xbe   : > { %v594_v34 = vadd.f32 %v9905_v10, %v592_v21  ;;  %v7006_v60 = vpop.permute.xlu0 %792  ;;  %v287_v10 = vld [vmem:[%s6333_s7 + $0x1e8] sm:$0xff] }
  0xbf   : > { %v458_v37 = vadd.f32 %v9906_v58, %v456_v53  ;;  %v286_v53 = vld [vmem:[%s6333_s7 + $0x1e0] sm:$0xff]  ;;  %v467_v58 = vsel %vm355_vm2, %v347_v29, 0.0 }
  0xc0   : > { %810 = vrot.lane.b32.xlu1 %v6983_v51, %s6222_s22  ;;  %v596_v59 = vadd.f32 %v6773_v42, %v594_v34  ;;  %v348_v42 = vmul.f32 %v283_v35, %v283_v35  ;;  %v7013_v34 = vpack.c.bf16 %v287_v10, %v286_v53 }
  0xc1   : > { %v460_v7 = vadd.f32 %v459_v17, %v458_v37 }
  0xc2   : > { %v598_v38 = vadd.f32 %v597_v14, %v596_v59  ;;  %v605_v14 = vsel %vm493_vm3, %v347_v29, 0.0  ;;  %v7020_v59 = vpop.permute.xlu0 %796  ;;  %v469_v35 = vsel %vm355_vm2, %v348_v42, 0.0 }
  0xc3   : > { %v462_v18 = vadd.f32 %v461_v33, %v460_v7  ;;  %v607_v33 = vsel %vm493_vm3, %v348_v42, 0.0 }
  0xc4   : > { %814 = vrot.lane.b32.xlu1 %v6991_v28, %s6222_s22  ;;  %v600_v21 = vadd.f32 %v599_v56, %v598_v38 }
  0xc5   : > { %v464_v17 = vadd.f32 %v6743_v25, %v462_v18  ;;  %v351_v25 = vmul.f32 %v286_v53, %v286_v53 }
  0xc6   : > { %v602_v24 = vadd.f32 %v6778_v45, %v600_v21  ;;  %v352_v21 = vmul.f32 %v287_v10, %v287_v10 }
  0xc7   : > { %v466_v44 = vadd.f32 %v6746_v46, %v464_v17  ;;  %v7030_v46 = vpop.permute.xlu0 %800  ;;  %v475_v18 = vsel %vm355_vm2, %v351_v25, 0.0  ;;  %v613_v42 = vsel %vm493_vm3, %v351_v25, 0.0 }
  0xc8   : > { %818 = vrot.lane.b32.xlu1 %v7004_v57, %s6222_s22  ;;  %v604_v37 = vadd.f32 %v6785_v48, %v602_v24  ;;  %v477_v17 = vsel %vm355_vm2, %v352_v21, 0.0  ;;  %v615_v10 = vsel %vm493_vm3, %v352_v21, 0.0 }
  0xc9   : > { %v468_v45 = vadd.f32 %v467_v58, %v466_v44 }
  0xca   : > { %v606_v56 = vadd.f32 %v605_v14, %v604_v37 }
  0xcb   : > { %v470_v38 = vadd.f32 %v469_v35, %v468_v45  ;;  %v7040_v37 = vpop.permute.xlu0 %804 }
  0xcc   : > { %822 = vrot.lane.b32.xlu1 %v7013_v34, %s6222_s22  ;;  %v608_v7 = vadd.f32 %v607_v33, %v606_v56 }
  0xcd   : > { %v472_v48 = vadd.f32 %v6753_v4, %v470_v38 }
  0xce   : > { %v610_v29 = vadd.f32 %v6788_v31, %v608_v7 }
  0xcf   : > { %v474_v53 = vadd.f32 %v6756_v40, %v472_v48  ;;  %v7050_v56 = vpop.permute.xlu0 %808 }
  0xd0   : > { %943 = vrot.lane.b32.xlu1 %v6793_v9, %s6223_s23  ;;  %v612_v24 = vadd.f32 %v6796_v27, %v610_v29 }
  0xd1   : > { %v476_v58 = vadd.f32 %v475_v18, %v474_v53  ;;  %v290_v53 = vld [vmem:[#allocation3] sm:$0x1] }
  0xd2   : > { %v614_v31 = vadd.f32 %v613_v42, %v612_v24  ;;  %v7067_v42 = vpop.trf.xlu1 }
  0xd3   : > { %v478_v14 = vadd.f32 %v477_v17, %v476_v58  ;;  %v7054_v38 = vpop.permute.xlu0 %812  ;;  %9908 = vst [vmem:[#allocation9_spill] sm:$0xff] %v7067_v42 }
  0xd4   : > { %947 = vrot.lane.b32.xlu1 %v6830_v43, %s6223_s23  ;;  %v616_v4 = vadd.f32 %v615_v10, %v614_v31 }
  0xd5   : > { %v480_v35 = vadd.f32 %v6766_v0, %v478_v14 }
  0xd6   : > { %v618_v44 = vadd.f32 %v6803_v12, %v616_v4  ;;  %v9907_v12 = vld [vmem:[#allocation7_spill] sm:$0xff] }
  0xd7   : > { %v482_v27 = vadd.f32 %v6769_v3, %v480_v35 }
  0xd8   : > { %951 = vrot.lane.b32.xlu1 %v6858_v50, %s6223_s23  ;;  %v620_v40 = vadd.f32 %v6806_v52, %v618_v44  ;;  %v7061_v52 = vpop.permute.xlu0 %816 }
  0xd9   : > { %v483_v7 = vrot.slane %v482_v27, 4 }
  0xda   : > { %v621_v33 = vrot.slane %v620_v40, 4 }
  0xdb   : > { %v484_v29 = vadd.f32 %v483_v7, %v482_v27 }
  0xdc   : > { %955 = vrot.lane.b32.xlu1 %v6886_v63, %s6223_s23  ;;  %v622_v45 = vadd.f32 %v621_v33, %v620_v40  ;;  %v7069_v17 = vpop.permute.xlu0 %820 }
  0xdd   : > { %v485_v48 = vrot.slane %v484_v29, 2 }
  0xde   : > { %v623_v25 = vrot.slane %v622_v45, 2 }
  0xdf   : > { %v486_v18 = vadd.f32 %v485_v48, %v484_v29 }
  0xe0   : > { %959 = vrot.lane.b32.xlu1 %v9907_v12, %s6223_s23  ;;  %v624_v0 = vadd.f32 %v623_v25, %v622_v45  ;;  %v7080_v4 = vpop.permute.xlu0 %824 }
  0xe1   : > { %v487_v24 = vrot.slane %v486_v18, 1 }
  0xe2   : > { %v625_v21 = vrot.slane %v624_v0, 1 }
  0xe3   : > { %v488_v10 = vadd.f32 %v487_v24, %v486_v18 }
  0xe4   : > { %963 = vrot.lane.b32.xlu1 %v9880_v19, %s6223_s23  ;;  %v626_v3 = vadd.f32 %v625_v21, %v624_v0  ;;  %v7086_v35 = vpop.permute.xlu0 %945 }
  0xe5   : > { %v489_v31 = vadd.f32 %v488_v10, %v290_v53 }
  0xe6   : > { %628 = vrot.lane.b32.xlu0 %v626_v3, %s6222_s22 }
  0xe7   : > { %491 = vst.msk [vmem:[#allocation3] sm:$0x1] %vm490_vm4, %v489_v31 }
  0xe8   : > { %967 = vrot.lane.b32.xlu1 %v9884_v62, %s6223_s23  ;;  %v7096_v27 = vpop.permute.xlu0 %949 }
  0xea   : > { %1103 = vrot.lane.b32.xlu0 %v6793_v9, %s6224_s24 }
  0xec   : > { %971 = vrot.lane.b32.xlu1 %v9890_v16, %s6223_s23  ;;  %v7102_v25 = vpop.permute.xlu0 %953 }
  0xee   : > { %1109 = vrot.lane.b32.xlu0 %v6721_v5, %s6224_s24 }
  0xf0   : > { %975 = vrot.lane.b32.xlu1 %v9893_v13, %s6223_s23  ;;  %v7110_v0 = vpop.permute.xlu0 %957 }
  0xf2   : > { %v763_v58 = vpop.permute.xlu1 %762  ;;  %1113 = vrot.lane.b32.xlu0 %v6723_v36, %s6224_s24 }
  0xf3   : > { %5437 = vmatpush3.bf16.msra.mxu0 %v763_v58 }
  0xf4   : > { %979 = vrot.lane.b32.xlu1 %v9898_v8, %s6223_s23  ;;  %v7116_v3 = vpop.permute.xlu0 %961 }
  0xf6   : > { %v765_v14 = vpop.permute.xlu1 %764  ;;  %1117 = vrot.lane.b32.xlu0 %v6763_v32, %s6224_s24 }
  0xf8   : > { %983 = vrot.lane.b32.xlu1 %v9899_v1, %s6223_s23  ;;  %v7122_v18 = vpop.permute.xlu0 %965 }
  0xfa   : > { %v767_v44 = vpop.permute.xlu1 %766  ;;  %1121 = vrot.lane.b32.xlu0 %v6363_v6, %s6224_s24 }
  0xfc   : > { %987 = vrot.lane.b32.xlu1 %v6713_v39, %s6223_s23  ;;  %v7127_v10 = vpop.permute.xlu0 %969 }
  0xfe   : > { %v769_v40 = vpop.permute.xlu1 %768  ;;  %1125 = vrot.lane.b32.xlu0 %v6381_v11, %s6224_s24 }
 0x100   : > { %991 = vrot.lane.b32.xlu1 %v6983_v51, %s6223_s23 }
 0x102   : > { %v771_v33 = vpop.permute.xlu1 %770  ;;  %1129 = vrot.lane.b32.xlu0 %v6398_v15, %s6224_s24 }
 0x104   : > { %995 = vrot.lane.b32.xlu1 %v6991_v28, %s6223_s23 }
 0x106   : > { %v773_v45 = vpop.permute.xlu1 %772  ;;  %1133 = vrot.lane.b32.xlu0 %v6417_v20, %s6224_s24 }
 0x108   : > { %999 = vrot.lane.b32.xlu1 %v7004_v57, %s6223_s23 }
 0x10a   : > { %v775_v7 = vpop.permute.xlu1 %774  ;;  %1137 = vrot.lane.b32.xlu0 %v6428_v26, %s6224_s24 }
 0x10c   : > { %1003 = vrot.lane.b32.xlu1 %v7013_v34, %s6223_s23 }
 0x10e   : > { %v777_v21 = vpop.permute.xlu1 %776  ;;  %1141 = vrot.lane.b32.xlu0 %v9871_v61, %s6224_s24 }
 0x112   : > { %v781_v29 = vpop.permute.xlu1 %780  ;;  %1145 = vrot.lane.b32.xlu0 %v6482_v49, %s6224_s24 }
 0x113   : > { %5438 = vmatprep.subr.bf16.mxu0 %v781_v29 }
 0x114   : > { %5439 = vmatpush3.bf16.msra.mxu0 %v765_v14 }
 0x116   : > { %v783_v48 = vpop.permute.xlu1 %782  ;;  %1149 = vrot.lane.b32.xlu0 %v6521_v22, %s6224_s24 }
 0x117   : > { %5440 = vmatprep.subr.bf16.mxu0 %v783_v48 }
 0x118   : > { %5441 = vmatpush3.bf16.msra.mxu0 %v767_v44 }
 0x119   : > { %5442 = vmatprep.subr.bf16.mxu0 %v6972_v23  ;;  %v7134_v23 = vpop.permute.xlu0 %973 }
 0x11a   : > { %v787_v24 = vpop.permute.xlu1 %786  ;;  %1153 = vrot.lane.b32.xlu0 %v9877_v54, %s6224_s24 }
 0x11c   : > { %5443 = vmatpush3.bf16.msra.mxu0 %v769_v40 }
 0x11d   : > { %5444 = vmatprep.subr.bf16.mxu0 %v787_v24  ;;  %v7139_v44 = vpop.permute.xlu0 %977 }
 0x11e   : > { %v791_v53 = vpop.permute.xlu1 %790  ;;  %1157 = vrot.lane.b32.xlu0 %v9882_v47, %s6224_s24 }
 0x120   : > { %5445 = vmatpush3.bf16.msra.mxu0 %v771_v33 }
 0x121   : > { %5446 = vmatprep.subr.bf16.mxu0 %v6986_v41  ;;  %v7145_v40 = vpop.permute.xlu0 %981 }
 0x122   : > { %v795_v31 = vpop.permute.xlu1 %794  ;;  %1161 = vrot.lane.b32.xlu0 %v9887_v30, %s6224_s24 }
 0x124   : > { %5447 = vmatpush3.bf16.msra.mxu0 %v773_v45 }
 0x125   : > { %5448 = vmatprep.subr.bf16.mxu0 %v791_v53 }
 0x126   : > { %v799_v58 = vpop.permute.xlu1 %798  ;;  %1165 = vrot.lane.b32.xlu0 %v9891_v55, %s6224_s24 }
 0x128   : > { %5449 = vmatpush3.bf16.msra.mxu0 %v775_v7 }
 0x129   : > { %5450 = vmatprep.subr.bf16.mxu0 %v7006_v60  ;;  %v7150_v60 = vpop.permute.xlu0 %985 }
 0x12a   : > { %v803_v14 = vpop.permute.xlu1 %802  ;;  %1285 = vrot.lane.b32.xlu0 %v6697_v2, %s6225_s25  ;;  %9909 = vst [vmem:[#allocation44_spill] sm:$0xff] %v7150_v60 }
 0x12c   : > { %5451 = vmatpush3.bf16.msra.mxu0 %v777_v21 }
 0x12d   : > { %v7157_v21 = vpop.permute.xlu0 %989 }
 0x12e   : > { %v807_v41 = vpop.permute.xlu1 %806  ;;  %1289 = vrot.lane.b32.xlu0 %v6721_v5, %s6225_s25  ;;  %9910 = vst [vmem:[#allocation23_spill] sm:$0xff] %v7157_v21 }
 0x132   : > { %v811_v33 = vpop.permute.xlu1 %810  ;;  %1293 = vrot.lane.b32.xlu0 %v6723_v36, %s6225_s25 }
 0x133   : > { %5458 = vmatprep.subr.bf16.mxu1 %v811_v33 }
 0x134   : > { %5459 = vmatpush3.bf16.msra.mxu1 %v795_v31 }
 0x135   : > { %5460 = vmatprep.subr.bf16.mxu1 %v7054_v38  ;;  %v994_v38 = vpop.permute.xlu0 %993 }
 0x136   : > { %v815_v45 = vpop.permute.xlu1 %814  ;;  %1297 = vrot.lane.b32.xlu0 %v6763_v32, %s6225_s25 }
 0x138   : > { %5461 = vmatpush3.bf16.msra.mxu1 %v7020_v59 }
 0x139   : > { %5462 = vmatprep.subr.bf16.mxu1 %v815_v45 }
 0x13a   : > { %v819_v7 = vpop.permute.xlu1 %818  ;;  %1301 = vrot.lane.b32.xlu0 %v6363_v6, %s6225_s25 }
 0x13c   : > { %5463 = vmatpush3.bf16.msra.mxu1 %v799_v58 }
 0x13d   : > { %5464 = vmatprep.subr.bf16.mxu1 %v7061_v52  ;;  %v998_v52 = vpop.permute.xlu0 %997 }
 0x13e   : > { %v823_v29 = vpop.permute.xlu1 %822  ;;  %1305 = vrot.lane.b32.xlu0 %v6381_v11, %s6225_s25 }
 0x140   : > { %5465 = vmatpush3.bf16.msra.mxu1 %v7030_v46 }
 0x141   : > { %5466 = vmatprep.subr.bf16.mxu1 %v819_v7  ;;  %v1002_v24 = vpop.permute.xlu0 %1001 }
 0x142   : > { %v944_v48 = vpop.permute.xlu1 %943  ;;  %1309 = vrot.lane.b32.xlu0 %v6398_v15, %s6225_s25 }
 0x143   : > { %1039 = vxpose.xlu1.c.b16.start [1/8] (narrow) %v944_v48, 16 }
 0x144   : > { %5467 = vmatpush3.bf16.msra.mxu1 %v803_v14 }
 0x145   : > { %5468 = vmatprep.subr.bf16.mxu1 %v7069_v17 }
 0x146   : > { %v948_v59 = vpop.permute.xlu1 %947  ;;  %1313 = vrot.lane.b32.xlu0 %v6417_v20, %s6225_s25 }
 0x147   : > { %1040 = vxpose.xlu1.c.b16.cont [2/8] (narrow) %v7086_v35, 16 }
 0x148   : > { %5469 = vmatpush3.bf16.msra.mxu1 %v7040_v37  ;;  %v1006_v37 = vpop.permute.xlu0 %1005 }
 0x149   : > { %5470 = vmatprep.subr.bf16.mxu1 %v823_v29 }
 0x14a   : > { %v952_v46 = vpop.permute.xlu1 %951  ;;  %1317 = vrot.lane.b32.xlu0 %v6428_v26, %s6225_s25 }
 0x14b   : > { %1041 = vxpose.xlu1.c.b16.cont [3/8] (narrow) %v948_v59, 16 }
 0x14c   : > { %5471 = vmatpush3.bf16.msra.mxu1 %v807_v41 }
 0x14d   : > { %5472 = vmatprep.subr.bf16.mxu1 %v7080_v4  ;;  %v492_v4 = vld [vmem:[#allocation3 + $0x1] sm:$0x1] }
 0x14e   : > { %v956_v17 = vpop.permute.xlu1 %955  ;;  %1321 = vrot.lane.b32.xlu0 %v9871_v61, %s6225_s25 }
 0x14f   : > { %1042 = vxpose.xlu1.c.b16.cont [4/8] (narrow) %v7096_v27, 16 }
 0x150   : > { %5473 = vmatpush3.bf16.msra.mxu1 %v7050_v56 }
 0x152   : > { %v7177_v35 = vpop.permute.xlu1 %959  ;;  %1325 = vrot.lane.b32.xlu0 %v6482_v49, %s6225_s25 }
 0x153   : > { %1043 = vxpose.xlu1.c.b16.cont [5/8] (narrow) %v952_v46, 16 }
 0x156   : > { %v7181_v53 = vpop.permute.xlu1 %963  ;;  %1329 = vrot.lane.b32.xlu0 %v6521_v22, %s6225_s25 }
 0x157   : > { %1044 = vxpose.xlu1.c.b16.cont [6/8] (narrow) %v7102_v25, 16 }
 0x158   : > { %v629_v27 = vpop.permute.xlu0 %628 }
 0x159   : > { %v631_v58 = vadd.f32 %v629_v27, %v492_v4 }
 0x15a   : > { %v7186_v31 = vpop.permute.xlu1 %967  ;;  %1333 = vrot.lane.b32.xlu0 %v9877_v54, %s6225_s25 }
 0x15b   : > { %1045 = vxpose.xlu1.c.b16.cont [7/8] (narrow) %v956_v17, 16  ;;  %632 = vst.msk [vmem:[#allocation3 + $0x1] sm:$0x1] %vm490_vm4, %v631_v58 }
 0x15c   : > { %v7191_v56 = vpop.permute.xlu0 %1103 }
 0x15e   : > { %v7193_v14 = vpop.permute.xlu1 %971  ;;  %1337 = vrot.lane.b32.xlu0 %v9882_v47, %s6225_s25 }
 0x15f   : > { %1046 = vxpose.xlu1.c.b16.end [8/8] (narrow) %v7110_v0, 16 }
 0x160   : > { %v7198_v25 = vpop.permute.xlu0 %1109 }
 0x161   : > { %9911 = vst [vmem:[#allocation15_spill] sm:$0xff] %v7198_v25 }
 0x162   : > { %v7200_v41 = vpop.permute.xlu1 %975  ;;  %1341 = vrot.lane.b32.xlu0 %v9887_v30, %s6225_s25 }
 0x164   : > { %v7204_v33 = vpop.permute.xlu0 %1113 }
 0x165   : > { %9912 = vst [vmem:[#allocation24_spill] sm:$0xff] %v7204_v33 }
 0x166   : > { %v7206_v45 = vpop.permute.xlu1 %979  ;;  %1345 = vrot.lane.b32.xlu0 %v9891_v55, %s6225_s25 }
 0x168   : > { %v7210_v7 = vpop.permute.xlu0 %1117 }
 0x169   : > { %9913 = vst [vmem:[#allocation36_spill] sm:$0xff] %v7210_v7 }
 0x16a   : > { %v7212_v0 = vpop.permute.xlu1 %983  ;;  %1459 = vrot.lane.b32.xlu0 %v9907_v12, %s6226_s26 }
 0x16c   : > { %v7216_v29 = vpop.permute.xlu0 %1121 }
 0x16e   : > { %v7218_v48 = vpop.permute.xlu1 %987  ;;  %1491 = vrot.lane.b32.xlu0 %v6983_v51, %s6226_s26 }
 0x16f   : > { %9914 = vst [vmem:[#allocation37_spill] sm:$0xff] %v7218_v48 }
 0x170   : > { %v7222_v59 = vpop.permute.xlu0 %1125 }
 0x172   : > { %v992_v46 = vpop.permute.xlu1 %991  ;;  %1443 = vrot.lane.b32.xlu0 %v6793_v9, %s6226_s26 }
 0x173   : > { %1087 = vxpose.xlu1.c.b16.start [1/8] (narrow) %v992_v46, 16 }
 0x174   : > { %v7226_v17 = vpop.permute.xlu0 %1129 }
 0x175   : > { %9915 = vst [vmem:[#allocation11_spill] sm:$0xff] %v7226_v17 }
 0x176   : > { %1475 = vrot.lane.b32.xlu0 %v9893_v13, %s6226_s26  ;;  %v996_v4 = vpop.permute.xlu1 %995 }
 0x177   : > { %1088 = vxpose.xlu1.c.b16.cont [2/8] (narrow) %v994_v38, 16 }
 0x178   : > { %v7230_v27 = vpop.permute.xlu0 %1133 }
 0x179   : > { %9916 = vst [vmem:[#allocation13_spill] sm:$0xff] %v7230_v27 }
 0x17a   : > { %1461 = vrot.lane.b32.xlu0 %v6363_v6, %s6226_s26  ;;  %v1000_v46 = vpop.permute.xlu1 %999 }
 0x17b   : > { %1089 = vxpose.xlu1.c.b16.cont [3/8] (narrow) %v996_v4, 16 }
 0x17c   : > { %v7234_v58 = vpop.permute.xlu0 %1137 }
 0x17d   : > { %9917 = vst [vmem:[#allocation32_spill] sm:$0xff] %v7234_v58 }
 0x17e   : > { %1493 = vrot.lane.b32.xlu0 %v9877_v54, %s6226_s26  ;;  %v1004_v4 = vpop.permute.xlu1 %1003 }
 0x17f   : > { %1090 = vxpose.xlu1.c.b16.cont [4/8] (narrow) %v998_v52, 16 }
 0x180   : > { %v7238_v42 = vpop.permute.xlu0 %1141 }
 0x181   : > { %9918 = vst [vmem:[#allocation12_spill] sm:$0xff] %v7238_v42 }
 0x182   : > { %1445 = vrot.lane.b32.xlu0 %v6697_v2, %s6226_s26 }
 0x183   : > { %1091 = vxpose.xlu1.c.b16.cont [5/8] (narrow) %v1000_v46, 16 }
 0x184   : > { %v7242_v38 = vpop.permute.xlu0 %1145 }
 0x185   : > { %9919 = vst [vmem:[#allocation14_spill] sm:$0xff] %v7242_v38 }
 0x186   : > { %1477 = vrot.lane.b32.xlu0 %v6428_v26, %s6226_s26 }
 0x187   : > { %1092 = vxpose.xlu1.c.b16.cont [6/8] (narrow) %v1002_v24, 16 }
 0x188   : > { %v7246_v7 = vpop.permute.xlu0 %1149 }
 0x189   : > { %9920 = vst [vmem:[#allocation8_spill] sm:$0xff] %v7246_v7 }
 0x18a   : > { %1463 = vrot.lane.b32.xlu0 %v9880_v19, %s6226_s26 }
 0x18b   : > { %1093 = vxpose.xlu1.c.b16.cont [7/8] (narrow) %v1004_v4, 16 }
 0x18c   : > { %v7250_v52 = vpop.permute.xlu0 %1153 }
 0x18d   : > { %9921 = vst [vmem:[#allocation41_spill] sm:$0xff] %v7250_v52 }
 0x18e   : > { %1495 = vrot.lane.b32.xlu0 %v6991_v28, %s6226_s26 }
 0x18f   : > { %1094 = vxpose.xlu1.c.b16.end [8/8] (narrow) %v1006_v37, 16 }
 0x190   : > { %v7254_v46 = vpop.permute.xlu0 %1157 }
 0x191   : > { %9922 = vst [vmem:[#allocation38_spill] sm:$0xff] %v7254_v46 }
 0x192   : > { %1447 = vrot.lane.b32.xlu0 %v6830_v43, %s6226_s26 }
 0x193   : > { %1105 = vrot.lane.b32.xlu1 %v6697_v2, %s6224_s24 }
 0x194   : > { %v7260_v24 = vpop.permute.xlu0 %1161 }
 0x195   : > { %9923 = vst [vmem:[#allocation42_spill] sm:$0xff] %v7260_v24 }
 0x196   : > { %1479 = vrot.lane.b32.xlu0 %v9898_v8, %s6226_s26 }
 0x197   : > { %1107 = vrot.lane.b32.xlu1 %v6830_v43, %s6224_s24 }
 0x198   : > { %v7266_v37 = vpop.permute.xlu0 %1165 }
 0x199   : > { %9924 = vst [vmem:[#allocation10_spill] sm:$0xff] %v7266_v37 }
 0x19a   : > { %1639 = vrot.lane.b32.xlu0 %v9907_v12, %s6227_s27 }
 0x19b   : > { %1111 = vrot.lane.b32.xlu1 %v6858_v50, %s6224_s24 }
 0x19c   : > { %v7272_v4 = vpop.permute.xlu0 %1285 }
 0x19e   : > { %1671 = vrot.lane.b32.xlu0 %v6983_v51, %s6227_s27 }
 0x19f   : > { %1115 = vrot.lane.b32.xlu1 %v6886_v63, %s6224_s24 }
 0x1a0   : > { %v7278_v7 = vpop.permute.xlu0 %1289 }
 0x1a2   : > { %1465 = vrot.lane.b32.xlu0 %v6381_v11, %s6226_s26 }
 0x1a3   : > { %1119 = vrot.lane.b32.xlu1 %v9907_v12, %s6224_s24 }
 0x1a4   : > { %v7284_v37 = vpop.permute.xlu0 %1293 }
 0x1a6   : > { %1497 = vrot.lane.b32.xlu0 %v9882_v47, %s6226_s26 }
 0x1a7   : > { %1123 = vrot.lane.b32.xlu1 %v9880_v19, %s6224_s24 }
 0x1a8   : > { %v7290_v38 = vpop.permute.xlu0 %1297 }
 0x1aa   : > { %1655 = vrot.lane.b32.xlu0 %v9893_v13, %s6227_s27 }
 0x1ab   : > { %1127 = vrot.lane.b32.xlu1 %v9884_v62, %s6224_s24 }
 0x1ac   : > { %v7296_v24 = vpop.permute.xlu0 %1301 }
 0x1ae   : > { %1481 = vrot.lane.b32.xlu0 %v9871_v61, %s6226_s26 }
 0x1af   : > { %1131 = vrot.lane.b32.xlu1 %v9890_v16, %s6224_s24 }
 0x1b0   : > { %v7302_v42 = vpop.permute.xlu0 %1305 }
 0x1b2   : > { %1673 = vrot.lane.b32.xlu0 %v9877_v54, %s6227_s27 }
 0x1b3   : > { %1135 = vrot.lane.b32.xlu1 %v9893_v13, %s6224_s24 }
 0x1b4   : > { %v7308_v46 = vpop.permute.xlu0 %1309 }
 0x1b6   : > { %1657 = vrot.lane.b32.xlu0 %v6428_v26, %s6227_s27 }
 0x1b7   : > { %1139 = vrot.lane.b32.xlu1 %v9898_v8, %s6224_s24 }
 0x1b8   : > { %v7314_v58 = vpop.permute.xlu0 %1313 }
 0x1ba   : > { %1675 = vrot.lane.b32.xlu0 %v6991_v28, %s6227_s27 }
 0x1bb   : > { %1143 = vrot.lane.b32.xlu1 %v9899_v1, %s6224_s24 }
 0x1bc   : > { %v7320_v52 = vpop.permute.xlu0 %1317 }
 0x1bd   : > { %9925 = vst [vmem:[#allocation16_spill] sm:$0xff] %v7320_v52 }
 0x1be   : > { %1499 = vrot.lane.b32.xlu0 %v7004_v57, %s6226_s26 }
 0x1bf   : > { %1147 = vrot.lane.b32.xlu1 %v6713_v39, %s6224_s24 }
 0x1c0   : > { %v7326_v27 = vpop.permute.xlu0 %1321 }
 0x1c1   : > { %9926 = vst [vmem:[#allocation18_spill] sm:$0xff] %v7326_v27 }
 0x1c2   : > { %1659 = vrot.lane.b32.xlu0 %v9898_v8, %s6227_s27 }
 0x1c3   : > { %1151 = vrot.lane.b32.xlu1 %v6983_v51, %s6224_s24 }
 0x1c4   : > { %v7332_v21 = vpop.permute.xlu0 %1325 }
 0x1c5   : > { %9927 = vst [vmem:[#allocation40_spill] sm:$0xff] %v7332_v21 }
 0x1c6   : > { %1483 = vrot.lane.b32.xlu0 %v9899_v1, %s6226_s26 }
 0x1c7   : > { %1155 = vrot.lane.b32.xlu1 %v6991_v28, %s6224_s24 }
 0x1c8   : > { %v7338_v52 = vpop.permute.xlu0 %1329 }
 0x1c9   : > { %9928 = vst [vmem:[#allocation17_spill] sm:$0xff] %v7338_v52 }
 0x1ca   : > { %1677 = vrot.lane.b32.xlu0 %v9882_v47, %s6227_s27 }
 0x1cb   : > { %1159 = vrot.lane.b32.xlu1 %v7004_v57, %s6224_s24 }
 0x1cc   : > { %v7344_v27 = vpop.permute.xlu0 %1333 }
 0x1cd   : > { %9929 = vst [vmem:[#allocation19_spill] sm:$0xff] %v7344_v27 }
 0x1ce   : > { %1661 = vrot.lane.b32.xlu0 %v9871_v61, %s6227_s27 }
 0x1cf   : > { %1163 = vrot.lane.b32.xlu1 %v7013_v34, %s6224_s24 }
 0x1d0   : > { %v7350_v21 = vpop.permute.xlu0 %1337 }
 0x1d1   : > { %9930 = vst [vmem:[#allocation20_spill] sm:$0xff] %v7350_v21 }
 0x1d2   : > { %1679 = vrot.lane.b32.xlu0 %v7004_v57, %s6227_s27 }
 0x1d3   : > { %1283 = vrot.lane.b32.xlu1 %v6793_v9, %s6225_s25 }
 0x1d4   : > { %v7356_v52 = vpop.permute.xlu0 %1341 }
 0x1d5   : > { %9931 = vst [vmem:[#allocation43_spill] sm:$0xff] %v7356_v52 }
 0x1d6   : > { %1501 = vrot.lane.b32.xlu0 %v9887_v30, %s6226_s26 }
 0x1d7   : > { %1287 = vrot.lane.b32.xlu1 %v6830_v43, %s6225_s25 }
 0x1d8   : > { %v7362_v27 = vpop.permute.xlu0 %1345 }
 0x1d9   : > { %9932 = vst [vmem:[#allocation46_spill] sm:$0xff] %v7362_v27 }
 0x1da   : > { %1663 = vrot.lane.b32.xlu0 %v9899_v1, %s6227_s27 }
 0x1db   : > { %1291 = vrot.lane.b32.xlu1 %v6858_v50, %s6225_s25 }
 0x1dc   : > { %v7368_v21 = vpop.permute.xlu0 %1459 }
 0x1dd   : > { %9933 = vst [vmem:[#allocation31_spill] sm:$0xff] %v7368_v21 }
 0x1de   : > { %1485 = vrot.lane.b32.xlu0 %v6482_v49, %s6226_s26 }
 0x1df   : > { %1295 = vrot.lane.b32.xlu1 %v6886_v63, %s6225_s25 }
 0x1e0   : > { %v7374_v52 = vpop.permute.xlu0 %1491 }
 0x1e1   : > { %9934 = vst [vmem:[#allocation21_spill] sm:$0xff] %v7374_v52 }
 0x1e2   : > { %1681 = vrot.lane.b32.xlu0 %v9887_v30, %s6227_s27 }
 0x1e3   : > { %1299 = vrot.lane.b32.xlu1 %v9907_v12, %s6225_s25  ;;  %v7406_v12 = vpop.trf.xlu1 }
 0x1e4   : > { %v7380_v27 = vpop.permute.xlu0 %1443  ;;  %9940 = vst [vmem:[#allocation27_spill] sm:$0xff] %v7406_v12 }
 0x1e5   : > { %9935 = vst [vmem:[#allocation22_spill] sm:$0xff] %v7380_v27 }
 0x1e6   : > { %1665 = vrot.lane.b32.xlu0 %v6482_v49, %s6227_s27 }
 0x1e7   : > { %1303 = vrot.lane.b32.xlu1 %v9880_v19, %s6225_s25  ;;  %v7414_v17 = vpop.trf.xlu1 }
 0x1e8   : > { %v7386_v21 = vpop.permute.xlu0 %1475  ;;  %9943 = vst [vmem:[#allocation30_spill] sm:$0xff] %v7414_v17 }
 0x1e9   : > { %9936 = vst [vmem:[#allocation25_spill] sm:$0xff] %v7386_v21 }
 0x1ea   : > { %1683 = vrot.lane.b32.xlu0 %v7013_v34, %s6227_s27 }
 0x1eb   : > { %1307 = vrot.lane.b32.xlu1 %v9884_v62, %s6225_s25 }
 0x1ec   : > { %v7392_v52 = vpop.permute.xlu0 %1461 }
 0x1ed   : > { %9937 = vst [vmem:[#allocation26_spill] sm:$0xff] %v7392_v52 }
 0x1ee   : > { %1503 = vrot.lane.b32.xlu0 %v7013_v34, %s6226_s26 }
 0x1ef   : > { %1311 = vrot.lane.b32.xlu1 %v9890_v16, %s6225_s25 }
 0x1f0   : > { %v7398_v27 = vpop.permute.xlu0 %1493 }
 0x1f1   : > { %9938 = vst [vmem:[#allocation39_spill] sm:$0xff] %v7398_v27 }
 0x1f2   : > { %1667 = vrot.lane.b32.xlu0 %v6713_v39, %s6227_s27 }
 0x1f4   : > { %v7402_v21 = vpop.permute.xlu0 %1445 }
 0x1f5   : > { %9939 = vst [vmem:[#allocation45_spill] sm:$0xff] %v7402_v21 }
 0x1f6   : > { %1487 = vrot.lane.b32.xlu0 %v6713_v39, %s6226_s26 }
 0x1f8   : > { %v7408_v33 = vpop.permute.xlu0 %1477 }
 0x1f9   : > { %9941 = vst [vmem:[#allocation29_spill] sm:$0xff] %v7408_v33 }
 0x1fa   : > { %1685 = vrot.lane.b32.xlu0 %v9891_v55, %s6227_s27 }
 0x1fc   : > { %v7412_v52 = vpop.permute.xlu0 %1463 }
 0x1fd   : > { %9942 = vst [vmem:[#allocation28_spill] sm:$0xff] %v7412_v52 }
 0x1fe   : > { %1669 = vrot.lane.b32.xlu0 %v6521_v22, %s6227_s27 }
 0x200   : > { %v7418_v27 = vpop.permute.xlu0 %1495 }
 0x201   : > { %9944 = vst [vmem:[#allocation33_spill] sm:$0xff] %v7418_v27 }
 0x202   : > { %1505 = vrot.lane.b32.xlu0 %v9891_v55, %s6226_s26 }
 0x204   : > { %v7424_v12 = vpop.permute.xlu0 %1447 }
 0x205   : > { %v7422_v21 = vpop.permute.xlu1 %1105  ;;  %9945 = vst [vmem:[#allocation35_spill] sm:$0xff] %v7424_v12 }
 0x206   : > { %1489 = vrot.lane.b32.xlu0 %v6521_v22, %s6226_s26 }
 0x208   : > { %v7430_v52 = vpop.permute.xlu0 %1479 }
 0x209   : > { %v7428_v33 = vpop.permute.xlu1 %1107  ;;  %9946 = vst [vmem:[#allocation34_spill] sm:$0xff] %v7430_v52 }
 0x20a   : > { %1831 = vrot.lane.b32.xlu0 %v6983_v51, %s6228_s28 }
 0x20c   : > { %v7436_v27 = vpop.permute.xlu0 %1639 }
 0x20d   : > { %v7434_v17 = vpop.permute.xlu1 %1111  ;;  %9948 = vst [vmem:[#allocation48_spill] sm:$0xff] %v7436_v27 }
 0x20e   : > { %9947 = vst [vmem:[#allocation47_spill] sm:$0xff] %v7434_v17  ;;  %1815 = vrot.lane.b32.xlu0 %v9893_v13, %s6228_s28 }
 0x210   : > { %v7442_v12 = vpop.permute.xlu0 %1671 }
 0x211   : > { %v7440_v48 = vpop.permute.xlu1 %1115  ;;  %9950 = vst [vmem:[#allocation50_spill] sm:$0xff] %v7442_v12 }
 0x212   : > { %9949 = vst [vmem:[#allocation49_spill] sm:$0xff] %v7440_v48  ;;  %1833 = vrot.lane.b32.xlu0 %v9877_v54, %s6228_s28 }
 0x214   : > { %v7446_v52 = vpop.permute.xlu0 %1465 }
 0x215   : > { %v1120_v60 = vpop.permute.xlu1 %1119  ;;  %9951 = vst [vmem:[#allocation51_spill] sm:$0xff] %v7446_v52 }
 0x216   : > { %5480 = vmatprep.subr.bf16.mxu0 %v1120_v60  ;;  %1817 = vrot.lane.b32.xlu0 %v6428_v26, %s6228_s28 }
 0x218   : > { %v7452_v27 = vpop.permute.xlu0 %1497 }
 0x219   : > { %v7450_v17 = vpop.permute.xlu1 %1123  ;;  %9952 = vst [vmem:[#allocation52_spill] sm:$0xff] %v7452_v27 }
 0x21a   : > { %1835 = vrot.lane.b32.xlu0 %v6991_v28, %s6228_s28 }
 0x21c   : > { %v7458_v12 = vpop.permute.xlu0 %1655 }
 0x21d   : > { %v7456_v48 = vpop.permute.xlu1 %1127  ;;  %9953 = vst [vmem:[#allocation53_spill] sm:$0xff] %v7458_v12 }
 0x21e   : > { %1819 = vrot.lane.b32.xlu0 %v9898_v8, %s6228_s28 }
 0x220   : > { %v7464_v60 = vpop.permute.xlu0 %1481 }
 0x221   : > { %v7462_v25 = vpop.permute.xlu1 %1131  ;;  %9955 = vst [vmem:[#allocation55_spill] sm:$0xff] %v7464_v60 }
 0x222   : > { %9954 = vst [vmem:[#allocation54_spill] sm:$0xff] %v7462_v25  ;;  %1837 = vrot.lane.b32.xlu0 %v9882_v47, %s6228_s28 }
 0x224   : > { %v7470_v27 = vpop.permute.xlu0 %1673 }
 0x225   : > { %v7468_v26 = vpop.permute.xlu1 %1135  ;;  %9957 = vst [vmem:[#allocation57_spill] sm:$0xff] %v7470_v27 }
 0x226   : > { %9956 = vst [vmem:[#allocation56_spill] sm:$0xff] %v7468_v26  ;;  %1821 = vrot.lane.b32.xlu0 %v9871_v61, %s6228_s28 }
 0x228   : > { %v7476_v12 = vpop.permute.xlu0 %1657 }
 0x229   : > { %v7474_v52 = vpop.permute.xlu1 %1139  ;;  %9959 = vst [vmem:[#allocation59_spill] sm:$0xff] %v7476_v12 }
 0x22a   : > { %9958 = vst [vmem:[#allocation58_spill] sm:$0xff] %v7474_v52  ;;  %1839 = vrot.lane.b32.xlu0 %v7004_v57, %s6228_s28 }
 0x22c   : > { %v7482_v60 = vpop.permute.xlu0 %1675 }
 0x22d   : > { %v7480_v25 = vpop.permute.xlu1 %1143  ;;  %9961 = vst [vmem:[#allocation61_spill] sm:$0xff] %v7482_v60 }
 0x22e   : > { %9960 = vst [vmem:[#allocation60_spill] sm:$0xff] %v7480_v25  ;;  %1823 = vrot.lane.b32.xlu0 %v9899_v1, %s6228_s28 }
 0x230   : > { %v7488_v27 = vpop.permute.xlu0 %1499 }
 0x231   : > { %v7486_v26 = vpop.permute.xlu1 %1147  ;;  %9963 = vst [vmem:[#allocation63_spill] sm:$0xff] %v7488_v27 }
 0x232   : > { %9962 = vst [vmem:[#allocation62_spill] sm:$0xff] %v7486_v26  ;;  %1809 = vrot.lane.b32.xlu0 %v6398_v15, %s6228_s28 }
 0x234   : > { %v7492_v52 = vpop.permute.xlu0 %1659 }
 0x235   : > { %v1152_v61 = vpop.permute.xlu1 %1151  ;;  %9964 = vst [vmem:[#allocation64_spill] sm:$0xff] %v7492_v52 }
 0x236   : > { %5502 = vmatprep.subr.bf16.mxu1 %v1152_v61  ;;  %1793 = vrot.lane.b32.xlu0 %v6723_v36, %s6228_s28 }
 0x238   : > { %v7498_v60 = vpop.permute.xlu0 %1483 }
 0x239   : > { %v7496_v12 = vpop.permute.xlu1 %1155  ;;  %9966 = vst [vmem:[#allocation66_spill] sm:$0xff] %v7498_v60 }
 0x23a   : > { %9965 = vst [vmem:[#allocation65_spill] sm:$0xff] %v7496_v12  ;;  %1825 = vrot.lane.b32.xlu0 %v6482_v49, %s6228_s28 }
 0x23c   : > { %v7504_v27 = vpop.permute.xlu0 %1677 }
 0x23d   : > { %v7502_v26 = vpop.permute.xlu1 %1159  ;;  %9967 = vst [vmem:[#allocation67_spill] sm:$0xff] %v7504_v27 }
 0x23e   : > { %1811 = vrot.lane.b32.xlu0 %v9890_v16, %s6228_s28 }
 0x240   : > { %v7510_v61 = vpop.permute.xlu0 %1661 }
 0x241   : > { %v7508_v25 = vpop.permute.xlu1 %1163  ;;  %9968 = vst [vmem:[#allocation68_spill] sm:$0xff] %v7510_v61 }
 0x242   : > { %1843 = vrot.lane.b32.xlu0 %v7013_v34, %s6228_s28 }
 0x244   : > { %v7514_v12 = vpop.permute.xlu0 %1679 }
 0x245   : > { %v1284_v52 = vpop.permute.xlu1 %1283  ;;  %9969 = vst [vmem:[#allocation69_spill] sm:$0xff] %v7514_v12 }
 0x246   : > { %1379 = vxpose.xlu1.c.b16.start [1/8] (narrow) %v1284_v52, 16  ;;  %1795 = vrot.lane.b32.xlu0 %v6886_v63, %s6228_s28 }
 0x248   : > { %v7518_v49 = vpop.permute.xlu0 %1501 }
 0x249   : > { %v1288_v27 = vpop.permute.xlu1 %1287 }
 0x24a   : > { %1380 = vxpose.xlu1.c.b16.cont [2/8] (narrow) %v7272_v4, 16  ;;  %1827 = vrot.lane.b32.xlu0 %v6713_v39, %s6228_s28 }
 0x24c   : > { %v7523_v60 = vpop.permute.xlu0 %1663 }
 0x24d   : > { %9970 = vst [vmem:[#allocation70_spill] sm:$0xff] %v7523_v60  ;;  %v1292_v52 = vpop.permute.xlu1 %1291 }
 0x24e   : > { %1381 = vxpose.xlu1.c.b16.cont [3/8] (narrow) %v1288_v27, 16  ;;  %1813 = vrot.lane.b32.xlu0 %v6417_v20, %s6228_s28 }
 0x250   : > { %v7527_v61 = vpop.permute.xlu0 %1485 }
 0x251   : > { %9971 = vst [vmem:[#allocation71_spill] sm:$0xff] %v7527_v61  ;;  %v1296_v27 = vpop.permute.xlu1 %1295 }
 0x252   : > { %1382 = vxpose.xlu1.c.b16.cont [4/8] (narrow) %v7278_v7, 16  ;;  %1845 = vrot.lane.b32.xlu0 %v9891_v55, %s6228_s28 }
 0x254   : > { %v7532_v12 = vpop.permute.xlu0 %1681 }
 0x255   : > { %9972 = vst [vmem:[#allocation72_spill] sm:$0xff] %v7532_v12  ;;  %v1300_v12 = vpop.permute.xlu1 %1299 }
 0x256   : > { %1383 = vxpose.xlu1.c.b16.cont [5/8] (narrow) %v1292_v52, 16  ;;  %1797 = vrot.lane.b32.xlu0 %v6763_v32, %s6228_s28 }
 0x258   : > { %v7536_v4 = vpop.permute.xlu0 %1665 }
 0x259   : > { %9973 = vst [vmem:[#allocation73_spill] sm:$0xff] %v7536_v4 }
 0x25a   : > { %1384 = vxpose.xlu1.c.b16.cont [6/8] (narrow) %v7284_v37, 16  ;;  %1829 = vrot.lane.b32.xlu0 %v6521_v22, %s6228_s28  ;;  %v1304_v37 = vpop.permute.xlu1 %1303 }
 0x25c   : > { %v7541_v60 = vpop.permute.xlu0 %1683 }
 0x25d   : > { %9974 = vst [vmem:[#allocation74_spill] sm:$0xff] %v7541_v60 }
 0x25e   : > { %1385 = vxpose.xlu1.c.b16.cont [7/8] (narrow) %v1296_v27, 16  ;;  %v1308_v27 = vpop.permute.xlu1 %1307 }
 0x260   : > { %v7543_v7 = vpop.permute.xlu0 %1503 }
 0x262   : > { %1386 = vxpose.xlu1.c.b16.end [8/8] (narrow) %v7290_v38, 16 }
 0x264   : > { %v7546_v52 = vpop.permute.xlu0 %1667 }
 0x266   : > { %1395 = vxpose.xlu1.c.b16.start [1/8] (narrow) %v1300_v12, 16  ;;  %v1312_v12 = vpop.permute.xlu1 %1311 }
 0x268   : > { %v7548_v61 = vpop.permute.xlu0 %1487 }
 0x26a   : > { %1396 = vxpose.xlu1.c.b16.cont [2/8] (narrow) %v7296_v24, 16 }
 0x26c   : > { %v7551_v4 = vpop.permute.xlu0 %1685 }
 0x26e   : > { %1397 = vxpose.xlu1.c.b16.cont [3/8] (narrow) %v1304_v37, 16 }
 0x270   : > { %v7553_v22 = vpop.permute.xlu0 %1669 }
 0x272   : > { %1398 = vxpose.xlu1.c.b16.cont [4/8] (narrow) %v7302_v42, 16 }
 0x274   : > { %v7556_v60 = vpop.permute.xlu0 %1505 }
 0x276   : > { %1399 = vxpose.xlu1.c.b16.cont [5/8] (narrow) %v1308_v27, 16 }
 0x278   : > { %666 = vxpose.xlu0.c.b16.start [1/8] (narrow) %v6793_v9, 16  ;;  %v7559_v38 = vpop.permute.xlu0 %1489 }
 0x27a   : > { %1400 = vxpose.xlu1.c.b16.cont [6/8] (narrow) %v7308_v46, 16 }
 0x27c   : > { %667 = vxpose.xlu0.c.b16.cont [2/8] (narrow) %v6697_v2, 16  ;;  %v7563_v24 = vpop.permute.xlu0 %1831 }
 0x27e   : > { %1401 = vxpose.xlu1.c.b16.cont [7/8] (narrow) %v1312_v12, 16 }
 0x280   : > { %668 = vxpose.xlu0.c.b16.cont [3/8] (narrow) %v6830_v43, 16  ;;  %v7566_v37 = vpop.permute.xlu0 %1815 }
 0x282   : > { %1402 = vxpose.xlu1.c.b16.end [8/8] (narrow) %v7314_v58, 16 }
 0x284   : > { %669 = vxpose.xlu0.c.b16.cont [4/8] (narrow) %v6721_v5, 16  ;;  %v7570_v42 = vpop.permute.xlu0 %1833 }
 0x286   : > { %1315 = vrot.lane.b32.xlu1 %v9893_v13, %s6225_s25 }
 0x288   : > { %670 = vxpose.xlu0.c.b16.cont [5/8] (narrow) %v6858_v50, 16  ;;  %v7575_v46 = vpop.permute.xlu0 %1817 }
 0x28a   : > { %1319 = vrot.lane.b32.xlu1 %v9898_v8, %s6225_s25 }
 0x28c   : > { %671 = vxpose.xlu0.c.b16.cont [6/8] (narrow) %v6723_v36, 16  ;;  %v7580_v27 = vpop.permute.xlu0 %1835 }
 0x28e   : > { %1323 = vrot.lane.b32.xlu1 %v9899_v1, %s6225_s25 }
 0x290   : > { %672 = vxpose.xlu0.c.b16.cont [7/8] (narrow) %v6886_v63, 16  ;;  %v7585_v58 = vpop.permute.xlu0 %1819 }
 0x292   : > { %1327 = vrot.lane.b32.xlu1 %v6713_v39, %s6225_s25 }
 0x294   : > { %673 = vxpose.xlu0.c.b16.end [8/8] (narrow) %v6763_v32, 16  ;;  %v7590_v13 = vpop.permute.xlu0 %1837 }
 0x296   : > { %1331 = vrot.lane.b32.xlu1 %v6983_v51, %s6225_s25 }
 0x298   : > { %714 = vxpose.xlu0.c.b16.start [1/8] (narrow) %v6983_v51, 16  ;;  %v7595_v8 = vpop.permute.xlu0 %1821 }
 0x29a   : > { %1335 = vrot.lane.b32.xlu1 %v6991_v28, %s6225_s25 }
 0x29c   : > { %715 = vxpose.xlu0.c.b16.cont [2/8] (narrow) %v9877_v54, 16  ;;  %v7600_v1 = vpop.permute.xlu0 %1839 }
 0x29e   : > { %1339 = vrot.lane.b32.xlu1 %v7004_v57, %s6225_s25 }
 0x2a0   : > { %716 = vxpose.xlu0.c.b16.cont [3/8] (narrow) %v6991_v28, 16  ;;  %v7605_v39 = vpop.permute.xlu0 %1823 }
 0x2a2   : > { %1343 = vrot.lane.b32.xlu1 %v7013_v34, %s6225_s25 }
 0x2a4   : > { %717 = vxpose.xlu0.c.b16.cont [4/8] (narrow) %v9882_v47, 16  ;;  %v7610_v51 = vpop.permute.xlu0 %1809 }
 0x2a6   : > { %1623 = vrot.lane.b32.xlu1 %v6793_v9, %s6227_s27 }
 0x2a8   : > { %718 = vxpose.xlu0.c.b16.cont [5/8] (narrow) %v7004_v57, 16  ;;  %v7615_v54 = vpop.permute.xlu0 %1793 }
 0x2aa   : > { %1449 = vrot.lane.b32.xlu1 %v6721_v5, %s6226_s26 }
 0x2ac   : > { %719 = vxpose.xlu0.c.b16.cont [6/8] (narrow) %v9887_v30, 16  ;;  %v7620_v28 = vpop.permute.xlu0 %1825 }
 0x2ae   : > { %1641 = vrot.lane.b32.xlu1 %v6363_v6, %s6227_s27 }
 0x2b0   : > { %720 = vxpose.xlu0.c.b16.cont [7/8] (narrow) %v7013_v34, 16  ;;  %v7625_v47 = vpop.permute.xlu0 %1811 }
 0x2b2   : > { %1625 = vrot.lane.b32.xlu1 %v6697_v2, %s6227_s27 }
 0x2b4   : > { %721 = vxpose.xlu0.c.b16.end [8/8] (narrow) %v9891_v55, 16  ;;  %v7630_v57 = vpop.permute.xlu0 %1843 }
 0x2b6   : > { %1643 = vrot.lane.b32.xlu1 %v9880_v19, %s6227_s27 }
 0x2b8   : > { %1055 = vxpose.xlu0.c.b16.start [1/8] (narrow) %v7177_v35, 16  ;;  %v7637_v12 = vpop.permute.xlu0 %1795 }
 0x2ba   : > { %1467 = vrot.lane.b32.xlu1 %v9884_v62, %s6226_s26 }
 0x2bc   : > { %1056 = vxpose.xlu0.c.b16.cont [2/8] (narrow) %v7116_v3, 16  ;;  %v7643_v55 = vpop.permute.xlu0 %1827 }
 0x2be   : > { %1627 = vrot.lane.b32.xlu1 %v6830_v43, %s6227_s27 }
 0x2c0   : > { %1057 = vxpose.xlu0.c.b16.cont [3/8] (narrow) %v7181_v53, 16  ;;  %v7650_v34 = vpop.permute.xlu0 %1813  ;;  %v9979_v53 = vld [vmem:[#allocation11_spill] sm:$0xff] }
 0x2c2   : > { %1451 = vrot.lane.b32.xlu1 %v6858_v50, %s6226_s26 }
 0x2c4   : > { %1058 = vxpose.xlu0.c.b16.cont [4/8] (narrow) %v7122_v18, 16  ;;  %v7656_v3 = vpop.permute.xlu0 %1845 }
 0x2c6   : > { %1645 = vrot.lane.b32.xlu1 %v6381_v11, %s6227_s27 }
 0x2c8   : > { %1059 = vxpose.xlu0.c.b16.cont [5/8] (narrow) %v7186_v31, 16  ;;  %v7663_v18 = vpop.permute.xlu0 %1797  ;;  %v9981_v31 = vld [vmem:[#allocation23_spill] sm:$0xff] }
 0x2ca   : > { %1629 = vrot.lane.b32.xlu1 %v6721_v5, %s6227_s27 }
 0x2cc   : > { %1060 = vxpose.xlu0.c.b16.cont [6/8] (narrow) %v7127_v10, 16  ;;  %v7669_v10 = vpop.permute.xlu0 %1829 }
 0x2ce   : > { %1647 = vrot.lane.b32.xlu1 %v9884_v62, %s6227_s27 }
 0x2d0   : > { %1061 = vxpose.xlu0.c.b16.cont [7/8] (narrow) %v7193_v14, 16 }
 0x2d2   : > { %1469 = vrot.lane.b32.xlu1 %v6398_v15, %s6226_s26 }
 0x2d4   : > { %1062 = vxpose.xlu0.c.b16.end [8/8] (narrow) %v7134_v23, 16  ;;  %v9976_v23 = vld [vmem:[#allocation44_spill] sm:$0xff] }
 0x2d6   : > { %1631 = vrot.lane.b32.xlu1 %v6858_v50, %s6227_s27 }
 0x2d8   : > { %1071 = vxpose.xlu0.c.b16.start [1/8] (narrow) %v7200_v41, 16  ;;  %v9983_v41 = vld [vmem:[#allocation49_spill] sm:$0xff] }
 0x2da   : > { %1453 = vrot.lane.b32.xlu1 %v6723_v36, %s6226_s26 }
 0x2dc   : > { %1072 = vxpose.xlu0.c.b16.cont [2/8] (narrow) %v7139_v44, 16  ;;  %v9977_v44 = vld [vmem:[#allocation47_spill] sm:$0xff] }
 0x2de   : > { %1649 = vrot.lane.b32.xlu1 %v6398_v15, %s6227_s27  ;;  %v674_v35 = vpop.trf.xlu0  ;;  %v7691_v15 = vpop.trf.xlu1 }
 0x2df   : > { %891 = vmatmul.mubr.bf16.vlgmr.msra.gmra.mrb[0].mxu0 %v674_v35  ;;  %v9989_v35 = vld [vmem:[#allocation30_spill] sm:$0xff] }
 0x2e0   : > { %5481 = vmatpush3.bf16.msra.mxu0 %v7191_v56  ;;  %1073 = vxpose.xlu0.c.b16.cont [3/8] (narrow) %v7206_v45, 16  ;;  %v9982_v56 = vld [vmem:[#allocation54_spill] sm:$0xff] }
 0x2e1   : > { %5482 = vmatprep.subr.bf16.mxu0 %v7216_v29 }
 0x2e2   : > { %1633 = vrot.lane.b32.xlu1 %v6723_v36, %s6227_s27  ;;  %v9975_v36 = vld [vmem:[#allocation15_spill] sm:$0xff] }
 0x2e4   : > { %5483 = vmatpush3.bf16.msra.mxu0 %v7422_v21  ;;  %1074 = vxpose.xlu0.c.b16.cont [4/8] (narrow) %v7145_v40, 16  ;;  %v9978_v40 = vld [vmem:[#allocation37_spill] sm:$0xff]  ;;  %v1403_v21 = vpop.trf.xlu1 }
 0x2e5   : > { %5484 = vmatprep.subr.bf16.mxu0 %v7450_v17  ;;  %v9988_v17 = vld [vmem:[#allocation56_spill] sm:$0xff] }
 0x2e6   : > { %1651 = vrot.lane.b32.xlu1 %v9890_v16, %s6227_s27 }
 0x2e8   : > { %5485 = vmatpush3.bf16.msra.mxu0 %v7428_v33  ;;  %1075 = vxpose.xlu0.c.b16.cont [5/8] (narrow) %v7212_v0, 16  ;;  %v9984_v33 = vld [vmem:[#allocation13_spill] sm:$0xff]  ;;  %v9986_v0 = vld [vmem:[#allocation31_spill] sm:$0xff] }
 0x2e9   : > { %5486 = vmatprep.subr.bf16.mxu0 %v7222_v59  ;;  %v9987_v59 = vld [vmem:[#allocation9_spill] sm:$0xff] }
 0x2ea   : > { %1471 = vrot.lane.b32.xlu1 %v9890_v16, %s6226_s26  ;;  %v9980_v16 = vld [vmem:[#allocation24_spill] sm:$0xff] }
 0x2ec   : > { %5487 = vmatpush3.bf16.msra.mxu0 %v9975_v36  ;;  %1076 = vxpose.xlu0.c.b16.cont [6/8] (narrow) %v9976_v23, 16  ;;  %v9990_v36 = vld [vmem:[#allocation41_spill] sm:$0xff] }
 0x2ed   : > { %5488 = vmatprep.subr.bf16.mxu0 %v7456_v48 }
 0x2ee   : > { %1635 = vrot.lane.b32.xlu1 %v6886_v63, %s6227_s27 }
 0x2f0   : > { %5489 = vmatpush3.bf16.msra.mxu0 %v9977_v44  ;;  %1077 = vxpose.xlu0.c.b16.cont [7/8] (narrow) %v9978_v40, 16  ;;  %v9991_v44 = vld [vmem:[#allocation32_spill] sm:$0xff]  ;;  %v9993_v40 = vld [vmem:[#allocation7_spill] sm:$0xff] }
 0x2f1   : > { %5490 = vmatprep.subr.bf16.mxu0 %v9979_v53 }
 0x2f2   : > { %1455 = vrot.lane.b32.xlu1 %v6886_v63, %s6226_s26  ;;  %v9985_v63 = vld [vmem:[#allocation36_spill] sm:$0xff] }
 0x2f4   : > { %5491 = vmatpush3.bf16.msra.mxu0 %v9980_v16  ;;  %1078 = vxpose.xlu0.c.b16.end [8/8] (narrow) %v9981_v31, 16  ;;  %v9994_v16 = vld [vmem:[#allocation58_spill] sm:$0xff] }
 0x2f5   : > { %5492 = vmatprep.subr.bf16.mxu0 %v9982_v56  ;;  %v9995_v31 = vld [vmem:[#allocation38_spill] sm:$0xff] }
 0x2f6   : > { %1653 = vrot.lane.b32.xlu1 %v6417_v20, %s6227_s27 }
 0x2f8   : > { %v7708_v14 = vpop.permute.xlu1 %1315  ;;  %5493 = vmatpush3.bf16.msra.mxu0 %v9983_v41  ;;  %v9997_v41 = vld [vmem:[#allocation12_spill] sm:$0xff] }
 0x2f9   : > { %5494 = vmatprep.subr.bf16.mxu0 %v9984_v33 }
 0x2fa   : > { %1637 = vrot.lane.b32.xlu1 %v6763_v32, %s6227_s27 }
 0x2fc   : > { %v7714_v45 = vpop.permute.xlu1 %1319  ;;  %5495 = vmatpush3.bf16.msra.mxu0 %v9985_v63  ;;  %v9998_v63 = vld [vmem:[#allocation60_spill] sm:$0xff] }
 0x2fd   : > { %5524 = vmatprep.subr.bf16.mxu0 %v9986_v0  ;;  %v9999_v0 = vld [vmem:[#allocation42_spill] sm:$0xff] }
 0x2fe   : > { %1473 = vrot.lane.b32.xlu1 %v6417_v20, %s6226_s26  ;;  %v722_v29 = vpop.trf.xlu0  ;;  %v9992_v20 = vld [vmem:[#allocation65_spill] sm:$0xff] }
 0x2ff   : > { %930 = vmatprep.mubr.bf16.mxu1 %v722_v29  ;;  %v10000_v29 = vld [vmem:[#allocation20_spill] sm:$0xff] }
 0x300   : > { %v7720_v48 = vpop.permute.xlu1 %1323  ;;  %931 = vmatmul.mubr.bf16.vlgmr.msra.gmra.mrb[0].mxu1 %v9987_v59  ;;  %v10001_v59 = vld [vmem:[#allocation14_spill] sm:$0xff] }
 0x301   : > { %5503 = vmatpush3.bf16.msra.mxu1 %v9988_v17  ;;  %1271 = vmatprep.mubr.bf16.mxu1 %v9989_v35  ;;  %v10003_v17 = vld [vmem:[#allocation10_spill] sm:$0xff]  ;;  %v10004_v35 = vld [vmem:[#allocation43_spill] sm:$0xff] }
 0x302   : > { %5504 = vmatprep.subr.bf16.mxu1 %v9990_v36  ;;  %1457 = vrot.lane.b32.xlu1 %v6763_v32, %s6226_s26  ;;  %v9996_v32 = vld [vmem:[#allocation19_spill] sm:$0xff]  ;;  %v10005_v36 = vld [vmem:[#allocation8_spill] sm:$0xff] }
 0x304   : > { %v7728_v23 = vpop.permute.xlu1 %1327 }
 0x305   : > { %5505 = vmatpush3.bf16.msra.mxu1 %v9991_v44  ;;  %v10006_v44 = vld [vmem:[#allocation21_spill] sm:$0xff] }
 0x306   : > { %5506 = vmatprep.subr.bf16.mxu1 %v9992_v20  ;;  %1799 = vrot.lane.b32.xlu1 %v9993_v40, %s6228_s28  ;;  %v10007_v20 = vld [vmem:[#allocation27_spill] sm:$0xff]  ;;  %v10008_v40 = vld [vmem:[#allocation22_spill] sm:$0xff] }
 0x308   : > { %v1332_v53 = vpop.permute.xlu1 %1331 }
 0x309   : > { %1427 = vxpose.xlu0.c.b16.start [1/8] (narrow) %v1332_v53, 16  ;;  %5507 = vmatpush3.bf16.msra.mxu1 %v9994_v16  ;;  %v10010_v16 = vld [vmem:[#allocation46_spill] sm:$0xff] }
 0x30a   : > { %5508 = vmatprep.subr.bf16.mxu1 %v9995_v31  ;;  %1783 = vrot.lane.b32.xlu1 %v6793_v9, %s6228_s28  ;;  %v10011_v31 = vld [vmem:[#allocation45_spill] sm:$0xff] }
 0x30c   : > { %v1336_v56 = vpop.permute.xlu1 %1335 }
 0x30d   : > { %1428 = vxpose.xlu0.c.b16.cont [2/8] (narrow) %v9996_v32, 16  ;;  %5509 = vmatpush3.bf16.msra.mxu1 %v9997_v41  ;;  %v10013_v32 = vld [vmem:[#allocation48_spill] sm:$0xff]  ;;  %v10015_v41 = vld [vmem:[#allocation51_spill] sm:$0xff] }
 0x30e   : > { %5510 = vmatprep.subr.bf16.mxu1 %v7502_v26  ;;  %1801 = vrot.lane.b32.xlu1 %v6363_v6, %s6228_s28  ;;  %v10002_v26 = vld [vmem:[#allocation62_spill] sm:$0xff] }
 0x310   : > { %v1340_v33 = vpop.permute.xlu1 %1339 }
 0x311   : > { %1429 = vxpose.xlu0.c.b16.cont [3/8] (narrow) %v1336_v56, 16  ;;  %5511 = vmatpush3.bf16.msra.mxu1 %v9998_v63 }
 0x312   : > { %5512 = vmatprep.subr.bf16.mxu1 %v9999_v0  ;;  %1785 = vrot.lane.b32.xlu1 %v6697_v2, %s6228_s28 }
 0x314   : > { %v1344_v9 = vpop.permute.xlu1 %1343 }
 0x315   : > { %1430 = vxpose.xlu0.c.b16.cont [4/8] (narrow) %v10000_v29, 16  ;;  %5513 = vmatpush3.bf16.msra.mxu1 %v10001_v59  ;;  %v10017_v59 = vld [vmem:[#allocation39_spill] sm:$0xff] }
 0x316   : > { %5514 = vmatprep.subr.bf16.mxu1 %v7508_v25  ;;  %1803 = vrot.lane.b32.xlu1 %v9880_v19, %s6228_s28 }
 0x318   : > { %v7752_v6 = vpop.permute.xlu1 %1623 }
 0x319   : > { %1431 = vxpose.xlu0.c.b16.cont [5/8] (narrow) %v1340_v33, 16  ;;  %5515 = vmatpush3.bf16.msra.mxu1 %v10002_v26 }
 0x31a   : > { %5516 = vmatprep.subr.bf16.mxu1 %v10003_v17  ;;  %1787 = vrot.lane.b32.xlu1 %v6830_v43, %s6228_s28  ;;  %v10009_v43 = vld [vmem:[#allocation26_spill] sm:$0xff]  ;;  %v10019_v17 = vld [vmem:[#allocation33_spill] sm:$0xff] }
 0x31c   : > { %v1450_v2 = vpop.permute.xlu1 %1449 }
 0x31d   : > { %1432 = vxpose.xlu0.c.b16.cont [6/8] (narrow) %v10004_v35, 16  ;;  %5517 = vmatpush3.bf16.msra.mxu1 %v10005_v36  ;;  %v10020_v35 = vld [vmem:[#allocation34_spill] sm:$0xff]  ;;  %v10021_v36 = vld [vmem:[#allocation52_spill] sm:$0xff] }
 0x31e   : > { %5546 = vmatprep.subr.bf16.mxu1 %v10006_v44  ;;  %v1063_v25 = vpop.trf.xlu0  ;;  %1805 = vrot.lane.b32.xlu1 %v6381_v11, %s6228_s28  ;;  %v10012_v11 = vld [vmem:[#allocation28_spill] sm:$0xff] }
 0x31f   : > { %1231 = vmatprep.mubr.bf16.mxu0 %v1063_v25  ;;  %v10022_v25 = vld [vmem:[#allocation55_spill] sm:$0xff] }
 0x320   : > { %v1642_v19 = vpop.permute.xlu1 %1641  ;;  %1232 = vmatmul.mubr.bf16.vlgmr.msra.gmra.mrb[4].mxu0 %v10007_v20 }
 0x321   : > { %1433 = vxpose.xlu0.c.b16.cont [7/8] (narrow) %v1344_v9, 16  ;;  %5525 = vmatpush3.bf16.msra.mxu0 %v10008_v40  ;;  %v10024_v40 = vld [vmem:[#allocation66_spill] sm:$0xff] }
 0x322   : > { %1571 = vmatprep.mubr.bf16.mxu0 %v1403_v21  ;;  %5526 = vmatprep.subr.bf16.mxu0 %v10009_v43  ;;  %v10014_v21 = vld [vmem:[#allocation35_spill] sm:$0xff] }
 0x323   : > { %1789 = vrot.lane.b32.xlu1 %v6721_v5, %s6228_s28 }
 0x324   : > { %v7768_v53 = vpop.permute.xlu1 %1625 }
 0x325   : > { %1434 = vxpose.xlu0.c.b16.end [8/8] (narrow) %v10010_v16, 16  ;;  %5527 = vmatpush3.bf16.msra.mxu0 %v10011_v31  ;;  %v10025_v16 = vld [vmem:[#allocation71_spill] sm:$0xff]  ;;  %v10026_v31 = vld [vmem:[#allocation16_spill] sm:$0xff] }
 0x326   : > { %5528 = vmatprep.subr.bf16.mxu0 %v10012_v11 }
 0x327   : > { %1807 = vrot.lane.b32.xlu1 %v9884_v62, %s6228_s28 }
 0x328   : > { %v1644_v56 = vpop.permute.xlu1 %1643 }
 0x329   : > { %1735 = vxpose.xlu0.c.b16.start [1/8] (narrow) %v10013_v32, 16  ;;  %5529 = vmatpush3.bf16.msra.mxu0 %v10014_v21 }
 0x32a   : > { %5530 = vmatprep.subr.bf16.mxu0 %v10015_v41  ;;  %v10031_v41 = vld [vmem:[#allocation59_spill] sm:$0xff] }
 0x32b   : > { %1791 = vrot.lane.b32.xlu1 %v6858_v50, %s6228_s28  ;;  %v10016_v50 = vld [vmem:[#allocation25_spill] sm:$0xff] }
 0x32c   : > { %v1468_v5 = vpop.permute.xlu1 %1467 }
 0x32d   : > { %1736 = vxpose.xlu0.c.b16.cont [2/8] (narrow) %v1642_v19, 16  ;;  %5531 = vmatpush3.bf16.msra.mxu0 %v1450_v2  ;;  %v10023_v19 = vld [vmem:[#allocation63_spill] sm:$0xff] }
 0x32e   : > { %5532 = vmatprep.subr.bf16.mxu0 %v1468_v5 }
 0x32f   : > { %1841 = vrot.lane.b32.xlu1 %v9887_v30, %s6228_s28  ;;  %v10018_v30 = vld [vmem:[#allocation29_spill] sm:$0xff] }
 0x330   : > { %v7782_v33 = vpop.permute.xlu1 %1627 }
 0x331   : > { %1737 = vxpose.xlu0.c.b16.cont [3/8] (narrow) %v1644_v56, 16 }
 0x334   : > { %v1452_v62 = vpop.permute.xlu1 %1451 }
 0x335   : > { %5533 = vmatpush3.bf16.msra.mxu0 %v1452_v62  ;;  %v10033_v62 = vld [vmem:[#allocation64_spill] sm:$0xff] }
 0x338   : > { %v1646_v63 = vpop.permute.xlu1 %1645 }
 0x339   : > { %1738 = vxpose.xlu0.c.b16.cont [4/8] (narrow) %v1646_v63, 16  ;;  %v10034_v63 = vld [vmem:[#allocation57_spill] sm:$0xff] }
 0x33c   : > { %v7784_v0 = vpop.permute.xlu1 %1629 }
 0x33e   : > { %v1079_v9 = vpop.trf.xlu0 }
 0x33f   : > { %1272 = vmatmul.mubr.bf16.vlgmr.msra.gmra.mrb[4].mxu1 %v1079_v9  ;;  %v10035_v9 = vld [vmem:[#allocation68_spill] sm:$0xff] }
 0x340   : > { %v1648_v29 = vpop.permute.xlu1 %1647  ;;  %5547 = vmatpush3.bf16.msra.mxu1 %v10016_v50 }
 0x341   : > { %1739 = vxpose.xlu0.c.b16.cont [5/8] (narrow) %v1648_v29, 16  ;;  %5548 = vmatprep.subr.bf16.mxu1 %v10017_v59  ;;  %v10036_v29 = vld [vmem:[#allocation61_spill] sm:$0xff]  ;;  %v10037_v59 = vld [vmem:[#allocation70_spill] sm:$0xff] }
 0x344   : > { %v1470_v26 = vpop.permute.xlu1 %1469  ;;  %5549 = vmatpush3.bf16.msra.mxu1 %v10018_v30 }
 0x345   : > { %5534 = vmatprep.subr.bf16.mxu0 %v1470_v26  ;;  %5550 = vmatprep.subr.bf16.mxu1 %v10019_v17  ;;  %v10038_v26 = vld [vmem:[#allocation67_spill] sm:$0xff]  ;;  %v10039_v17 = vld [vmem:[#allocation73_spill] sm:$0xff] }
 0x348   : > { %v7790_v2 = vpop.permute.xlu1 %1631  ;;  %5551 = vmatpush3.bf16.msra.mxu1 %v10020_v35  ;;  %v10040_v35 = vld [vmem:[#allocation69_spill] sm:$0xff] }
 0x349   : > { %5552 = vmatprep.subr.bf16.mxu1 %v10021_v36 }
 0x34c   : > { %v1454_v44 = vpop.permute.xlu1 %1453  ;;  %5553 = vmatpush3.bf16.msra.mxu1 %v10022_v25  ;;  %v10042_v25 = vld [vmem:[#allocation74_spill] sm:$0xff] }
 0x34d   : > { %5535 = vmatpush3.bf16.msra.mxu0 %v1454_v44  ;;  %5554 = vmatprep.subr.bf16.mxu1 %v10023_v19 }
 0x350   : > { %v1650_v20 = vpop.permute.xlu1 %1649  ;;  %5555 = vmatpush3.bf16.msra.mxu1 %v10024_v40 }
 0x351   : > { %1740 = vxpose.xlu0.c.b16.cont [6/8] (narrow) %v1650_v20, 16  ;;  %5556 = vmatprep.subr.bf16.mxu1 %v7518_v49  ;;  %v10027_v49 = vld [vmem:[#allocation18_spill] sm:$0xff] }
 0x352   : > { %1411 = vxpose.xlu1.c.b16.start [1/8] (narrow) %v7708_v14, 16 }
 0x354   : > { %v7799_v43 = vpop.permute.xlu1 %1633  ;;  %5557 = vmatpush3.bf16.msra.mxu1 %v10025_v16 }
 0x355   : > { %5558 = vmatprep.subr.bf16.mxu1 %v7543_v7 }
 0x356   : > { %1412 = vxpose.xlu1.c.b16.cont [2/8] (narrow) %v10026_v31, 16  ;;  %v942_v31 = vld [vmem:[#allocation2 + $0x8] sm:$0xff] }
 0x358   : > { %v1652_v11 = vpop.permute.xlu1 %1651  ;;  %5559 = vmatpush3.bf16.msra.mxu1 %v7548_v61  ;;  %v10028_v61 = vld [vmem:[#allocation40_spill] sm:$0xff] }
 0x359   : > { %1741 = vxpose.xlu0.c.b16.cont [7/8] (narrow) %v1652_v11, 16  ;;  %5560 = vmatprep.subr.bf16.mxu1 %v7556_v60 }
 0x35a   : > { %1413 = vxpose.xlu1.c.b16.cont [3/8] (narrow) %v7714_v45, 16  ;;  %v10029_v45 = vld [vmem:[#allocation53_spill] sm:$0xff] }
 0x35c   : > { %v1472_v56 = vpop.permute.xlu1 %1471  ;;  %5561 = vmatpush3.bf16.msra.mxu1 %v7559_v38  ;;  %v10030_v38 = vld [vmem:[#allocation17_spill] sm:$0xff] }
 0x35d   : > { %5536 = vmatprep.subr.bf16.mxu0 %v1472_v56  ;;  %5590 = vmatprep.subr.bf16.mxu1 %v7563_v24 }
 0x35e   : > { %1414 = vxpose.xlu1.c.b16.cont [4/8] (narrow) %v10027_v49, 16 }
 0x360   : > { %v7810_v14 = vpop.permute.xlu1 %1635 }
 0x362   : > { %1415 = vxpose.xlu1.c.b16.cont [5/8] (narrow) %v7720_v48, 16  ;;  %v10032_v48 = vld [vmem:[#allocation50_spill] sm:$0xff] }
 0x364   : > { %v1456_v7 = vpop.permute.xlu1 %1455 }
 0x365   : > { %5537 = vmatpush3.bf16.msra.mxu0 %v1456_v7 }
 0x366   : > { %1416 = vxpose.xlu1.c.b16.cont [6/8] (narrow) %v10028_v61, 16 }
 0x368   : > { %v1654_v32 = vpop.permute.xlu1 %1653 }
 0x369   : > { %1742 = vxpose.xlu0.c.b16.end [8/8] (narrow) %v1654_v32, 16 }
 0x36a   : > { %1417 = vxpose.xlu1.c.b16.cont [7/8] (narrow) %v7728_v23, 16 }
 0x36c   : > { %v1638_v60 = vpop.permute.xlu1 %1637 }
 0x36d   : > { %1751 = vxpose.xlu0.c.b16.start [1/8] (narrow) %v10029_v45, 16 }
 0x36e   : > { %1418 = vxpose.xlu1.c.b16.end [8/8] (narrow) %v10030_v38, 16 }
 0x36f   : > { %v1435_v24 = vpop.trf.xlu0 }
 0x370   : > { %1611 = vmatprep.mubr.bf16.mxu1 %v1435_v24  ;;  %v1474_v21 = vpop.permute.xlu1 %1473 }
 0x371   : > { %1752 = vxpose.xlu0.c.b16.cont [2/8] (narrow) %v10031_v41, 16  ;;  %5538 = vmatprep.subr.bf16.mxu0 %v1474_v21  ;;  %v1282_v41 = vld [vmem:[#allocation2 + $0x10] sm:$0xff] }
 0x372   : > { %1767 = vxpose.xlu1.c.b16.start [1/8] (narrow) %v10032_v48, 16 }
 0x374   : > { %v1458_v5 = vpop.permute.xlu1 %1457 }
 0x375   : > { %1753 = vxpose.xlu0.c.b16.cont [3/8] (narrow) %v10033_v62, 16  ;;  %5539 = vmatpush3.bf16.msra.mxu0 %v1458_v5 }
 0x376   : > { %1768 = vxpose.xlu1.c.b16.cont [2/8] (narrow) %v10034_v63, 16 }
 0x378   : > { %v1800_v23 = vpop.permute.xlu1 %1799  ;;  %1572 = vmatmul.mubr.bf16.vlgmr.msra.gmra.mrb[8].mxu0 %v7691_v15  ;;  %v10041_v15 = vld [vmem:[#allocation72_spill] sm:$0xff] }
 0x379   : > { %1754 = vxpose.xlu0.c.b16.cont [4/8] (narrow) %v10035_v9, 16  ;;  %5568 = vmatprep.subr.bf16.mxu0 %v1800_v23 }
 0x37a   : > { %1769 = vxpose.xlu1.c.b16.cont [3/8] (narrow) %v10036_v29, 16 }
 0x37c   : > { %v1784_v50 = vpop.permute.xlu1 %1783 }
 0x37d   : > { %1755 = vxpose.xlu0.c.b16.cont [5/8] (narrow) %v10037_v59, 16  ;;  %5569 = vmatpush3.bf16.msra.mxu0 %v1784_v50 }
 0x37e   : > { %1770 = vxpose.xlu1.c.b16.cont [4/8] (narrow) %v10038_v26, 16 }
 0x380   : > { %v1802_v30 = vpop.permute.xlu1 %1801 }
 0x381   : > { %1756 = vxpose.xlu0.c.b16.cont [6/8] (narrow) %v10039_v17, 16  ;;  %5570 = vmatprep.subr.bf16.mxu0 %v1802_v30 }
 0x382   : > { %1771 = vxpose.xlu1.c.b16.cont [5/8] (narrow) %v10040_v35, 16  ;;  %v1622_v35 = vld [vmem:[#allocation2 + $0x18] sm:$0xff] }
 0x384   : > { %v1786_v36 = vpop.permute.xlu1 %1785 }
 0x385   : > { %1757 = vxpose.xlu0.c.b16.cont [7/8] (narrow) %v7546_v52, 16  ;;  %5571 = vmatpush3.bf16.msra.mxu0 %v1786_v36 }
 0x386   : > { %1772 = vxpose.xlu1.c.b16.cont [6/8] (narrow) %v10041_v15, 16 }
 0x388   : > { %v1804_v44 = vpop.permute.xlu1 %1803 }
 0x389   : > { %1758 = vxpose.xlu0.c.b16.end [8/8] (narrow) %v7553_v22, 16  ;;  %5572 = vmatprep.subr.bf16.mxu0 %v1804_v44 }
 0x38a   : > { %1773 = vxpose.xlu1.c.b16.cont [7/8] (narrow) %v10042_v25, 16 }
 0x38c   : > { %v1788_v19 = vpop.permute.xlu1 %1787 }
 0x38d   : > { %5573 = vmatpush3.bf16.msra.mxu0 %v1788_v19 }
 0x38e   : > { %1774 = vxpose.xlu1.c.b16.end [8/8] (narrow) %v7551_v4, 16 }
 0x390   : > { %v1806_v20 = vpop.permute.xlu1 %1805 }
 0x391   : > { %5574 = vmatprep.subr.bf16.mxu0 %v1806_v20 }
 0x392   : > { %1719 = vxpose.xlu1.c.b16.start [1/8] (narrow) %v7752_v6, 16 }
 0x395   : > { %v1790_v40 = vpop.permute.xlu1 %1789 }
 0x396   : > { %1720 = vxpose.xlu1.c.b16.cont [2/8] (narrow) %v7768_v53, 16  ;;  %5575 = vmatpush3.bf16.msra.mxu0 %v1790_v40 }
 0x399   : > { %v1808_v52 = vpop.permute.xlu1 %1807 }
 0x39a   : > { %1721 = vxpose.xlu1.c.b16.cont [3/8] (narrow) %v7782_v33, 16  ;;  %5576 = vmatprep.subr.bf16.mxu0 %v1808_v52 }
 0x39d   : > { %v1792_v22 = vpop.permute.xlu1 %1791 }
 0x39e   : > { %1722 = vxpose.xlu1.c.b16.cont [4/8] (narrow) %v7784_v0, 16  ;;  %5577 = vmatpush3.bf16.msra.mxu0 %v1792_v22 }
 0x39f   : > { %5578 = vmatprep.subr.bf16.mxu0 %v7610_v51 }
 0x3a1   : > { %v1842_v51 = vpop.permute.xlu1 %1841 }
 0x3a2   : > { %1723 = vxpose.xlu1.c.b16.cont [5/8] (narrow) %v7790_v2, 16  ;;  %5579 = vmatpush3.bf16.msra.mxu0 %v7615_v54 }
 0x3a3   : > { %5580 = vmatprep.subr.bf16.mxu0 %v7625_v47 }
 0x3a6   : > { %1724 = vxpose.xlu1.c.b16.cont [6/8] (narrow) %v7799_v43, 16  ;;  %5581 = vmatpush3.bf16.msra.mxu0 %v7637_v12 }
 0x3a7   : > { %5582 = vmatprep.subr.bf16.mxu0 %v7650_v34 }
 0x3aa   : > { %1725 = vxpose.xlu1.c.b16.cont [7/8] (narrow) %v7810_v14, 16  ;;  %5583 = vmatpush3.bf16.msra.mxu0 %v7663_v18 }
 0x3ae   : > { %1726 = vxpose.xlu1.c.b16.end [8/8] (narrow) %v1638_v60, 16 }
 0x3b2   : > { %v5452_v4 = vpop.f32.mrb[0].mxu0 }
 0x3b3   : > { %v1743_v6 = vpop.trf.xlu0  ;;  %v5453_v53 = vpop.f32.mrb[1].mxu0 }
 0x3b4   : > { %1911 = vmatprep.mubr.bf16.mxu0 %v1743_v6  ;;  %v5454_v33 = vadd.f32 %v5453_v53, %v5452_v4  ;;  %v5455_v54 = vpop.f32.mrb[2].mxu0 }
 0x3b5   : > { %v5456_v0 = vpop.f32.mrb[3].mxu0 }
 0x3b8   : > { %v1419_v47 = vpop.trf.xlu1 }
 0x3b9   : > { %1612 = vmatmul.mubr.bf16.vlgmr.msra.gmra.mrb[8].mxu1 %v1419_v47 }
 0x3ba   : > { %5591 = vmatpush3.bf16.msra.mxu1 %v7566_v37 }
 0x3bb   : > { %5592 = vmatprep.subr.bf16.mxu1 %v7570_v42 }
 0x3be   : > { %5593 = vmatpush3.bf16.msra.mxu1 %v7575_v46 }
 0x3bf   : > { %5594 = vmatprep.subr.bf16.mxu1 %v7580_v27 }
 0x3c2   : > { %5595 = vmatpush3.bf16.msra.mxu1 %v7585_v58  ;;  %v665_v58 = vld [vmem:[#allocation2] sm:$0xff] }
 0x3c3   : > { %5596 = vmatprep.subr.bf16.mxu1 %v7590_v13 }
 0x3c6   : > { %5597 = vmatpush3.bf16.msra.mxu1 %v7595_v8 }
 0x3c7   : > { %5598 = vmatprep.subr.bf16.mxu1 %v7600_v1 }
 0x3ca   : > { %5599 = vmatpush3.bf16.msra.mxu1 %v7605_v39 }
 0x3cb   : > { %5600 = vmatprep.subr.bf16.mxu1 %v1842_v51 }
 0x3ce   : > { %5601 = vmatpush3.bf16.msra.mxu1 %v7620_v28 }
 0x3cf   : > { %5602 = vmatprep.subr.bf16.mxu1 %v7630_v57 }
 0x3d2   : > { %5603 = vmatpush3.bf16.msra.mxu1 %v7643_v55 }
 0x3d3   : > { %5604 = vmatprep.subr.bf16.mxu1 %v7656_v3  ;;  %v5474_v37 = vpop.f32.mrb[0].mxu1  ;;  %v1759_v8 = vpop.trf.xlu0 }
 0x3d4   : > { %v5475_v42 = vpop.f32.mrb[1].mxu1 }
 0x3d5   : > { %v5476_v46 = vadd.f32 %v5475_v42, %v5474_v37  ;;  %v5477_v27 = vpop.f32.mrb[2].mxu1 }
 0x3d6   : > { %5605 = vmatpush3.bf16.msra.mxu1 %v7669_v10  ;;  %v5478_v13 = vpop.f32.mrb[3].mxu1 }
 0x3d7   : > { %v933_v1 = vadd.f32 %v5476_v46, %v5454_v33 }
 0x3d8   : > { %v1775_v39 = vpop.trf.xlu1 }
 0x3d9   : > { %1951 = vmatprep.mubr.bf16.mxu1 %v1775_v39  ;;  %v938_v28 = vadd.f32 %v933_v1, %v665_v58 }
 0x3da   : > { %1952 = vmatmul.mubr.bf16.vlgmr.msra.gmra.mrb[12].mxu1 %v1759_v8 }
 0x3db   : > { %940 = vst.msk [vmem:[#allocation2] sm:$0xff] %vm939_vm5, %v938_v28 }
 0x3f3   : > { %v5496_v57 = vpop.f32.mrb[4].mxu0 }
 0x3f4   : > { %v5497_v12 = vpop.f32.mrb[5].mxu0 }
 0x3f5   : > { %v5498_v55 = vadd.f32 %v5497_v12, %v5496_v57  ;;  %v5499_v34 = vpop.f32.mrb[6].mxu0 }
 0x3f6   : > { %v5500_v3 = vpop.f32.mrb[7].mxu0 }
 0x3f8   : > { %v1727_v18 = vpop.trf.xlu1 }
 0x3f9   : > { %1912 = vmatmul.mubr.bf16.vlgmr.msra.gmra.mrb[12].mxu0 %v1727_v18 }
 0x412   : > { %v5518_v2 = vpop.f32.mrb[4].mxu1 }
 0x413   : > { %v5519_v10 = vpop.f32.mrb[5].mxu1 }
 0x414   : > { %v5520_v43 = vadd.f32 %v5519_v10, %v5518_v2  ;;  %v5521_v16 = vpop.f32.mrb[6].mxu1 }
 0x415   : > { %v5522_v11 = vpop.f32.mrb[7].mxu1 }
 0x416   : > { %v1274_v56 = vadd.f32 %v5520_v43, %v5498_v55 }
 0x418   : > { %v1279_v49 = vadd.f32 %v1274_v56, %v942_v31 }
 0x41a   : > { %1280 = vst.msk [vmem:[#allocation2 + $0x8] sm:$0xff] %vm939_vm5, %v1279_v49 }
 0x44b   : > { %v5540_v14 = vpop.f32.mrb[8].mxu0 }
 0x44c   : > { %v5541_v7 = vpop.f32.mrb[9].mxu0 }
 0x44d   : > { %v5542_v61 = vadd.f32 %v5541_v7, %v5540_v14  ;;  %v5543_v32 = vpop.f32.mrb[10].mxu0 }
 0x44e   : > { %v5544_v60 = vpop.f32.mrb[11].mxu0 }
 0x48c   : > { %v5562_v45 = vpop.f32.mrb[8].mxu1 }
 0x48d   : > { %v5563_v38 = vpop.f32.mrb[9].mxu1 }
 0x48e   : > { %v5564_v24 = vadd.f32 %v5563_v38, %v5562_v45  ;;  %v5565_v21 = vpop.f32.mrb[10].mxu1 }
 0x48f   : > { %v5566_v48 = vpop.f32.mrb[11].mxu1 }
 0x490   : > { %v1614_v5 = vadd.f32 %v5564_v24, %v5542_v61 }
 0x492   : > { %v1619_v62 = vadd.f32 %v1614_v5, %v1282_v41 }
 0x494   : > { %1620 = vst.msk [vmem:[#allocation2 + $0x10] sm:$0xff] %vm939_vm5, %v1619_v62 }
 0x4ad   : > { %v5606_v63 = vpop.f32.mrb[12].mxu1 }
 0x4ae   : > { %v5607_v23 = vpop.f32.mrb[13].mxu1 }
 0x4af   : > { %v5608_v9 = vadd.f32 %v5607_v23, %v5606_v63  ;;  %v5609_v29 = vpop.f32.mrb[14].mxu1 }
 0x4b0   : > { %v5610_v50 = vpop.f32.mrb[15].mxu1 }
 0x4cc   : > { %v5584_v59 = vpop.f32.mrb[12].mxu0 }
 0x4cd   : > { %v5585_v26 = vpop.f32.mrb[13].mxu0 }
 0x4ce   : > { %v5586_v30 = vadd.f32 %v5585_v26, %v5584_v59  ;;  %v5587_v17 = vpop.f32.mrb[14].mxu0 }
 0x4cf   : > { %v5588_v36 = vpop.f32.mrb[15].mxu0 }
 0x4d0   : > { %v1954_v15 = vadd.f32 %v5608_v9, %v5586_v30 }
 0x4d2   : > { %v1959_v44 = vadd.f32 %v1954_v15, %v1622_v35 }
 0x4d4   : > { %1960 = vst.msk [vmem:[#allocation2 + $0x18] sm:$0xff] %vm939_vm5, %v1959_v44 }
 0x4d5 PF: > { %p1961_p10 = scmp.eq.s32.totalorder %s6198_s10, 1 }
 0x4d7   : > { %p1962_p11 = pnand %p1961_p10, %p211_p7 }
 0x4d8   : > { %v2140_v25 = vld [vmem:[#allocation3] sm:$0x1] (!%p1962_p11)  ;;  %v1966_v13 = vlaneseq (!%p1962_p11)  ;;  %s6229_s9 = smov (!%p1962_p11), 104   ;;  %s6230_s29 = smov (!%p1962_p11), 120   ;;  %v2091_v56 = vld [vmem:[#allocation3 + $0x1] sm:$0x1] (!%p1962_p11) }
 0x4d9   : > { %1965 = sbr.rel (%p1962_p11) target bundleno = 1862 (0x746), region = 44  ;;  %v2022_v19 = vld [vmem:[#allocation3] sm:$0x1] (!%p1962_p11)  ;;  %6097 = vrsqrt.f32 (!%p1962_p11), %v2140_v25  ;;  %vm2143_vm6 = vcmp.eq.f32.partialorder (!%p1962_p11), %v2140_v25, inf  ;;  %v2146_v52 = vand.u32 (!%p1962_p11), 2147483648, %v2140_v25  ;;  %vm2145_vm7 = vcmp.eq.f32.partialorder (!%p1962_p11), %v2140_v25, 0.0 }
 0x4da   : > { %v2081_v20 = vld [vmem:[#allocation3] sm:$0x1] (!%p1962_p11)  ;;  %6099 = vrsqrt.f32 (!%p1962_p11), %v2022_v19  ;;  %vm2025_vm8 = vcmp.eq.f32.partialorder (!%p1962_p11), %v2022_v19, inf  ;;  %v2028_v6 = vand.u32 (!%p1962_p11), 2147483648, %v2022_v19  ;;  %vm2027_vm9 = vcmp.eq.f32.partialorder (!%p1962_p11), %v2022_v19, 0.0  ;;  %s6231_s30 = smov (!%p1962_p11), 112  }
 0x4db   : > { %6101 = vrsqrt.f32 (!%p1962_p11), %v2081_v20  ;;  %vm2084_vm10 = vcmp.eq.f32.partialorder (!%p1962_p11), %v2081_v20, inf  ;;  %v2087_v33 = vand.u32 (!%p1962_p11), 2147483648, %v2081_v20  ;;  %vm2086_vm11 = vcmp.eq.f32.partialorder (!%p1962_p11), %v2081_v20, 0.0  ;;  %v1971_v47 = vld [vmem:[#allocation3] sm:$0x1] (!%p1962_p11)  ;;  %s2007_s3 = sld [smem:[#allocation4]] (!%p1962_p11) }
 0x4dc   : > { %6103 = vrsqrt.f32 (!%p1962_p11), %v1971_v47  ;;  %v7867_v28 = vshrl.u32 (!%p1962_p11), %v1966_v13, 7  ;;  %vm1974_vm12 = vcmp.eq.f32.partialorder (!%p1962_p11), %v1971_v47, inf  ;;  %v1977_v16 = vand.u32 (!%p1962_p11), 2147483648, %v1971_v47  ;;  %v2150_v63 = vld [vmem:[#allocation3 + $0x1] sm:$0x1] (!%p1962_p11)  ;;  %s5303_s4 = sld [smem:[#allocation4 + $0x2]] (!%p1962_p11) }
 0x4dd   : > { %vm1976_vm13 = vcmp.eq.f32.partialorder (!%p1962_p11), %v1971_v47, 0.0  ;;  %v1969_v32 = vand.u32 (!%p1962_p11), 127, %v1966_v13  ;;  %vm2094_vm14 = vcmp.eq.f32.partialorder (!%p1962_p11), %v2091_v56, inf  ;;  %v2097_v60 = vand.u32 (!%p1962_p11), 2147483648, %v2091_v56  ;;  %v2032_v23 = vld [vmem:[#allocation3 + $0x1] sm:$0x1] (!%p1962_p11) }
 0x4de   : > { %v7870_v57 = vsub.s32 (!%p1962_p11), 0, %v7867_v28  ;;  %vm2096_vm15 = vcmp.eq.f32.partialorder (!%p1962_p11), %v2091_v56, 0.0  ;;  %vm1996_vm1 = vcmask (!%p1962_p11), 64512   ;;  %vm2153_vm2 = vcmp.eq.f32.partialorder (!%p1962_p11), %v2150_v63, inf  ;;  %s5304_s5 = sld [smem:[#allocation4 + $0x3]] (!%p1962_p11)  ;;  %s5302_s6 = sld [smem:[#allocation4 + $0x1]] (!%p1962_p11) }
 0x4df   : > { %vm1970_vm0 = vcmp.eq.s32.totalorder (!%p1962_p11), %v7867_v28, %v1969_v32  ;;  %v2156_v50 = vand.u32 (!%p1962_p11), 2147483648, %v2150_v63  ;;  %vm2155_vm3 = vcmp.eq.f32.partialorder (!%p1962_p11), %v2150_v63, 0.0  ;;  %vm2035_vm4 = vcmp.eq.f32.partialorder (!%p1962_p11), %v2032_v23, inf }
 0x4e0   : > { %vm2037_vm5 = vcmp.eq.f32.partialorder %v2032_v23, 0.0 }
 0x4e2   : > { %v2126_v32 = vstv %s5303_s4 }
 0x4e3   : > { %v6098_v40 = vpop.eup %6097 }
 0x4e4   : > { %v6100_v22 = vpop.eup %6099  ;;  %v2142_v4 = vmul.f32 %v6098_v40, %v2140_v25 }
 0x4e5   : > { %v6102_v51 = vpop.eup %6101  ;;  %v2024_v53 = vmul.f32 %v6100_v22, %v2022_v19 }
 0x4e6   : > { %v2144_v54 = vsel %vm2143_vm6, %v2140_v25, %v2142_v4  ;;  %v2083_v0 = vmul.f32 %v6102_v51, %v2081_v20  ;;  %v6104_v12 = vpop.eup %6103 }
 0x4e7   : > { %v2147_v37 = vsel %vm2145_vm7, %v2146_v52, %v2144_v54  ;;  %v2026_v42 = vsel %vm2025_vm8, %v2022_v19, %v2024_v53  ;;  %v1973_v10 = vmul.f32 %v6104_v12, %v1971_v47 }
 0x4e8   : > { %v2148_v46 = vmax.f32 %v2147_v37, 1e-12  ;;  %v2029_v27 = vsel %vm2027_vm9, %v2028_v6, %v2026_v42  ;;  %v2085_v58 = vsel %vm2084_vm10, %v2081_v20, %v2083_v0  ;;  %v2038_v20 = vand.u32 2147483648, %v2032_v23  ;;  %v1981_v0 = vld [vmem:[#allocation3 + $0x1] sm:$0x1] }
 0x4e9   : > { %v2030_v8 = vmax.f32 %v2029_v27, 1e-12  ;;  %v2088_v1 = vsel %vm2086_vm11, %v2087_v33, %v2085_v58  ;;  %v1975_v31 = vsel %vm1974_vm12, %v1971_v47, %v1973_v10  ;;  %vm1984_vm6 = vcmp.eq.f32.partialorder %v1981_v0, inf }
 0x4ea   : > { %6105 = vrcp.f32 %v2148_v46  ;;  %v2089_v39 = vmax.f32 %v2088_v1, 1e-12  ;;  %v1978_v11 = vsel %vm1976_vm13, %v1977_v16, %v1975_v31  ;;  %v1987_v27 = vand.u32 2147483648, %v1981_v0 }
 0x4eb   : > { %6107 = vrcp.f32 %v2030_v8  ;;  %v1979_v49 = vmax.f32 %v1978_v11, 1e-12  ;;  %vm1986_vm7 = vcmp.eq.f32.partialorder %v1981_v0, 0.0 }
 0x4ec   : > { %6109 = vrcp.f32 %v2089_v39  ;;  %v2000_v39 = vld [vmem:[#allocation2] sm:$0xff] }
 0x4ed   : > { %6111 = vrsqrt.f32 %v2091_v56 }
 0x4ee   : > { %6113 = vrcp.f32 %v1979_v49 }
 0x4f4   : > { %v6106_v55 = vpop.eup %6105 }
 0x4f5   : > { %v6108_v34 = vpop.eup %6107  ;;  %v2163_v3 = vrot.slane %v6106_v55, %v7870_v57 }
 0x4f6   : > { %v6110_v18 = vpop.eup %6109  ;;  %v2045_v2 = vrot.slane %v6108_v34, %v7870_v57  ;;  %v2008_v34 = vstv %s2007_s3 }
 0x4f7   : > { %2165 = vrot.lane.b32.xlu1 %v2163_v3, %s6229_s9  ;;  %v2104_v43 = vrot.slane %v6110_v18, %v7870_v57  ;;  %v6112_v14 = vpop.eup %6111 }
 0x4f8   : > { %2047 = vrot.lane.b32.xlu0 %v2045_v2, %s6230_s29  ;;  %v2093_v7 = vmul.f32 %v6112_v14, %v2091_v56  ;;  %v6114_v61 = vpop.eup %6113  ;;  %v2055_v14 = vld [vmem:[#allocation2 + $0x8] sm:$0xff] }
 0x4f9   : > { %v1994_v45 = vrot.slane %v6114_v61, %v7870_v57 }
 0x4fa   : > { %v2095_v38 = vsel %vm2094_vm14, %v2091_v56, %v2093_v7  ;;  %v2114_v56 = vld [vmem:[#allocation2 + $0x10] sm:$0xff] }
 0x4fb   : > { %v2098_v24 = vsel %vm2096_vm15, %v2097_v60, %v2095_v38  ;;  %v1995_v21 = vsel %vm1970_vm0, %v1994_v45, 0.0  ;;  %v2185_v60 = vstv %s5304_s5 }
 0x4fc   : > { %2106 = vrot.lane.b32.xlu0 %v2104_v43, %s6231_s30  ;;  %v2099_v41 = vmax.f32 %v2098_v24, 1e-12  ;;  %v1997_v48 = vsel %vm1996_vm1, %v1995_v21, 0.0  ;;  %v2173_v43 = vld [vmem:[#allocation2 + $0x18] sm:$0xff]  ;;  %v2067_v21 = vstv %s5302_s6 }
 0x4fe   : > { %6115 = vrcp.f32 %v2099_v41 }
 0x4ff   : > { %6117 = vrsqrt.f32 %v2150_v63 }
 0x500   : > { %6119 = vrsqrt.f32 %v2032_v23 }
 0x508   : > { %v6116_v5 = vpop.eup %6115 }
 0x509   : > { %v2119_v62 = vrot.slane %v6116_v5, %v7870_v57  ;;  %v6118_v9 = vpop.eup %6117 }
 0x50a   : > { %v2152_v29 = vmul.f32 %v6118_v9, %v2150_v63  ;;  %v6120_v26 = vpop.eup %6119 }
 0x50b   : > { %v2034_v17 = vmul.f32 %v6120_v26, %v2032_v23 }
 0x50c   : > { %v2154_v59 = vsel %vm2153_vm2, %v2150_v63, %v2152_v29 }
 0x50d   : > { %v2157_v30 = vsel %vm2155_vm3, %v2156_v50, %v2154_v59  ;;  %v2036_v52 = vsel %vm2035_vm4, %v2032_v23, %v2034_v17 }
 0x50e   : > { %v2158_v35 = vmax.f32 %v2157_v30, 1e-12  ;;  %v2039_v6 = vsel %vm2037_vm5, %v2038_v20, %v2036_v52 }
 0x50f   : > { %v2040_v53 = vmax.f32 %v2039_v6, 1e-12 }
 0x510   : > { %6121 = vrcp.f32 %v2158_v35 }
 0x511   : > { %6123 = vrcp.f32 %v2040_v53 }
 0x512   : > { %6125 = vrsqrt.f32 %v1981_v0 }
 0x51a   : > { %v6122_v33 = vpop.eup %6121 }
 0x51b   : > { %1998 = vadd.xlane.f32.xlu1 %v1997_v48  ;;  %v2178_v54 = vrot.slane %v6122_v33, %v7870_v57  ;;  %v6124_v47 = vpop.eup %6123 }
 0x51c   : > { %v2060_v37 = vrot.slane %v6124_v47, %v7870_v57  ;;  %v6126_v42 = vpop.eup %6125 }
 0x51d   : > { %v1983_v46 = vmul.f32 %v6126_v42, %v1981_v0 }
 0x51f   : > { %v1985_v58 = vsel %vm1984_vm6, %v1981_v0, %v1983_v46 }
 0x520   : > { %v1988_v13 = vsel %vm1986_vm7, %v1987_v27, %v1985_v58 }
 0x521   : > { %v1989_v8 = vmax.f32 %v1988_v13, 1e-12 }
 0x523   : > { %6127 = vrcp.f32 %v1989_v8 }
 0x52c   : > { %2121 = vrot.lane.b32.xlu1 %v2119_v62, %s6231_s30 }
 0x52d   : > { %v6128_v1 = vpop.eup %6127 }
 0x52e   : > { %v2005_v28 = vrot.slane %v6128_v1, %v7870_v57 }
 0x569   : > { %v2166_v36 = vpop.permute.xlu1 %2165 }
 0x56a   : > { %v2048_v15 = vpop.permute.xlu0 %2047  ;;  %v2168_v44 = vsel %vm1970_vm0, %v2166_v36, 0.0 }
 0x56b   : > { %v2050_v25 = vsel %vm1970_vm0, %v2048_v15, 0.0  ;;  %v2169_v19 = vsel %vm1996_vm1, %v2168_v44, 0.0 }
 0x56c   : > { %v2051_v40 = vsel %vm1996_vm1, %v2050_v25, 0.0  ;;  %2170 = vadd.xlane.f32.xlu1 %v2169_v19 }
 0x56d   : > { %2052 = vadd.xlane.f32.xlu0 %v2051_v40 }
 0x56e   : > { %v2107_v22 = vpop.permute.xlu0 %2106 }
 0x56f   : > { %v2109_v4 = vsel %vm1970_vm0, %v2107_v22, 0.0 }
 0x570   : > { %v2110_v51 = vsel %vm1996_vm1, %v2109_v4, 0.0 }
 0x571   : > { %2111 = vadd.xlane.f32.xlu0 %v2110_v51 }
 0x57d   : > { %2180 = vrot.lane.b32.xlu1 %v2178_v54, %s6229_s9 }
 0x587   : > { %2062 = vrot.lane.b32.xlu0 %v2060_v37, %s6230_s29 }
 0x5a8   : > { %v1999_v12 = vpop.xlane.xlu1 %1998 }
 0x5a9   : > { %v2001_v55 = vmul.f32 %v2000_v39, %v1999_v12 }
 0x5ab   : > { %v2006_v3 = vmul.f32 %v2005_v28, %v2001_v55 }
 0x5ac   : > { %v2122_v10 = vpop.permute.xlu1 %2121 }
 0x5ad   : > { %v2009_v18 = vmul.f32 %v2008_v34, %v2006_v3 }
 0x5af   : > { %v2010_v2 = vsel %vm1996_vm1, %v2009_v18, -inf }
 0x5b0   : > { %2011 = vmax.xlane.f32.xlu0 %v2010_v2 }
 0x5f9   : > { %v2171_v16 = vpop.xlane.xlu1 %2170 }
 0x5fa   : > { %v2053_v31 = vpop.xlane.xlu0 %2052  ;;  %v2174_v11 = vmul.f32 %v2173_v43, %v2171_v16 }
 0x5fb   : > { %v2056_v45 = vmul.f32 %v2055_v14, %v2053_v31 }
 0x5fd   : > { %v2181_v49 = vpop.permute.xlu1 %2180 }
 0x5fe   : > { %v2112_v57 = vpop.xlane.xlu0 %2111  ;;  %v2183_v61 = vmul.f32 %v2181_v49, %v2174_v11 }
 0x5ff   : > { %v2115_v7 = vmul.f32 %v2114_v56, %v2112_v57 }
 0x600   : > { %v2186_v5 = vmul.f32 %v2185_v60, %v2183_v61 }
 0x601   : > { %v2124_v38 = vmul.f32 %v2122_v10, %v2115_v7 }
 0x602   : > { %v2063_v24 = vpop.permute.xlu0 %2062  ;;  %v2187_v9 = vsel %vm1996_vm1, %v2186_v5, -inf }
 0x603   : > { %v2065_v41 = vmul.f32 %v2063_v24, %v2056_v45  ;;  %v2127_v48 = vmul.f32 %v2126_v32, %v2124_v38 }
 0x605   : > { %v2128_v62 = vsel %vm1996_vm1, %v2127_v48, -inf  ;;  %v2068_v63 = vmul.f32 %v2067_v21, %v2065_v41 }
 0x606   : > { %2129 = vmax.xlane.f32.xlu0 %v2128_v62 }
 0x607   : > { %v2069_v23 = vsel %vm1996_vm1, %v2068_v63, -inf }
 0x608   : > { %2070 = vmax.xlane.f32.xlu1 %v2069_v23 }
 0x60a   : > { %2188 = vmax.xlane.f32.xlu0 %v2187_v9 }
 0x63d   : > { %v2012_v29 = vpop.xlane.xlu0 %2011 }
 0x63e   : > { %v2013_v50 = vsub.f32 %v2009_v18, %v2012_v29 }
 0x640   : > { %v2014_v59 = vmul.f32 1.442695, %v2013_v50 }
 0x642   : > { %6129 = vpow2.f32 %v2014_v59 }
 0x64c   : > { %v6130_v26 = vpop.eup %6129 }
 0x64d   : > { %v2016_v30 = vsel %vm1996_vm1, %v6130_v26, 0.0 }
 0x64e   : > { %2017 = vadd.xlane.f32.xlu1 %v2016_v30 }
 0x693   : > { %v2130_v17 = vpop.xlane.xlu0 %2129 }
 0x694   : > { %v2131_v35 = vsub.f32 %v2127_v48, %v2130_v17 }
 0x695   : > { %v2071_v36 = vpop.xlane.xlu1 %2070 }
 0x696   : > { %v2132_v15 = vmul.f32 1.442695, %v2131_v35  ;;  %v2072_v44 = vsub.f32 %v2068_v63, %v2071_v36 }
 0x697   : > { %v2189_v25 = vpop.xlane.xlu0 %2188 }
 0x698   : > { %6131 = vpow2.f32 %v2132_v15  ;;  %v2073_v19 = vmul.f32 1.442695, %v2072_v44  ;;  %v2190_v20 = vsub.f32 %v2186_v5, %v2189_v25 }
 0x69a   : > { %6133 = vpow2.f32 %v2073_v19  ;;  %v2191_v40 = vmul.f32 1.442695, %v2190_v20 }
 0x69c   : > { %6135 = vpow2.f32 %v2191_v40 }
 0x6a2   : > { %v6132_v52 = vpop.eup %6131 }
 0x6a3   : > { %v2134_v22 = vsel %vm1996_vm1, %v6132_v52, 0.0 }
 0x6a4   : > { %v6134_v4 = vpop.eup %6133  ;;  %2135 = vadd.xlane.f32.xlu1 %v2134_v22 }
 0x6a5   : > { %v2075_v6 = vsel %vm1996_vm1, %v6134_v4, 0.0 }
 0x6a6   : > { %v6136_v51 = vpop.eup %6135  ;;  %2076 = vadd.xlane.f32.xlu0 %v2075_v6 }
 0x6a7   : > { %v2193_v53 = vsel %vm1996_vm1, %v6136_v51, 0.0 }
 0x6aa   : > { %2194 = vadd.xlane.f32.xlu0 %v2193_v53 }
 0x6db   : > { %v2018_v33 = vpop.xlane.xlu1 %2017 }
 0x6dc   : > { %6137 = vrcp.f32 %v2018_v33 }
 0x6e6   : > { %v6138_v54 = vpop.eup %6137 }
 0x6e7   : > { %v2020_v0 = vmul.f32 %v6138_v54, %v6130_v26 }
 0x6e9   : > { %2021 = vst.msk [vmem:[#allocation2] sm:$0xff] %vm1996_vm1, %v2020_v0 }
 0x731   : > { %v2136_v47 = vpop.xlane.xlu1 %2135 }
 0x732   : > { %6139 = vrcp.f32 %v2136_v47 }
 0x733   : > { %v2077_v37 = vpop.xlane.xlu0 %2076 }
 0x734   : > { %6141 = vrcp.f32 %v2077_v37 }
 0x737   : > { %v2195_v42 = vpop.xlane.xlu0 %2194 }
 0x738   : > { %6143 = vrcp.f32 %v2195_v42 }
 0x73c   : > { %v6140_v46 = vpop.eup %6139 }
 0x73d   : > { %v2138_v27 = vmul.f32 %v6140_v46, %v6132_v52 }
 0x73e   : > { %v6142_v58 = vpop.eup %6141 }
 0x73f   : > { %2139 = vst.msk [vmem:[#allocation2 + $0x10] sm:$0xff] %vm1996_vm1, %v2138_v27  ;;  %v2079_v13 = vmul.f32 %v6142_v58, %v6134_v4 }
 0x741   : > { %2080 = vst.msk [vmem:[#allocation2 + $0x8] sm:$0xff] %vm1996_vm1, %v2079_v13 }
 0x742   : > { %v6144_v8 = vpop.eup %6143 }
 0x743   : > { %v2197_v1 = vmul.f32 %v6144_v8, %v6136_v51 }
 0x745   : > { %2198 = vst.msk [vmem:[#allocation2 + $0x18] sm:$0xff] %vm1996_vm1, %v2197_v1 }
 0x746 PF: > { %p5305_p12 = scmp.ne.s32.totalorder %s6198_s10, 1 }
 0x748   : > { %2201 = sbr.rel (%p5305_p12) target bundleno = 2761 (0xac9), region = 48 }
 0x74f   : > { %v2202_v39 = vld [vmem:[%s6333_s7] sm:$0xff]  ;;  %v2203_v28 = vld [vmem:[%s6333_s7 + $0x8] sm:$0xff]  ;;  %v2204_v3 = vld [vmem:[%s6333_s7 + $0x10] sm:$0xff]  ;;  %s6232_s10 = smov 64   ;;  %vm2396_vm8 = vcmask 64512   ;;  %s6233_s8 = smov 56  }
 0x750   : > { %v2206_v12 = vld [vmem:[%s6333_s7 + $0x20] sm:$0xff]  ;;  %v7913_v55 = vpack.c.bf16 %v2203_v28, %v2202_v39  ;;  %v2207_v34 = vld [vmem:[%s6333_s7 + $0x28] sm:$0xff]  ;;  %v2205_v18 = vld [vmem:[%s6333_s7 + $0x18] sm:$0xff]  ;;  %s6235_s16 = smov 40   ;;  %s6236_s20 = smov 8   ;;  %vm4982_vm9 = vcmask 130048  }
 0x751   : > { %v7918_v2 = vpack.c.bf16 %v2207_v34, %v2206_v12  ;;  %v2208_v10 = vld [vmem:[%s6333_s7 + $0x30] sm:$0xff]  ;;  %v2209_v43 = vld [vmem:[%s6333_s7 + $0x38] sm:$0xff]  ;;  %v7924_v16 = vpack.c.bf16 %v2205_v18, %v2204_v3  ;;  %v2210_v11 = vld [vmem:[%s6333_s7 + $0x40] sm:$0xff]  ;;  %s6237_s21 = smov 16   ;;  %s6238_s22 = smov 24   ;;  %vm5047_vm10 = vcmask 195584  }
 0x752   : > { %2332 = vrot.lane.b32.xlu0 %v7913_v55, %s6232_s10  ;;  %v7928_v31 = vpack.c.bf16 %v2209_v43, %v2208_v10  ;;  %v2211_v56 = vld [vmem:[%s6333_s7 + $0x48] sm:$0xff]  ;;  %v2212_v49 = vld [vmem:[%s6333_s7 + $0x50] sm:$0xff]  ;;  %v2213_v14 = vld [vmem:[%s6333_s7 + $0x58] sm:$0xff]  ;;  %vm5112_vm11 = vcmask 261120  }
 0x753   : > { %2336 = vrot.lane.b32.xlu1 %v7918_v2, %s6232_s10  ;;  %v7936_v57 = vpack.c.bf16 %v2211_v56, %v2210_v11  ;;  %v7940_v7 = vpack.c.bf16 %v2213_v14, %v2212_v49  ;;  %v2214_v61 = vld [vmem:[%s6333_s7 + $0x60] sm:$0xff]  ;;  %v2215_v32 = vld [vmem:[%s6333_s7 + $0x68] sm:$0xff]  ;;  %v2216_v60 = vld [vmem:[%s6333_s7 + $0x70] sm:$0xff] }
 0x754   : > { %v2217_v45 = vld [vmem:[%s6333_s7 + $0x78] sm:$0xff]  ;;  %v7948_v38 = vpack.c.bf16 %v2215_v32, %v2214_v61  ;;  %v2218_v21 = vld [vmem:[%s6333_s7 + $0x80] sm:$0xff]  ;;  %v2219_v41 = vld [vmem:[%s6333_s7 + $0x88] sm:$0xff] }
 0x755   : > { %v7952_v24 = vpack.c.bf16 %v2217_v45, %v2216_v60  ;;  %v2220_v48 = vld [vmem:[%s6333_s7 + $0x90] sm:$0xff]  ;;  %v2221_v5 = vld [vmem:[%s6333_s7 + $0x98] sm:$0xff]  ;;  %v7960_v62 = vpack.c.bf16 %v2219_v41, %v2218_v21  ;;  %v2222_v23 = vld [vmem:[%s6333_s7 + $0xa0] sm:$0xff] }
 0x756   : > { %2334 = vrot.lane.b32.xlu0 %v7924_v16, %s6232_s10  ;;  %v7964_v63 = vpack.c.bf16 %v2221_v5, %v2220_v48  ;;  %v2223_v9 = vld [vmem:[%s6333_s7 + $0xa8] sm:$0xff]  ;;  %v2224_v29 = vld [vmem:[%s6333_s7 + $0xb0] sm:$0xff]  ;;  %v2225_v50 = vld [vmem:[%s6333_s7 + $0xb8] sm:$0xff] }
 0x757   : > { %2338 = vrot.lane.b32.xlu1 %v7928_v31, %s6232_s10  ;;  %v7972_v59 = vpack.c.bf16 %v2223_v9, %v2222_v23  ;;  %v7976_v26 = vpack.c.bf16 %v2225_v50, %v2224_v29  ;;  %v2226_v30 = vld [vmem:[%s6333_s7 + $0xc0] sm:$0xff]  ;;  %v2227_v17 = vld [vmem:[%s6333_s7 + $0xc8] sm:$0xff]  ;;  %v2228_v35 = vld [vmem:[%s6333_s7 + $0xd0] sm:$0xff] }
 0x758   : > { %v2229_v36 = vld [vmem:[%s6333_s7 + $0xd8] sm:$0xff]  ;;  %v2298_v15 = vld [vmem:[#allocation2] sm:$0xff]  ;;  %v7984_v25 = vpack.c.bf16 %v2227_v17, %v2226_v30  ;;  %v2231_v40 = vld [vmem:[%s6333_s7 + $0xe8] sm:$0xff] }
 0x759   : > { %v2299_v44 = vpack.c.bf16 %v2298_v15, %v2298_v15  ;;  %v7988_v19 = vpack.c.bf16 %v2229_v36, %v2228_v35  ;;  %v2230_v20 = vld [vmem:[%s6333_s7 + $0xe0] sm:$0xff]  ;;  %v2232_v22 = vld [vmem:[%s6333_s7 + $0xf0] sm:$0xff]  ;;  %v2233_v4 = vld [vmem:[%s6333_s7 + $0xf8] sm:$0xff] }
 0x75a   : > { %2340 = vrot.lane.b32.xlu0 %v7936_v57, %s6232_s10  ;;  %v7998_v6 = vpack.c.bf16 %v2231_v40, %v2230_v20  ;;  %v8002_v51 = vpack.c.bf16 %v2233_v4, %v2232_v22  ;;  %v2234_v53 = vld [vmem:[%s6333_s7 + $0x100] sm:$0xff]  ;;  %v2235_v33 = vld [vmem:[%s6333_s7 + $0x108] sm:$0xff]  ;;  %v2236_v54 = vld [vmem:[%s6333_s7 + $0x110] sm:$0xff] }
 0x75b   : > { %2342 = vrot.lane.b32.xlu1 %v7940_v7, %s6232_s10  ;;  %6008 = vmatprep.subr.msk.bf16.mxu0 %vm2396_vm8, %v2299_v44  ;;  %v2494_v52 = vsel %vm2396_vm8, %v2299_v44, 0  ;;  %v2237_v0 = vld [vmem:[%s6333_s7 + $0x118] sm:$0xff]  ;;  %v8010_v47 = vpack.c.bf16 %v2235_v33, %v2234_v53  ;;  %v2238_v42 = vld [vmem:[%s6333_s7 + $0x120] sm:$0xff]  ;;  %v2239_v46 = vld [vmem:[%s6333_s7 + $0x128] sm:$0xff] }
 0x75c   : > { %5745 = vmatpush3.bf16.xpose.msra.mxu0 %v2494_v52  ;;  %v8014_v37 = vpack.c.bf16 %v2237_v0, %v2236_v54  ;;  %v2240_v27 = vld [vmem:[%s6333_s7 + $0x130] sm:$0xff]  ;;  %v2241_v58 = vld [vmem:[%s6333_s7 + $0x138] sm:$0xff]  ;;  %v8022_v13 = vpack.c.bf16 %v2239_v46, %v2238_v42  ;;  %v2242_v1 = vld [vmem:[%s6333_s7 + $0x140] sm:$0xff] }
 0x75d   : > { %v8026_v8 = vpack.c.bf16 %v2241_v58, %v2240_v27  ;;  %v2243_v39 = vld [vmem:[%s6333_s7 + $0x148] sm:$0xff]  ;;  %v2244_v28 = vld [vmem:[%s6333_s7 + $0x150] sm:$0xff]  ;;  %v2245_v12 = vld [vmem:[%s6333_s7 + $0x158] sm:$0xff] }
 0x75e   : > { %2344 = vrot.lane.b32.xlu0 %v7948_v38, %s6232_s10  ;;  %v8034_v34 = vpack.c.bf16 %v2243_v39, %v2242_v1  ;;  %v8038_v3 = vpack.c.bf16 %v2245_v12, %v2244_v28  ;;  %v2246_v18 = vld [vmem:[%s6333_s7 + $0x160] sm:$0xff]  ;;  %v2247_v10 = vld [vmem:[%s6333_s7 + $0x168] sm:$0xff]  ;;  %v2248_v11 = vld [vmem:[%s6333_s7 + $0x170] sm:$0xff] }
 0x75f   : > { %2346 = vrot.lane.b32.xlu1 %v7952_v24, %s6232_s10  ;;  %v2786_v43 = vld [vmem:[#allocation2 + $0x8] sm:$0xff]  ;;  %v2249_v56 = vld [vmem:[%s6333_s7 + $0x178] sm:$0xff]  ;;  %v8046_v14 = vpack.c.bf16 %v2247_v10, %v2246_v18  ;;  %v2250_v60 = vld [vmem:[%s6333_s7 + $0x180] sm:$0xff] }
 0x760   : > { %v2787_v49 = vpack.c.bf16 %v2786_v43, %v2786_v43  ;;  %v8052_v32 = vpack.c.bf16 %v2249_v56, %v2248_v11  ;;  %v2251_v45 = vld [vmem:[%s6333_s7 + $0x188] sm:$0xff]  ;;  %v2252_v21 = vld [vmem:[%s6333_s7 + $0x190] sm:$0xff]  ;;  %v2253_v41 = vld [vmem:[%s6333_s7 + $0x198] sm:$0xff] }
 0x761   : > { %v8060_v48 = vpack.c.bf16 %v2251_v45, %v2250_v60  ;;  %v8064_v5 = vpack.c.bf16 %v2253_v41, %v2252_v21  ;;  %v2254_v23 = vld [vmem:[%s6333_s7 + $0x1a0] sm:$0xff]  ;;  %v2255_v9 = vld [vmem:[%s6333_s7 + $0x1a8] sm:$0xff]  ;;  %v2256_v29 = vld [vmem:[%s6333_s7 + $0x1b0] sm:$0xff] }
 0x762   : > { %2348 = vrot.lane.b32.xlu0 %v7960_v62, %s6232_s10  ;;  %6009 = vmatprep.subr.msk.bf16.mxu1 %vm2396_vm8, %v2787_v49  ;;  %v2949_v61 = vsel %vm2396_vm8, %v2787_v49, 0  ;;  %v2257_v50 = vld [vmem:[%s6333_s7 + $0x1b8] sm:$0xff]  ;;  %v3241_v30 = vld [vmem:[#allocation2 + $0x10] sm:$0xff]  ;;  %v8072_v35 = vpack.c.bf16 %v2255_v9, %v2254_v23  ;;  %v2258_v15 = vld [vmem:[%s6333_s7 + $0x1c0] sm:$0xff] }
 0x763   : > { %2350 = vrot.lane.b32.xlu1 %v7964_v63, %s6232_s10  ;;  %5811 = vmatpush3.bf16.xpose.msra.mxu1 %v2949_v61  ;;  %v3242_v17 = vpack.c.bf16 %v3241_v30, %v3241_v30  ;;  %v8076_v36 = vpack.c.bf16 %v2257_v50, %v2256_v29  ;;  %v2259_v44 = vld [vmem:[%s6333_s7 + $0x1c8] sm:$0xff]  ;;  %v2260_v20 = vld [vmem:[%s6333_s7 + $0x1d0] sm:$0xff]  ;;  %v2261_v40 = vld [vmem:[%s6333_s7 + $0x1d8] sm:$0xff] }
 0x764   : > { %v3696_v52 = vld [vmem:[#allocation2 + $0x18] sm:$0xff]  ;;  %v8087_v4 = vpack.c.bf16 %v2259_v44, %v2258_v15  ;;  %v8091_v53 = vpack.c.bf16 %v2261_v40, %v2260_v20  ;;  %v2262_v33 = vld [vmem:[%s6333_s7 + $0x1e0] sm:$0xff]  ;;  %v2263_v54 = vld [vmem:[%s6333_s7 + $0x1e8] sm:$0xff] }
 0x765   : > { %6010 = vmatprep.subr.msk.bf16.mxu0 %vm2396_vm8, %v3242_v17  ;;  %v8083_v22 = vpack.c.bf16 %v3696_v52, %v3696_v52  ;;  %v2264_v0 = vld [vmem:[%s6333_s7 + $0x1f0] sm:$0xff]  ;;  %v2265_v42 = vld [vmem:[%s6333_s7 + $0x1f8] sm:$0xff]  ;;  %v8105_v46 = vpack.c.bf16 %v2263_v54, %v2262_v33  ;;  %v3404_v28 = vsel %vm2396_vm8, %v3242_v17, 0  ;;  %s6234_s7 = smov 48  }
 0x766   : > { %2352 = vrot.lane.b32.xlu0 %v7972_v59, %s6232_s10  ;;  %v8109_v27 = vpack.c.bf16 %v2265_v42, %v2264_v0 }
 0x767   : > { %2354 = vrot.lane.b32.xlu1 %v7976_v26, %s6232_s10  ;;  %6011 = vmatprep.subr.msk.bf16.mxu1 %vm2396_vm8, %v8083_v22 }
 0x76a   : > { %2356 = vrot.lane.b32.xlu0 %v7984_v25, %s6232_s10 }
 0x76b   : > { %2358 = vrot.lane.b32.xlu1 %v7988_v19, %s6232_s10 }
 0x76e   : > { %2360 = vrot.lane.b32.xlu0 %v7998_v6, %s6232_s10 }
 0x76f   : > { %2362 = vrot.lane.b32.xlu1 %v8002_v51, %s6232_s10 }
 0x772   : > { %2364 = vrot.lane.b32.xlu0 %v8010_v47, %s6232_s10 }
 0x773   : > { %2366 = vrot.lane.b32.xlu1 %v8014_v37, %s6232_s10 }
 0x776   : > { %2368 = vrot.lane.b32.xlu0 %v8022_v13, %s6232_s10 }
 0x777   : > { %2370 = vrot.lane.b32.xlu1 %v8026_v8, %s6232_s10 }
 0x77a   : > { %2372 = vrot.lane.b32.xlu0 %v8034_v34, %s6232_s10 }
 0x77b   : > { %2374 = vrot.lane.b32.xlu1 %v8038_v3, %s6232_s10 }
 0x77e   : > { %2376 = vrot.lane.b32.xlu0 %v8046_v14, %s6232_s10 }
 0x77f   : > { %2378 = vrot.lane.b32.xlu1 %v8052_v32, %s6232_s10 }
 0x782   : > { %2380 = vrot.lane.b32.xlu0 %v8060_v48, %s6232_s10 }
 0x783   : > { %2382 = vrot.lane.b32.xlu1 %v8064_v5, %s6232_s10 }
 0x786   : > { %2384 = vrot.lane.b32.xlu0 %v8072_v35, %s6232_s10 }
 0x787   : > { %2386 = vrot.lane.b32.xlu1 %v8076_v36, %s6232_s10 }
 0x78a   : > { %2388 = vrot.lane.b32.xlu0 %v8087_v4, %s6232_s10 }
 0x78b   : > { %2390 = vrot.lane.b32.xlu1 %v8091_v53, %s6232_s10 }
 0x78e   : > { %2788 = vrot.lane.b32.xlu0 %v7913_v55, %s6233_s8 }
 0x78f   : > { %2790 = vrot.lane.b32.xlu1 %v7924_v16, %s6233_s8 }
 0x792   : > { %2392 = vrot.lane.b32.xlu0 %v8105_v46, %s6232_s10 }
 0x793   : > { %2394 = vrot.lane.b32.xlu1 %v8109_v27, %s6232_s10 }
 0x796   : > { %2792 = vrot.lane.b32.xlu0 %v7918_v2, %s6233_s8 }
 0x797   : > { %2794 = vrot.lane.b32.xlu1 %v7928_v31, %s6233_s8 }
 0x79a   : > { %2796 = vrot.lane.b32.xlu0 %v7936_v57, %s6233_s8 }
 0x79b   : > { %2798 = vrot.lane.b32.xlu1 %v7940_v7, %s6233_s8 }
 0x79e   : > { %2800 = vrot.lane.b32.xlu0 %v7948_v38, %s6233_s8 }
 0x79f   : > { %2802 = vrot.lane.b32.xlu1 %v7952_v24, %s6233_s8 }
 0x7a2   : > { %2804 = vrot.lane.b32.xlu0 %v7960_v62, %s6233_s8 }
 0x7a3   : > { %2806 = vrot.lane.b32.xlu1 %v7964_v63, %s6233_s8 }
 0x7a6   : > { %2808 = vrot.lane.b32.xlu0 %v7972_v59, %s6233_s8 }
 0x7a7   : > { %2810 = vrot.lane.b32.xlu1 %v7976_v26, %s6233_s8 }
 0x7aa   : > { %2812 = vrot.lane.b32.xlu0 %v7984_v25, %s6233_s8 }
 0x7ab   : > { %2814 = vrot.lane.b32.xlu1 %v7988_v19, %s6233_s8 }
 0x7ae   : > { %2816 = vrot.lane.b32.xlu0 %v7998_v6, %s6233_s8 }
 0x7af   : > { %2818 = vrot.lane.b32.xlu1 %v8002_v51, %s6233_s8 }
 0x7b2   : > { %2820 = vrot.lane.b32.xlu0 %v8010_v47, %s6233_s8 }
 0x7b3   : > { %2822 = vrot.lane.b32.xlu1 %v8014_v37, %s6233_s8 }
 0x7b6   : > { %2824 = vrot.lane.b32.xlu0 %v8022_v13, %s6233_s8 }
 0x7b7   : > { %2826 = vrot.lane.b32.xlu1 %v8026_v8, %s6233_s8 }
 0x7ba   : > { %2828 = vrot.lane.b32.xlu0 %v8034_v34, %s6233_s8 }
 0x7bb   : > { %2830 = vrot.lane.b32.xlu1 %v8038_v3, %s6233_s8 }
 0x7be   : > { %2832 = vrot.lane.b32.xlu0 %v8046_v14, %s6233_s8 }
 0x7bf   : > { %2834 = vrot.lane.b32.xlu1 %v8052_v32, %s6233_s8 }
 0x7c2   : > { %2836 = vrot.lane.b32.xlu0 %v8060_v48, %s6233_s8 }
 0x7c3   : > { %2838 = vrot.lane.b32.xlu1 %v8064_v5, %s6233_s8 }
 0x7c4   : > { %v2333_v58 = vpop.permute.xlu0 %2332 }
 0x7c5   : > { %v2337_v1 = vpop.permute.xlu1 %2336  ;;  %5746 = vmatprep.mubr.msk.bf16.mxu0 %vm2396_vm8, %v2333_v58 }
 0x7c6   : > { %2840 = vrot.lane.b32.xlu0 %v8072_v35, %s6233_s8 }
 0x7c7   : > { %2842 = vrot.lane.b32.xlu1 %v8076_v36, %s6233_s8 }
 0x7c8   : > { %v2335_v39 = vpop.permute.xlu0 %2334 }
 0x7c9   : > { %v2339_v12 = vpop.permute.xlu1 %2338  ;;  %5747 = vmatmul.mubr.msk.bf16.vlgmr.msra.gmra.mrb[0].mxu0 %vm2396_vm8, %v2335_v39  ;;  %v3859_v39 = vsel %vm2396_vm8, %v8083_v22, 0 }
 0x7ca   : > { %5750 = vmatprep.mubr.msk.bf16.mxu0 %vm2396_vm8, %v2337_v1  ;;  %2844 = vrot.lane.b32.xlu0 %v8087_v4, %s6233_s8 }
 0x7cb   : > { %2846 = vrot.lane.b32.xlu1 %v8091_v53, %s6233_s8  ;;  %5877 = vmatpush3.bf16.xpose.msra.mxu0 %v3404_v28 }
 0x7cc   : > { %v2341_v18 = vpop.permute.xlu0 %2340 }
 0x7cd   : > { %v2343_v10 = vpop.permute.xlu1 %2342 }
 0x7ce   : > { %2848 = vrot.lane.b32.xlu0 %v8105_v46, %s6233_s8 }
 0x7cf   : > { %2850 = vrot.lane.b32.xlu1 %v8109_v27, %s6233_s8 }
 0x7d0   : > { %v2345_v43 = vpop.permute.xlu0 %2344 }
 0x7d1   : > { %v2347_v11 = vpop.permute.xlu1 %2346  ;;  %5751 = vmatmul.mubr.msk.bf16.gmra.mrb[4].mxu0 %vm2396_vm8, %v2339_v12 }
 0x7d2   : > { %5754 = vmatprep.mubr.msk.bf16.mxu0 %vm2396_vm8, %v2341_v18  ;;  %3243 = vrot.lane.b32.xlu0 %v7913_v55, %s6234_s7 }
 0x7d3   : > { %3245 = vrot.lane.b32.xlu1 %v7924_v16, %s6234_s7 }
 0x7d4   : > { %v2349_v56 = vpop.permute.xlu0 %2348 }
 0x7d5   : > { %v2351_v49 = vpop.permute.xlu1 %2350 }
 0x7d6   : > { %3247 = vrot.lane.b32.xlu0 %v7918_v2, %s6234_s7 }
 0x7d7   : > { %3249 = vrot.lane.b32.xlu1 %v7928_v31, %s6234_s7 }
 0x7d8   : > { %v2353_v61 = vpop.permute.xlu0 %2352 }
 0x7d9   : > { %v2355_v60 = vpop.permute.xlu1 %2354  ;;  %5755 = vmatmul.mubr.msk.bf16.gmra.mrb[8].mxu0 %vm2396_vm8, %v2343_v10 }
 0x7da   : > { %5758 = vmatprep.mubr.msk.bf16.mxu0 %vm2396_vm8, %v2345_v43  ;;  %3251 = vrot.lane.b32.xlu0 %v7936_v57, %s6234_s7 }
 0x7db   : > { %3253 = vrot.lane.b32.xlu1 %v7940_v7, %s6234_s7 }
 0x7dc   : > { %v2357_v45 = vpop.permute.xlu0 %2356 }
 0x7dd   : > { %v2359_v21 = vpop.permute.xlu1 %2358 }
 0x7de   : > { %3255 = vrot.lane.b32.xlu0 %v7948_v38, %s6234_s7 }
 0x7df   : > { %3257 = vrot.lane.b32.xlu1 %v7952_v24, %s6234_s7 }
 0x7e0   : > { %v2361_v41 = vpop.permute.xlu0 %2360 }
 0x7e1   : > { %v2363_v23 = vpop.permute.xlu1 %2362  ;;  %5759 = vmatmul.mubr.msk.bf16.gmra.mrb[12].mxu0 %vm2396_vm8, %v2347_v11 }
 0x7e2   : > { %5762 = vmatprep.mubr.msk.bf16.mxu0 %vm2396_vm8, %v2349_v56  ;;  %3259 = vrot.lane.b32.xlu0 %v7960_v62, %s6234_s7 }
 0x7e3   : > { %3261 = vrot.lane.b32.xlu1 %v7964_v63, %s6234_s7 }
 0x7e4   : > { %v2365_v9 = vpop.permute.xlu0 %2364 }
 0x7e5   : > { %v2367_v29 = vpop.permute.xlu1 %2366 }
 0x7e6   : > { %3263 = vrot.lane.b32.xlu0 %v7972_v59, %s6234_s7 }
 0x7e7   : > { %3265 = vrot.lane.b32.xlu1 %v7976_v26, %s6234_s7 }
 0x7e8   : > { %v2369_v50 = vpop.permute.xlu0 %2368 }
 0x7e9   : > { %v2371_v30 = vpop.permute.xlu1 %2370  ;;  %5763 = vmatmul.mubr.msk.bf16.gmra.mrb[16].mxu0 %vm2396_vm8, %v2351_v49 }
 0x7ea   : > { %5766 = vmatprep.mubr.msk.bf16.mxu0 %vm2396_vm8, %v2353_v61  ;;  %3267 = vrot.lane.b32.xlu0 %v7984_v25, %s6234_s7 }
 0x7eb   : > { %3269 = vrot.lane.b32.xlu1 %v7988_v19, %s6234_s7 }
 0x7ec   : > { %v2373_v17 = vpop.permute.xlu0 %2372 }
 0x7ed   : > { %v8215_v15 = vpop.permute.xlu1 %2374 }
 0x7ee   : > { %3271 = vrot.lane.b32.xlu0 %v7998_v6, %s6234_s7 }
 0x7ef   : > { %3273 = vrot.lane.b32.xlu1 %v8002_v51, %s6234_s7 }
 0x7f0   : > { %v8221_v44 = vpop.permute.xlu0 %2376 }
 0x7f1   : > { %v8223_v20 = vpop.permute.xlu1 %2378  ;;  %5767 = vmatmul.mubr.msk.bf16.gmra.mrb[20].mxu0 %vm2396_vm8, %v2355_v60 }
 0x7f2   : > { %5770 = vmatprep.mubr.msk.bf16.mxu0 %vm2396_vm8, %v2357_v45  ;;  %3275 = vrot.lane.b32.xlu0 %v8010_v47, %s6234_s7 }
 0x7f3   : > { %3277 = vrot.lane.b32.xlu1 %v8014_v37, %s6234_s7 }
 0x7f4   : > { %v8231_v40 = vpop.permute.xlu0 %2380 }
 0x7f5   : > { %v8233_v52 = vpop.permute.xlu1 %2382 }
 0x7f6   : > { %3279 = vrot.lane.b32.xlu0 %v8022_v13, %s6234_s7 }
 0x7f7   : > { %3281 = vrot.lane.b32.xlu1 %v8026_v8, %s6234_s7 }
 0x7f8   : > { %v8239_v33 = vpop.permute.xlu0 %2384 }
 0x7f9   : > { %v8241_v54 = vpop.permute.xlu1 %2386  ;;  %5771 = vmatmul.mubr.msk.bf16.gmra.mrb[24].mxu0 %vm2396_vm8, %v2359_v21 }
 0x7fa   : > { %5774 = vmatprep.mubr.msk.bf16.mxu0 %vm2396_vm8, %v2361_v41  ;;  %3283 = vrot.lane.b32.xlu0 %v8034_v34, %s6234_s7 }
 0x7fb   : > { %3285 = vrot.lane.b32.xlu1 %v8038_v3, %s6234_s7 }
 0x7fc   : > { %v8249_v0 = vpop.permute.xlu0 %2388 }
 0x7fd   : > { %v8251_v42 = vpop.permute.xlu1 %2390 }
 0x7fe   : > { %3287 = vrot.lane.b32.xlu0 %v8046_v14, %s6234_s7 }
 0x7ff   : > { %3289 = vrot.lane.b32.xlu1 %v8052_v32, %s6234_s7 }
 0x800   : > { %v2789_v58 = vpop.permute.xlu0 %2788 }
 0x801   : > { %v2791_v1 = vpop.permute.xlu1 %2790  ;;  %5775 = vmatmul.mubr.msk.bf16.gmra.mrb[28].mxu0 %vm2396_vm8, %v2363_v23  ;;  %5812 = vmatprep.mubr.msk.bf16.mxu1 %vm2396_vm8, %v2789_v58 }
 0x802   : > { %5778 = vmatprep.mubr.msk.bf16.mxu0 %vm2396_vm8, %v2365_v9  ;;  %5813 = vmatmul.mubr.msk.bf16.vlgmr.msra.gmra.mrb[0].mxu1 %vm2396_vm8, %v2791_v1 }
 0x803   : > { %3291 = vrot.lane.b32.xlu0 %v8060_v48, %s6234_s7  ;;  %3293 = vrot.lane.b32.xlu1 %v8064_v5, %s6234_s7 }
 0x804   : > { %v8267_v28 = vpop.permute.xlu0 %2392  ;;  %5943 = vmatpush3.bf16.xpose.msra.mxu1 %v3859_v39 }
 0x805   : > { %v8269_v12 = vpop.permute.xlu1 %2394 }
 0x807   : > { %3295 = vrot.lane.b32.xlu0 %v8072_v35, %s6234_s7  ;;  %3297 = vrot.lane.b32.xlu1 %v8076_v36, %s6234_s7 }
 0x808   : > { %v2793_v22 = vpop.permute.xlu0 %2792 }
 0x809   : > { %v2795_v18 = vpop.permute.xlu1 %2794  ;;  %5779 = vmatmul.mubr.msk.bf16.gmra.mrb[32].mxu0 %vm2396_vm8, %v2367_v29  ;;  %5816 = vmatprep.mubr.msk.bf16.mxu1 %vm2396_vm8, %v2793_v22 }
 0x80a   : > { %5782 = vmatprep.mubr.msk.bf16.mxu0 %vm2396_vm8, %v2369_v50  ;;  %5817 = vmatmul.mubr.msk.bf16.gmra.mrb[4].mxu1 %vm2396_vm8, %v2795_v18 }
 0x80b   : > { %3299 = vrot.lane.b32.xlu0 %v8087_v4, %s6234_s7  ;;  %3301 = vrot.lane.b32.xlu1 %v8091_v53, %s6234_s7 }
 0x80c   : > { %v2797_v10 = vpop.permute.xlu0 %2796 }
 0x80d   : > { %v2799_v43 = vpop.permute.xlu1 %2798  ;;  %5820 = vmatprep.mubr.msk.bf16.mxu1 %vm2396_vm8, %v2797_v10 }
 0x80f   : > { %3698 = vrot.lane.b32.xlu0 %v7913_v55, %s6235_s16  ;;  %3700 = vrot.lane.b32.xlu1 %v7924_v16, %s6235_s16 }
 0x810   : > { %v2801_v11 = vpop.permute.xlu0 %2800 }
 0x811   : > { %5783 = vmatmul.mubr.msk.bf16.gmra.mrb[36].mxu0 %vm2396_vm8, %v2371_v30  ;;  %v2803_v56 = vpop.permute.xlu1 %2802 }
 0x812   : > { %5786 = vmatprep.mubr.msk.bf16.mxu0 %vm2396_vm8, %v2373_v17  ;;  %5821 = vmatmul.mubr.msk.bf16.gmra.mrb[8].mxu1 %vm2396_vm8, %v2799_v43 }
 0x813   : > { %5824 = vmatprep.mubr.msk.bf16.mxu1 %vm2396_vm8, %v2801_v11  ;;  %3303 = vrot.lane.b32.xlu0 %v8105_v46, %s6234_s7 }
 0x814   : > { %v2805_v49 = vpop.permute.xlu0 %2804  ;;  %3305 = vrot.lane.b32.xlu1 %v8109_v27, %s6234_s7 }
 0x815   : > { %v2807_v55 = vpop.permute.xlu1 %2806 }
 0x817   : > { %3702 = vrot.lane.b32.xlu0 %v7918_v2, %s6235_s16 }
 0x818   : > { %v2809_v16 = vpop.permute.xlu0 %2808  ;;  %3704 = vrot.lane.b32.xlu1 %v7928_v31, %s6235_s16 }
 0x819   : > { %5787 = vmatmul.mubr.msk.bf16.gmra.mrb[40].mxu0 %vm2396_vm8, %v8215_v15  ;;  %v2811_v61 = vpop.permute.xlu1 %2810 }
 0x81a   : > { %5790 = vmatprep.mubr.msk.bf16.mxu0 %vm2396_vm8, %v8221_v44  ;;  %5825 = vmatmul.mubr.msk.bf16.gmra.mrb[12].mxu1 %vm2396_vm8, %v2803_v56 }
 0x81b   : > { %5828 = vmatprep.mubr.msk.bf16.mxu1 %vm2396_vm8, %v2805_v49  ;;  %3706 = vrot.lane.b32.xlu0 %v7936_v57, %s6235_s16 }
 0x81c   : > { %v2813_v60 = vpop.permute.xlu0 %2812  ;;  %3708 = vrot.lane.b32.xlu1 %v7940_v7, %s6235_s16 }
 0x81d   : > { %v2815_v2 = vpop.permute.xlu1 %2814 }
 0x81f   : > { %3710 = vrot.lane.b32.xlu0 %v7948_v38, %s6235_s16 }
 0x820   : > { %v2817_v31 = vpop.permute.xlu0 %2816  ;;  %3712 = vrot.lane.b32.xlu1 %v7952_v24, %s6235_s16 }
 0x821   : > { %5791 = vmatmul.mubr.msk.bf16.gmra.mrb[44].mxu0 %vm2396_vm8, %v8223_v20  ;;  %v2819_v45 = vpop.permute.xlu1 %2818 }
 0x822   : > { %5794 = vmatprep.mubr.msk.bf16.mxu0 %vm2396_vm8, %v8231_v40  ;;  %5829 = vmatmul.mubr.msk.bf16.gmra.mrb[16].mxu1 %vm2396_vm8, %v2807_v55 }
 0x823   : > { %5832 = vmatprep.mubr.msk.bf16.mxu1 %vm2396_vm8, %v2809_v16  ;;  %3714 = vrot.lane.b32.xlu0 %v7960_v62, %s6235_s16 }
 0x824   : > { %v2821_v57 = vpop.permute.xlu0 %2820  ;;  %3716 = vrot.lane.b32.xlu1 %v7964_v63, %s6235_s16 }
 0x825   : > { %v2823_v7 = vpop.permute.xlu1 %2822 }
 0x827   : > { %3718 = vrot.lane.b32.xlu0 %v7972_v59, %s6235_s16 }
 0x828   : > { %v2825_v38 = vpop.permute.xlu0 %2824  ;;  %3720 = vrot.lane.b32.xlu1 %v7976_v26, %s6235_s16 }
 0x829   : > { %5795 = vmatmul.mubr.msk.bf16.gmra.mrb[48].mxu0 %vm2396_vm8, %v8233_v52  ;;  %v2827_v24 = vpop.permute.xlu1 %2826 }
 0x82a   : > { %5798 = vmatprep.mubr.msk.bf16.mxu0 %vm2396_vm8, %v8239_v33  ;;  %5833 = vmatmul.mubr.msk.bf16.gmra.mrb[20].mxu1 %vm2396_vm8, %v2811_v61 }
 0x82b   : > { %5836 = vmatprep.mubr.msk.bf16.mxu1 %vm2396_vm8, %v2813_v60  ;;  %3722 = vrot.lane.b32.xlu0 %v7984_v25, %s6235_s16 }
 0x82c   : > { %v2829_v62 = vpop.permute.xlu0 %2828  ;;  %3724 = vrot.lane.b32.xlu1 %v7988_v19, %s6235_s16 }
 0x82d   : > { %v2831_v63 = vpop.permute.xlu1 %2830 }
 0x82f   : > { %3726 = vrot.lane.b32.xlu0 %v7998_v6, %s6235_s16 }
 0x830   : > { %v2833_v59 = vpop.permute.xlu0 %2832  ;;  %3728 = vrot.lane.b32.xlu1 %v8002_v51, %s6235_s16 }
 0x831   : > { %5799 = vmatmul.mubr.msk.bf16.gmra.mrb[52].mxu0 %vm2396_vm8, %v8241_v54  ;;  %v2835_v26 = vpop.permute.xlu1 %2834 }
 0x832   : > { %5802 = vmatprep.mubr.msk.bf16.mxu0 %vm2396_vm8, %v8249_v0  ;;  %5837 = vmatmul.mubr.msk.bf16.gmra.mrb[24].mxu1 %vm2396_vm8, %v2815_v2 }
 0x833   : > { %5840 = vmatprep.mubr.msk.bf16.mxu1 %vm2396_vm8, %v2817_v31  ;;  %3730 = vrot.lane.b32.xlu0 %v8010_v47, %s6235_s16 }
 0x834   : > { %v2837_v25 = vpop.permute.xlu0 %2836  ;;  %3732 = vrot.lane.b32.xlu1 %v8014_v37, %s6235_s16 }
 0x835   : > { %v2839_v19 = vpop.permute.xlu1 %2838 }
 0x837   : > { %3734 = vrot.lane.b32.xlu0 %v8022_v13, %s6235_s16 }
 0x838   : > { %v2841_v6 = vpop.permute.xlu0 %2840  ;;  %3736 = vrot.lane.b32.xlu1 %v8026_v8, %s6235_s16 }
 0x839   : > { %5803 = vmatmul.mubr.msk.bf16.gmra.mrb[56].mxu0 %vm2396_vm8, %v8251_v42  ;;  %v2843_v51 = vpop.permute.xlu1 %2842 }
 0x83a   : > { %5806 = vmatprep.mubr.msk.bf16.mxu0 %vm2396_vm8, %v8267_v28  ;;  %5841 = vmatmul.mubr.msk.bf16.gmra.mrb[28].mxu1 %vm2396_vm8, %v2819_v45 }
 0x83b   : > { %5844 = vmatprep.mubr.msk.bf16.mxu1 %vm2396_vm8, %v2821_v57  ;;  %3738 = vrot.lane.b32.xlu0 %v8034_v34, %s6235_s16 }
 0x83c   : > { %v2845_v47 = vpop.permute.xlu0 %2844  ;;  %3740 = vrot.lane.b32.xlu1 %v8038_v3, %s6235_s16 }
 0x83d   : > { %v2847_v37 = vpop.permute.xlu1 %2846 }
 0x83f   : > { %3742 = vrot.lane.b32.xlu0 %v8046_v14, %s6235_s16 }
 0x840   : > { %v2849_v13 = vpop.permute.xlu0 %2848  ;;  %3744 = vrot.lane.b32.xlu1 %v8052_v32, %s6235_s16 }
 0x841   : > { %5807 = vmatmul.mubr.msk.bf16.gmra.mrb[60].mxu0 %vm2396_vm8, %v8269_v12  ;;  %v8372_v8 = vpop.permute.xlu1 %2850 }
 0x842   : > { %5845 = vmatmul.mubr.msk.bf16.gmra.mrb[32].mxu1 %vm2396_vm8, %v2823_v7 }
 0x843   : > { %5848 = vmatprep.mubr.msk.bf16.mxu1 %vm2396_vm8, %v2825_v38  ;;  %3746 = vrot.lane.b32.xlu0 %v8060_v48, %s6235_s16 }
 0x844   : > { %v3244_v34 = vpop.permute.xlu0 %3243  ;;  %3748 = vrot.lane.b32.xlu1 %v8064_v5, %s6235_s16 }
 0x845   : > { %v3246_v3 = vpop.permute.xlu1 %3245  ;;  %5878 = vmatprep.mubr.msk.bf16.mxu0 %vm2396_vm8, %v3244_v34 }
 0x847   : > { %3750 = vrot.lane.b32.xlu0 %v8072_v35, %s6235_s16 }
 0x848   : > { %v3248_v14 = vpop.permute.xlu0 %3247  ;;  %3752 = vrot.lane.b32.xlu1 %v8076_v36, %s6235_s16 }
 0x849   : > { %5879 = vmatmul.mubr.msk.bf16.vlgmr.msra.gmra.mrb[64].mxu0 %vm2396_vm8, %v3246_v3  ;;  %v3250_v32 = vpop.permute.xlu1 %3249 }
 0x84a   : > { %5849 = vmatmul.mubr.msk.bf16.gmra.mrb[36].mxu1 %vm2396_vm8, %v2827_v24  ;;  %5882 = vmatprep.mubr.msk.bf16.mxu0 %vm2396_vm8, %v3248_v14 }
 0x84b   : > { %5852 = vmatprep.mubr.msk.bf16.mxu1 %vm2396_vm8, %v2829_v62  ;;  %3754 = vrot.lane.b32.xlu0 %v8087_v4, %s6235_s16 }
 0x84c   : > { %v3252_v48 = vpop.permute.xlu0 %3251  ;;  %3756 = vrot.lane.b32.xlu1 %v8091_v53, %s6235_s16 }
 0x84d   : > { %v3254_v5 = vpop.permute.xlu1 %3253 }
 0x84f   : > { %3758 = vrot.lane.b32.xlu0 %v8105_v46, %s6235_s16 }
 0x850   : > { %v3256_v35 = vpop.permute.xlu0 %3255  ;;  %3760 = vrot.lane.b32.xlu1 %v8109_v27, %s6235_s16 }
 0x851   : > { %5883 = vmatmul.mubr.msk.bf16.gmra.mrb[68].mxu0 %vm2396_vm8, %v3250_v32  ;;  %v3258_v36 = vpop.permute.xlu1 %3257 }
 0x852   : > { %5853 = vmatmul.mubr.msk.bf16.gmra.mrb[40].mxu1 %vm2396_vm8, %v2831_v63  ;;  %5886 = vmatprep.mubr.msk.bf16.mxu0 %vm2396_vm8, %v3252_v48 }
 0x853   : > { %5856 = vmatprep.mubr.msk.bf16.mxu1 %vm2396_vm8, %v2833_v59 }
 0x854   : > { %v3260_v4 = vpop.permute.xlu0 %3259 }
 0x855   : > { %v3262_v21 = vpop.permute.xlu1 %3261 }
 0x858   : > { %v3264_v53 = vpop.permute.xlu0 %3263 }
 0x859   : > { %5887 = vmatmul.mubr.msk.bf16.gmra.mrb[72].mxu0 %vm2396_vm8, %v3254_v5  ;;  %v3266_v41 = vpop.permute.xlu1 %3265 }
 0x85a   : > { %5857 = vmatmul.mubr.msk.bf16.gmra.mrb[44].mxu1 %vm2396_vm8, %v2835_v26  ;;  %5890 = vmatprep.mubr.msk.bf16.mxu0 %vm2396_vm8, %v3256_v35 }
 0x85b   : > { %5860 = vmatprep.mubr.msk.bf16.mxu1 %vm2396_vm8, %v2837_v25 }
 0x85c   : > { %v3268_v46 = vpop.permute.xlu0 %3267 }
 0x85d   : > { %v3270_v27 = vpop.permute.xlu1 %3269 }
 0x860   : > { %v3272_v23 = vpop.permute.xlu0 %3271 }
 0x861   : > { %5891 = vmatmul.mubr.msk.bf16.gmra.mrb[76].mxu0 %vm2396_vm8, %v3258_v36  ;;  %v3274_v9 = vpop.permute.xlu1 %3273 }
 0x862   : > { %5861 = vmatmul.mubr.msk.bf16.gmra.mrb[48].mxu1 %vm2396_vm8, %v2839_v19  ;;  %5894 = vmatprep.mubr.msk.bf16.mxu0 %vm2396_vm8, %v3260_v4 }
 0x863   : > { %5864 = vmatprep.mubr.msk.bf16.mxu1 %vm2396_vm8, %v2841_v6 }
 0x864   : > { %v3276_v29 = vpop.permute.xlu0 %3275 }
 0x865   : > { %v3278_v50 = vpop.permute.xlu1 %3277 }
 0x868   : > { %v3280_v30 = vpop.permute.xlu0 %3279 }
 0x869   : > { %5895 = vmatmul.mubr.msk.bf16.gmra.mrb[80].mxu0 %vm2396_vm8, %v3262_v21  ;;  %v3282_v17 = vpop.permute.xlu1 %3281 }
 0x86a   : > { %5865 = vmatmul.mubr.msk.bf16.gmra.mrb[52].mxu1 %vm2396_vm8, %v2843_v51  ;;  %5898 = vmatprep.mubr.msk.bf16.mxu0 %vm2396_vm8, %v3264_v53 }
 0x86b   : > { %5868 = vmatprep.mubr.msk.bf16.mxu1 %vm2396_vm8, %v2845_v47 }
 0x86c   : > { %v3284_v15 = vpop.permute.xlu0 %3283 }
 0x86d   : > { %v3286_v44 = vpop.permute.xlu1 %3285 }
 0x870   : > { %v3288_v20 = vpop.permute.xlu0 %3287 }
 0x871   : > { %5899 = vmatmul.mubr.msk.bf16.gmra.mrb[84].mxu0 %vm2396_vm8, %v3266_v41  ;;  %v3290_v40 = vpop.permute.xlu1 %3289 }
 0x872   : > { %5869 = vmatmul.mubr.msk.bf16.gmra.mrb[56].mxu1 %vm2396_vm8, %v2847_v37  ;;  %5902 = vmatprep.mubr.msk.bf16.mxu0 %vm2396_vm8, %v3268_v46 }
 0x873   : > { %5872 = vmatprep.mubr.msk.bf16.mxu1 %vm2396_vm8, %v2849_v13 }
 0x875   : > { %v3292_v52 = vpop.permute.xlu0 %3291  ;;  %v3294_v33 = vpop.permute.xlu1 %3293 }
 0x879   : > { %5903 = vmatmul.mubr.msk.bf16.gmra.mrb[88].mxu0 %vm2396_vm8, %v3270_v27  ;;  %v3296_v54 = vpop.permute.xlu0 %3295  ;;  %v3298_v0 = vpop.permute.xlu1 %3297 }
 0x87a   : > { %5873 = vmatmul.mubr.msk.bf16.gmra.mrb[60].mxu1 %vm2396_vm8, %v8372_v8  ;;  %5906 = vmatprep.mubr.msk.bf16.mxu0 %vm2396_vm8, %v3272_v23 }
 0x87d   : > { %v3300_v42 = vpop.permute.xlu0 %3299  ;;  %v8421_v58 = vpop.permute.xlu1 %3301 }
 0x881   : > { %5907 = vmatmul.mubr.msk.bf16.gmra.mrb[92].mxu0 %vm2396_vm8, %v3274_v9  ;;  %v3699_v1 = vpop.permute.xlu0 %3698  ;;  %v3701_v39 = vpop.permute.xlu1 %3700 }
 0x882   : > { %5910 = vmatprep.mubr.msk.bf16.mxu0 %vm2396_vm8, %v3276_v29  ;;  %5944 = vmatprep.mubr.msk.bf16.mxu1 %vm2396_vm8, %v3699_v1 }
 0x883   : > { %5945 = vmatmul.mubr.msk.bf16.vlgmr.msra.gmra.mrb[64].mxu1 %vm2396_vm8, %v3701_v39 }
 0x885   : > { %v3304_v28 = vpop.permute.xlu0 %3303 }
 0x886   : > { %v8427_v12 = vpop.permute.xlu1 %3305 }
 0x889   : > { %5911 = vmatmul.mubr.msk.bf16.gmra.mrb[96].mxu0 %vm2396_vm8, %v3278_v50  ;;  %v3703_v22 = vpop.permute.xlu0 %3702 }
 0x88a   : > { %5914 = vmatprep.mubr.msk.bf16.mxu0 %vm2396_vm8, %v3280_v30  ;;  %v3705_v18 = vpop.permute.xlu1 %3704  ;;  %5948 = vmatprep.mubr.msk.bf16.mxu1 %vm2396_vm8, %v3703_v22 }
 0x88b   : > { %5949 = vmatmul.mubr.msk.bf16.gmra.mrb[68].mxu1 %vm2396_vm8, %v3705_v18 }
 0x88d   : > { %v3707_v10 = vpop.permute.xlu0 %3706 }
 0x88e   : > { %5952 = vmatprep.mubr.msk.bf16.mxu1 %vm2396_vm8, %v3707_v10  ;;  %v3709_v43 = vpop.permute.xlu1 %3708 }
 0x891   : > { %5915 = vmatmul.mubr.msk.bf16.gmra.mrb[100].mxu0 %vm2396_vm8, %v3282_v17  ;;  %v3711_v11 = vpop.permute.xlu0 %3710 }
 0x892   : > { %5918 = vmatprep.mubr.msk.bf16.mxu0 %vm2396_vm8, %v3284_v15  ;;  %v3713_v56 = vpop.permute.xlu1 %3712 }
 0x893   : > { %5953 = vmatmul.mubr.msk.bf16.gmra.mrb[72].mxu1 %vm2396_vm8, %v3709_v43 }
 0x894   : > { %5956 = vmatprep.mubr.msk.bf16.mxu1 %vm2396_vm8, %v3711_v11 }
 0x895   : > { %v3715_v49 = vpop.permute.xlu0 %3714 }
 0x896   : > { %v3717_v2 = vpop.permute.xlu1 %3716 }
 0x899   : > { %5919 = vmatmul.mubr.msk.bf16.gmra.mrb[104].mxu0 %vm2396_vm8, %v3286_v44  ;;  %v3719_v31 = vpop.permute.xlu0 %3718 }
 0x89a   : > { %5922 = vmatprep.mubr.msk.bf16.mxu0 %vm2396_vm8, %v3288_v20  ;;  %v3721_v24 = vpop.permute.xlu1 %3720 }
 0x89b   : > { %5957 = vmatmul.mubr.msk.bf16.gmra.mrb[76].mxu1 %vm2396_vm8, %v3713_v56 }
 0x89c   : > { %v8441_v55 = vpop.f32.mrb[0].mxu0  ;;  %5960 = vmatprep.mubr.msk.bf16.mxu1 %vm2396_vm8, %v3715_v49 }
 0x89d   : > { %v8444_v16 = vpop.f32.mrb[1].mxu0  ;;  %v3723_v62 = vpop.permute.xlu0 %3722 }
 0x89e   : > { %v8446_v61 = vpop.f32.mrb[2].mxu0  ;;  %v3725_v19 = vpop.permute.xlu1 %3724 }
 0x89f   : > { %v8448_v60 = vpop.f32.mrb[3].mxu0 }
 0x8a1   : > { %5923 = vmatmul.mubr.msk.bf16.gmra.mrb[108].mxu0 %vm2396_vm8, %v3290_v40  ;;  %v3727_v6 = vpop.permute.xlu0 %3726 }
 0x8a2   : > { %5926 = vmatprep.mubr.msk.bf16.mxu0 %vm2396_vm8, %v3292_v52  ;;  %v3729_v8 = vpop.permute.xlu1 %3728 }
 0x8a3   : > { %5961 = vmatmul.mubr.msk.bf16.gmra.mrb[80].mxu1 %vm2396_vm8, %v3717_v2 }
 0x8a4   : > { %v8453_v45 = vpop.f32.mrb[4].mxu0  ;;  %5964 = vmatprep.mubr.msk.bf16.mxu1 %vm2396_vm8, %v3719_v31 }
 0x8a5   : > { %v8456_v57 = vpop.f32.mrb[5].mxu0  ;;  %v3731_v34 = vpop.permute.xlu0 %3730 }
 0x8a6   : > { %v8458_v7 = vpop.f32.mrb[6].mxu0  ;;  %v3733_v5 = vpop.permute.xlu1 %3732 }
 0x8a7   : > { %v8460_v38 = vpop.f32.mrb[7].mxu0 }
 0x8a9   : > { %5927 = vmatmul.mubr.msk.bf16.gmra.mrb[112].mxu0 %vm2396_vm8, %v3294_v33  ;;  %v3735_v35 = vpop.permute.xlu0 %3734 }
 0x8aa   : > { %5930 = vmatprep.mubr.msk.bf16.mxu0 %vm2396_vm8, %v3296_v54  ;;  %v3737_v41 = vpop.permute.xlu1 %3736 }
 0x8ab   : > { %5965 = vmatmul.mubr.msk.bf16.gmra.mrb[84].mxu1 %vm2396_vm8, %v3721_v24 }
 0x8ac   : > { %v8465_v63 = vpop.f32.mrb[8].mxu0  ;;  %5968 = vmatprep.mubr.msk.bf16.mxu1 %vm2396_vm8, %v3723_v62 }
 0x8ad   : > { %10043 = vst [vmem:[#allocation75_spill] sm:$0xff] %v8465_v63  ;;  %v8468_v59 = vpop.f32.mrb[9].mxu0  ;;  %v3739_v46 = vpop.permute.xlu0 %3738 }
 0x8ae   : > { %10044 = vst [vmem:[#allocation76_spill] sm:$0xff] %v8468_v59  ;;  %v8470_v26 = vpop.f32.mrb[10].mxu0  ;;  %v3741_v50 = vpop.permute.xlu1 %3740 }
 0x8af   : > { %10045 = vst [vmem:[#allocation77_spill] sm:$0xff] %v8470_v26  ;;  %v8472_v25 = vpop.f32.mrb[11].mxu0 }
 0x8b0   : > { %10046 = vst [vmem:[#allocation78_spill] sm:$0xff] %v8472_v25 }
 0x8b1   : > { %5931 = vmatmul.mubr.msk.bf16.gmra.mrb[116].mxu0 %vm2396_vm8, %v3298_v0  ;;  %v3743_v30 = vpop.permute.xlu0 %3742 }
 0x8b2   : > { %5934 = vmatprep.mubr.msk.bf16.mxu0 %vm2396_vm8, %v3300_v42  ;;  %v3745_v0 = vpop.permute.xlu1 %3744 }
 0x8b3   : > { %5969 = vmatmul.mubr.msk.bf16.gmra.mrb[88].mxu1 %vm2396_vm8, %v3725_v19 }
 0x8b4   : > { %v8477_v51 = vpop.f32.mrb[12].mxu0  ;;  %5972 = vmatprep.mubr.msk.bf16.mxu1 %vm2396_vm8, %v3727_v6 }
 0x8b5   : > { %10047 = vst [vmem:[#allocation79_spill] sm:$0xff] %v8477_v51  ;;  %v8480_v47 = vpop.f32.mrb[13].mxu0  ;;  %v3747_v42 = vpop.permute.xlu0 %3746 }
 0x8b6   : > { %10048 = vst [vmem:[#allocation80_spill] sm:$0xff] %v8480_v47  ;;  %v8482_v37 = vpop.f32.mrb[14].mxu0  ;;  %v3749_v43 = vpop.permute.xlu1 %3748 }
 0x8b7   : > { %10049 = vst [vmem:[#allocation81_spill] sm:$0xff] %v8482_v37  ;;  %v8484_v13 = vpop.f32.mrb[15].mxu0 }
 0x8b8   : > { %10050 = vst [vmem:[#allocation82_spill] sm:$0xff] %v8484_v13 }
 0x8b9   : > { %5935 = vmatmul.mubr.msk.bf16.gmra.mrb[120].mxu0 %vm2396_vm8, %v8421_v58  ;;  %v3751_v11 = vpop.permute.xlu0 %3750 }
 0x8ba   : > { %5938 = vmatprep.mubr.msk.bf16.mxu0 %vm2396_vm8, %v3304_v28 }
 0x8bb   : > { %5973 = vmatmul.mubr.msk.bf16.gmra.mrb[92].mxu1 %vm2396_vm8, %v3729_v8  ;;  %v3753_v8 = vpop.permute.xlu1 %3752 }
 0x8bc   : > { %v8490_v3 = vpop.f32.mrb[16].mxu0  ;;  %5976 = vmatprep.mubr.msk.bf16.mxu1 %vm2396_vm8, %v3731_v34 }
 0x8bd   : > { %10051 = vst [vmem:[#allocation83_spill] sm:$0xff] %v8490_v3  ;;  %v8493_v14 = vpop.f32.mrb[17].mxu0  ;;  %v3755_v34 = vpop.permute.xlu0 %3754 }
 0x8be   : > { %10052 = vst [vmem:[#allocation84_spill] sm:$0xff] %v8493_v14  ;;  %v8495_v32 = vpop.f32.mrb[18].mxu0 }
 0x8bf   : > { %10053 = vst [vmem:[#allocation85_spill] sm:$0xff] %v8495_v32  ;;  %v8497_v48 = vpop.f32.mrb[19].mxu0 }
 0x8c0   : > { %10054 = vst [vmem:[#allocation86_spill] sm:$0xff] %v8497_v48 }
 0x8c1   : > { %5939 = vmatmul.mubr.msk.bf16.gmra.mrb[124].mxu0 %vm2396_vm8, %v8427_v12 }
 0x8c3   : > { %5977 = vmatmul.mubr.msk.bf16.gmra.mrb[96].mxu1 %vm2396_vm8, %v3733_v5 }
 0x8c4   : > { %v8502_v36 = vpop.f32.mrb[20].mxu0  ;;  %5980 = vmatprep.mubr.msk.bf16.mxu1 %vm2396_vm8, %v3735_v35 }
 0x8c5   : > { %10055 = vst [vmem:[#allocation87_spill] sm:$0xff] %v8502_v36  ;;  %v8505_v4 = vpop.f32.mrb[21].mxu0 }
 0x8c6   : > { %10056 = vst [vmem:[#allocation88_spill] sm:$0xff] %v8505_v4  ;;  %v8507_v21 = vpop.f32.mrb[22].mxu0 }
 0x8c7   : > { %10057 = vst [vmem:[#allocation89_spill] sm:$0xff] %v8507_v21  ;;  %v8509_v53 = vpop.f32.mrb[23].mxu0 }
 0x8c8   : > { %10058 = vst [vmem:[#allocation90_spill] sm:$0xff] %v8509_v53 }
 0x8cb   : > { %5981 = vmatmul.mubr.msk.bf16.gmra.mrb[100].mxu1 %vm2396_vm8, %v3737_v41 }
 0x8cc   : > { %v8512_v27 = vpop.f32.mrb[24].mxu0  ;;  %5984 = vmatprep.mubr.msk.bf16.mxu1 %vm2396_vm8, %v3739_v46 }
 0x8cd   : > { %10059 = vst [vmem:[#allocation91_spill] sm:$0xff] %v8512_v27  ;;  %v8515_v23 = vpop.f32.mrb[25].mxu0 }
 0x8ce   : > { %10060 = vst [vmem:[#allocation92_spill] sm:$0xff] %v8515_v23  ;;  %v8517_v9 = vpop.f32.mrb[26].mxu0 }
 0x8cf   : > { %10061 = vst [vmem:[#allocation93_spill] sm:$0xff] %v8517_v9  ;;  %v8519_v29 = vpop.f32.mrb[27].mxu0 }
 0x8d0   : > { %10062 = vst [vmem:[#allocation94_spill] sm:$0xff] %v8519_v29 }
 0x8d3   : > { %5985 = vmatmul.mubr.msk.bf16.gmra.mrb[104].mxu1 %vm2396_vm8, %v3741_v50 }
 0x8d4   : > { %v8522_v17 = vpop.f32.mrb[28].mxu0  ;;  %5988 = vmatprep.mubr.msk.bf16.mxu1 %vm2396_vm8, %v3743_v30 }
 0x8d5   : > { %10063 = vst [vmem:[#allocation95_spill] sm:$0xff] %v8522_v17  ;;  %v8525_v15 = vpop.f32.mrb[29].mxu0  ;;  %v5814_v44 = vpop.f32.mrb[0].mxu1 }
 0x8d6   : > { %10064 = vst [vmem:[#allocation96_spill] sm:$0xff] %v8525_v15  ;;  %v8527_v20 = vpop.f32.mrb[30].mxu0  ;;  %4218 = vrot.lane.b32.xlu0 %v5814_v44, %s6236_s20  ;;  %v2985_v40 = vpop.f32.mrb[1].mxu1 }
 0x8d7   : > { %10065 = vst [vmem:[#allocation97_spill] sm:$0xff] %v8527_v20  ;;  %v8530_v52 = vpop.f32.mrb[31].mxu0  ;;  %v5815_v33 = vpop.f32.mrb[2].mxu1 }
 0x8d8   : > { %10066 = vst [vmem:[#allocation98_spill] sm:$0xff] %v8530_v52  ;;  %4220 = vrot.lane.b32.xlu1 %v5815_v33, %s6236_s20  ;;  %v2988_v54 = vpop.f32.mrb[3].mxu1  ;;  %v3757_v33 = vpop.permute.xlu1 %3756 }
 0x8da   : > { %4214 = vrot.lane.b32.xlu0 %v2985_v40, %s6236_s20 }
 0x8db   : > { %5989 = vmatmul.mubr.msk.bf16.gmra.mrb[108].mxu1 %vm2396_vm8, %v3745_v0 }
 0x8dc   : > { %v8535_v58 = vpop.f32.mrb[32].mxu0  ;;  %4216 = vrot.lane.b32.xlu1 %v2988_v54, %s6236_s20  ;;  %5992 = vmatprep.mubr.msk.bf16.mxu1 %vm2396_vm8, %v3747_v42  ;;  %v3759_v54 = vpop.permute.xlu0 %3758 }
 0x8dd   : > { %10067 = vst [vmem:[#allocation99_spill] sm:$0xff] %v8535_v58  ;;  %v8539_v1 = vpop.f32.mrb[33].mxu0  ;;  %v5818_v39 = vpop.f32.mrb[4].mxu1 }
 0x8de   : > { %10068 = vst [vmem:[#allocation100_spill] sm:$0xff] %v8539_v1  ;;  %v8541_v28 = vpop.f32.mrb[34].mxu0  ;;  %4226 = vrot.lane.b32.xlu0 %v5818_v39, %s6236_s20  ;;  %v3001_v12 = vpop.f32.mrb[5].mxu1 }
 0x8df   : > { %10069 = vst [vmem:[#allocation101_spill] sm:$0xff] %v8541_v28  ;;  %v8544_v22 = vpop.f32.mrb[35].mxu0  ;;  %v5819_v18 = vpop.f32.mrb[6].mxu1 }
 0x8e0   : > { %10070 = vst [vmem:[#allocation102_spill] sm:$0xff] %v8544_v22  ;;  %4228 = vrot.lane.b32.xlu1 %v5819_v18, %s6236_s20  ;;  %v3004_v10 = vpop.f32.mrb[7].mxu1 }
 0x8e2   : > { %4222 = vrot.lane.b32.xlu0 %v3001_v12, %s6236_s20 }
 0x8e3   : > { %5993 = vmatmul.mubr.msk.bf16.gmra.mrb[112].mxu1 %vm2396_vm8, %v3749_v43 }
 0x8e4   : > { %v8549_v56 = vpop.f32.mrb[36].mxu0  ;;  %4224 = vrot.lane.b32.xlu1 %v3004_v10, %s6236_s20  ;;  %5996 = vmatprep.mubr.msk.bf16.mxu1 %vm2396_vm8, %v3751_v11 }
 0x8e5   : > { %10071 = vst [vmem:[#allocation103_spill] sm:$0xff] %v8549_v56  ;;  %v8553_v49 = vpop.f32.mrb[37].mxu0  ;;  %v5822_v2 = vpop.f32.mrb[8].mxu1 }
 0x8e6   : > { %10072 = vst [vmem:[#allocation104_spill] sm:$0xff] %v8553_v49  ;;  %v8555_v31 = vpop.f32.mrb[38].mxu0  ;;  %v3017_v24 = vpop.f32.mrb[9].mxu1  ;;  %4234 = vrot.lane.b32.xlu0 %v5822_v2, %s6236_s20 }
 0x8e7   : > { %10073 = vst [vmem:[#allocation105_spill] sm:$0xff] %v8555_v31  ;;  %v8558_v62 = vpop.f32.mrb[39].mxu0  ;;  %v5823_v19 = vpop.f32.mrb[10].mxu1 }
 0x8e8   : > { %10074 = vst [vmem:[#allocation106_spill] sm:$0xff] %v8558_v62  ;;  %4236 = vrot.lane.b32.xlu1 %v5823_v19, %s6236_s20  ;;  %v3020_v6 = vpop.f32.mrb[11].mxu1  ;;  %v3761_v2 = vpop.permute.xlu1 %3760 }
 0x8ea   : > { %4230 = vrot.lane.b32.xlu0 %v3017_v24, %s6236_s20 }
 0x8eb   : > { %5997 = vmatmul.mubr.msk.bf16.gmra.mrb[116].mxu1 %vm2396_vm8, %v3753_v8 }
 0x8ec   : > { %v8563_v5 = vpop.f32.mrb[40].mxu0  ;;  %4232 = vrot.lane.b32.xlu1 %v3020_v6, %s6236_s20  ;;  %6000 = vmatprep.mubr.msk.bf16.mxu1 %vm2396_vm8, %v3755_v34 }
 0x8ed   : > { %10075 = vst [vmem:[#allocation107_spill] sm:$0xff] %v8563_v5  ;;  %v8567_v35 = vpop.f32.mrb[41].mxu0  ;;  %v5826_v41 = vpop.f32.mrb[12].mxu1 }
 0x8ee   : > { %10076 = vst [vmem:[#allocation108_spill] sm:$0xff] %v8567_v35  ;;  %v8569_v46 = vpop.f32.mrb[42].mxu0  ;;  %v3033_v50 = vpop.f32.mrb[13].mxu1  ;;  %4242 = vrot.lane.b32.xlu0 %v5826_v41, %s6236_s20 }
 0x8ef   : > { %10077 = vst [vmem:[#allocation109_spill] sm:$0xff] %v8569_v46  ;;  %v8572_v30 = vpop.f32.mrb[43].mxu0  ;;  %v5827_v44 = vpop.f32.mrb[14].mxu1 }
 0x8f0   : > { %10078 = vst [vmem:[#allocation110_spill] sm:$0xff] %v8572_v30  ;;  %4244 = vrot.lane.b32.xlu1 %v5827_v44, %s6236_s20  ;;  %v3036_v40 = vpop.f32.mrb[15].mxu1 }
 0x8f2   : > { %4238 = vrot.lane.b32.xlu0 %v3033_v50, %s6236_s20 }
 0x8f3   : > { %6001 = vmatmul.mubr.msk.bf16.gmra.mrb[120].mxu1 %vm2396_vm8, %v3757_v33 }
 0x8f4   : > { %v8577_v0 = vpop.f32.mrb[44].mxu0  ;;  %4240 = vrot.lane.b32.xlu1 %v3036_v40, %s6236_s20  ;;  %6004 = vmatprep.mubr.msk.bf16.mxu1 %vm2396_vm8, %v3759_v54 }
 0x8f5   : > { %10079 = vst [vmem:[#allocation111_spill] sm:$0xff] %v8577_v0  ;;  %v8581_v42 = vpop.f32.mrb[45].mxu0  ;;  %v5830_v39 = vpop.f32.mrb[16].mxu1 }
 0x8f6   : > { %10080 = vst [vmem:[#allocation112_spill] sm:$0xff] %v8581_v42  ;;  %v8583_v12 = vpop.f32.mrb[46].mxu0  ;;  %v3049_v18 = vpop.f32.mrb[17].mxu1  ;;  %4250 = vrot.lane.b32.xlu0 %v5830_v39, %s6236_s20 }
 0x8f7   : > { %10081 = vst [vmem:[#allocation113_spill] sm:$0xff] %v8583_v12  ;;  %v8586_v10 = vpop.f32.mrb[47].mxu0  ;;  %v5831_v43 = vpop.f32.mrb[18].mxu1 }
 0x8f8   : > { %10082 = vst [vmem:[#allocation114_spill] sm:$0xff] %v8586_v10  ;;  %4252 = vrot.lane.b32.xlu1 %v5831_v43, %s6236_s20  ;;  %v3052_v11 = vpop.f32.mrb[19].mxu1 }
 0x8fa   : > { %4246 = vrot.lane.b32.xlu0 %v3049_v18, %s6236_s20 }
 0x8fb   : > { %6005 = vmatmul.mubr.msk.bf16.gmra.mrb[124].mxu1 %vm2396_vm8, %v3761_v2 }
 0x8fc   : > { %v8591_v24 = vpop.f32.mrb[48].mxu0  ;;  %4248 = vrot.lane.b32.xlu1 %v3052_v11, %s6236_s20 }
 0x8fd   : > { %10083 = vst [vmem:[#allocation115_spill] sm:$0xff] %v8591_v24  ;;  %v8594_v19 = vpop.f32.mrb[49].mxu0  ;;  %v5834_v6 = vpop.f32.mrb[20].mxu1 }
 0x8fe   : > { %10084 = vst [vmem:[#allocation116_spill] sm:$0xff] %v8594_v19  ;;  %v8596_v8 = vpop.f32.mrb[50].mxu0  ;;  %v3065_v34 = vpop.f32.mrb[21].mxu1  ;;  %4258 = vrot.lane.b32.xlu0 %v5834_v6, %s6236_s20 }
 0x8ff   : > { %10085 = vst [vmem:[#allocation117_spill] sm:$0xff] %v8596_v8  ;;  %v8599_v41 = vpop.f32.mrb[51].mxu0  ;;  %v5835_v50 = vpop.f32.mrb[22].mxu1 }
 0x900   : > { %10086 = vst [vmem:[#allocation118_spill] sm:$0xff] %v8599_v41  ;;  %4260 = vrot.lane.b32.xlu1 %v5835_v50, %s6236_s20  ;;  %v3068_v44 = vpop.f32.mrb[23].mxu1 }
 0x902   : > { %4254 = vrot.lane.b32.xlu0 %v3065_v34, %s6236_s20 }
 0x904   : > { %v8603_v40 = vpop.f32.mrb[52].mxu0  ;;  %4256 = vrot.lane.b32.xlu1 %v3068_v44, %s6236_s20 }
 0x905   : > { %10087 = vst [vmem:[#allocation119_spill] sm:$0xff] %v8603_v40  ;;  %v8606_v33 = vpop.f32.mrb[53].mxu0  ;;  %v5838_v54 = vpop.f32.mrb[24].mxu1 }
 0x906   : > { %10088 = vst [vmem:[#allocation120_spill] sm:$0xff] %v8606_v33  ;;  %v8608_v39 = vpop.f32.mrb[54].mxu0  ;;  %v3081_v18 = vpop.f32.mrb[25].mxu1  ;;  %4266 = vrot.lane.b32.xlu0 %v5838_v54, %s6236_s20 }
 0x907   : > { %10089 = vst [vmem:[#allocation121_spill] sm:$0xff] %v8608_v39  ;;  %v8611_v43 = vpop.f32.mrb[55].mxu0  ;;  %v5839_v11 = vpop.f32.mrb[26].mxu1 }
 0x908   : > { %10090 = vst [vmem:[#allocation122_spill] sm:$0xff] %v8611_v43  ;;  %4268 = vrot.lane.b32.xlu1 %v5839_v11, %s6236_s20  ;;  %v3084_v2 = vpop.f32.mrb[27].mxu1 }
 0x90a   : > { %4262 = vrot.lane.b32.xlu0 %v3081_v18, %s6236_s20 }
 0x90c   : > { %v8615_v6 = vpop.f32.mrb[56].mxu0  ;;  %4264 = vrot.lane.b32.xlu1 %v3084_v2, %s6236_s20 }
 0x90d   : > { %10091 = vst [vmem:[#allocation123_spill] sm:$0xff] %v8615_v6  ;;  %v8618_v34 = vpop.f32.mrb[57].mxu0  ;;  %v5842_v50 = vpop.f32.mrb[28].mxu1 }
 0x90e   : > { %10092 = vst [vmem:[#allocation124_spill] sm:$0xff] %v8618_v34  ;;  %v8620_v44 = vpop.f32.mrb[58].mxu0  ;;  %v3097_v39 = vpop.f32.mrb[29].mxu1  ;;  %4274 = vrot.lane.b32.xlu0 %v5842_v50, %s6236_s20 }
 0x90f   : > { %10093 = vst [vmem:[#allocation125_spill] sm:$0xff] %v8620_v44  ;;  %v8623_v54 = vpop.f32.mrb[59].mxu0  ;;  %v5843_v40 = vpop.f32.mrb[30].mxu1 }
 0x910   : > { %10094 = vst [vmem:[#allocation126_spill] sm:$0xff] %v8623_v54  ;;  %4276 = vrot.lane.b32.xlu1 %v5843_v40, %s6236_s20  ;;  %v3100_v11 = vpop.f32.mrb[31].mxu1 }
 0x912   : > { %4270 = vrot.lane.b32.xlu0 %v3097_v39, %s6236_s20 }
 0x914   : > { %v8627_v18 = vpop.f32.mrb[60].mxu0  ;;  %4272 = vrot.lane.b32.xlu1 %v3100_v11, %s6236_s20 }
 0x915   : > { %10095 = vst [vmem:[#allocation127_spill] sm:$0xff] %v8627_v18  ;;  %v8630_v2 = vpop.f32.mrb[61].mxu0  ;;  %v5846_v6 = vpop.f32.mrb[32].mxu1 }
 0x916   : > { %10096 = vst [vmem:[#allocation128_spill] sm:$0xff] %v8630_v2  ;;  %v8632_v34 = vpop.f32.mrb[62].mxu0  ;;  %v3113_v44 = vpop.f32.mrb[33].mxu1  ;;  %4282 = vrot.lane.b32.xlu0 %v5846_v6, %s6236_s20 }
 0x917   : > { %10097 = vst [vmem:[#allocation129_spill] sm:$0xff] %v8632_v34  ;;  %v8635_v50 = vpop.f32.mrb[63].mxu0  ;;  %v5847_v54 = vpop.f32.mrb[34].mxu1 }
 0x918   : > { %10098 = vst [vmem:[#allocation130_spill] sm:$0xff] %v8635_v50  ;;  %4284 = vrot.lane.b32.xlu1 %v5847_v54, %s6236_s20  ;;  %v3116_v40 = vpop.f32.mrb[35].mxu1 }
 0x91a   : > { %4278 = vrot.lane.b32.xlu0 %v3113_v44, %s6236_s20 }
 0x91c   : > { %4280 = vrot.lane.b32.xlu1 %v3116_v40, %s6236_s20  ;;  %v8640_v39 = vpop.f32.mrb[64].mxu0 }
 0x91d   : > { %v5850_v11 = vpop.f32.mrb[36].mxu1  ;;  %v8642_v18 = vpop.f32.mrb[65].mxu0 }
 0x91e   : > { %v3129_v2 = vpop.f32.mrb[37].mxu1  ;;  %v8644_v34 = vpop.f32.mrb[66].mxu0  ;;  %4290 = vrot.lane.b32.xlu0 %v5850_v11, %s6236_s20 }
 0x91f   : > { %v5851_v6 = vpop.f32.mrb[38].mxu1  ;;  %v8647_v50 = vpop.f32.mrb[67].mxu0 }
 0x920   : > { %4292 = vrot.lane.b32.xlu1 %v5851_v6, %s6236_s20  ;;  %v3132_v54 = vpop.f32.mrb[39].mxu1 }
 0x922   : > { %4286 = vrot.lane.b32.xlu0 %v3129_v2, %s6236_s20 }
 0x924   : > { %4288 = vrot.lane.b32.xlu1 %v3132_v54, %s6236_s20  ;;  %v8652_v44 = vpop.f32.mrb[68].mxu0 }
 0x925   : > { %v5854_v40 = vpop.f32.mrb[40].mxu1  ;;  %v8654_v43 = vpop.f32.mrb[69].mxu0 }
 0x926   : > { %v3145_v33 = vpop.f32.mrb[41].mxu1  ;;  %v8656_v8 = vpop.f32.mrb[70].mxu0  ;;  %4298 = vrot.lane.b32.xlu0 %v5854_v40, %s6236_s20 }
 0x927   : > { %v5855_v11 = vpop.f32.mrb[42].mxu1  ;;  %v8659_v24 = vpop.f32.mrb[71].mxu0 }
 0x928   : > { %4300 = vrot.lane.b32.xlu1 %v5855_v11, %s6236_s20  ;;  %v3148_v6 = vpop.f32.mrb[43].mxu1 }
 0x92a   : > { %4294 = vrot.lane.b32.xlu0 %v3145_v33, %s6236_s20 }
 0x92c   : > { %4296 = vrot.lane.b32.xlu1 %v3148_v6, %s6236_s20  ;;  %v8664_v2 = vpop.f32.mrb[72].mxu0 }
 0x92d   : > { %v5858_v54 = vpop.f32.mrb[44].mxu1  ;;  %v8666_v41 = vpop.f32.mrb[73].mxu0 }
 0x92e   : > { %v3161_v19 = vpop.f32.mrb[45].mxu1  ;;  %v8668_v12 = vpop.f32.mrb[74].mxu0  ;;  %4306 = vrot.lane.b32.xlu0 %v5858_v54, %s6236_s20 }
 0x92f   : > { %v5859_v40 = vpop.f32.mrb[46].mxu1  ;;  %v8671_v0 = vpop.f32.mrb[75].mxu0 }
 0x930   : > { %4308 = vrot.lane.b32.xlu1 %v5859_v40, %s6236_s20  ;;  %v3164_v11 = vpop.f32.mrb[47].mxu1 }
 0x932   : > { %4302 = vrot.lane.b32.xlu0 %v3161_v19, %s6236_s20 }
 0x934   : > { %4304 = vrot.lane.b32.xlu1 %v3164_v11, %s6236_s20  ;;  %v8676_v33 = vpop.f32.mrb[76].mxu0 }
 0x935   : > { %v5862_v6 = vpop.f32.mrb[48].mxu1  ;;  %v8678_v10 = vpop.f32.mrb[77].mxu0 }
 0x936   : > { %v3177_v42 = vpop.f32.mrb[49].mxu1  ;;  %v8680_v46 = vpop.f32.mrb[78].mxu0  ;;  %4314 = vrot.lane.b32.xlu0 %v5862_v6, %s6236_s20 }
 0x937   : > { %v5863_v54 = vpop.f32.mrb[50].mxu1  ;;  %v8683_v5 = vpop.f32.mrb[79].mxu0 }
 0x938   : > { %4316 = vrot.lane.b32.xlu1 %v5863_v54, %s6236_s20  ;;  %v3180_v40 = vpop.f32.mrb[51].mxu1 }
 0x93a   : > { %4310 = vrot.lane.b32.xlu0 %v3177_v42, %s6236_s20 }
 0x93c   : > { %4312 = vrot.lane.b32.xlu1 %v3180_v40, %s6236_s20  ;;  %v8688_v19 = vpop.f32.mrb[80].mxu0 }
 0x93d   : > { %v5866_v11 = vpop.f32.mrb[52].mxu1  ;;  %v8690_v30 = vpop.f32.mrb[81].mxu0 }
 0x93e   : > { %v3193_v35 = vpop.f32.mrb[53].mxu1  ;;  %v8692_v31 = vpop.f32.mrb[82].mxu0  ;;  %4322 = vrot.lane.b32.xlu0 %v5866_v11, %s6236_s20 }
 0x93f   : > { %v5867_v6 = vpop.f32.mrb[54].mxu1  ;;  %v8695_v56 = vpop.f32.mrb[83].mxu0 }
 0x940   : > { %4324 = vrot.lane.b32.xlu1 %v5867_v6, %s6236_s20  ;;  %v3196_v54 = vpop.f32.mrb[55].mxu1 }
 0x942   : > { %4318 = vrot.lane.b32.xlu0 %v3193_v35, %s6236_s20 }
 0x944   : > { %4320 = vrot.lane.b32.xlu1 %v3196_v54, %s6236_s20  ;;  %v8700_v42 = vpop.f32.mrb[84].mxu0 }
 0x945   : > { %v5870_v40 = vpop.f32.mrb[56].mxu1  ;;  %v8702_v62 = vpop.f32.mrb[85].mxu0 }
 0x946   : > { %v3209_v49 = vpop.f32.mrb[57].mxu1  ;;  %v8704_v22 = vpop.f32.mrb[86].mxu0  ;;  %4330 = vrot.lane.b32.xlu0 %v5870_v40, %s6236_s20 }
 0x947   : > { %v5871_v11 = vpop.f32.mrb[58].mxu1  ;;  %v8707_v1 = vpop.f32.mrb[87].mxu0 }
 0x948   : > { %4332 = vrot.lane.b32.xlu1 %v5871_v11, %s6236_s20  ;;  %v3212_v6 = vpop.f32.mrb[59].mxu1  ;;  %v8710_v28 = vpop.permute.xlu0 %4218 }
 0x94a   : > { %v8712_v35 = vpop.permute.xlu1 %4220  ;;  %4326 = vrot.lane.b32.xlu0 %v3209_v49, %s6236_s20 }
 0x94c   : > { %4328 = vrot.lane.b32.xlu1 %v3212_v6, %s6236_s20  ;;  %v8716_v54 = vpop.f32.mrb[88].mxu0  ;;  %v8718_v58 = vpop.permute.xlu0 %4214 }
 0x94d   : > { %v5874_v52 = vpop.f32.mrb[60].mxu1  ;;  %v8720_v40 = vpop.f32.mrb[89].mxu0 }
 0x94e   : > { %v8722_v15 = vpop.permute.xlu1 %4216  ;;  %v3225_v20 = vpop.f32.mrb[61].mxu1  ;;  %4338 = vrot.lane.b32.xlu0 %v5874_v52, %s6236_s20 }
 0x94f   : > { %v8725_v11 = vpop.f32.mrb[90].mxu0  ;;  %v5875_v17 = vpop.f32.mrb[62].mxu1 }
 0x950   : > { %v8727_v29 = vpop.f32.mrb[91].mxu0  ;;  %4340 = vrot.lane.b32.xlu1 %v5875_v17, %s6236_s20  ;;  %v3228_v49 = vpop.f32.mrb[63].mxu1 }
 0x951   : > { %v8730_v6 = vpop.permute.xlu0 %4226 }
 0x952   : > { %v8732_v23 = vpop.permute.xlu1 %4228  ;;  %4334 = vrot.lane.b32.xlu0 %v3225_v20, %s6236_s20 }
 0x954   : > { %4336 = vrot.lane.b32.xlu1 %v3228_v49, %s6236_s20  ;;  %v8736_v9 = vpop.f32.mrb[92].mxu0 }
 0x955   : > { %v8738_v27 = vpop.permute.xlu0 %4222  ;;  %v8740_v52 = vpop.f32.mrb[93].mxu0 }
 0x956   : > { %v8742_v53 = vpop.permute.xlu1 %4224  ;;  %v8744_v4 = vpop.f32.mrb[94].mxu0  ;;  %4474 = vrot.lane.b32.xlu0 %v8640_v39, %s6237_s21 }
 0x957   : > { %v5946_v17 = vpop.f32.mrb[64].mxu1  ;;  %v8748_v21 = vpop.f32.mrb[95].mxu0 }
 0x958   : > { %v3895_v20 = vpop.f32.mrb[65].mxu1  ;;  %4476 = vrot.lane.b32.xlu1 %v8644_v34, %s6237_s21 }
 0x959   : > { %v5947_v49 = vpop.f32.mrb[66].mxu1  ;;  %v8752_v36 = vpop.permute.xlu0 %4234 }
 0x95a   : > { %10099 = vst [vmem:[#allocation131_spill] sm:$0xff] %v8752_v36  ;;  %v3898_v48 = vpop.f32.mrb[67].mxu1  ;;  %v8754_v14 = vpop.permute.xlu1 %4236  ;;  %4730 = vrot.lane.b32.xlu0 %v5946_v17, %s6238_s22 }
 0x95b   : > { %10100 = vst [vmem:[#allocation132_spill] sm:$0xff] %v8754_v14 }
 0x95c   : > { %v8757_v32 = vpop.f32.mrb[96].mxu0  ;;  %4732 = vrot.lane.b32.xlu1 %v5947_v49, %s6238_s22 }
 0x95d   : > { %v8760_v39 = vpop.permute.xlu0 %4230  ;;  %v8762_v3 = vpop.f32.mrb[97].mxu0 }
 0x95e   : > { %10101 = vst [vmem:[#allocation133_spill] sm:$0xff] %v8760_v39  ;;  %v8764_v13 = vpop.permute.xlu1 %4232  ;;  %v8766_v34 = vpop.f32.mrb[98].mxu0  ;;  %4470 = vrot.lane.b32.xlu0 %v8642_v18, %s6237_s21 }
 0x95f   : > { %10102 = vst [vmem:[#allocation134_spill] sm:$0xff] %v8764_v13  ;;  %v8770_v47 = vpop.f32.mrb[99].mxu0  ;;  %v5950_v37 = vpop.f32.mrb[68].mxu1 }
 0x960   : > { %4472 = vrot.lane.b32.xlu1 %v8647_v50, %s6237_s21  ;;  %v3911_v17 = vpop.f32.mrb[69].mxu1 }
 0x961   : > { %v8774_v51 = vpop.permute.xlu0 %4242  ;;  %v5951_v49 = vpop.f32.mrb[70].mxu1 }
 0x962   : > { %10103 = vst [vmem:[#allocation135_spill] sm:$0xff] %v8774_v51  ;;  %v8776_v25 = vpop.permute.xlu1 %4244  ;;  %4726 = vrot.lane.b32.xlu0 %v3895_v20, %s6238_s22  ;;  %v3914_v13 = vpop.f32.mrb[71].mxu1 }
 0x963   : > { %10104 = vst [vmem:[#allocation136_spill] sm:$0xff] %v8776_v25 }
 0x964   : > { %v8779_v59 = vpop.f32.mrb[100].mxu0  ;;  %4728 = vrot.lane.b32.xlu1 %v3898_v48, %s6238_s22 }
 0x965   : > { %v8782_v18 = vpop.permute.xlu0 %4238  ;;  %v8784_v39 = vpop.f32.mrb[101].mxu0 }
 0x966   : > { %10105 = vst [vmem:[#allocation137_spill] sm:$0xff] %v8782_v18  ;;  %v8786_v26 = vpop.permute.xlu1 %4240  ;;  %v8788_v50 = vpop.f32.mrb[102].mxu0  ;;  %4482 = vrot.lane.b32.xlu0 %v8652_v44, %s6237_s21 }
 0x967   : > { %10106 = vst [vmem:[#allocation138_spill] sm:$0xff] %v8786_v26  ;;  %v8792_v51 = vpop.f32.mrb[103].mxu0  ;;  %v5954_v25 = vpop.f32.mrb[72].mxu1 }
 0x968   : > { %10107 = vst [vmem:[#allocation139_spill] sm:$0xff] %v8792_v51  ;;  %4484 = vrot.lane.b32.xlu1 %v8656_v8, %s6237_s21  ;;  %v3927_v20 = vpop.f32.mrb[73].mxu1 }
 0x969   : > { %v8796_v14 = vpop.permute.xlu0 %4250  ;;  %v5955_v48 = vpop.f32.mrb[74].mxu1 }
 0x96a   : > { %10108 = vst [vmem:[#allocation140_spill] sm:$0xff] %v8796_v14  ;;  %v8798_v18 = vpop.permute.xlu1 %4252  ;;  %4738 = vrot.lane.b32.xlu0 %v5950_v37, %s6238_s22  ;;  %v3930_v26 = vpop.f32.mrb[75].mxu1 }
 0x96b   : > { %10109 = vst [vmem:[#allocation141_spill] sm:$0xff] %v8798_v18 }
 0x96c   : > { %v8801_v63 = vpop.f32.mrb[104].mxu0  ;;  %4740 = vrot.lane.b32.xlu1 %v5951_v49, %s6238_s22 }
 0x96d   : > { %10110 = vst [vmem:[#allocation142_spill] sm:$0xff] %v8801_v63  ;;  %v8804_v44 = vpop.permute.xlu0 %4246  ;;  %v8806_v51 = vpop.f32.mrb[105].mxu0 }
 0x96e   : > { %10111 = vst [vmem:[#allocation143_spill] sm:$0xff] %v8804_v44  ;;  %10112 = vst [vmem:[#allocation144_spill] sm:$0xff] %v8806_v51  ;;  %v8808_v36 = vpop.permute.xlu1 %4248  ;;  %v8810_v8 = vpop.f32.mrb[106].mxu0  ;;  %4478 = vrot.lane.b32.xlu0 %v8654_v43, %s6237_s21 }
 0x96f   : > { %10113 = vst [vmem:[#allocation145_spill] sm:$0xff] %v8808_v36  ;;  %10114 = vst [vmem:[#allocation146_spill] sm:$0xff] %v8810_v8  ;;  %v8814_v14 = vpop.f32.mrb[107].mxu0  ;;  %v5958_v18 = vpop.f32.mrb[76].mxu1 }
 0x970   : > { %10115 = vst [vmem:[#allocation147_spill] sm:$0xff] %v8814_v14  ;;  %4480 = vrot.lane.b32.xlu1 %v8659_v24, %s6237_s21  ;;  %v8818_v37 = vpop.f32.mrb[77].mxu1 }
 0x971   : > { %v8820_v49 = vpop.permute.xlu0 %4258  ;;  %v5959_v44 = vpop.f32.mrb[78].mxu1 }
 0x972   : > { %10116 = vst [vmem:[#allocation148_spill] sm:$0xff] %v8820_v49  ;;  %v8822_v63 = vpop.permute.xlu1 %4260  ;;  %4734 = vrot.lane.b32.xlu0 %v3911_v17, %s6238_s22  ;;  %v8825_v36 = vpop.f32.mrb[79].mxu1 }
 0x973   : > { %10117 = vst [vmem:[#allocation149_spill] sm:$0xff] %v8822_v63 }
 0x974   : > { %v8827_v51 = vpop.f32.mrb[108].mxu0  ;;  %4736 = vrot.lane.b32.xlu1 %v3914_v13, %s6238_s22 }
 0x975   : > { %10118 = vst [vmem:[#allocation150_spill] sm:$0xff] %v8827_v51  ;;  %v8830_v43 = vpop.permute.xlu0 %4254  ;;  %v8832_v14 = vpop.f32.mrb[109].mxu0 }
 0x976   : > { %10119 = vst [vmem:[#allocation151_spill] sm:$0xff] %v8830_v43  ;;  %10120 = vst [vmem:[#allocation152_spill] sm:$0xff] %v8832_v14  ;;  %v8834_v24 = vpop.permute.xlu1 %4256  ;;  %v8836_v8 = vpop.f32.mrb[110].mxu0  ;;  %4490 = vrot.lane.b32.xlu0 %v8664_v2, %s6237_s21 }
 0x977   : > { %10121 = vst [vmem:[#allocation153_spill] sm:$0xff] %v8834_v24  ;;  %10122 = vst [vmem:[#allocation154_spill] sm:$0xff] %v8836_v8  ;;  %v8840_v63 = vpop.f32.mrb[111].mxu0  ;;  %v8842_v17 = vpop.f32.mrb[80].mxu1 }
 0x978   : > { %10123 = vst [vmem:[#allocation155_spill] sm:$0xff] %v8840_v63  ;;  %4492 = vrot.lane.b32.xlu1 %v8668_v12, %s6237_s21  ;;  %v8846_v49 = vpop.f32.mrb[81].mxu1 }
 0x979   : > { %v8848_v13 = vpop.permute.xlu0 %4266  ;;  %v8850_v43 = vpop.f32.mrb[82].mxu1 }
 0x97a   : > { %10124 = vst [vmem:[#allocation156_spill] sm:$0xff] %v8848_v13  ;;  %v8852_v14 = vpop.permute.xlu1 %4268  ;;  %4746 = vrot.lane.b32.xlu0 %v5954_v25, %s6238_s22  ;;  %v8855_v24 = vpop.f32.mrb[83].mxu1 }
 0x97b   : > { %10125 = vst [vmem:[#allocation157_spill] sm:$0xff] %v8852_v14 }
 0x97c   : > { %v8857_v2 = vpop.f32.mrb[112].mxu0  ;;  %4748 = vrot.lane.b32.xlu1 %v5955_v48, %s6238_s22 }
 0x97d   : > { %10126 = vst [vmem:[#allocation158_spill] sm:$0xff] %v8857_v2  ;;  %v8860_v63 = vpop.permute.xlu0 %4262  ;;  %v8862_v8 = vpop.f32.mrb[113].mxu0 }
 0x97e   : > { %10127 = vst [vmem:[#allocation159_spill] sm:$0xff] %v8860_v63  ;;  %10128 = vst [vmem:[#allocation160_spill] sm:$0xff] %v8862_v8  ;;  %v8864_v12 = vpop.permute.xlu1 %4264  ;;  %v8866_v51 = vpop.f32.mrb[114].mxu0  ;;  %4486 = vrot.lane.b32.xlu0 %v8666_v41, %s6237_s21 }
 0x97f   : > { %10129 = vst [vmem:[#allocation161_spill] sm:$0xff] %v8864_v12  ;;  %10130 = vst [vmem:[#allocation162_spill] sm:$0xff] %v8866_v51  ;;  %v8870_v14 = vpop.f32.mrb[115].mxu0  ;;  %v8872_v25 = vpop.f32.mrb[84].mxu1 }
 0x980   : > { %10131 = vst [vmem:[#allocation163_spill] sm:$0xff] %v8870_v14  ;;  %4488 = vrot.lane.b32.xlu1 %v8671_v0, %s6237_s21  ;;  %v8876_v13 = vpop.f32.mrb[85].mxu1 }
 0x981   : > { %v8878_v48 = vpop.permute.xlu0 %4274  ;;  %v8880_v63 = vpop.f32.mrb[86].mxu1 }
 0x982   : > { %10132 = vst [vmem:[#allocation164_spill] sm:$0xff] %v8878_v48  ;;  %v8882_v8 = vpop.permute.xlu1 %4276  ;;  %4742 = vrot.lane.b32.xlu0 %v3927_v20, %s6238_s22  ;;  %v8885_v12 = vpop.f32.mrb[87].mxu1 }
 0x983   : > { %10133 = vst [vmem:[#allocation165_spill] sm:$0xff] %v8882_v8 }
 0x984   : > { %v8887_v41 = vpop.f32.mrb[116].mxu0  ;;  %4744 = vrot.lane.b32.xlu1 %v3930_v26, %s6238_s22 }
 0x985   : > { %10134 = vst [vmem:[#allocation166_spill] sm:$0xff] %v8887_v41  ;;  %v8890_v14 = vpop.permute.xlu0 %4270  ;;  %v8892_v51 = vpop.f32.mrb[117].mxu0 }
 0x986   : > { %10135 = vst [vmem:[#allocation167_spill] sm:$0xff] %v8890_v14  ;;  %10136 = vst [vmem:[#allocation168_spill] sm:$0xff] %v8892_v51  ;;  %v8894_v0 = vpop.permute.xlu1 %4272  ;;  %v8896_v2 = vpop.f32.mrb[118].mxu0  ;;  %4498 = vrot.lane.b32.xlu0 %v8676_v33, %s6237_s21 }
 0x987   : > { %10137 = vst [vmem:[#allocation169_spill] sm:$0xff] %v8894_v0  ;;  %10138 = vst [vmem:[#allocation170_spill] sm:$0xff] %v8896_v2  ;;  %v8900_v8 = vpop.f32.mrb[119].mxu0  ;;  %v8902_v20 = vpop.f32.mrb[88].mxu1 }
 0x988   : > { %10139 = vst [vmem:[#allocation171_spill] sm:$0xff] %v8900_v8  ;;  %4500 = vrot.lane.b32.xlu1 %v8680_v46, %s6237_s21  ;;  %v8906_v48 = vpop.f32.mrb[89].mxu1 }
 0x989   : > { %v8908_v26 = vpop.permute.xlu0 %4282  ;;  %v8910_v14 = vpop.f32.mrb[90].mxu1 }
 0x98a   : > { %10140 = vst [vmem:[#allocation172_spill] sm:$0xff] %v8908_v26  ;;  %v8912_v51 = vpop.permute.xlu1 %4284  ;;  %4754 = vrot.lane.b32.xlu0 %v5958_v18, %s6238_s22  ;;  %v8915_v0 = vpop.f32.mrb[91].mxu1 }
 0x98b   : > { %10141 = vst [vmem:[#allocation173_spill] sm:$0xff] %v8912_v51 }
 0x98c   : > { %v8917_v33 = vpop.f32.mrb[120].mxu0  ;;  %4756 = vrot.lane.b32.xlu1 %v5959_v44, %s6238_s22 }
 0x98d   : > { %v8920_v8 = vpop.permute.xlu0 %4278  ;;  %v8922_v2 = vpop.f32.mrb[121].mxu0 }
 0x98e   : > { %10142 = vst [vmem:[#allocation174_spill] sm:$0xff] %v8920_v8  ;;  %10143 = vst [vmem:[#allocation175_spill] sm:$0xff] %v8922_v2  ;;  %v8924_v46 = vpop.permute.xlu1 %4280  ;;  %v8926_v41 = vpop.f32.mrb[122].mxu0  ;;  %4494 = vrot.lane.b32.xlu0 %v8678_v10, %s6237_s21 }
 0x98f   : > { %10144 = vst [vmem:[#allocation176_spill] sm:$0xff] %v8924_v46  ;;  %10145 = vst [vmem:[#allocation177_spill] sm:$0xff] %v8926_v41  ;;  %v8930_v51 = vpop.f32.mrb[123].mxu0  ;;  %v8932_v18 = vpop.f32.mrb[92].mxu1 }
 0x990   : > { %10146 = vst [vmem:[#allocation178_spill] sm:$0xff] %v8930_v51  ;;  %4496 = vrot.lane.b32.xlu1 %v8683_v5, %s6237_s21  ;;  %v8936_v26 = vpop.f32.mrb[93].mxu1 }
 0x991   : > { %v8938_v44 = vpop.permute.xlu0 %4290  ;;  %v8940_v8 = vpop.f32.mrb[94].mxu1 }
 0x992   : > { %10147 = vst [vmem:[#allocation179_spill] sm:$0xff] %v8938_v44  ;;  %v8942_v2 = vpop.permute.xlu1 %4292  ;;  %4750 = vrot.lane.b32.xlu0 %v8818_v37, %s6238_s22  ;;  %v8946_v46 = vpop.f32.mrb[95].mxu1 }
 0x993   : > { %10148 = vst [vmem:[#allocation180_spill] sm:$0xff] %v8942_v2 }
 0x994   : > { %v8948_v10 = vpop.f32.mrb[124].mxu0  ;;  %4752 = vrot.lane.b32.xlu1 %v8825_v36, %s6238_s22 }
 0x995   : > { %10149 = vst [vmem:[#allocation181_spill] sm:$0xff] %v8948_v10  ;;  %v8952_v51 = vpop.permute.xlu0 %4286  ;;  %v8954_v5 = vpop.f32.mrb[125].mxu0 }
 0x996   : > { %10150 = vst [vmem:[#allocation182_spill] sm:$0xff] %v8952_v51  ;;  %10151 = vst [vmem:[#allocation183_spill] sm:$0xff] %v8954_v5  ;;  %v8956_v41 = vpop.permute.xlu1 %4288  ;;  %v8958_v44 = vpop.f32.mrb[126].mxu0  ;;  %4506 = vrot.lane.b32.xlu0 %v8688_v19, %s6237_s21 }
 0x997   : > { %10152 = vst [vmem:[#allocation184_spill] sm:$0xff] %v8956_v41  ;;  %10153 = vst [vmem:[#allocation185_spill] sm:$0xff] %v8958_v44  ;;  %v8962_v2 = vpop.f32.mrb[127].mxu0  ;;  %v8964_v37 = vpop.f32.mrb[96].mxu1 }
 0x998   : > { %10154 = vst [vmem:[#allocation186_spill] sm:$0xff] %v8962_v2  ;;  %4508 = vrot.lane.b32.xlu1 %v8692_v31, %s6237_s21  ;;  %v8968_v10 = vpop.f32.mrb[97].mxu1 }
 0x999   : > { %v8970_v36 = vpop.permute.xlu0 %4298  ;;  %v8972_v51 = vpop.f32.mrb[98].mxu1 }
 0x99a   : > { %10155 = vst [vmem:[#allocation187_spill] sm:$0xff] %v8970_v36  ;;  %v8974_v5 = vpop.permute.xlu1 %4300  ;;  %4762 = vrot.lane.b32.xlu0 %v8842_v17, %s6238_s22  ;;  %v8978_v41 = vpop.f32.mrb[99].mxu1 }
 0x99b   : > { %10156 = vst [vmem:[#allocation188_spill] sm:$0xff] %v8974_v5 }
 0x99c   : > { %4764 = vrot.lane.b32.xlu1 %v8850_v43, %s6238_s22 }
 0x99d   : > { %v8982_v19 = vpop.permute.xlu0 %4294 }
 0x99e   : > { %10157 = vst [vmem:[#allocation189_spill] sm:$0xff] %v8982_v19  ;;  %v8984_v2 = vpop.permute.xlu1 %4296  ;;  %4502 = vrot.lane.b32.xlu0 %v8690_v30, %s6237_s21  ;;  %v8988_v31 = vpop.f32.mrb[100].mxu1 }
 0x99f   : > { %10158 = vst [vmem:[#allocation190_spill] sm:$0xff] %v8984_v2  ;;  %v8990_v36 = vpop.f32.mrb[101].mxu1 }
 0x9a0   : > { %4504 = vrot.lane.b32.xlu1 %v8695_v56, %s6237_s21  ;;  %v8994_v17 = vpop.f32.mrb[102].mxu1 }
 0x9a1   : > { %v8996_v5 = vpop.permute.xlu0 %4306  ;;  %v8998_v44 = vpop.f32.mrb[103].mxu1 }
 0x9a2   : > { %10159 = vst [vmem:[#allocation191_spill] sm:$0xff] %v8996_v5  ;;  %v9000_v43 = vpop.permute.xlu1 %4308  ;;  %4758 = vrot.lane.b32.xlu0 %v8846_v49, %s6238_s22 }
 0x9a3   : > { %10160 = vst [vmem:[#allocation192_spill] sm:$0xff] %v9000_v43 }
 0x9a4   : > { %4760 = vrot.lane.b32.xlu1 %v8855_v24, %s6238_s22 }
 0x9a5   : > { %v9006_v30 = vpop.permute.xlu0 %4302 }
 0x9a6   : > { %10161 = vst [vmem:[#allocation193_spill] sm:$0xff] %v9006_v30  ;;  %v9008_v2 = vpop.permute.xlu1 %4304  ;;  %4514 = vrot.lane.b32.xlu0 %v8700_v42, %s6237_s21  ;;  %v9012_v56 = vpop.f32.mrb[104].mxu1 }
 0x9a7   : > { %10162 = vst [vmem:[#allocation194_spill] sm:$0xff] %v9008_v2  ;;  %v9014_v5 = vpop.f32.mrb[105].mxu1 }
 0x9a8   : > { %4516 = vrot.lane.b32.xlu1 %v8704_v22, %s6237_s21  ;;  %v9018_v43 = vpop.f32.mrb[106].mxu1 }
 0x9a9   : > { %v9020_v49 = vpop.permute.xlu0 %4314  ;;  %v9022_v19 = vpop.f32.mrb[107].mxu1 }
 0x9aa   : > { %10163 = vst [vmem:[#allocation195_spill] sm:$0xff] %v9020_v49  ;;  %v9024_v24 = vpop.permute.xlu1 %4316  ;;  %4770 = vrot.lane.b32.xlu0 %v8872_v25, %s6238_s22 }
 0x9ab   : > { %10164 = vst [vmem:[#allocation196_spill] sm:$0xff] %v9024_v24 }
 0x9ac   : > { %4772 = vrot.lane.b32.xlu1 %v8880_v63, %s6238_s22 }
 0x9ad   : > { %v9030_v42 = vpop.permute.xlu0 %4310 }
 0x9ae   : > { %10165 = vst [vmem:[#allocation197_spill] sm:$0xff] %v9030_v42  ;;  %v9032_v2 = vpop.permute.xlu1 %4312  ;;  %4510 = vrot.lane.b32.xlu0 %v8702_v62, %s6237_s21  ;;  %v9036_v22 = vpop.f32.mrb[108].mxu1 }
 0x9af   : > { %10166 = vst [vmem:[#allocation198_spill] sm:$0xff] %v9032_v2  ;;  %v9038_v49 = vpop.f32.mrb[109].mxu1 }
 0x9b0   : > { %4512 = vrot.lane.b32.xlu1 %v8707_v1, %s6237_s21  ;;  %v9042_v24 = vpop.f32.mrb[110].mxu1 }
 0x9b1   : > { %v9044_v25 = vpop.permute.xlu0 %4322  ;;  %v9046_v30 = vpop.f32.mrb[111].mxu1 }
 0x9b2   : > { %10167 = vst [vmem:[#allocation199_spill] sm:$0xff] %v9044_v25  ;;  %v9048_v63 = vpop.permute.xlu1 %4324  ;;  %4766 = vrot.lane.b32.xlu0 %v8876_v13, %s6238_s22 }
 0x9b3   : > { %10168 = vst [vmem:[#allocation200_spill] sm:$0xff] %v9048_v63 }
 0x9b4   : > { %4768 = vrot.lane.b32.xlu1 %v8885_v12, %s6238_s22 }
 0x9b5   : > { %v9054_v62 = vpop.permute.xlu0 %4318 }
 0x9b6   : > { %10169 = vst [vmem:[#allocation201_spill] sm:$0xff] %v9054_v62  ;;  %v9056_v2 = vpop.permute.xlu1 %4320  ;;  %4522 = vrot.lane.b32.xlu0 %v8716_v54, %s6237_s21  ;;  %v9060_v1 = vpop.f32.mrb[112].mxu1 }
 0x9b7   : > { %10170 = vst [vmem:[#allocation202_spill] sm:$0xff] %v9056_v2  ;;  %v9062_v25 = vpop.f32.mrb[113].mxu1 }
 0x9b8   : > { %4524 = vrot.lane.b32.xlu1 %v8725_v11, %s6237_s21  ;;  %v9066_v63 = vpop.f32.mrb[114].mxu1 }
 0x9b9   : > { %v9068_v13 = vpop.permute.xlu0 %4330  ;;  %v9070_v42 = vpop.f32.mrb[115].mxu1 }
 0x9ba   : > { %10171 = vst [vmem:[#allocation203_spill] sm:$0xff] %v9068_v13  ;;  %v9072_v12 = vpop.permute.xlu1 %4332  ;;  %4778 = vrot.lane.b32.xlu0 %v8902_v20, %s6238_s22 }
 0x9bb   : > { %10172 = vst [vmem:[#allocation204_spill] sm:$0xff] %v9072_v12 }
 0x9bc   : > { %4780 = vrot.lane.b32.xlu1 %v8910_v14, %s6238_s22 }
 0x9bd   : > { %v9078_v54 = vpop.permute.xlu0 %4326 }
 0x9be   : > { %10173 = vst [vmem:[#allocation205_spill] sm:$0xff] %v9078_v54  ;;  %v9080_v2 = vpop.permute.xlu1 %4328  ;;  %4518 = vrot.lane.b32.xlu0 %v8720_v40, %s6237_s21  ;;  %v9084_v11 = vpop.f32.mrb[116].mxu1 }
 0x9bf   : > { %10174 = vst [vmem:[#allocation206_spill] sm:$0xff] %v9080_v2  ;;  %v9086_v13 = vpop.f32.mrb[117].mxu1 }
 0x9c0   : > { %4520 = vrot.lane.b32.xlu1 %v8727_v29, %s6237_s21  ;;  %v9090_v12 = vpop.f32.mrb[118].mxu1 }
 0x9c1   : > { %v9092_v20 = vpop.permute.xlu0 %4338  ;;  %v9094_v62 = vpop.f32.mrb[119].mxu1 }
 0x9c2   : > { %10175 = vst [vmem:[#allocation207_spill] sm:$0xff] %v9092_v20  ;;  %v9096_v14 = vpop.permute.xlu1 %4340  ;;  %4774 = vrot.lane.b32.xlu0 %v8906_v48, %s6238_s22 }
 0x9c3   : > { %10176 = vst [vmem:[#allocation208_spill] sm:$0xff] %v9096_v14 }
 0x9c4   : > { %4776 = vrot.lane.b32.xlu1 %v8915_v0, %s6238_s22 }
 0x9c5   : > { %v9102_v40 = vpop.permute.xlu0 %4334 }
 0x9c6   : > { %10177 = vst [vmem:[#allocation209_spill] sm:$0xff] %v9102_v40  ;;  %v9104_v2 = vpop.permute.xlu1 %4336  ;;  %4530 = vrot.lane.b32.xlu0 %v8736_v9, %s6237_s21  ;;  %v9108_v29 = vpop.f32.mrb[120].mxu1  ;;  %v4920_v9 = vsel %vm2396_vm8, %v8441_v55, %v8710_v28 }
 0x9c7   : > { %10178 = vst [vmem:[#allocation210_spill] sm:$0xff] %v9104_v2  ;;  %10179 = vst [vmem:[#allocation211_spill] sm:$0xff] %v9108_v29  ;;  %v9110_v20 = vpop.f32.mrb[121].mxu1 }
 0x9c8   : > { %4532 = vrot.lane.b32.xlu1 %v8744_v4, %s6237_s21  ;;  %v9114_v14 = vpop.f32.mrb[122].mxu1  ;;  %v4921_v4 = vsel %vm2396_vm8, %v8446_v61, %v8712_v35 }
 0x9c9   : > { %10180 = vst [vmem:[#allocation212_spill] sm:$0xff] %v9114_v14  ;;  %v4475_v48 = vpop.permute.xlu0 %4474  ;;  %v9116_v54 = vpop.f32.mrb[123].mxu1 }
 0x9ca   : > { %v4477_v0 = vpop.permute.xlu1 %4476  ;;  %4786 = vrot.lane.b32.xlu0 %v8932_v18, %s6238_s22  ;;  %v4985_v2 = vsel %vm4982_vm9, %v4920_v9, %v4475_v48 }
 0x9cb   : > { %v4986_v14 = vsel %vm4982_vm9, %v4921_v4, %v4477_v0 }
 0x9cc   : > { %4788 = vrot.lane.b32.xlu1 %v8940_v8, %s6238_s22 }
 0x9cd   : > { %v4731_v40 = vpop.permute.xlu0 %4730 }
 0x9ce   : > { %v5050_v18 = vsel %vm5047_vm10, %v4985_v2, %v4731_v40  ;;  %v4733_v29 = vpop.permute.xlu1 %4732  ;;  %4526 = vrot.lane.b32.xlu0 %v8740_v52, %s6237_s21  ;;  %v9133_v55 = vpop.f32.mrb[124].mxu1 }
 0x9cf   : > { %5115 = vst.msk [vmem:[%s6341_s11 + $0x10] sm:$0xff] %vm5112_vm11, %v5050_v18  ;;  %v5051_v28 = vsel %vm5047_vm10, %v4986_v14, %v4733_v29  ;;  %v9138_v8 = vpop.f32.mrb[125].mxu1  ;;  %v4918_v14 = vsel %vm2396_vm8, %v8444_v16, %v8718_v58  ;;  %v4925_v58 = vsel %vm2396_vm8, %v8458_v7, %v8732_v23  ;;  %v4923_v23 = vsel %vm2396_vm8, %v8460_v38, %v8742_v53 }
 0x9d0   : > { %5116 = vst.msk [vmem:[%s6341_s11 + $0x18] sm:$0xff] %vm5112_vm11, %v5051_v28  ;;  %4528 = vrot.lane.b32.xlu1 %v8748_v21, %s6237_s21  ;;  %v9144_v61 = vpop.f32.mrb[126].mxu1  ;;  %v4919_v21 = vsel %vm2396_vm8, %v8448_v60, %v8722_v15 }
 0x9d1   : > { %v4471_v35 = vpop.permute.xlu0 %4470  ;;  %v9146_v2 = vpop.f32.mrb[127].mxu1 }
 0x9d2   : > { %v4473_v52 = vpop.permute.xlu1 %4472  ;;  %4782 = vrot.lane.b32.xlu0 %v8936_v26, %s6238_s22  ;;  %v4983_v40 = vsel %vm4982_vm9, %v4918_v14, %v4471_v35  ;;  %v10185_v14 = vld [vmem:[#allocation77_spill] sm:$0xff] }
 0x9d3   : > { %v4984_v48 = vsel %vm4982_vm9, %v4919_v21, %v4473_v52  ;;  %v10184_v52 = vld [vmem:[#allocation132_spill] sm:$0xff] }
 0x9d4   : > { %4784 = vrot.lane.b32.xlu1 %v8946_v46, %s6238_s22  ;;  %v4929_v21 = vsel %vm2396_vm8, %v10185_v14, %v10184_v52  ;;  %v10201_v52 = vld [vmem:[#allocation81_spill] sm:$0xff] }
 0x9d5   : > { %v4727_v29 = vpop.permute.xlu0 %4726 }
 0x9d6   : > { %v5048_v0 = vsel %vm5047_vm10, %v4983_v40, %v4727_v29  ;;  %v4729_v9 = vpop.permute.xlu1 %4728  ;;  %4538 = vrot.lane.b32.xlu0 %v8757_v32, %s6237_s21  ;;  %v4924_v32 = vsel %vm2396_vm8, %v8453_v45, %v8730_v6 }
 0x9d7   : > { %5113 = vst.msk [vmem:[%s6341_s11] sm:$0xff] %vm5112_vm11, %v5048_v0  ;;  %v5049_v16 = vsel %vm5047_vm10, %v4984_v48, %v4729_v9 }
 0x9d8   : > { %5114 = vst.msk [vmem:[%s6341_s11 + $0x8] sm:$0xff] %vm5112_vm11, %v5049_v16  ;;  %4540 = vrot.lane.b32.xlu1 %v8766_v34, %s6237_s21  ;;  %v10187_v16 = vld [vmem:[#allocation146_spill] sm:$0xff] }
 0x9d9   : > { %v4483_v60 = vpop.permute.xlu0 %4482 }
 0x9da   : > { %v4485_v15 = vpop.permute.xlu1 %4484  ;;  %4794 = vrot.lane.b32.xlu0 %v8964_v37, %s6238_s22  ;;  %v4989_v26 = vsel %vm4982_vm9, %v4924_v32, %v4483_v60  ;;  %v10188_v32 = vld [vmem:[#allocation144_spill] sm:$0xff] }
 0x9db   : > { %v4990_v34 = vsel %vm4982_vm9, %v4925_v58, %v4485_v15  ;;  %v10189_v58 = vld [vmem:[#allocation133_spill] sm:$0xff] }
 0x9dc   : > { %4796 = vrot.lane.b32.xlu1 %v8972_v51, %s6238_s22 }
 0x9dd   : > { %v4739_v46 = vpop.permute.xlu0 %4738 }
 0x9de   : > { %v5054_v4 = vsel %vm5047_vm10, %v4989_v26, %v4739_v46  ;;  %v4741_v18 = vpop.permute.xlu1 %4740  ;;  %4534 = vrot.lane.b32.xlu0 %v8762_v3, %s6237_s21  ;;  %v4922_v3 = vsel %vm2396_vm8, %v8456_v57, %v8738_v27  ;;  %v10181_v27 = vld [vmem:[#allocation131_spill] sm:$0xff]  ;;  %v10190_v26 = vld [vmem:[#allocation76_spill] sm:$0xff] }
 0x9df   : > { %5119 = vst.msk [vmem:[%s6341_s11 + $0x30] sm:$0xff] %vm5112_vm11, %v5054_v4  ;;  %v5055_v45 = vsel %vm5047_vm10, %v4990_v34, %v4741_v18  ;;  %v4926_v46 = vsel %vm2396_vm8, %v10190_v26, %v10189_v58  ;;  %v10191_v34 = vld [vmem:[#allocation147_spill] sm:$0xff]  ;;  %v10192_v4 = vld [vmem:[#allocation134_spill] sm:$0xff]  ;;  %v10206_v58 = vld [vmem:[#allocation80_spill] sm:$0xff] }
 0x9e0   : > { %5120 = vst.msk [vmem:[%s6341_s11 + $0x38] sm:$0xff] %vm5112_vm11, %v5055_v45  ;;  %4536 = vrot.lane.b32.xlu1 %v8770_v47, %s6237_s21  ;;  %v10193_v18 = vld [vmem:[#allocation78_spill] sm:$0xff] }
 0x9e1   : > { %v4479_v7 = vpop.permute.xlu0 %4478  ;;  %v4927_v45 = vsel %vm2396_vm8, %v10193_v18, %v10192_v4  ;;  %v10209_v4 = vld [vmem:[#allocation82_spill] sm:$0xff] }
 0x9e2   : > { %v4481_v51 = vpop.permute.xlu1 %4480  ;;  %4790 = vrot.lane.b32.xlu0 %v8968_v10, %s6238_s22  ;;  %v4987_v6 = vsel %vm4982_vm9, %v4922_v3, %v4479_v7  ;;  %v10183_v10 = vld [vmem:[#allocation139_spill] sm:$0xff] }
 0x9e3   : > { %v4988_v47 = vsel %vm4982_vm9, %v4923_v23, %v4481_v51 }
 0x9e4   : > { %4792 = vrot.lane.b32.xlu1 %v8978_v41, %s6238_s22  ;;  %v10182_v41 = vld [vmem:[#allocation75_spill] sm:$0xff] }
 0x9e5   : > { %v4735_v37 = vpop.permute.xlu0 %4734 }
 0x9e6   : > { %v5052_v28 = vsel %vm5047_vm10, %v4987_v6, %v4735_v37  ;;  %v4737_v35 = vpop.permute.xlu1 %4736  ;;  %4546 = vrot.lane.b32.xlu0 %v8779_v59, %s6237_s21  ;;  %v4928_v59 = vsel %vm2396_vm8, %v10182_v41, %v10181_v27  ;;  %v10194_v37 = vld [vmem:[#allocation150_spill] sm:$0xff]  ;;  %v10198_v27 = vld [vmem:[#allocation79_spill] sm:$0xff] }
 0x9e7   : > { %5117 = vst.msk [vmem:[%s6341_s11 + $0x20] sm:$0xff] %vm5112_vm11, %v5052_v28  ;;  %v5053_v57 = vsel %vm5047_vm10, %v4988_v47, %v4737_v35  ;;  %v10195_v28 = vld [vmem:[#allocation154_spill] sm:$0xff] }
 0x9e8   : > { %5118 = vst.msk [vmem:[%s6341_s11 + $0x28] sm:$0xff] %vm5112_vm11, %v5053_v57  ;;  %4548 = vrot.lane.b32.xlu1 %v8788_v50, %s6237_s21 }
 0x9e9   : > { %v4491_v38 = vpop.permute.xlu0 %4490 }
 0x9ea   : > { %v4493_v53 = vpop.permute.xlu1 %4492  ;;  %4542 = vrot.lane.b32.xlu0 %v8784_v39, %s6237_s21  ;;  %v4993_v40 = vsel %vm4982_vm9, %v4928_v59, %v4491_v38  ;;  %v10186_v39 = vld [vmem:[#allocation142_spill] sm:$0xff]  ;;  %v10196_v38 = vld [vmem:[#allocation152_spill] sm:$0xff]  ;;  %v10199_v59 = vld [vmem:[#allocation155_spill] sm:$0xff] }
 0x9eb   : > { %v4994_v50 = vsel %vm4982_vm9, %v4929_v21, %v4493_v53  ;;  %v10197_v53 = vld [vmem:[#allocation135_spill] sm:$0xff] }
 0x9ec   : > { %4544 = vrot.lane.b32.xlu1 %v10183_v10, %s6237_s21  ;;  %v4932_v41 = vsel %vm2396_vm8, %v10198_v27, %v10197_v53  ;;  %v10200_v10 = vld [vmem:[#allocation136_spill] sm:$0xff]  ;;  %v10214_v53 = vld [vmem:[#allocation83_spill] sm:$0xff] }
 0x9ed   : > { %v4747_v29 = vpop.permute.xlu0 %4746  ;;  %v4933_v14 = vsel %vm2396_vm8, %v10201_v52, %v10200_v10  ;;  %v10217_v10 = vld [vmem:[#allocation85_spill] sm:$0xff] }
 0x9ee   : > { %v5058_v48 = vsel %vm5047_vm10, %v4993_v40, %v4747_v29  ;;  %v4749_v0 = vpop.permute.xlu1 %4748  ;;  %4554 = vrot.lane.b32.xlu0 %v10186_v39, %s6237_s21 }
 0x9ef   : > { %5123 = vst.msk [vmem:[%s6341_s11 + $0x50] sm:$0xff] %vm5112_vm11, %v5058_v48  ;;  %v5059_v9 = vsel %vm5047_vm10, %v4994_v50, %v4749_v0  ;;  %v10202_v0 = vld [vmem:[#allocation158_spill] sm:$0xff] }
 0x9f0   : > { %5124 = vst.msk [vmem:[%s6341_s11 + $0x58] sm:$0xff] %vm5112_vm11, %v5059_v9  ;;  %4556 = vrot.lane.b32.xlu1 %v10187_v16, %s6237_s21  ;;  %v10203_v9 = vld [vmem:[#allocation162_spill] sm:$0xff] }
 0x9f1   : > { %v4487_v60 = vpop.permute.xlu0 %4486 }
 0x9f2   : > { %v4489_v15 = vpop.permute.xlu1 %4488  ;;  %4550 = vrot.lane.b32.xlu0 %v10188_v32, %s6237_s21  ;;  %v4991_v7 = vsel %vm4982_vm9, %v4926_v46, %v4487_v60  ;;  %v10205_v32 = vld [vmem:[#allocation137_spill] sm:$0xff]  ;;  %v10207_v46 = vld [vmem:[#allocation163_spill] sm:$0xff] }
 0x9f3   : > { %v4992_v3 = vsel %vm4982_vm9, %v4927_v45, %v4489_v15  ;;  %v10204_v15 = vld [vmem:[#allocation160_spill] sm:$0xff]  ;;  %v4930_v26 = vsel %vm2396_vm8, %v10206_v58, %v10205_v32  ;;  %v10222_v32 = vld [vmem:[#allocation178_spill] sm:$0xff]  ;;  %v10223_v58 = vld [vmem:[#allocation145_spill] sm:$0xff] }
 0x9f4   : > { %4552 = vrot.lane.b32.xlu1 %v10191_v34, %s6237_s21  ;;  %v10208_v34 = vld [vmem:[#allocation138_spill] sm:$0xff] }
 0x9f5   : > { %v4743_v51 = vpop.permute.xlu0 %4742  ;;  %v4931_v18 = vsel %vm2396_vm8, %v10209_v4, %v10208_v34 }
 0x9f6   : > { %v5056_v23 = vsel %vm5047_vm10, %v4991_v7, %v4743_v51  ;;  %v4745_v6 = vpop.permute.xlu1 %4744  ;;  %4562 = vrot.lane.b32.xlu0 %v10194_v37, %s6237_s21 }
 0x9f7   : > { %5121 = vst.msk [vmem:[%s6341_s11 + $0x40] sm:$0xff] %vm5112_vm11, %v5056_v23  ;;  %v5057_v47 = vsel %vm5047_vm10, %v4992_v3, %v4745_v6  ;;  %v10210_v6 = vld [vmem:[#allocation166_spill] sm:$0xff] }
 0x9f8   : > { %5122 = vst.msk [vmem:[%s6341_s11 + $0x48] sm:$0xff] %vm5112_vm11, %v5057_v47  ;;  %4564 = vrot.lane.b32.xlu1 %v10195_v28, %s6237_s21  ;;  %v10211_v47 = vld [vmem:[#allocation170_spill] sm:$0xff] }
 0x9f9   : > { %v4499_v35 = vpop.permute.xlu0 %4498 }
 0x9fa   : > { %v4501_v57 = vpop.permute.xlu1 %4500  ;;  %4558 = vrot.lane.b32.xlu0 %v10196_v38, %s6237_s21  ;;  %v4997_v21 = vsel %vm4982_vm9, %v4932_v41, %v4499_v35  ;;  %v10213_v38 = vld [vmem:[#allocation140_spill] sm:$0xff]  ;;  %v10215_v41 = vld [vmem:[#allocation171_spill] sm:$0xff] }
 0x9fb   : > { %v4998_v29 = vsel %vm4982_vm9, %v4933_v14, %v4501_v57  ;;  %v10212_v57 = vld [vmem:[#allocation168_spill] sm:$0xff]  ;;  %v4936_v27 = vsel %vm2396_vm8, %v10214_v53, %v10213_v38  ;;  %v10230_v38 = vld [vmem:[#allocation186_spill] sm:$0xff]  ;;  %v10231_v53 = vld [vmem:[#allocation149_spill] sm:$0xff] }
 0x9fc   : > { %4560 = vrot.lane.b32.xlu1 %v10199_v59, %s6237_s21  ;;  %v10216_v59 = vld [vmem:[#allocation141_spill] sm:$0xff] }
 0x9fd   : > { %v4755_v40 = vpop.permute.xlu0 %4754  ;;  %v4937_v52 = vsel %vm2396_vm8, %v10217_v10, %v10216_v59 }
 0x9fe   : > { %v5062_v50 = vsel %vm5047_vm10, %v4997_v21, %v4755_v40  ;;  %v4757_v48 = vpop.permute.xlu1 %4756  ;;  %4570 = vrot.lane.b32.xlu0 %v10202_v0, %s6237_s21  ;;  %v10218_v0 = vld [vmem:[#allocation177_spill] sm:$0xff] }
 0x9ff   : > { %5127 = vst.msk [vmem:[%s6341_s11 + $0x70] sm:$0xff] %vm5112_vm11, %v5062_v50  ;;  %v5063_v39 = vsel %vm5047_vm10, %v4998_v29, %v4757_v48 }
 0xa00   : > { %5128 = vst.msk [vmem:[%s6341_s11 + $0x78] sm:$0xff] %vm5112_vm11, %v5063_v39  ;;  %4572 = vrot.lane.b32.xlu1 %v10203_v9, %s6237_s21 }
 0xa01   : > { %v4495_v16 = vpop.permute.xlu0 %4494 }
 0xa02   : > { %v4497_v60 = vpop.permute.xlu1 %4496  ;;  %4566 = vrot.lane.b32.xlu0 %v10204_v15, %s6237_s21  ;;  %v4995_v45 = vsel %vm4982_vm9, %v4930_v26, %v4495_v16  ;;  %v10219_v16 = vld [vmem:[#allocation175_spill] sm:$0xff]  ;;  %v10221_v15 = vld [vmem:[#allocation84_spill] sm:$0xff]  ;;  %v10224_v26 = vld [vmem:[#allocation86_spill] sm:$0xff] }
 0xa03   : > { %v4996_v51 = vsel %vm4982_vm9, %v4931_v18, %v4497_v60  ;;  %v10220_v60 = vld [vmem:[#allocation143_spill] sm:$0xff] }
 0xa04   : > { %4568 = vrot.lane.b32.xlu1 %v10207_v46, %s6237_s21  ;;  %v4935_v46 = vsel %vm2396_vm8, %v10224_v26, %v10223_v58  ;;  %v10237_v26 = vld [vmem:[#allocation156_spill] sm:$0xff] }
 0xa05   : > { %v4751_v7 = vpop.permute.xlu0 %4750 }
 0xa06   : > { %v5060_v3 = vsel %vm5047_vm10, %v4995_v45, %v4751_v7  ;;  %v4753_v23 = vpop.permute.xlu1 %4752  ;;  %4578 = vrot.lane.b32.xlu0 %v10210_v6, %s6237_s21 }
 0xa07   : > { %5125 = vst.msk [vmem:[%s6341_s11 + $0x60] sm:$0xff] %vm5112_vm11, %v5060_v3  ;;  %v5061_v37 = vsel %vm5047_vm10, %v4996_v51, %v4753_v23  ;;  %v10225_v51 = vld [vmem:[#allocation181_spill] sm:$0xff] }
 0xa08   : > { %5126 = vst.msk [vmem:[%s6341_s11 + $0x68] sm:$0xff] %vm5112_vm11, %v5061_v37  ;;  %4580 = vrot.lane.b32.xlu1 %v10211_v47, %s6237_s21  ;;  %v10226_v23 = vld [vmem:[#allocation185_spill] sm:$0xff]  ;;  %v10227_v47 = vld [vmem:[#allocation183_spill] sm:$0xff] }
 0xa09   : > { %v4507_v28 = vpop.permute.xlu0 %4506 }
 0xa0a   : > { %v4509_v35 = vpop.permute.xlu1 %4508  ;;  %4574 = vrot.lane.b32.xlu0 %v10212_v57, %s6237_s21  ;;  %v5001_v14 = vsel %vm4982_vm9, %v4936_v27, %v4507_v28  ;;  %v10228_v28 = vld [vmem:[#allocation148_spill] sm:$0xff]  ;;  %v10232_v27 = vld [vmem:[#allocation89_spill] sm:$0xff] }
 0xa0b   : > { %v5002_v40 = vsel %vm4982_vm9, %v4937_v52, %v4509_v35  ;;  %v10229_v35 = vld [vmem:[#allocation87_spill] sm:$0xff] }
 0xa0c   : > { %4576 = vrot.lane.b32.xlu1 %v10215_v41, %s6237_s21  ;;  %v4940_v57 = vsel %vm2396_vm8, %v10229_v35, %v10228_v28  ;;  %v4941_v41 = vsel %vm2396_vm8, %v10232_v27, %v10231_v53  ;;  %v10244_v28 = vld [vmem:[#allocation94_spill] sm:$0xff] }
 0xa0d   : > { %v4763_v21 = vpop.permute.xlu0 %4762 }
 0xa0e   : > { %v5066_v29 = vsel %vm5047_vm10, %v5001_v14, %v4763_v21  ;;  %v4765_v50 = vpop.permute.xlu1 %4764  ;;  %4586 = vrot.lane.b32.xlu0 %v8917_v33, %s6237_s21  ;;  %v4934_v33 = vsel %vm2396_vm8, %v10221_v15, %v10220_v60 }
 0xa0f   : > { %5131 = vst.msk [vmem:[%s6341_s11 + $0x90] sm:$0xff] %vm5112_vm11, %v5066_v29  ;;  %v5067_v48 = vsel %vm5047_vm10, %v5002_v40, %v4765_v50 }
 0xa10   : > { %5132 = vst.msk [vmem:[%s6341_s11 + $0x98] sm:$0xff] %vm5112_vm11, %v5067_v48  ;;  %4588 = vrot.lane.b32.xlu1 %v10218_v0, %s6237_s21  ;;  %v10233_v48 = vld [vmem:[#allocation151_spill] sm:$0xff]  ;;  %v10234_v0 = vld [vmem:[#allocation88_spill] sm:$0xff] }
 0xa11   : > { %v4503_v39 = vpop.permute.xlu0 %4502 }
 0xa12   : > { %v4505_v9 = vpop.permute.xlu1 %4504  ;;  %4582 = vrot.lane.b32.xlu0 %v10219_v16, %s6237_s21  ;;  %v4999_v34 = vsel %vm4982_vm9, %v4934_v33, %v4503_v39  ;;  %v10235_v39 = vld [vmem:[#allocation153_spill] sm:$0xff] }
 0xa13   : > { %v5000_v18 = vsel %vm4982_vm9, %v4935_v46, %v4505_v9  ;;  %v10236_v9 = vld [vmem:[#allocation90_spill] sm:$0xff]  ;;  %v10238_v46 = vld [vmem:[#allocation91_spill] sm:$0xff] }
 0xa14   : > { %4584 = vrot.lane.b32.xlu1 %v10222_v32, %s6237_s21  ;;  %v4939_v16 = vsel %vm2396_vm8, %v10236_v9, %v10235_v39  ;;  %v10250_v39 = vld [vmem:[#allocation96_spill] sm:$0xff]  ;;  %v10251_v9 = vld [vmem:[#allocation169_spill] sm:$0xff] }
 0xa15   : > { %v4759_v4 = vpop.permute.xlu0 %4758 }
 0xa16   : > { %v5064_v45 = vsel %vm5047_vm10, %v4999_v34, %v4759_v4  ;;  %v4761_v7 = vpop.permute.xlu1 %4760  ;;  %4594 = vrot.lane.b32.xlu0 %v10225_v51, %s6237_s21  ;;  %v10239_v34 = vld [vmem:[#allocation157_spill] sm:$0xff] }
 0xa17   : > { %5129 = vst.msk [vmem:[%s6341_s11 + $0x80] sm:$0xff] %vm5112_vm11, %v5064_v45  ;;  %v5065_v3 = vsel %vm5047_vm10, %v5000_v18, %v4761_v7  ;;  %v10240_v4 = vld [vmem:[#allocation93_spill] sm:$0xff] }
 0xa18   : > { %5130 = vst.msk [vmem:[%s6341_s11 + $0x88] sm:$0xff] %vm5112_vm11, %v5065_v3  ;;  %4596 = vrot.lane.b32.xlu1 %v10226_v23, %s6237_s21  ;;  %v4945_v18 = vsel %vm2396_vm8, %v10240_v4, %v10239_v34  ;;  %v10258_v34 = vld [vmem:[#allocation101_spill] sm:$0xff] }
 0xa19   : > { %v4515_v6 = vpop.permute.xlu0 %4514 }
 0xa1a   : > { %v4517_v37 = vpop.permute.xlu1 %4516  ;;  %4590 = vrot.lane.b32.xlu0 %v10227_v47, %s6237_s21  ;;  %v5005_v59 = vsel %vm4982_vm9, %v4940_v57, %v4515_v6  ;;  %v10241_v6 = vld [vmem:[#allocation159_spill] sm:$0xff]  ;;  %v10243_v47 = vld [vmem:[#allocation161_spill] sm:$0xff] }
 0xa1b   : > { %v5006_v52 = vsel %vm4982_vm9, %v4941_v41, %v4517_v37  ;;  %v10242_v37 = vld [vmem:[#allocation92_spill] sm:$0xff]  ;;  %v4943_v35 = vsel %vm2396_vm8, %v10244_v28, %v10243_v47 }
 0xa1c   : > { %4592 = vrot.lane.b32.xlu1 %v10230_v38, %s6237_s21 }
 0xa1d   : > { %v4771_v10 = vpop.permute.xlu0 %4770 }
 0xa1e   : > { %v5070_v14 = vsel %vm5047_vm10, %v5005_v59, %v4771_v10  ;;  %v4773_v21 = vpop.permute.xlu1 %4772  ;;  %4798 = vrot.lane.b32.xlu0 %v8990_v36, %s6238_s22  ;;  %v4938_v36 = vsel %vm2396_vm8, %v10234_v0, %v10233_v48  ;;  %v10245_v59 = vld [vmem:[#allocation164_spill] sm:$0xff]  ;;  %v10246_v10 = vld [vmem:[#allocation95_spill] sm:$0xff] }
 0xa1f   : > { %5135 = vst.msk [vmem:[%s6341_s11 + $0xb0] sm:$0xff] %vm5112_vm11, %v5070_v14  ;;  %v5071_v40 = vsel %vm5047_vm10, %v5006_v52, %v4773_v21  ;;  %v10247_v52 = vld [vmem:[#allocation165_spill] sm:$0xff] }
 0xa20   : > { %5136 = vst.msk [vmem:[%s6341_s11 + $0xb8] sm:$0xff] %vm5112_vm11, %v5071_v40  ;;  %4800 = vrot.lane.b32.xlu1 %v8998_v44, %s6238_s22  ;;  %v10248_v14 = vld [vmem:[#allocation97_spill] sm:$0xff] }
 0xa21   : > { %v4511_v29 = vpop.permute.xlu0 %4510  ;;  %v4949_v21 = vsel %vm2396_vm8, %v10248_v14, %v10247_v52 }
 0xa22   : > { %v4513_v50 = vpop.permute.xlu1 %4512  ;;  %4802 = vrot.lane.b32.xlu0 %v8988_v31, %s6238_s22  ;;  %v5003_v60 = vsel %vm4982_vm9, %v4938_v36, %v4511_v29  ;;  %v10249_v36 = vld [vmem:[#allocation167_spill] sm:$0xff] }
 0xa23   : > { %v5004_v44 = vsel %vm4982_vm9, %v4939_v16, %v4513_v50  ;;  %v10252_v16 = vld [vmem:[#allocation98_spill] sm:$0xff] }
 0xa24   : > { %4804 = vrot.lane.b32.xlu1 %v8994_v17, %s6238_s22 }
 0xa25   : > { %v4767_v15 = vpop.permute.xlu0 %4766 }
 0xa26   : > { %v5068_v33 = vsel %vm5047_vm10, %v5003_v60, %v4767_v15  ;;  %v4769_v32 = vpop.permute.xlu1 %4768  ;;  %4806 = vrot.lane.b32.xlu0 %v9014_v5, %s6238_s22  ;;  %v4944_v5 = vsel %vm2396_vm8, %v10238_v46, %v10237_v26  ;;  %v4947_v60 = vsel %vm2396_vm8, %v10252_v16, %v10251_v9  ;;  %v10255_v26 = vld [vmem:[#allocation99_spill] sm:$0xff]  ;;  %v10256_v46 = vld [vmem:[#allocation212_spill] sm:$0xff] }
 0xa27   : > { %5133 = vst.msk [vmem:[%s6341_s11 + $0xa0] sm:$0xff] %vm5112_vm11, %v5068_v33  ;;  %v5069_v31 = vsel %vm5047_vm10, %v5004_v44, %v4769_v32 }
 0xa28   : > { %5134 = vst.msk [vmem:[%s6341_s11 + $0xa8] sm:$0xff] %vm5112_vm11, %v5069_v31  ;;  %4808 = vrot.lane.b32.xlu1 %v9022_v19, %s6238_s22 }
 0xa29   : > { %v4523_v17 = vpop.permute.xlu0 %4522 }
 0xa2a   : > { %v4525_v58 = vpop.permute.xlu1 %4524  ;;  %4810 = vrot.lane.b32.xlu0 %v9012_v56, %s6238_s22  ;;  %v5009_v45 = vsel %vm4982_vm9, %v4944_v5, %v4523_v17  ;;  %v10253_v17 = vld [vmem:[#allocation211_spill] sm:$0xff]  ;;  %v10257_v5 = vld [vmem:[#allocation173_spill] sm:$0xff] }
 0xa2b   : > { %v5010_v19 = vsel %vm4982_vm9, %v4945_v18, %v4525_v58  ;;  %v10254_v58 = vld [vmem:[#allocation172_spill] sm:$0xff]  ;;  %v4953_v4 = vsel %vm2396_vm8, %v10258_v34, %v10257_v5  ;;  %v10268_v5 = vld [vmem:[#allocation103_spill] sm:$0xff] }
 0xa2c   : > { %4812 = vrot.lane.b32.xlu1 %v9018_v43, %s6238_s22 }
 0xa2d   : > { %v4779_v7 = vpop.permute.xlu0 %4778 }
 0xa2e   : > { %v5074_v51 = vsel %vm5047_vm10, %v5009_v45, %v4779_v7  ;;  %v4781_v3 = vpop.permute.xlu1 %4780  ;;  %4814 = vrot.lane.b32.xlu0 %v9038_v49, %s6238_s22  ;;  %v4942_v49 = vsel %vm2396_vm8, %v10242_v37, %v10241_v6  ;;  %v10261_v6 = vld [vmem:[#allocation176_spill] sm:$0xff]  ;;  %v10262_v37 = vld [vmem:[#allocation102_spill] sm:$0xff] }
 0xa2f   : > { %5139 = vst.msk [vmem:[%s6341_s11 + $0xd0] sm:$0xff] %vm5112_vm11, %v5074_v51  ;;  %v5075_v43 = vsel %vm5047_vm10, %v5010_v19, %v4781_v3 }
 0xa30   : > { %5140 = vst.msk [vmem:[%s6341_s11 + $0xd8] sm:$0xff] %vm5112_vm11, %v5075_v43  ;;  %4816 = vrot.lane.b32.xlu1 %v9046_v30, %s6238_s22 }
 0xa31   : > { %v4519_v56 = vpop.permute.xlu0 %4518 }
 0xa32   : > { %v4521_v23 = vpop.permute.xlu1 %4520  ;;  %4818 = vrot.lane.b32.xlu0 %v9036_v22, %s6238_s22  ;;  %v5007_v57 = vsel %vm4982_vm9, %v4942_v49, %v4519_v56  ;;  %v10259_v56 = vld [vmem:[#allocation174_spill] sm:$0xff]  ;;  %v4951_v49 = vsel %vm2396_vm8, %v10262_v37, %v10261_v6 }
 0xa33   : > { %v5008_v30 = vsel %vm4982_vm9, %v4943_v35, %v4521_v23  ;;  %v10260_v23 = vld [vmem:[#allocation100_spill] sm:$0xff]  ;;  %v10273_v6 = vld [vmem:[#allocation190_spill] sm:$0xff] }
 0xa34   : > { %4820 = vrot.lane.b32.xlu1 %v9042_v24, %s6238_s22  ;;  %v10274_v37 = vld [vmem:[#allocation110_spill] sm:$0xff] }
 0xa35   : > { %v4775_v38 = vpop.permute.xlu0 %4774 }
 0xa36   : > { %v5072_v53 = vsel %vm5047_vm10, %v5007_v57, %v4775_v38  ;;  %v4777_v27 = vpop.permute.xlu1 %4776  ;;  %4822 = vrot.lane.b32.xlu0 %v9062_v25, %s6238_s22  ;;  %v4948_v25 = vsel %vm2396_vm8, %v10246_v10, %v10245_v59 }
 0xa37   : > { %5137 = vst.msk [vmem:[%s6341_s11 + $0xc0] sm:$0xff] %vm5112_vm11, %v5072_v53  ;;  %v5073_v24 = vsel %vm5047_vm10, %v5008_v30, %v4777_v27 }
 0xa38   : > { %5138 = vst.msk [vmem:[%s6341_s11 + $0xc8] sm:$0xff] %vm5112_vm11, %v5073_v24  ;;  %4824 = vrot.lane.b32.xlu1 %v9070_v42, %s6238_s22 }
 0xa39   : > { %v4531_v22 = vpop.permute.xlu0 %4530 }
 0xa3a   : > { %v4533_v41 = vpop.permute.xlu1 %4532  ;;  %4826 = vrot.lane.b32.xlu0 %v9060_v1, %s6238_s22  ;;  %v5013_v40 = vsel %vm4982_vm9, %v4948_v25, %v4531_v22 }
 0xa3b   : > { %v5014_v42 = vsel %vm4982_vm9, %v4949_v21, %v4533_v41 }
 0xa3c   : > { %4828 = vrot.lane.b32.xlu1 %v9066_v63, %s6238_s22 }
 0xa3d   : > { %v4787_v29 = vpop.permute.xlu0 %4786 }
 0xa3e   : > { %v5078_v50 = vsel %vm5047_vm10, %v5013_v40, %v4787_v29  ;;  %v4789_v48 = vpop.permute.xlu1 %4788  ;;  %4830 = vrot.lane.b32.xlu0 %v9086_v13, %s6238_s22  ;;  %v4946_v13 = vsel %vm2396_vm8, %v10250_v39, %v10249_v36 }
 0xa3f   : > { %5143 = vst.msk [vmem:[%s6341_s11 + $0xf0] sm:$0xff] %vm5112_vm11, %v5078_v50  ;;  %v5079_v63 = vsel %vm5047_vm10, %v5014_v42, %v4789_v48 }
 0xa40   : > { %5144 = vst.msk [vmem:[%s6341_s11 + $0xf8] sm:$0xff] %vm5112_vm11, %v5079_v63  ;;  %4832 = vrot.lane.b32.xlu1 %v9094_v62, %s6238_s22 }
 0xa41   : > { %v4527_v1 = vpop.permute.xlu0 %4526 }
 0xa42   : > { %v4529_v0 = vpop.permute.xlu1 %4528  ;;  %4834 = vrot.lane.b32.xlu0 %v9084_v11, %s6238_s22  ;;  %v5011_v15 = vsel %vm4982_vm9, %v4946_v13, %v4527_v1 }
 0xa43   : > { %v5012_v62 = vsel %vm4982_vm9, %v4947_v60, %v4529_v0 }
 0xa44   : > { %4836 = vrot.lane.b32.xlu1 %v9090_v12, %s6238_s22 }
 0xa45   : > { %v4783_v44 = vpop.permute.xlu0 %4782 }
 0xa46   : > { %v5076_v33 = vsel %vm5047_vm10, %v5011_v15, %v4783_v44  ;;  %v4785_v32 = vpop.permute.xlu1 %4784  ;;  %4838 = vrot.lane.b32.xlu0 %v9110_v20, %s6238_s22  ;;  %v4952_v20 = vsel %vm2396_vm8, %v10255_v26, %v10254_v58  ;;  %v10263_v15 = vld [vmem:[#allocation182_spill] sm:$0xff]  ;;  %v10264_v44 = vld [vmem:[#allocation104_spill] sm:$0xff] }
 0xa47   : > { %5141 = vst.msk [vmem:[%s6341_s11 + $0xe0] sm:$0xff] %vm5112_vm11, %v5076_v33  ;;  %v5077_v12 = vsel %vm5047_vm10, %v5012_v62, %v4785_v32  ;;  %v4954_v62 = vsel %vm2396_vm8, %v10264_v44, %v10263_v15  ;;  %v10265_v33 = vld [vmem:[#allocation184_spill] sm:$0xff]  ;;  %v10266_v32 = vld [vmem:[#allocation106_spill] sm:$0xff]  ;;  %v10278_v15 = vld [vmem:[#allocation109_spill] sm:$0xff] }
 0xa48   : > { %5142 = vst.msk [vmem:[%s6341_s11 + $0xe8] sm:$0xff] %vm5112_vm11, %v5077_v12  ;;  %4840 = vrot.lane.b32.xlu1 %v9116_v54, %s6238_s22  ;;  %v4955_v12 = vsel %vm2396_vm8, %v10266_v32, %v10265_v33 }
 0xa49   : > { %v4539_v11 = vpop.permute.xlu0 %4538 }
 0xa4a   : > { %v4541_v31 = vpop.permute.xlu1 %4540  ;;  %4842 = vrot.lane.b32.xlu0 %v10253_v17, %s6238_s22  ;;  %v5017_v18 = vsel %vm4982_vm9, %v4952_v20, %v4539_v11 }
 0xa4b   : > { %v5018_v54 = vsel %vm4982_vm9, %v4953_v4, %v4541_v31  ;;  %v10269_v4 = vld [vmem:[#allocation180_spill] sm:$0xff] }
 0xa4c   : > { %4844 = vrot.lane.b32.xlu1 %v10256_v46, %s6238_s22  ;;  %v10267_v46 = vld [vmem:[#allocation179_spill] sm:$0xff] }
 0xa4d   : > { %v4795_v45 = vpop.permute.xlu0 %4794  ;;  %v4956_v34 = vsel %vm2396_vm8, %v10268_v5, %v10267_v46 }
 0xa4e   : > { %v5082_v7 = vsel %vm5047_vm10, %v5017_v18, %v4795_v45  ;;  %v4797_v19 = vpop.permute.xlu1 %4796  ;;  %4846 = vrot.lane.b32.xlu0 %v9138_v8, %s6238_s22  ;;  %v4950_v8 = vsel %vm2396_vm8, %v10260_v23, %v10259_v56  ;;  %v10270_v18 = vld [vmem:[#allocation105_spill] sm:$0xff]  ;;  %v10272_v23 = vld [vmem:[#allocation108_spill] sm:$0xff] }
 0xa4f   : > { %5147 = vst.msk [vmem:[%s6341_s11 + $0x110] sm:$0xff] %vm5112_vm11, %v5082_v7  ;;  %v5083_v51 = vsel %vm5047_vm10, %v5018_v54, %v4797_v19  ;;  %v4957_v45 = vsel %vm2396_vm8, %v10270_v18, %v10269_v4  ;;  %v10271_v56 = vld [vmem:[#allocation189_spill] sm:$0xff]  ;;  %v10283_v18 = vld [vmem:[#allocation191_spill] sm:$0xff] }
 0xa50   : > { %5148 = vst.msk [vmem:[%s6341_s11 + $0x118] sm:$0xff] %vm5112_vm11, %v5083_v51  ;;  %4848 = vrot.lane.b32.xlu1 %v9146_v2, %s6238_s22 }
 0xa51   : > { %v4535_v3 = vpop.permute.xlu0 %4534 }
 0xa52   : > { %v4537_v43 = vpop.permute.xlu1 %4536  ;;  %4850 = vrot.lane.b32.xlu0 %v9133_v55, %s6238_s22  ;;  %v5015_v47 = vsel %vm4982_vm9, %v4950_v8, %v4535_v3  ;;  %v4958_v8 = vsel %vm2396_vm8, %v10272_v23, %v10271_v56 }
 0xa53   : > { %v5016_v2 = vsel %vm4982_vm9, %v4951_v49, %v4537_v43  ;;  %v4959_v49 = vsel %vm2396_vm8, %v10274_v37, %v10273_v6  ;;  %v10288_v6 = vld [vmem:[#allocation116_spill] sm:$0xff] }
 0xa54   : > { %4852 = vrot.lane.b32.xlu1 %v9144_v61, %s6238_s22 }
 0xa55   : > { %v4791_v28 = vpop.permute.xlu0 %4790 }
 0xa56   : > { %v5080_v35 = vsel %vm5047_vm10, %v5015_v47, %v4791_v28  ;;  %v4793_v57 = vpop.permute.xlu1 %4792 }
 0xa57   : > { %5145 = vst.msk [vmem:[%s6341_s11 + $0x100] sm:$0xff] %vm5112_vm11, %v5080_v35  ;;  %v5081_v55 = vsel %vm5047_vm10, %v5016_v2, %v4793_v57 }
 0xa58   : > { %5146 = vst.msk [vmem:[%s6341_s11 + $0x108] sm:$0xff] %vm5112_vm11, %v5081_v55 }
 0xa59   : > { %v4547_v38 = vpop.permute.xlu0 %4546 }
 0xa5a   : > { %v4549_v61 = vpop.permute.xlu1 %4548  ;;  %v5021_v54 = vsel %vm4982_vm9, %v4956_v34, %v4547_v38  ;;  %v10275_v38 = vld [vmem:[#allocation187_spill] sm:$0xff] }
 0xa5b   : > { %v5022_v19 = vsel %vm4982_vm9, %v4957_v45, %v4549_v61  ;;  %v10276_v61 = vld [vmem:[#allocation107_spill] sm:$0xff] }
 0xa5c   : > { %v10284_v45 = vld [vmem:[#allocation111_spill] sm:$0xff] }
 0xa5d   : > { %v4543_v30 = vpop.permute.xlu0 %4542 }
 0xa5e   : > { %v4545_v53 = vpop.permute.xlu1 %4544  ;;  %v5019_v11 = vsel %vm4982_vm9, %v4954_v62, %v4543_v30  ;;  %v4960_v30 = vsel %vm2396_vm8, %v10276_v61, %v10275_v38  ;;  %v10291_v38 = vld [vmem:[#allocation195_spill] sm:$0xff] }
 0xa5f   : > { %v5020_v17 = vsel %vm4982_vm9, %v4955_v12, %v4545_v53  ;;  %v10277_v53 = vld [vmem:[#allocation188_spill] sm:$0xff]  ;;  %v10292_v61 = vld [vmem:[#allocation115_spill] sm:$0xff] }
 0xa61   : > { %v4555_v27 = vpop.permute.xlu0 %4554 }
 0xa62   : > { %v4557_v24 = vpop.permute.xlu1 %4556 }
 0xa65   : > { %v4551_v22 = vpop.permute.xlu0 %4550 }
 0xa66   : > { %v4553_v41 = vpop.permute.xlu1 %4552  ;;  %v5023_v47 = vsel %vm4982_vm9, %v4958_v8, %v4551_v22  ;;  %v4961_v22 = vsel %vm2396_vm8, %v10278_v15, %v10277_v53  ;;  %v10287_v8 = vld [vmem:[#allocation197_spill] sm:$0xff]  ;;  %v10293_v53 = vld [vmem:[#allocation196_spill] sm:$0xff] }
 0xa67   : > { %v5024_v2 = vsel %vm4982_vm9, %v4959_v49, %v4553_v41  ;;  %v5025_v41 = vsel %vm4982_vm9, %v4960_v30, %v4555_v27  ;;  %v5026_v62 = vsel %vm4982_vm9, %v4961_v22, %v4557_v24  ;;  %v4966_v37 = vsel %vm2396_vm8, %v10288_v6, %v10287_v8  ;;  %v10289_v49 = vld [vmem:[#allocation198_spill] sm:$0xff] }
 0xa68   : > { %v4968_v30 = vsel %vm2396_vm8, %v10292_v61, %v10291_v38 }
 0xa69   : > { %v9518_v59 = vpop.permute.xlu0 %4562 }
 0xa6a   : > { %v9520_v10 = vpop.permute.xlu1 %4564 }
 0xa6d   : > { %v4559_v25 = vpop.permute.xlu0 %4558 }
 0xa6e   : > { %v4561_v52 = vpop.permute.xlu1 %4560 }
 0xa71   : > { %v9522_v14 = vpop.permute.xlu0 %4570 }
 0xa72   : > { %v9524_v21 = vpop.permute.xlu1 %4572 }
 0xa75   : > { %v9526_v40 = vpop.permute.xlu0 %4566 }
 0xa76   : > { %v9528_v29 = vpop.permute.xlu1 %4568 }
 0xa79   : > { %v9530_v42 = vpop.permute.xlu0 %4578 }
 0xa7a   : > { %v9532_v50 = vpop.permute.xlu1 %4580 }
 0xa7d   : > { %v9534_v48 = vpop.permute.xlu0 %4574 }
 0xa7e   : > { %v9536_v63 = vpop.permute.xlu1 %4576 }
 0xa81   : > { %v9538_v1 = vpop.permute.xlu0 %4586 }
 0xa82   : > { %v9540_v0 = vpop.permute.xlu1 %4588 }
 0xa85   : > { %v9542_v36 = vpop.permute.xlu0 %4582 }
 0xa86   : > { %v9544_v39 = vpop.permute.xlu1 %4584 }
 0xa89   : > { %v9546_v13 = vpop.permute.xlu0 %4594 }
 0xa8a   : > { %v9548_v9 = vpop.permute.xlu1 %4596 }
 0xa8d   : > { %v9550_v16 = vpop.permute.xlu0 %4590 }
 0xa8e   : > { %v9552_v60 = vpop.permute.xlu1 %4592 }
 0xa91   : > { %v4799_v31 = vpop.permute.xlu0 %4798 }
 0xa92   : > { %v5084_v58 = vsel %vm5047_vm10, %v5019_v11, %v4799_v31  ;;  %v4801_v26 = vpop.permute.xlu1 %4800  ;;  %v10279_v11 = vld [vmem:[#allocation193_spill] sm:$0xff]  ;;  %v10280_v31 = vld [vmem:[#allocation112_spill] sm:$0xff] }
 0xa93   : > { %5149 = vst.msk [vmem:[%s6341_s11 + $0x120] sm:$0xff] %vm5112_vm11, %v5084_v58  ;;  %v5085_v20 = vsel %vm5047_vm10, %v5020_v17, %v4801_v26  ;;  %v4962_v17 = vsel %vm2396_vm8, %v10280_v31, %v10279_v11  ;;  %v10281_v58 = vld [vmem:[#allocation194_spill] sm:$0xff] }
 0xa94   : > { %5150 = vst.msk [vmem:[%s6341_s11 + $0x128] sm:$0xff] %vm5112_vm11, %v5085_v20  ;;  %v10282_v26 = vld [vmem:[#allocation114_spill] sm:$0xff]  ;;  %v5027_v24 = vsel %vm4982_vm9, %v4962_v17, %v4559_v25 }
 0xa95   : > { %v4803_v7 = vpop.permute.xlu0 %4802  ;;  %v4963_v27 = vsel %vm2396_vm8, %v10282_v26, %v10281_v58  ;;  %v10297_v31 = vld [vmem:[#allocation202_spill] sm:$0xff] }
 0xa96   : > { %v5086_v51 = vsel %vm5047_vm10, %v5021_v54, %v4803_v7  ;;  %v4805_v3 = vpop.permute.xlu1 %4804  ;;  %v5028_v46 = vsel %vm4982_vm9, %v4963_v27, %v4561_v52  ;;  %v4964_v54 = vsel %vm2396_vm8, %v10284_v45, %v10283_v18  ;;  %v10285_v7 = vld [vmem:[#allocation192_spill] sm:$0xff] }
 0xa97   : > { %5151 = vst.msk [vmem:[%s6341_s11 + $0x130] sm:$0xff] %vm5112_vm11, %v5086_v51  ;;  %v5087_v43 = vsel %vm5047_vm10, %v5022_v19, %v4805_v3  ;;  %v10286_v19 = vld [vmem:[#allocation113_spill] sm:$0xff]  ;;  %v5029_v52 = vsel %vm4982_vm9, %v4964_v54, %v9518_v59  ;;  %v10290_v59 = vld [vmem:[#allocation118_spill] sm:$0xff] }
 0xa98   : > { %5152 = vst.msk [vmem:[%s6341_s11 + $0x138] sm:$0xff] %vm5112_vm11, %v5087_v43  ;;  %v4965_v25 = vsel %vm2396_vm8, %v10286_v19, %v10285_v7 }
 0xa99   : > { %v4807_v28 = vpop.permute.xlu0 %4806  ;;  %v5030_v3 = vsel %vm4982_vm9, %v4965_v25, %v9520_v10  ;;  %v5031_v10 = vsel %vm4982_vm9, %v4966_v37, %v9526_v40  ;;  %v10294_v40 = vld [vmem:[#allocation117_spill] sm:$0xff] }
 0xa9a   : > { %v5088_v35 = vsel %vm5047_vm10, %v5023_v47, %v4807_v28  ;;  %v4809_v57 = vpop.permute.xlu1 %4808  ;;  %v4967_v47 = vsel %vm2396_vm8, %v10290_v59, %v10289_v49  ;;  %v4969_v15 = vsel %vm2396_vm8, %v10294_v40, %v10293_v53  ;;  %v10307_v59 = vld [vmem:[#allocation203_spill] sm:$0xff]  ;;  %v10312_v53 = vld [vmem:[#allocation128_spill] sm:$0xff] }
 0xa9b   : > { %5153 = vst.msk [vmem:[%s6341_s11 + $0x140] sm:$0xff] %vm5112_vm11, %v5088_v35  ;;  %v5089_v55 = vsel %vm5047_vm10, %v5024_v2, %v4809_v57  ;;  %v5032_v2 = vsel %vm4982_vm9, %v4967_v47, %v9528_v29  ;;  %v5033_v29 = vsel %vm4982_vm9, %v4968_v30, %v9522_v14  ;;  %v10298_v14 = vld [vmem:[#allocation122_spill] sm:$0xff]  ;;  %v10308_v47 = vld [vmem:[#allocation123_spill] sm:$0xff]  ;;  %v10311_v30 = vld [vmem:[#allocation209_spill] sm:$0xff] }
 0xa9c   : > { %5154 = vst.msk [vmem:[%s6341_s11 + $0x148] sm:$0xff] %vm5112_vm11, %v5089_v55  ;;  %v4971_v17 = vsel %vm2396_vm8, %v10298_v14, %v10297_v31  ;;  %v4978_v40 = vsel %vm2396_vm8, %v10312_v53, %v10311_v30  ;;  %v10317_v31 = vld [vmem:[#allocation208_spill] sm:$0xff] }
 0xa9d   : > { %v4811_v44 = vpop.permute.xlu0 %4810  ;;  %v5036_v26 = vsel %vm4982_vm9, %v4971_v17, %v9536_v63 }
 0xa9e   : > { %v5090_v33 = vsel %vm5047_vm10, %v5025_v41, %v4811_v44  ;;  %v4813_v32 = vpop.permute.xlu1 %4812  ;;  %v5034_v41 = vsel %vm4982_vm9, %v4969_v15, %v9524_v21  ;;  %v10313_v15 = vld [vmem:[#allocation210_spill] sm:$0xff] }
 0xa9f   : > { %5155 = vst.msk [vmem:[%s6341_s11 + $0x150] sm:$0xff] %vm5112_vm11, %v5090_v33  ;;  %v5091_v12 = vsel %vm5047_vm10, %v5026_v62, %v4813_v32  ;;  %v10295_v32 = vld [vmem:[#allocation201_spill] sm:$0xff] }
 0xaa0   : > { %5156 = vst.msk [vmem:[%s6341_s11 + $0x158] sm:$0xff] %vm5112_vm11, %v5091_v12  ;;  %v10296_v12 = vld [vmem:[#allocation120_spill] sm:$0xff] }
 0xaa1   : > { %v4815_v20 = vpop.permute.xlu0 %4814  ;;  %v4970_v11 = vsel %vm2396_vm8, %v10296_v12, %v10295_v32  ;;  %v10315_v32 = vld [vmem:[#allocation207_spill] sm:$0xff] }
 0xaa2   : > { %v5092_v5 = vsel %vm5047_vm10, %v5027_v24, %v4815_v20  ;;  %v4817_v34 = vpop.permute.xlu1 %4816  ;;  %v5035_v21 = vsel %vm4982_vm9, %v4970_v11, %v9534_v48  ;;  %v10302_v48 = vld [vmem:[#allocation121_spill] sm:$0xff]  ;;  %v10316_v12 = vld [vmem:[#allocation127_spill] sm:$0xff] }
 0xaa3   : > { %5157 = vst.msk [vmem:[%s6341_s11 + $0x160] sm:$0xff] %vm5112_vm11, %v5092_v5  ;;  %v5093_v4 = vsel %vm5047_vm10, %v5028_v46, %v4817_v34  ;;  %v10299_v46 = vld [vmem:[#allocation199_spill] sm:$0xff]  ;;  %v4980_v11 = vsel %vm2396_vm8, %v10316_v12, %v10315_v32 }
 0xaa4   : > { %5158 = vst.msk [vmem:[%s6341_s11 + $0x168] sm:$0xff] %vm5112_vm11, %v5093_v4  ;;  %v10300_v5 = vld [vmem:[#allocation119_spill] sm:$0xff]  ;;  %v10301_v4 = vld [vmem:[#allocation200_spill] sm:$0xff] }
 0xaa5   : > { %v4819_v51 = vpop.permute.xlu0 %4818  ;;  %v4972_v34 = vsel %vm2396_vm8, %v10300_v5, %v10299_v46  ;;  %v4973_v18 = vsel %vm2396_vm8, %v10302_v48, %v10301_v4 }
 0xaa6   : > { %v5094_v43 = vsel %vm5047_vm10, %v5029_v52, %v4819_v51  ;;  %v4821_v56 = vpop.permute.xlu1 %4820  ;;  %v5037_v63 = vsel %vm4982_vm9, %v4972_v34, %v9530_v42  ;;  %v5038_v54 = vsel %vm4982_vm9, %v4973_v18, %v9532_v50  ;;  %v10303_v52 = vld [vmem:[#allocation205_spill] sm:$0xff]  ;;  %v10304_v51 = vld [vmem:[#allocation124_spill] sm:$0xff]  ;;  %v10306_v42 = vld [vmem:[#allocation126_spill] sm:$0xff] }
 0xaa7   : > { %5159 = vst.msk [vmem:[%s6341_s11 + $0x170] sm:$0xff] %vm5112_vm11, %v5094_v43  ;;  %v5095_v23 = vsel %vm5047_vm10, %v5030_v3, %v4821_v56  ;;  %v4974_v3 = vsel %vm2396_vm8, %v10304_v51, %v10303_v52  ;;  %v10305_v43 = vld [vmem:[#allocation206_spill] sm:$0xff] }
 0xaa8   : > { %5160 = vst.msk [vmem:[%s6341_s11 + $0x178] sm:$0xff] %vm5112_vm11, %v5095_v23  ;;  %v4975_v56 = vsel %vm2396_vm8, %v10306_v42, %v10305_v43  ;;  %v5039_v50 = vsel %vm4982_vm9, %v4974_v3, %v9542_v36  ;;  %v10310_v36 = vld [vmem:[#allocation125_spill] sm:$0xff] }
 0xaa9   : > { %v4823_v28 = vpop.permute.xlu0 %4822  ;;  %v5040_v8 = vsel %vm4982_vm9, %v4975_v56, %v9544_v39 }
 0xaaa   : > { %v5096_v35 = vsel %vm5047_vm10, %v5031_v10, %v4823_v28  ;;  %v4825_v57 = vpop.permute.xlu1 %4824  ;;  %v4976_v10 = vsel %vm2396_vm8, %v10308_v47, %v10307_v59  ;;  %v10309_v28 = vld [vmem:[#allocation204_spill] sm:$0xff] }
 0xaab   : > { %5161 = vst.msk [vmem:[%s6341_s11 + $0x180] sm:$0xff] %vm5112_vm11, %v5096_v35  ;;  %v5097_v55 = vsel %vm5047_vm10, %v5032_v2, %v4825_v57  ;;  %v4977_v2 = vsel %vm2396_vm8, %v10310_v36, %v10309_v28  ;;  %v5041_v39 = vsel %vm4982_vm9, %v4976_v10, %v9538_v1  ;;  %v10314_v1 = vld [vmem:[#allocation130_spill] sm:$0xff] }
 0xaac   : > { %5162 = vst.msk [vmem:[%s6341_s11 + $0x188] sm:$0xff] %vm5112_vm11, %v5097_v55  ;;  %v5042_v57 = vsel %vm4982_vm9, %v4977_v2, %v9540_v0  ;;  %v5043_v0 = vsel %vm4982_vm9, %v4978_v40, %v9550_v16  ;;  %v10318_v16 = vld [vmem:[#allocation129_spill] sm:$0xff] }
 0xaad   : > { %v4827_v22 = vpop.permute.xlu0 %4826  ;;  %v4981_v14 = vsel %vm2396_vm8, %v10318_v16, %v10317_v31 }
 0xaae   : > { %v5098_v44 = vsel %vm5047_vm10, %v5033_v29, %v4827_v22  ;;  %v4829_v62 = vpop.permute.xlu1 %4828  ;;  %v4979_v29 = vsel %vm2396_vm8, %v10314_v1, %v10313_v15 }
 0xaaf   : > { %5163 = vst.msk [vmem:[%s6341_s11 + $0x190] sm:$0xff] %vm5112_vm11, %v5098_v44  ;;  %v5099_v33 = vsel %vm5047_vm10, %v5034_v41, %v4829_v62  ;;  %v5044_v41 = vsel %vm4982_vm9, %v4979_v29, %v9552_v60  ;;  %v5045_v60 = vsel %vm4982_vm9, %v4980_v11, %v9546_v13 }
 0xab0   : > { %5164 = vst.msk [vmem:[%s6341_s11 + $0x198] sm:$0xff] %vm5112_vm11, %v5099_v33 }
 0xab1   : > { %v4831_v58 = vpop.permute.xlu0 %4830 }
 0xab2   : > { %v5100_v27 = vsel %vm5047_vm10, %v5035_v21, %v4831_v58  ;;  %v4833_v24 = vpop.permute.xlu1 %4832  ;;  %v5046_v21 = vsel %vm4982_vm9, %v4981_v14, %v9548_v9 }
 0xab3   : > { %5165 = vst.msk [vmem:[%s6341_s11 + $0x1a0] sm:$0xff] %vm5112_vm11, %v5100_v27  ;;  %v5101_v20 = vsel %vm5047_vm10, %v5036_v26, %v4833_v24 }
 0xab4   : > { %5166 = vst.msk [vmem:[%s6341_s11 + $0x1a8] sm:$0xff] %vm5112_vm11, %v5101_v20 }
 0xab5   : > { %v4835_v45 = vpop.permute.xlu0 %4834 }
 0xab6   : > { %v5102_v7 = vsel %vm5047_vm10, %v5037_v63, %v4835_v45  ;;  %v4837_v19 = vpop.permute.xlu1 %4836 }
 0xab7   : > { %5167 = vst.msk [vmem:[%s6341_s11 + $0x1b0] sm:$0xff] %vm5112_vm11, %v5102_v7  ;;  %v5103_v25 = vsel %vm5047_vm10, %v5038_v54, %v4837_v19 }
 0xab8   : > { %5168 = vst.msk [vmem:[%s6341_s11 + $0x1b8] sm:$0xff] %vm5112_vm11, %v5103_v25 }
 0xab9   : > { %v4839_v23 = vpop.permute.xlu0 %4838 }
 0xaba   : > { %v5104_v6 = vsel %vm5047_vm10, %v5039_v50, %v4839_v23  ;;  %v4841_v37 = vpop.permute.xlu1 %4840 }
 0xabb   : > { %5169 = vst.msk [vmem:[%s6341_s11 + $0x1c0] sm:$0xff] %vm5112_vm11, %v5104_v6  ;;  %v5105_v49 = vsel %vm5047_vm10, %v5040_v8, %v4841_v37 }
 0xabc   : > { %5170 = vst.msk [vmem:[%s6341_s11 + $0x1c8] sm:$0xff] %vm5112_vm11, %v5105_v49 }
 0xabd   : > { %v4843_v35 = vpop.permute.xlu0 %4842 }
 0xabe   : > { %v5106_v55 = vsel %vm5047_vm10, %v5041_v39, %v4843_v35  ;;  %v4845_v38 = vpop.permute.xlu1 %4844 }
 0xabf   : > { %5171 = vst.msk [vmem:[%s6341_s11 + $0x1d0] sm:$0xff] %vm5112_vm11, %v5106_v55  ;;  %v5107_v61 = vsel %vm5047_vm10, %v5042_v57, %v4845_v38 }
 0xac0   : > { %5172 = vst.msk [vmem:[%s6341_s11 + $0x1d8] sm:$0xff] %vm5112_vm11, %v5107_v61 }
 0xac1   : > { %v4847_v22 = vpop.permute.xlu0 %4846 }
 0xac2   : > { %v5108_v44 = vsel %vm5047_vm10, %v5043_v0, %v4847_v22  ;;  %v4849_v62 = vpop.permute.xlu1 %4848 }
 0xac3   : > { %5173 = vst.msk [vmem:[%s6341_s11 + $0x1e0] sm:$0xff] %vm5112_vm11, %v5108_v44  ;;  %v5109_v33 = vsel %vm5047_vm10, %v5044_v41, %v4849_v62 }
 0xac4   : > { %5174 = vst.msk [vmem:[%s6341_s11 + $0x1e8] sm:$0xff] %vm5112_vm11, %v5109_v33 }
 0xac5   : > { %v4851_v17 = vpop.permute.xlu0 %4850 }
 0xac6   : > { %v5110_v58 = vsel %vm5047_vm10, %v5045_v60, %v4851_v17  ;;  %v4853_v26 = vpop.permute.xlu1 %4852 }
 0xac7   : > { %5175 = vst.msk [vmem:[%s6341_s11 + $0x1f0] sm:$0xff] %vm5112_vm11, %v5110_v58  ;;  %v5111_v27 = vsel %vm5047_vm10, %v5046_v21, %v4853_v26 }
 0xac8   : > { %5176 = vst.msk [vmem:[%s6341_s11 + $0x1f8] sm:$0xff] %vm5112_vm11, %v5111_v27 }
 0xac9 PF: > { %s13_s15 = sadd.s32 1, %s6218_s15   ;;  %s10319_s9 = smov %s6206_s12 }
 0xaca   : > { %p10_p13 = scmp.ge.s32.totalorder %s13_s15, 10   ;;  %s10320_s10 = smov %s6210_s13 }
 0xacb   : > { %s10321_s11 = smov %s6214_s14  ;;  %s10322_s12 = smov %s10326_s17 }
 0xacc   : > { %s10323_s13 = smov %s10330_s18  ;;  %s10324_s14 = smov %s10334_s19 }
 0xacd   :  { %12 = sbr.rel (!%p10_p13) target bundleno = 4 (0x4), region = 88 }
 0xad4   :  { %5210 = vsyncpa [#allocation5], 1 }
 0xad5   :  { %5212 = vsyncpa [#allocation5 + $0x1], 1 }

</bundles_post_ra>
